<compile_context>
chip_gen: v5e
topology: v5e:2x2
jax: 0.10.0
libtpu: 0.0.40
codegen_flags: <defaults>
</compile_context>

<pallas_src>
import functools

import jax
import jax.numpy as jnp
from jax.experimental import pallas as pl
from jax.experimental.pallas import tpu as pltpu

LANE = 128
PADW = 2          # int(np.ceil((4 - 1) / 2)) in the reference module
KW = 4
LRELU_SLOPE = 0.2
BN_EPS = 1e-5


def _round_up(x, m):
    return (x + m - 1) // m * m


@functools.lru_cache(maxsize=None)
def _vmem_limit_bytes():
    """Raised scoped-VMEM limit with margin vs physical capacity (chip-aware)."""
    try:
        cap = int(pltpu.get_tpu_info().vmem_capacity_bytes)
        return int(min(3 * cap // 4, 100 * 1024 * 1024))
    except Exception:
        return 64 * 1024 * 1024


# --------------------- pl.Buffered(1) support probe ---------------------------


def _probe_kernel(x_ref, o_ref):
    o_ref[...] = x_ref[...] + 1.0


@functools.lru_cache(maxsize=None)
def _buffered_supported():
    """Verify single-buffered, grid-invariant input BlockSpecs compile and run here."""
    try:
        fn = pl.pallas_call(
            _probe_kernel,
            out_shape=jax.ShapeDtypeStruct((16, LANE), jnp.float32),
            grid=(2,),
            in_specs=[pl.BlockSpec((8, LANE), lambda i: (0, 0),
                                   pipeline_mode=pl.Buffered(1))],
            out_specs=pl.BlockSpec((8, LANE), lambda i: (i, 0)),
        )
        y = jax.block_until_ready(fn(jnp.zeros((8, LANE), jnp.float32)))
        return bool(jnp.all(y == 1.0))
    except Exception:
        return False


def _const_spec(shape):
    """BlockSpec for a grid-invariant operand (weights/bias/mask): single-buffered when
    supported so its VMEM footprint is not doubled by the pipeline."""
    nd = len(shape)
    index_map = lambda *_: (0,) * nd
    if _buffered_supported():
        return pl.BlockSpec(shape, index_map, pipeline_mode=pl.Buffered(1))
    return pl.BlockSpec(shape, index_map)


# ----------------------------- Pallas conv kernel ------------------------------


def _conv_kernel(x_ref, w_ref, b_ref, cm_ref, *out_refs,
                 ke, th, wcols, hout, cout, negative_slope, want_stats):
    """One (image, H-tile) step of a stride-1 conv with fused im2col.

    x_ref : (1, HqP, WqP, Cq)     bf16 spatially padded per-image input (grid-invariant
                                  along the H-tile axis -> fetched once per image).
    w_ref : (ke*ke, Cq, Coutp)    bf16 per-tap weight matrices (lane-padded Cout).
    b_ref : (1, Coutp)            f32 bias row.
    cm_ref: (th*wcols, 1)         f32 column-validity mask (1.0 for wo < Wout).
    out   : (1, th*wcols, Cout)   conv output rows (flattened (h, w)), true Cout.
    stats : (1, 1, 2, Coutp)      masked partial [sum, sum-of-squares] for BatchNorm.
    """
    o_ref = out_refs[0]
    t = pl.program_id(1)
    ho0 = t * th
    cq = x_ref.shape[3]
    coutp = w_ref.shape[2]
    mt = th * wcols

    acc = jnp.zeros((mt, coutp), jnp.float32)
    for i in range(ke):
        for j in range(ke):
            # (th, wcols, cq) contiguous window; wcols % 16 == 0 so the merge of the two
            # leading dims into the GEMM M axis is a tile-aligned (free) reshape.
            xs = x_ref[0, pl.ds(ho0 + i, th), pl.ds(j, wcols), :]
            acc = acc + jnp.dot(xs.reshape(mt, cq), w_ref[i * ke + j],
                                preferred_element_type=jnp.float32)
    acc = acc + b_ref[...]

    if want_stats:
        stats_ref = out_refs[1]
        # Mask rows past the true Hout (tail tile) and columns past the true Wout.
        nrows = jnp.minimum(th, hout - ho0)
        ridx = jax.lax.broadcasted_iota(jnp.int32, (mt, 1), 0)
        mask = jnp.where(ridx < nrows * wcols, cm_ref[...], 0.0)      # (mt, 1)
        vacc = acc * mask
        s = jnp.sum(vacc, axis=0, keepdims=True)                      # (1, coutp)
        sq = jnp.sum(vacc * vacc, axis=0, keepdims=True)              # (1, coutp)
        stats_ref[0, 0] = jnp.concatenate([s, sq], axis=0)

    if negative_slope is not None:
        acc = jnp.where(acc >= 0.0, acc, negative_slope * acc)
    o_ref[0] = acc[:, :cout].astype(o_ref.dtype)


def conv_layer_pallas(xq, w_taps, b_row, *, ke, th, nT, Hout, Wout, Wcols,
                      Cout, Coutp, want_stats, lrelu_slope, out_dtype):
    N, HqP, WqP, Cq = xq.shape
    mt = th * Wcols
    colmask = (jnp.tile(jnp.arange(Wcols) < Wout, th)
               .astype(jnp.float32).reshape(mt, 1))

    kern = functools.partial(
        _conv_kernel, ke=ke, th=th, wcols=Wcols, hout=Hout, cout=Cout,
        negative_slope=lrelu_slope, want_stats=want_stats)

    in_specs = [
        pl.BlockSpec((1, HqP, WqP, Cq), lambda n, t: (n, 0, 0, 0)),
        _const_spec((ke * ke, Cq, Coutp)),   # weights: grid-invariant
        _const_spec((1, Coutp)),             # bias
        _const_spec((mt, 1)),                # column mask
    ]
    out_shapes = [jax.ShapeDtypeStruct((N, nT * mt, Cout), out_dtype)]
    out_specs = [pl.BlockSpec((1, mt, Cout), lambda n, t: (n, t, 0))]
    if want_stats:
        out_shapes.append(jax.ShapeDtypeStruct((N, nT, 2, Coutp), jnp.float32))
        out_specs.append(pl.BlockSpec((1, 1, 2, Coutp), lambda n, t: (n, t, 0, 0)))

    res = pl.pallas_call(
        kern,
        out_shape=tuple(out_shapes) if want_stats else out_shapes[0],
        grid=(N, nT),
        in_specs=in_specs,
        out_specs=tuple(out_specs) if want_stats else out_specs[0],
        compiler_params=pltpu.CompilerParams(
            dimension_semantics=("parallel", "parallel"),
            vmem_limit_bytes=_vmem_limit_bytes()),
    )(xq, w_taps, b_row, colmask)

    if want_stats:
        return res[0], res[1]
    return res, None


# ----------------------------- XLA glue (fused per layer) ----------------------


def _prep_weights(w_oihw, bias, stride):
    """(Cout, Cin, 4, 4) -> per-tap (ke*ke, Cq, Coutp) matrices (space-to-depth for s=2)."""
    Cout, Cin, kh, kw = w_oihw.shape
    if stride == 2:
        ke = 2
        w6 = w_oihw.reshape(Cout, Cin, 2, 2, 2, 2)             # (co, c, iq, ir, jq, jr)
        wt = jnp.transpose(w6, (2, 4, 3, 5, 1, 0))             # (iq, jq, ir, jr, c, co)
        wt = wt.reshape(ke * ke, 4 * Cin, Cout)
    else:
        ke = 4
        wt = jnp.transpose(w_oihw, (2, 3, 1, 0)).reshape(ke * ke, Cin, Cout)
    Coutp = _round_up(Cout, LANE)
    wt = jnp.pad(wt, ((0, 0), (0, 0), (0, Coutp - Cout))).astype(jnp.bfloat16)
    b = jnp.pad(bias, (0, Coutp - Cout)).astype(jnp.float32).reshape(1, Coutp)
    return wt, b, ke, Coutp


def _preprocess(x4, Htrue, Wtrue, stride, pending, HoutP, Wcols, ke):
    """Slice true H/W, apply the previous layer's folded BN scale/shift + LeakyReLU,
    zero-pad spatially, space-to-depth for stride-2, pad to the kernel's tile geometry.
    All elementwise/pad/transpose -> one fused XLA pass over the activation."""
    x = x4[:, :Htrue, :Wtrue, :].astype(jnp.float32)
    if pending is not None:
        scale, shift = pending
        x = x * scale.reshape(1, 1, 1, -1) + shift.reshape(1, 1, 1, -1)
        x = jnp.where(x >= 0.0, x, LRELU_SLOPE * x)
    x = x.astype(jnp.bfloat16)
    x = jnp.pad(x, ((0, 0), (PADW, PADW), (PADW, PADW), (0, 0)))
    if stride == 2:
        N, Hp, Wp, C = x.shape
        He, We = _round_up(Hp, 2), _round_up(Wp, 2)
        x = jnp.pad(x, ((0, 0), (0, He - Hp), (0, We - Wp), (0, 0)))
        x = x.reshape(N, He // 2, 2, We // 2, 2, C)
        x = jnp.transpose(x, (0, 1, 3, 2, 4, 5)).reshape(N, He // 2, We // 2, 4 * C)
    N, Hq, Wq, Cq = x.shape
    HqP = max(Hq, HoutP + ke - 1)
    WqP = max(Wq, Wcols + ke - 1)
    if (HqP, WqP) != (Hq, Wq):
        x = jnp.pad(x, ((0, 0), (0, HqP - Hq), (0, WqP - Wq), (0, 0)))
    return x


def _finalize_bn(stats, gamma, beta, count, cout):
    """Training-mode BatchNorm (biased variance, eps=1e-5, affine) from fused partial
    stats, folded into a per-channel (scale, shift)."""
    s = jnp.sum(stats, axis=(0, 1))                  # (2, Coutp): [sum, sum of squares]
    mean = s[0, :cout] / count
    var = jnp.maximum(s[1, :cout] / count - mean * mean, 0.0)
    inv = jax.lax.rsqrt(var + BN_EPS)
    scale = gamma * inv
    shift = beta - mean * scale
    return scale, shift


def _pick_th(Hout, Wcols, Cq, Coutp, target_rows):
    """Row-tile height from a per-step VMEM budget (~8 MiB acc/window/out) and a target
    GEMM M; bigger tiles for the small-K early layers, smaller for deep wide ones."""
    per_row = Wcols * (4 * Coutp + 2 * Cq + 4 * Coutp)
    cap = max(1, (8 << 20) // max(per_row, 1))
    return int(max(1, min(Hout, cap, max(1, target_rows // Wcols))))


# ----------------------------- model setup --------------------------------------


def init_params(key, input_nc, ndf=64, n_layers=3):
    """Mirror NLayerDiscriminator.__init__ (norm='batch' => use_bias=False)."""
    use_bias = False
    cfgs = [dict(cin=input_nc, cout=ndf, stride=2, bias=True, norm=False)]
    nf_mult = 1
    for n in range(1, n_layers):
        nf_mult_prev, nf_mult = nf_mult, min(2 ** n, 8)
        cfgs.append(dict(cin=ndf * nf_mult_prev, cout=ndf * nf_mult,
                         stride=2, bias=use_bias, norm=True))
    nf_mult_prev, nf_mult = nf_mult, min(2 ** n_layers, 8)
    cfgs.append(dict(cin=ndf * nf_mult_prev, cout=ndf * nf_mult,
                     stride=1, bias=use_bias, norm=True))
    cfgs.append(dict(cin=ndf * nf_mult, cout=1, stride=1, bias=True, norm=False))

    params = []
    for cfg in cfgs:
        key, wk, bk, gk, bek = jax.random.split(key, 5)
        w = 0.02 * jax.random.normal(wk, (cfg["cout"], cfg["cin"], KW, KW), jnp.float32)
        b = (0.01 * jax.random.normal(bk, (cfg["cout"],), jnp.float32)
             if cfg["bias"] else jnp.zeros((cfg["cout"],), jnp.float32))
        gamma = (1.0 + 0.1 * jax.random.normal(gk, (cfg["cout"],), jnp.float32)
                 if cfg["norm"] else None)
        beta = (0.1 * jax.random.normal(bek, (cfg["cout"],), jnp.float32)
                if cfg["norm"] else None)
        params.append(dict(cfg=cfg, w=w, b=b, gamma=gamma, beta=beta))
    return params


def nlayer_discriminator_forward(params, x_nchw, target_rows=512):
    x4 = jnp.transpose(x_nchw, (0, 2, 3, 1)).astype(jnp.float32)   # NCHW -> NHWC
    N, Htrue, Wtrue = x4.shape[0], x4.shape[1], x4.shape[2]
    pending = None                       # folded (scale, shift) of the previous BN layer
    nlayers = len(params)
    for idx, p in enumerate(params):
        cfg = p["cfg"]
        stride, cout = cfg["stride"], cfg["cout"]
        is_last = idx == nlayers - 1

        Hout = (Htrue + 2 * PADW - KW) // stride + 1
        Wout = (Wtrue + 2 * PADW - KW) // stride + 1
        ke = 2 if stride == 2 else 4
        Wcols = _round_up(Wout, 16)      # computed cols per row (mult of bf16 tile)

        wt, brow, ke, Coutp = _prep_weights(p["w"], p["b"], stride)
        Cq = wt.shape[1]
        th = _pick_th(Hout, Wcols, Cq, Coutp, target_rows)
        nT = -(-Hout // th)
        HoutP = nT * th

        xq = _preprocess(x4, Htrue, Wtrue, stride, pending, HoutP, Wcols, ke)

        fuse_lrelu = (not cfg["norm"]) and (not is_last)        # layer 0 only
        out_dtype = jnp.float32 if is_last else jnp.bfloat16
        slab, stats = conv_layer_pallas(
            xq, wt, brow, ke=ke, th=th, nT=nT, Hout=Hout, Wout=Wout, Wcols=Wcols,
            Cout=cout, Coutp=Coutp, want_stats=cfg["norm"],
            lrelu_slope=LRELU_SLOPE if fuse_lrelu else None, out_dtype=out_dtype)

        x4 = slab.reshape(N, HoutP, Wcols, cout)
        if cfg["norm"]:
            pending = _finalize_bn(stats, p["gamma"], p["beta"],
                                   N * Hout * Wout, cout)
        else:
            pending = None
        Htrue, Wtrue = Hout, Wout

    out = x4[:, :Htrue, :Wtrue, :]                  # (N, Hout, Wout, 1), f32
    # use_sigmoid=False -> no sigmoid
    return jnp.transpose(out, (0, 3, 1, 2)).astype(jnp.float32)   # NHWC -> NCHW


def reference_forward(params, x_nchw):
    """Pure-JAX reference: same bf16-operand / f32-accumulate convs, training-mode BN."""
    x = x_nchw.astype(jnp.float32)
    for idx, p in enumerate(params):
        cfg = p["cfg"]
        is_last = idx == len(params) - 1
        y = jax.lax.conv_general_dilated(
            x.astype(jnp.bfloat16), p["w"].astype(jnp.bfloat16),
            (cfg["stride"], cfg["stride"]), [(PADW, PADW), (PADW, PADW)],
            dimension_numbers=("NCHW", "OIHW", "NCHW"),
            preferred_element_type=jnp.float32)
        y = y + p["b"].reshape(1, -1, 1, 1)
        if cfg["norm"]:
            mean = jnp.mean(y, axis=(0, 2, 3), keepdims=True)
            var = jnp.mean(jnp.square(y - mean), axis=(0, 2, 3), keepdims=True)
            y = (y - mean) * jax.lax.rsqrt(var + BN_EPS)
            y = y * p["gamma"].reshape(1, -1, 1, 1) + p["beta"].reshape(1, -1, 1, 1)
        if not is_last:
            y = jnp.where(y >= 0.0, y, LRELU_SLOPE * y)
        x = y
    return x


# ----------------------------- main ---------------------------------------------


if __name__ == "__main__":
    key = jax.random.PRNGKey(0)
    kx, kp = jax.random.split(key)

    # Small shapes: input_nc=4, ndf=16, n_layers=3; x is NCHW like the PyTorch module.
    input_nc, ndf, n_layers = 4, 16, 3
    x = jax.random.normal(kx, (2, input_nc, 16, 16), jnp.float32)
    params = init_params(kp, input_nc, ndf=ndf, n_layers=n_layers)

    _buffered_supported()        # pre-warm probes outside any tracing
    _vmem_limit_bytes()

    fwd = jax.jit(functools.partial(nlayer_discriminator_forward, params))
    out = jax.block_until_ready(fwd(x))
    ref = jax.block_until_ready(reference_forward(params, x))
    assert out.shape == ref.shape == (2, 1, 5, 5), (out.shape, ref.shape)
    err = float(jnp.max(jnp.abs(out - ref)))
    # bf16 storage of intermediate slabs (per perf feedback) adds ~one extra rounding of
    # each activation vs the f32-slab reference path, hence the 2e-2 tolerance.
    assert bool(jnp.allclose(out, ref, atol=2e-2, rtol=2e-2)), f"mismatch vs reference: {err}"

    # Also exercise the multi-H-tile grid and the masked (ragged-tail) BN-stats path.
    fwd_small = jax.jit(functools.partial(nlayer_discriminator_forward, params,
                                          target_rows=32))
    out2 = jax.block_until_ready(fwd_small(x))
    err2 = float(jnp.max(jnp.abs(out2 - ref)))
    assert bool(jnp.allclose(out2, ref, atol=2e-2, rtol=2e-2)), f"small-tile mismatch: {err2}"

    print("KERNEL_OK")
</pallas_src>

<mosaic_0001>
module attributes {stable_mosaic.version = 11 : i64} {
  func.func @_probe_kernel(%arg0: i32, %arg1: memref<8x128xf32, #tpu.memory_space<vmem>>, %arg2: memref<8x128xf32, #tpu.memory_space<vmem>>) attributes {dimension_semantics = [#tpu.dimension_semantics<arbitrary>], iteration_bounds = array<i64: 2>, scalar_prefetch = 0 : i64, scratch_operands = 0 : i64, tpu.core_type = #tpu.core_type<tc>, window_params = [{pipeline_mode = #tpu.pipeline_mode<synchronous>, transform_indices = @transform_0, window_bounds = array<i64: 8, 128>}, {transform_indices = @transform_1, window_bounds = array<i64: 8, 128>}]} {
    %c0 = arith.constant 0 : index
    %c0_0 = arith.constant 0 : index
    %0 = vector.load %arg1[%c0, %c0_0] : memref<8x128xf32, #tpu.memory_space<vmem>>, vector<8x128xf32>
    %cst = arith.constant 1.000000e+00 : f32
    %1 = vector.broadcast %cst : f32 to vector<8x128xf32>
    %2 = arith.addf %0, %1 : vector<8x128xf32>
    %c0_1 = arith.constant 0 : index
    %c0_2 = arith.constant 0 : index
    %3 = vector.load %arg2[%c0_1, %c0_2] : memref<8x128xf32, #tpu.memory_space<vmem>>, vector<8x128xf32>
    tpu.vector_store %arg2[%c0_1, %c0_2], %2 {strides = array<i32>} : memref<8x128xf32, #tpu.memory_space<vmem>>, vector<8x128xf32>,
    return
  }
  func.func @transform_0(%arg0: i32) -> (i32, i32) {
    %c0_i32 = arith.constant 0 : i32
    %c0_i32_0 = arith.constant 0 : i32
    %c0_i32_1 = arith.constant 0 : i32
    return %c0_i32, %c0_i32_0 : i32, i32
  }
  func.func @transform_1(%arg0: i32) -> (i32, i32) {
    %c0_i32 = arith.constant 0 : i32
    %c0_i32_0 = arith.constant 0 : i32
    return %arg0, %c0_i32 : i32, i32
  }
}

module attributes {stable_mosaic.version = 11 : i64} {
  func.func @_conv_kernel(%arg0: i32, %arg1: i32, %arg2: memref<1x10x17x16xbf16, #tpu.memory_space<vmem>>, %arg3: memref<4x16x128xbf16, #tpu.memory_space<vmem>>, %arg4: memref<1x128xf32, #tpu.memory_space<vmem>>, %arg5: memref<144x1xf32, #tpu.memory_space<vmem>>, %arg6: memref<1x144x16xbf16, #tpu.memory_space<vmem>>) attributes {dimension_semantics = [#tpu.dimension_semantics<parallel>, #tpu.dimension_semantics<parallel>], iteration_bounds = array<i64: 2, 1>, scalar_prefetch = 0 : i64, scratch_operands = 0 : i64, tpu.core_type = #tpu.core_type<tc>, window_params = [{transform_indices = @transform_0, window_bounds = array<i64: 1, 10, 17, 16>}, {pipeline_mode = #tpu.pipeline_mode<synchronous>, transform_indices = @transform_1, window_bounds = array<i64: 4, 16, 128>}, {pipeline_mode = #tpu.pipeline_mode<synchronous>, transform_indices = @transform_2, window_bounds = array<i64: 1, 128>}, {pipeline_mode = #tpu.pipeline_mode<synchronous>, transform_indices = @transform_3, window_bounds = array<i64: 144, 1>}, {transform_indices = @transform_4, window_bounds = array<i64: 1, 144, 16>}]} {
    %c9_i32 = arith.constant 9 : i32
    %0 = arith.muli %arg1, %c9_i32 : i32
    %cst = arith.constant 0.000000e+00 : f32
    %1 = vector.broadcast %cst : f32 to vector<144x128xf32>
    %c0_i32 = arith.constant 0 : i32
    %2 = arith.addi %0, %c0_i32 : i32
    %c0 = arith.constant 0 : index
    %3 = arith.index_cast %2 : i32 to index
    %c0_0 = arith.constant 0 : index
    %c0_1 = arith.constant 0 : index
    %4 = vector.load %arg2[%c0, %3, %c0_0, %c0_1] : memref<1x10x17x16xbf16, #tpu.memory_space<vmem>>, vector<1x9x16x16xbf16>
    %5 = vector.shape_cast %4 : vector<1x9x16x16xbf16> to vector<9x16x16xbf16>
    %6 = vector.shape_cast %5 : vector<9x16x16xbf16> to vector<144x16xbf16>
    %c0_2 = arith.constant 0 : index
    %c0_3 = arith.constant 0 : index
    %c0_4 = arith.constant 0 : index
    %7 = vector.load %arg3[%c0_2, %c0_3, %c0_4] : memref<4x16x128xbf16, #tpu.memory_space<vmem>>, vector<1x16x128xbf16>
    %8 = vector.shape_cast %7 : vector<1x16x128xbf16> to vector<16x128xbf16>
    %cst_5 = arith.constant dense<0.000000e+00> : vector<144x128xf32>
    %9 = tpu.matmul %6, %8, %cst_5 {dimension_numbers = #tpu.dot_dimension_numbers<[1], [0], [0], [1], [0, 0, 1, 1], [], []>} : vector<144x16xbf16>, vector<16x128xbf16>, vector<144x128xf32> -> vector<144x128xf32>
    %10 = arith.addf %1, %9 : vector<144x128xf32>
    %c0_i32_6 = arith.constant 0 : i32
    %11 = arith.addi %0, %c0_i32_6 : i32
    %c0_7 = arith.constant 0 : index
    %12 = arith.index_cast %11 : i32 to index
    %c1 = arith.constant 1 : index
    %c0_8 = arith.constant 0 : index
    %13 = vector.load %arg2[%c0_7, %12, %c1, %c0_8] : memref<1x10x17x16xbf16, #tpu.memory_space<vmem>>, vector<1x9x16x16xbf16>
    %14 = vector.shape_cast %13 : vector<1x9x16x16xbf16> to vector<9x16x16xbf16>
    %15 = vector.shape_cast %14 : vector<9x16x16xbf16> to vector<144x16xbf16>
    %c1_9 = arith.constant 1 : index
    %c0_10 = arith.constant 0 : index
    %c0_11 = arith.constant 0 : index
    %16 = vector.load %arg3[%c1_9, %c0_10, %c0_11] : memref<4x16x128xbf16, #tpu.memory_space<vmem>>, vector<1x16x128xbf16>
    %17 = vector.shape_cast %16 : vector<1x16x128xbf16> to vector<16x128xbf16>
    %cst_12 = arith.constant dense<0.000000e+00> : vector<144x128xf32>
    %18 = tpu.matmul %15, %17, %cst_12 {dimension_numbers = #tpu.dot_dimension_numbers<[1], [0], [0], [1], [0, 0, 1, 1], [], []>} : vector<144x16xbf16>, vector<16x128xbf16>, vector<144x128xf32> -> vector<144x128xf32>
    %19 = arith.addf %10, %18 : vector<144x128xf32>
    %c1_i32 = arith.constant 1 : i32
    %20 = arith.addi %0, %c1_i32 : i32
    %c0_13 = arith.constant 0 : index
    %21 = arith.index_cast %20 : i32 to index
    %c0_14 = arith.constant 0 : index
    %c0_15 = arith.constant 0 : index
    %22 = vector.load %arg2[%c0_13, %21, %c0_14, %c0_15] : memref<1x10x17x16xbf16, #tpu.memory_space<vmem>>, vector<1x9x16x16xbf16>
    %23 = vector.shape_cast %22 : vector<1x9x16x16xbf16> to vector<9x16x16xbf16>
    %24 = vector.shape_cast %23 : vector<9x16x16xbf16> to vector<144x16xbf16>
    %c2 = arith.constant 2 : index
    %c0_16 = arith.constant 0 : index
    %c0_17 = arith.constant 0 : index
    %25 = vector.load %arg3[%c2, %c0_16, %c0_17] : memref<4x16x128xbf16, #tpu.memory_space<vmem>>, vector<1x16x128xbf16>
    %26 = vector.shape_cast %25 : vector<1x16x128xbf16> to vector<16x128xbf16>
    %cst_18 = arith.constant dense<0.000000e+00> : vector<144x128xf32>
    %27 = tpu.matmul %24, %26, %cst_18 {dimension_numbers = #tpu.dot_dimension_numbers<[1], [0], [0], [1], [0, 0, 1, 1], [], []>} : vector<144x16xbf16>, vector<16x128xbf16>, vector<144x128xf32> -> vector<144x128xf32>
    %28 = arith.addf %19, %27 : vector<144x128xf32>
    %c1_i32_19 = arith.constant 1 : i32
    %29 = arith.addi %0, %c1_i32_19 : i32
    %c0_20 = arith.constant 0 : index
    %30 = arith.index_cast %29 : i32 to index
    %c1_21 = arith.constant 1 : index
    %c0_22 = arith.constant 0 : index
    %31 = vector.load %arg2[%c0_20, %30, %c1_21, %c0_22] : memref<1x10x17x16xbf16, #tpu.memory_space<vmem>>, vector<1x9x16x16xbf16>
    %32 = vector.shape_cast %31 : vector<1x9x16x16xbf16> to vector<9x16x16xbf16>
    %33 = vector.shape_cast %32 : vector<9x16x16xbf16> to vector<144x16xbf16>
    %c3 = arith.constant 3 : index
    %c0_23 = arith.constant 0 : index
    %c0_24 = arith.constant 0 : index
    %34 = vector.load %arg3[%c3, %c0_23, %c0_24] : memref<4x16x128xbf16, #tpu.memory_space<vmem>>, vector<1x16x128xbf16>
    %35 = vector.shape_cast %34 : vector<1x16x128xbf16> to vector<16x128xbf16>
    %cst_25 = arith.constant dense<0.000000e+00> : vector<144x128xf32>
    %36 = tpu.matmul %33, %35, %cst_25 {dimension_numbers = #tpu.dot_dimension_numbers<[1], [0], [0], [1], [0, 0, 1, 1], [], []>} : vector<144x16xbf16>, vector<16x128xbf16>, vector<144x128xf32> -> vector<144x128xf32>
    %37 = arith.addf %28, %36 : vector<144x128xf32>
    %c0_26 = arith.constant 0 : index
    %c0_27 = arith.constant 0 : index
    %38 = vector.load %arg4[%c0_26, %c0_27] : memref<1x128xf32, #tpu.memory_space<vmem>>, vector<1x128xf32>
    %39 = vector.broadcast %38 : vector<1x128xf32> to vector<144x128xf32>
    %40 = arith.addf %37, %39 : vector<144x128xf32>
    %cst_28 = arith.constant 0.000000e+00 : f32
    %41 = vector.broadcast %cst_28 : f32 to vector<144x128xf32>
    %42 = arith.cmpf oge, %40, %41 : vector<144x128xf32>
    %cst_29 = arith.constant 2.000000e-01 : f32
    %43 = vector.broadcast %cst_29 : f32 to vector<144x128xf32>
    %44 = arith.mulf %43, %40 : vector<144x128xf32>
    %45 = arith.select %42, %40, %44 : vector<144x128xi1>, vector<144x128xf32>
    %46 = vector.extract_strided_slice %45 {offsets = [0, 0], sizes = [144, 16], strides = [1, 1]} : vector<144x128xf32> to vector<144x16xf32>
    %47 = arith.truncf %46 : vector<144x16xf32> to vector<144x16xbf16>
    %c0_30 = arith.constant 0 : index
    %c0_31 = arith.constant 0 : index
    %c0_32 = arith.constant 0 : index
    %48 = vector.load %arg6[%c0_30, %c0_31, %c0_32] : memref<1x144x16xbf16, #tpu.memory_space<vmem>>, vector<1x144x16xbf16>
    %49 = vector.shape_cast %48 : vector<1x144x16xbf16> to vector<144x16xbf16>
    %50 = vector.shape_cast %47 : vector<144x16xbf16> to vector<1x144x16xbf16>
    tpu.vector_store %arg6[%c0_30, %c0_31, %c0_32], %50 {strides = array<i32>} : memref<1x144x16xbf16, #tpu.memory_space<vmem>>, vector<1x144x16xbf16>,
    return
  }
  func.func @transform_0(%arg0: i32, %arg1: i32) -> (i32, i32, i32, i32) {
    %c0_i32 = arith.constant 0 : i32
    %c0_i32_0 = arith.constant 0 : i32
    %c0_i32_1 = arith.constant 0 : i32
    %c0_i32_2 = arith.constant 0 : i32
    return %arg0, %c0_i32, %c0_i32_0, %c0_i32_1 : i32, i32, i32, i32
  }
  func.func @transform_1(%arg0: i32, %arg1: i32) -> (i32, i32, i32) {
    %c0_i32 = arith.constant 0 : i32
    %c0_i32_0 = arith.constant 0 : i32
    %c0_i32_1 = arith.constant 0 : i32
    %c0_i32_2 = arith.constant 0 : i32
    return %c0_i32, %c0_i32_0, %c0_i32_1 : i32, i32, i32
  }
  func.func @transform_2(%arg0: i32, %arg1: i32) -> (i32, i32) {
    %c0_i32 = arith.constant 0 : i32
    %c0_i32_0 = arith.constant 0 : i32
    %c0_i32_1 = arith.constant 0 : i32
    return %c0_i32, %c0_i32_0 : i32, i32
  }
  func.func @transform_3(%arg0: i32, %arg1: i32) -> (i32, i32) {
    %c0_i32 = arith.constant 0 : i32
    %c0_i32_0 = arith.constant 0 : i32
    %c0_i32_1 = arith.constant 0 : i32
    return %c0_i32, %c0_i32_0 : i32, i32
  }
  func.func @transform_4(%arg0: i32, %arg1: i32) -> (i32, i32, i32) {
    %c0_i32 = arith.constant 0 : i32
    %c0_i32_0 = arith.constant 0 : i32
    return %arg0, %arg1, %c0_i32 : i32, i32, i32
  }
}

module attributes {stable_mosaic.version = 11 : i64} {
  func.func @_conv_kernel(%arg0: i32, %arg1: i32, %arg2: memref<1x7x17x64xbf16, #tpu.memory_space<vmem>>, %arg3: memref<4x64x128xbf16, #tpu.memory_space<vmem>>, %arg4: memref<1x128xf32, #tpu.memory_space<vmem>>, %arg5: memref<80x1xf32, #tpu.memory_space<vmem>>, %arg6: memref<1x80x32xbf16, #tpu.memory_space<vmem>>, %arg7: memref<1x1x2x128xf32, #tpu.memory_space<vmem>>) attributes {dimension_semantics = [#tpu.dimension_semantics<parallel>, #tpu.dimension_semantics<parallel>], iteration_bounds = array<i64: 2, 1>, scalar_prefetch = 0 : i64, scratch_operands = 0 : i64, tpu.core_type = #tpu.core_type<tc>, window_params = [{transform_indices = @transform_0, window_bounds = array<i64: 1, 7, 17, 64>}, {pipeline_mode = #tpu.pipeline_mode<synchronous>, transform_indices = @transform_1, window_bounds = array<i64: 4, 64, 128>}, {pipeline_mode = #tpu.pipeline_mode<synchronous>, transform_indices = @transform_2, window_bounds = array<i64: 1, 128>}, {pipeline_mode = #tpu.pipeline_mode<synchronous>, transform_indices = @transform_3, window_bounds = array<i64: 80, 1>}, {transform_indices = @transform_4, window_bounds = array<i64: 1, 80, 32>}, {transform_indices = @transform_5, window_bounds = array<i64: 1, 1, 2, 128>}]} {
    %c5_i32 = arith.constant 5 : i32
    %0 = arith.muli %arg1, %c5_i32 : i32
    %cst = arith.constant 0.000000e+00 : f32
    %1 = vector.broadcast %cst : f32 to vector<80x128xf32>
    %c0_i32 = arith.constant 0 : i32
    %2 = arith.addi %0, %c0_i32 : i32
    %c0 = arith.constant 0 : index
    %3 = arith.index_cast %2 : i32 to index
    %c0_0 = arith.constant 0 : index
    %c0_1 = arith.constant 0 : index
    %4 = vector.load %arg2[%c0, %3, %c0_0, %c0_1] : memref<1x7x17x64xbf16, #tpu.memory_space<vmem>>, vector<1x5x16x64xbf16>
    %5 = vector.shape_cast %4 : vector<1x5x16x64xbf16> to vector<5x16x64xbf16>
    %6 = vector.shape_cast %5 : vector<5x16x64xbf16> to vector<80x64xbf16>
    %c0_2 = arith.constant 0 : index
    %c0_3 = arith.constant 0 : index
    %c0_4 = arith.constant 0 : index
    %7 = vector.load %arg3[%c0_2, %c0_3, %c0_4] : memref<4x64x128xbf16, #tpu.memory_space<vmem>>, vector<1x64x128xbf16>
    %8 = vector.shape_cast %7 : vector<1x64x128xbf16> to vector<64x128xbf16>
    %cst_5 = arith.constant dense<0.000000e+00> : vector<80x128xf32>
    %9 = tpu.matmul %6, %8, %cst_5 {dimension_numbers = #tpu.dot_dimension_numbers<[1], [0], [0], [1], [0, 0, 1, 1], [], []>} : vector<80x64xbf16>, vector<64x128xbf16>, vector<80x128xf32> -> vector<80x128xf32>
    %10 = arith.addf %1, %9 : vector<80x128xf32>
    %c0_i32_6 = arith.constant 0 : i32
    %11 = arith.addi %0, %c0_i32_6 : i32
    %c0_7 = arith.constant 0 : index
    %12 = arith.index_cast %11 : i32 to index
    %c1 = arith.constant 1 : index
    %c0_8 = arith.constant 0 : index
    %13 = vector.load %arg2[%c0_7, %12, %c1, %c0_8] : memref<1x7x17x64xbf16, #tpu.memory_space<vmem>>, vector<1x5x16x64xbf16>
    %14 = vector.shape_cast %13 : vector<1x5x16x64xbf16> to vector<5x16x64xbf16>
    %15 = vector.shape_cast %14 : vector<5x16x64xbf16> to vector<80x64xbf16>
    %c1_9 = arith.constant 1 : index
    %c0_10 = arith.constant 0 : index
    %c0_11 = arith.constant 0 : index
    %16 = vector.load %arg3[%c1_9, %c0_10, %c0_11] : memref<4x64x128xbf16, #tpu.memory_space<vmem>>, vector<1x64x128xbf16>
    %17 = vector.shape_cast %16 : vector<1x64x128xbf16> to vector<64x128xbf16>
    %cst_12 = arith.constant dense<0.000000e+00> : vector<80x128xf32>
    %18 = tpu.matmul %15, %17, %cst_12 {dimension_numbers = #tpu.dot_dimension_numbers<[1], [0], [0], [1], [0, 0, 1, 1], [], []>} : vector<80x64xbf16>, vector<64x128xbf16>, vector<80x128xf32> -> vector<80x128xf32>
    %19 = arith.addf %10, %18 : vector<80x128xf32>
    %c1_i32 = arith.constant 1 : i32
    %20 = arith.addi %0, %c1_i32 : i32
    %c0_13 = arith.constant 0 : index
    %21 = arith.index_cast %20 : i32 to index
    %c0_14 = arith.constant 0 : index
    %c0_15 = arith.constant 0 : index
    %22 = vector.load %arg2[%c0_13, %21, %c0_14, %c0_15] : memref<1x7x17x64xbf16, #tpu.memory_space<vmem>>, vector<1x5x16x64xbf16>
    %23 = vector.shape_cast %22 : vector<1x5x16x64xbf16> to vector<5x16x64xbf16>
    %24 = vector.shape_cast %23 : vector<5x16x64xbf16> to vector<80x64xbf16>
    %c2 = arith.constant 2 : index
    %c0_16 = arith.constant 0 : index
    %c0_17 = arith.constant 0 : index
    %25 = vector.load %arg3[%c2, %c0_16, %c0_17] : memref<4x64x128xbf16, #tpu.memory_space<vmem>>, vector<1x64x128xbf16>
    %26 = vector.shape_cast %25 : vector<1x64x128xbf16> to vector<64x128xbf16>
    %cst_18 = arith.constant dense<0.000000e+00> : vector<80x128xf32>
    %27 = tpu.matmul %24, %26, %cst_18 {dimension_numbers = #tpu.dot_dimension_numbers<[1], [0], [0], [1], [0, 0, 1, 1], [], []>} : vector<80x64xbf16>, vector<64x128xbf16>, vector<80x128xf32> -> vector<80x128xf32>
    %28 = arith.addf %19, %27 : vector<80x128xf32>
    %c1_i32_19 = arith.constant 1 : i32
    %29 = arith.addi %0, %c1_i32_19 : i32
    %c0_20 = arith.constant 0 : index
    %30 = arith.index_cast %29 : i32 to index
    %c1_21 = arith.constant 1 : index
    %c0_22 = arith.constant 0 : index
    %31 = vector.load %arg2[%c0_20, %30, %c1_21, %c0_22] : memref<1x7x17x64xbf16, #tpu.memory_space<vmem>>, vector<1x5x16x64xbf16>
    %32 = vector.shape_cast %31 : vector<1x5x16x64xbf16> to vector<5x16x64xbf16>
    %33 = vector.shape_cast %32 : vector<5x16x64xbf16> to vector<80x64xbf16>
    %c3 = arith.constant 3 : index
    %c0_23 = arith.constant 0 : index
    %c0_24 = arith.constant 0 : index
    %34 = vector.load %arg3[%c3, %c0_23, %c0_24] : memref<4x64x128xbf16, #tpu.memory_space<vmem>>, vector<1x64x128xbf16>
    %35 = vector.shape_cast %34 : vector<1x64x128xbf16> to vector<64x128xbf16>
    %cst_25 = arith.constant dense<0.000000e+00> : vector<80x128xf32>
    %36 = tpu.matmul %33, %35, %cst_25 {dimension_numbers = #tpu.dot_dimension_numbers<[1], [0], [0], [1], [0, 0, 1, 1], [], []>} : vector<80x64xbf16>, vector<64x128xbf16>, vector<80x128xf32> -> vector<80x128xf32>
    %37 = arith.addf %28, %36 : vector<80x128xf32>
    %c0_26 = arith.constant 0 : index
    %c0_27 = arith.constant 0 : index
    %38 = vector.load %arg4[%c0_26, %c0_27] : memref<1x128xf32, #tpu.memory_space<vmem>>, vector<1x128xf32>
    %39 = vector.broadcast %38 : vector<1x128xf32> to vector<80x128xf32>
    %40 = arith.addf %37, %39 : vector<80x128xf32>
    %c5_i32_28 = arith.constant 5 : i32
    %41 = arith.subi %c5_i32_28, %0 : i32
    %c5_i32_29 = arith.constant 5 : i32
    %42 = arith.minsi %c5_i32_29, %41 : i32
    %43 = tpu.iota {dimensions = array<i32: 0>} : vector<80x1xi32>
    %c16_i32 = arith.constant 16 : i32
    %44 = arith.muli %42, %c16_i32 : i32
    %45 = vector.broadcast %44 : i32 to vector<80x1xi32>
    %46 = arith.cmpi slt, %43, %45 : vector<80x1xi32>
    %c0_30 = arith.constant 0 : index
    %c0_31 = arith.constant 0 : index
    %47 = vector.load %arg5[%c0_30, %c0_31] : memref<80x1xf32, #tpu.memory_space<vmem>>, vector<80x1xf32>
    %cst_32 = arith.constant 0.000000e+00 : f32
    %48 = vector.broadcast %cst_32 : f32 to vector<80x1xf32>
    %49 = arith.select %46, %47, %48 : vector<80x1xi1>, vector<80x1xf32>
    %50 = vector.broadcast %49 : vector<80x1xf32> to vector<80x128xf32>
    %51 = arith.mulf %40, %50 : vector<80x128xf32>
    %cst_33 = arith.constant dense<0.000000e+00> : vector<128xf32>
    %52 = vector.multi_reduction <add>, %51, %cst_33 [0] : vector<80x128xf32> to vector<128xf32>
    %53 = vector.shape_cast %52 : vector<128xf32> to vector<1x128xf32>
    %54 = arith.mulf %51, %51 : vector<80x128xf32>
    %cst_34 = arith.constant dense<0.000000e+00> : vector<128xf32>
    %55 = vector.multi_reduction <add>, %54, %cst_34 [0] : vector<80x128xf32> to vector<128xf32>
    %56 = vector.shape_cast %55 : vector<128xf32> to vector<1x128xf32>
    %57 = tpu.concatenate %53, %56 in 0 : vector<1x128xf32>, vector<1x128xf32> -> vector<2x128xf32>
    %c0_35 = arith.constant 0 : index
    %c0_36 = arith.constant 0 : index
    %c0_37 = arith.constant 0 : index
    %c0_38 = arith.constant 0 : index
    %58 = vector.load %arg7[%c0_35, %c0_36, %c0_37, %c0_38] : memref<1x1x2x128xf32, #tpu.memory_space<vmem>>, vector<1x1x2x128xf32>
    %59 = vector.shape_cast %58 : vector<1x1x2x128xf32> to vector<2x128xf32>
    %60 = vector.shape_cast %57 : vector<2x128xf32> to vector<1x1x2x128xf32>
    tpu.vector_store %arg7[%c0_35, %c0_36, %c0_37, %c0_38], %60 {strides = array<i32>} : memref<1x1x2x128xf32, #tpu.memory_space<vmem>>, vector<1x1x2x128xf32>,
    %61 = vector.extract_strided_slice %40 {offsets = [0, 0], sizes = [80, 32], strides = [1, 1]} : vector<80x128xf32> to vector<80x32xf32>
    %62 = arith.truncf %61 : vector<80x32xf32> to vector<80x32xbf16>
    %c0_39 = arith.constant 0 : index
    %c0_40 = arith.constant 0 : index
    %c0_41 = arith.constant 0 : index
    %63 = vector.load %arg6[%c0_39, %c0_40, %c0_41] : memref<1x80x32xbf16, #tpu.memory_space<vmem>>, vector<1x80x32xbf16>
    %64 = vector.shape_cast %63 : vector<1x80x32xbf16> to vector<80x32xbf16>
    %65 = vector.shape_cast %62 : vector<80x32xbf16> to vector<1x80x32xbf16>
    tpu.vector_store %arg6[%c0_39, %c0_40, %c0_41], %65 {strides = array<i32>} : memref<1x80x32xbf16, #tpu.memory_space<vmem>>, vector<1x80x32xbf16>,
    return
  }
  func.func @transform_0(%arg0: i32, %arg1: i32) -> (i32, i32, i32, i32) {
    %c0_i32 = arith.constant 0 : i32
    %c0_i32_0 = arith.constant 0 : i32
    %c0_i32_1 = arith.constant 0 : i32
    %c0_i32_2 = arith.constant 0 : i32
    return %arg0, %c0_i32, %c0_i32_0, %c0_i32_1 : i32, i32, i32, i32
  }
  func.func @transform_1(%arg0: i32, %arg1: i32) -> (i32, i32, i32) {
    %c0_i32 = arith.constant 0 : i32
    %c0_i32_0 = arith.constant 0 : i32
    %c0_i32_1 = arith.constant 0 : i32
    %c0_i32_2 = arith.constant 0 : i32
    return %c0_i32, %c0_i32_0, %c0_i32_1 : i32, i32, i32
  }
  func.func @transform_2(%arg0: i32, %arg1: i32) -> (i32, i32) {
    %c0_i32 = arith.constant 0 : i32
    %c0_i32_0 = arith.constant 0 : i32
    %c0_i32_1 = arith.constant 0 : i32
    return %c0_i32, %c0_i32_0 : i32, i32
  }
  func.func @transform_3(%arg0: i32, %arg1: i32) -> (i32, i32) {
    %c0_i32 = arith.constant 0 : i32
    %c0_i32_0 = arith.constant 0 : i32
    %c0_i32_1 = arith.constant 0 : i32
    return %c0_i32, %c0_i32_0 : i32, i32
  }
  func.func @transform_4(%arg0: i32, %arg1: i32) -> (i32, i32, i32) {
    %c0_i32 = arith.constant 0 : i32
    %c0_i32_0 = arith.constant 0 : i32
    return %arg0, %arg1, %c0_i32 : i32, i32, i32
  }
  func.func @transform_5(%arg0: i32, %arg1: i32) -> (i32, i32, i32, i32) {
    %c0_i32 = arith.constant 0 : i32
    %c0_i32_0 = arith.constant 0 : i32
    %c0_i32_1 = arith.constant 0 : i32
    return %arg0, %arg1, %c0_i32, %c0_i32_0 : i32, i32, i32, i32
  }
}

module attributes {stable_mosaic.version = 11 : i64} {
  func.func @_conv_kernel(%arg0: i32, %arg1: i32, %arg2: memref<1x5x17x128xbf16, #tpu.memory_space<vmem>>, %arg3: memref<4x128x128xbf16, #tpu.memory_space<vmem>>, %arg4: memref<1x128xf32, #tpu.memory_space<vmem>>, %arg5: memref<48x1xf32, #tpu.memory_space<vmem>>, %arg6: memref<1x48x64xbf16, #tpu.memory_space<vmem>>, %arg7: memref<1x1x2x128xf32, #tpu.memory_space<vmem>>) attributes {dimension_semantics = [#tpu.dimension_semantics<parallel>, #tpu.dimension_semantics<parallel>], iteration_bounds = array<i64: 2, 1>, scalar_prefetch = 0 : i64, scratch_operands = 0 : i64, tpu.core_type = #tpu.core_type<tc>, window_params = [{transform_indices = @transform_0, window_bounds = array<i64: 1, 5, 17, 128>}, {pipeline_mode = #tpu.pipeline_mode<synchronous>, transform_indices = @transform_1, window_bounds = array<i64: 4, 128, 128>}, {pipeline_mode = #tpu.pipeline_mode<synchronous>, transform_indices = @transform_2, window_bounds = array<i64: 1, 128>}, {pipeline_mode = #tpu.pipeline_mode<synchronous>, transform_indices = @transform_3, window_bounds = array<i64: 48, 1>}, {transform_indices = @transform_4, window_bounds = array<i64: 1, 48, 64>}, {transform_indices = @transform_5, window_bounds = array<i64: 1, 1, 2, 128>}]} {
    %c3_i32 = arith.constant 3 : i32
    %0 = arith.muli %arg1, %c3_i32 : i32
    %cst = arith.constant 0.000000e+00 : f32
    %1 = vector.broadcast %cst : f32 to vector<48x128xf32>
    %c0_i32 = arith.constant 0 : i32
    %2 = arith.addi %0, %c0_i32 : i32
    %c0 = arith.constant 0 : index
    %3 = arith.index_cast %2 : i32 to index
    %c0_0 = arith.constant 0 : index
    %c0_1 = arith.constant 0 : index
    %4 = vector.load %arg2[%c0, %3, %c0_0, %c0_1] : memref<1x5x17x128xbf16, #tpu.memory_space<vmem>>, vector<1x3x16x128xbf16>
    %5 = vector.shape_cast %4 : vector<1x3x16x128xbf16> to vector<3x16x128xbf16>
    %6 = vector.shape_cast %5 : vector<3x16x128xbf16> to vector<48x128xbf16>
    %c0_2 = arith.constant 0 : index
    %c0_3 = arith.constant 0 : index
    %c0_4 = arith.constant 0 : index
    %7 = vector.load %arg3[%c0_2, %c0_3, %c0_4] : memref<4x128x128xbf16, #tpu.memory_space<vmem>>, vector<1x128x128xbf16>
    %8 = vector.shape_cast %7 : vector<1x128x128xbf16> to vector<128x128xbf16>
    %cst_5 = arith.constant dense<0.000000e+00> : vector<48x128xf32>
    %9 = tpu.matmul %6, %8, %cst_5 {dimension_numbers = #tpu.dot_dimension_numbers<[1], [0], [0], [1], [0, 0, 1, 1], [], []>} : vector<48x128xbf16>, vector<128x128xbf16>, vector<48x128xf32> -> vector<48x128xf32>
    %10 = arith.addf %1, %9 : vector<48x128xf32>
    %c0_i32_6 = arith.constant 0 : i32
    %11 = arith.addi %0, %c0_i32_6 : i32
    %c0_7 = arith.constant 0 : index
    %12 = arith.index_cast %11 : i32 to index
    %c1 = arith.constant 1 : index
    %c0_8 = arith.constant 0 : index
    %13 = vector.load %arg2[%c0_7, %12, %c1, %c0_8] : memref<1x5x17x128xbf16, #tpu.memory_space<vmem>>, vector<1x3x16x128xbf16>
    %14 = vector.shape_cast %13 : vector<1x3x16x128xbf16> to vector<3x16x128xbf16>
    %15 = vector.shape_cast %14 : vector<3x16x128xbf16> to vector<48x128xbf16>
    %c1_9 = arith.constant 1 : index
    %c0_10 = arith.constant 0 : index
    %c0_11 = arith.constant 0 : index
    %16 = vector.load %arg3[%c1_9, %c0_10, %c0_11] : memref<4x128x128xbf16, #tpu.memory_space<vmem>>, vector<1x128x128xbf16>
    %17 = vector.shape_cast %16 : vector<1x128x128xbf16> to vector<128x128xbf16>
    %cst_12 = arith.constant dense<0.000000e+00> : vector<48x128xf32>
    %18 = tpu.matmul %15, %17, %cst_12 {dimension_numbers = #tpu.dot_dimension_numbers<[1], [0], [0], [1], [0, 0, 1, 1], [], []>} : vector<48x128xbf16>, vector<128x128xbf16>, vector<48x128xf32> -> vector<48x128xf32>
    %19 = arith.addf %10, %18 : vector<48x128xf32>
    %c1_i32 = arith.constant 1 : i32
    %20 = arith.addi %0, %c1_i32 : i32
    %c0_13 = arith.constant 0 : index
    %21 = arith.index_cast %20 : i32 to index
    %c0_14 = arith.constant 0 : index
    %c0_15 = arith.constant 0 : index
    %22 = vector.load %arg2[%c0_13, %21, %c0_14, %c0_15] : memref<1x5x17x128xbf16, #tpu.memory_space<vmem>>, vector<1x3x16x128xbf16>
    %23 = vector.shape_cast %22 : vector<1x3x16x128xbf16> to vector<3x16x128xbf16>
    %24 = vector.shape_cast %23 : vector<3x16x128xbf16> to vector<48x128xbf16>
    %c2 = arith.constant 2 : index
    %c0_16 = arith.constant 0 : index
    %c0_17 = arith.constant 0 : index
    %25 = vector.load %arg3[%c2, %c0_16, %c0_17] : memref<4x128x128xbf16, #tpu.memory_space<vmem>>, vector<1x128x128xbf16>
    %26 = vector.shape_cast %25 : vector<1x128x128xbf16> to vector<128x128xbf16>
    %cst_18 = arith.constant dense<0.000000e+00> : vector<48x128xf32>
    %27 = tpu.matmul %24, %26, %cst_18 {dimension_numbers = #tpu.dot_dimension_numbers<[1], [0], [0], [1], [0, 0, 1, 1], [], []>} : vector<48x128xbf16>, vector<128x128xbf16>, vector<48x128xf32> -> vector<48x128xf32>
    %28 = arith.addf %19, %27 : vector<48x128xf32>
    %c1_i32_19 = arith.constant 1 : i32
    %29 = arith.addi %0, %c1_i32_19 : i32
    %c0_20 = arith.constant 0 : index
    %30 = arith.index_cast %29 : i32 to index
    %c1_21 = arith.constant 1 : index
    %c0_22 = arith.constant 0 : index
    %31 = vector.load %arg2[%c0_20, %30, %c1_21, %c0_22] : memref<1x5x17x128xbf16, #tpu.memory_space<vmem>>, vector<1x3x16x128xbf16>
    %32 = vector.shape_cast %31 : vector<1x3x16x128xbf16> to vector<3x16x128xbf16>
    %33 = vector.shape_cast %32 : vector<3x16x128xbf16> to vector<48x128xbf16>
    %c3 = arith.constant 3 : index
    %c0_23 = arith.constant 0 : index
    %c0_24 = arith.constant 0 : index
    %34 = vector.load %arg3[%c3, %c0_23, %c0_24] : memref<4x128x128xbf16, #tpu.memory_space<vmem>>, vector<1x128x128xbf16>
    %35 = vector.shape_cast %34 : vector<1x128x128xbf16> to vector<128x128xbf16>
    %cst_25 = arith.constant dense<0.000000e+00> : vector<48x128xf32>
    %36 = tpu.matmul %33, %35, %cst_25 {dimension_numbers = #tpu.dot_dimension_numbers<[1], [0], [0], [1], [0, 0, 1, 1], [], []>} : vector<48x128xbf16>, vector<128x128xbf16>, vector<48x128xf32> -> vector<48x128xf32>
    %37 = arith.addf %28, %36 : vector<48x128xf32>
    %c0_26 = arith.constant 0 : index
    %c0_27 = arith.constant 0 : index
    %38 = vector.load %arg4[%c0_26, %c0_27] : memref<1x128xf32, #tpu.memory_space<vmem>>, vector<1x128xf32>
    %39 = vector.broadcast %38 : vector<1x128xf32> to vector<48x128xf32>
    %40 = arith.addf %37, %39 : vector<48x128xf32>
    %c3_i32_28 = arith.constant 3 : i32
    %41 = arith.subi %c3_i32_28, %0 : i32
    %c3_i32_29 = arith.constant 3 : i32
    %42 = arith.minsi %c3_i32_29, %41 : i32
    %43 = tpu.iota {dimensions = array<i32: 0>} : vector<48x1xi32>
    %c16_i32 = arith.constant 16 : i32
    %44 = arith.muli %42, %c16_i32 : i32
    %45 = vector.broadcast %44 : i32 to vector<48x1xi32>
    %46 = arith.cmpi slt, %43, %45 : vector<48x1xi32>
    %c0_30 = arith.constant 0 : index
    %c0_31 = arith.constant 0 : index
    %47 = vector.load %arg5[%c0_30, %c0_31] : memref<48x1xf32, #tpu.memory_space<vmem>>, vector<48x1xf32>
    %cst_32 = arith.constant 0.000000e+00 : f32
    %48 = vector.broadcast %cst_32 : f32 to vector<48x1xf32>
    %49 = arith.select %46, %47, %48 : vector<48x1xi1>, vector<48x1xf32>
    %50 = vector.broadcast %49 : vector<48x1xf32> to vector<48x128xf32>
    %51 = arith.mulf %40, %50 : vector<48x128xf32>
    %cst_33 = arith.constant dense<0.000000e+00> : vector<128xf32>
    %52 = vector.multi_reduction <add>, %51, %cst_33 [0] : vector<48x128xf32> to vector<128xf32>
    %53 = vector.shape_cast %52 : vector<128xf32> to vector<1x128xf32>
    %54 = arith.mulf %51, %51 : vector<48x128xf32>
    %cst_34 = arith.constant dense<0.000000e+00> : vector<128xf32>
    %55 = vector.multi_reduction <add>, %54, %cst_34 [0] : vector<48x128xf32> to vector<128xf32>
    %56 = vector.shape_cast %55 : vector<128xf32> to vector<1x128xf32>
    %57 = tpu.concatenate %53, %56 in 0 : vector<1x128xf32>, vector<1x128xf32> -> vector<2x128xf32>
    %c0_35 = arith.constant 0 : index
    %c0_36 = arith.constant 0 : index
    %c0_37 = arith.constant 0 : index
    %c0_38 = arith.constant 0 : index
    %58 = vector.load %arg7[%c0_35, %c0_36, %c0_37, %c0_38] : memref<1x1x2x128xf32, #tpu.memory_space<vmem>>, vector<1x1x2x128xf32>
    %59 = vector.shape_cast %58 : vector<1x1x2x128xf32> to vector<2x128xf32>
    %60 = vector.shape_cast %57 : vector<2x128xf32> to vector<1x1x2x128xf32>
    tpu.vector_store %arg7[%c0_35, %c0_36, %c0_37, %c0_38], %60 {strides = array<i32>} : memref<1x1x2x128xf32, #tpu.memory_space<vmem>>, vector<1x1x2x128xf32>,
    %61 = vector.extract_strided_slice %40 {offsets = [0, 0], sizes = [48, 64], strides = [1, 1]} : vector<48x128xf32> to vector<48x64xf32>
    %62 = arith.truncf %61 : vector<48x64xf32> to vector<48x64xbf16>
    %c0_39 = arith.constant 0 : index
    %c0_40 = arith.constant 0 : index
    %c0_41 = arith.constant 0 : index
    %63 = vector.load %arg6[%c0_39, %c0_40, %c0_41] : memref<1x48x64xbf16, #tpu.memory_space<vmem>>, vector<1x48x64xbf16>
    %64 = vector.shape_cast %63 : vector<1x48x64xbf16> to vector<48x64xbf16>
    %65 = vector.shape_cast %62 : vector<48x64xbf16> to vector<1x48x64xbf16>
    tpu.vector_store %arg6[%c0_39, %c0_40, %c0_41], %65 {strides = array<i32>} : memref<1x48x64xbf16, #tpu.memory_space<vmem>>, vector<1x48x64xbf16>,
    return
  }
  func.func @transform_0(%arg0: i32, %arg1: i32) -> (i32, i32, i32, i32) {
    %c0_i32 = arith.constant 0 : i32
    %c0_i32_0 = arith.constant 0 : i32
    %c0_i32_1 = arith.constant 0 : i32
    %c0_i32_2 = arith.constant 0 : i32
    return %arg0, %c0_i32, %c0_i32_0, %c0_i32_1 : i32, i32, i32, i32
  }
  func.func @transform_1(%arg0: i32, %arg1: i32) -> (i32, i32, i32) {
    %c0_i32 = arith.constant 0 : i32
    %c0_i32_0 = arith.constant 0 : i32
    %c0_i32_1 = arith.constant 0 : i32
    %c0_i32_2 = arith.constant 0 : i32
    return %c0_i32, %c0_i32_0, %c0_i32_1 : i32, i32, i32
  }
  func.func @transform_2(%arg0: i32, %arg1: i32) -> (i32, i32) {
    %c0_i32 = arith.constant 0 : i32
    %c0_i32_0 = arith.constant 0 : i32
    %c0_i32_1 = arith.constant 0 : i32
    return %c0_i32, %c0_i32_0 : i32, i32
  }
  func.func @transform_3(%arg0: i32, %arg1: i32) -> (i32, i32) {
    %c0_i32 = arith.constant 0 : i32
    %c0_i32_0 = arith.constant 0 : i32
    %c0_i32_1 = arith.constant 0 : i32
    return %c0_i32, %c0_i32_0 : i32, i32
  }
  func.func @transform_4(%arg0: i32, %arg1: i32) -> (i32, i32, i32) {
    %c0_i32 = arith.constant 0 : i32
    %c0_i32_0 = arith.constant 0 : i32
    return %arg0, %arg1, %c0_i32 : i32, i32, i32
  }
  func.func @transform_5(%arg0: i32, %arg1: i32) -> (i32, i32, i32, i32) {
    %c0_i32 = arith.constant 0 : i32
    %c0_i32_0 = arith.constant 0 : i32
    %c0_i32_1 = arith.constant 0 : i32
    return %arg0, %arg1, %c0_i32, %c0_i32_0 : i32, i32, i32, i32
  }
}

module attributes {stable_mosaic.version = 11 : i64} {
  func.func @_conv_kernel(%arg0: i32, %arg1: i32, %arg2: memref<1x7x19x64xbf16, #tpu.memory_space<vmem>>, %arg3: memref<16x64x128xbf16, #tpu.memory_space<vmem>>, %arg4: memref<1x128xf32, #tpu.memory_space<vmem>>, %arg5: memref<64x1xf32, #tpu.memory_space<vmem>>, %arg6: memref<1x64x128xbf16, #tpu.memory_space<vmem>>, %arg7: memref<1x1x2x128xf32, #tpu.memory_space<vmem>>) attributes {dimension_semantics = [#tpu.dimension_semantics<parallel>, #tpu.dimension_semantics<parallel>], iteration_bounds = array<i64: 2, 1>, scalar_prefetch = 0 : i64, scratch_operands = 0 : i64, tpu.core_type = #tpu.core_type<tc>, window_params = [{transform_indices = @transform_0, window_bounds = array<i64: 1, 7, 19, 64>}, {pipeline_mode = #tpu.pipeline_mode<synchronous>, transform_indices = @transform_1, window_bounds = array<i64: 16, 64, 128>}, {pipeline_mode = #tpu.pipeline_mode<synchronous>, transform_indices = @transform_2, window_bounds = array<i64: 1, 128>}, {pipeline_mode = #tpu.pipeline_mode<synchronous>, transform_indices = @transform_3, window_bounds = array<i64: 64, 1>}, {transform_indices = @transform_4, window_bounds = array<i64: 1, 64, 128>}, {transform_indices = @transform_5, window_bounds = array<i64: 1, 1, 2, 128>}]} {
    %c4_i32 = arith.constant 4 : i32
    %0 = arith.muli %arg1, %c4_i32 : i32
    %cst = arith.constant 0.000000e+00 : f32
    %1 = vector.broadcast %cst : f32 to vector<64x128xf32>
    %c0_i32 = arith.constant 0 : i32
    %2 = arith.addi %0, %c0_i32 : i32
    %c0 = arith.constant 0 : index
    %3 = arith.index_cast %2 : i32 to index
    %c0_0 = arith.constant 0 : index
    %c0_1 = arith.constant 0 : index
    %4 = vector.load %arg2[%c0, %3, %c0_0, %c0_1] : memref<1x7x19x64xbf16, #tpu.memory_space<vmem>>, vector<1x4x16x64xbf16>
    %5 = vector.shape_cast %4 : vector<1x4x16x64xbf16> to vector<4x16x64xbf16>
    %6 = vector.shape_cast %5 : vector<4x16x64xbf16> to vector<64x64xbf16>
    %c0_2 = arith.constant 0 : index
    %c0_3 = arith.constant 0 : index
    %c0_4 = arith.constant 0 : index
    %7 = vector.load %arg3[%c0_2, %c0_3, %c0_4] : memref<16x64x128xbf16, #tpu.memory_space<vmem>>, vector<1x64x128xbf16>
    %8 = vector.shape_cast %7 : vector<1x64x128xbf16> to vector<64x128xbf16>
    %cst_5 = arith.constant dense<0.000000e+00> : vector<64x128xf32>
    %9 = tpu.matmul %6, %8, %cst_5 {dimension_numbers = #tpu.dot_dimension_numbers<[1], [0], [0], [1], [0, 0, 1, 1], [], []>} : vector<64x64xbf16>, vector<64x128xbf16>, vector<64x128xf32> -> vector<64x128xf32>
    %10 = arith.addf %1, %9 : vector<64x128xf32>
    %c0_i32_6 = arith.constant 0 : i32
    %11 = arith.addi %0, %c0_i32_6 : i32
    %c0_7 = arith.constant 0 : index
    %12 = arith.index_cast %11 : i32 to index
    %c1 = arith.constant 1 : index
    %c0_8 = arith.constant 0 : index
    %13 = vector.load %arg2[%c0_7, %12, %c1, %c0_8] : memref<1x7x19x64xbf16, #tpu.memory_space<vmem>>, vector<1x4x16x64xbf16>
    %14 = vector.shape_cast %13 : vector<1x4x16x64xbf16> to vector<4x16x64xbf16>
    %15 = vector.shape_cast %14 : vector<4x16x64xbf16> to vector<64x64xbf16>
    %c1_9 = arith.constant 1 : index
    %c0_10 = arith.constant 0 : index
    %c0_11 = arith.constant 0 : index
    %16 = vector.load %arg3[%c1_9, %c0_10, %c0_11] : memref<16x64x128xbf16, #tpu.memory_space<vmem>>, vector<1x64x128xbf16>
    %17 = vector.shape_cast %16 : vector<1x64x128xbf16> to vector<64x128xbf16>
    %cst_12 = arith.constant dense<0.000000e+00> : vector<64x128xf32>
    %18 = tpu.matmul %15, %17, %cst_12 {dimension_numbers = #tpu.dot_dimension_numbers<[1], [0], [0], [1], [0, 0, 1, 1], [], []>} : vector<64x64xbf16>, vector<64x128xbf16>, vector<64x128xf32> -> vector<64x128xf32>
    %19 = arith.addf %10, %18 : vector<64x128xf32>
    %c0_i32_13 = arith.constant 0 : i32
    %20 = arith.addi %0, %c0_i32_13 : i32
    %c0_14 = arith.constant 0 : index
    %21 = arith.index_cast %20 : i32 to index
    %c2 = arith.constant 2 : index
    %c0_15 = arith.constant 0 : index
    %22 = vector.load %arg2[%c0_14, %21, %c2, %c0_15] : memref<1x7x19x64xbf16, #tpu.memory_space<vmem>>, vector<1x4x16x64xbf16>
    %23 = vector.shape_cast %22 : vector<1x4x16x64xbf16> to vector<4x16x64xbf16>
    %24 = vector.shape_cast %23 : vector<4x16x64xbf16> to vector<64x64xbf16>
    %c2_16 = arith.constant 2 : index
    %c0_17 = arith.constant 0 : index
    %c0_18 = arith.constant 0 : index
    %25 = vector.load %arg3[%c2_16, %c0_17, %c0_18] : memref<16x64x128xbf16, #tpu.memory_space<vmem>>, vector<1x64x128xbf16>
    %26 = vector.shape_cast %25 : vector<1x64x128xbf16> to vector<64x128xbf16>
    %cst_19 = arith.constant dense<0.000000e+00> : vector<64x128xf32>
    %27 = tpu.matmul %24, %26, %cst_19 {dimension_numbers = #tpu.dot_dimension_numbers<[1], [0], [0], [1], [0, 0, 1, 1], [], []>} : vector<64x64xbf16>, vector<64x128xbf16>, vector<64x128xf32> -> vector<64x128xf32>
    %28 = arith.addf %19, %27 : vector<64x128xf32>
    %c0_i32_20 = arith.constant 0 : i32
    %29 = arith.addi %0, %c0_i32_20 : i32
    %c0_21 = arith.constant 0 : index
    %30 = arith.index_cast %29 : i32 to index
    %c3 = arith.constant 3 : index
    %c0_22 = arith.constant 0 : index
    %31 = vector.load %arg2[%c0_21, %30, %c3, %c0_22] : memref<1x7x19x64xbf16, #tpu.memory_space<vmem>>, vector<1x4x16x64xbf16>
    %32 = vector.shape_cast %31 : vector<1x4x16x64xbf16> to vector<4x16x64xbf16>
    %33 = vector.shape_cast %32 : vector<4x16x64xbf16> to vector<64x64xbf16>
    %c3_23 = arith.constant 3 : index
    %c0_24 = arith.constant 0 : index
    %c0_25 = arith.constant 0 : index
    %34 = vector.load %arg3[%c3_23, %c0_24, %c0_25] : memref<16x64x128xbf16, #tpu.memory_space<vmem>>, vector<1x64x128xbf16>
    %35 = vector.shape_cast %34 : vector<1x64x128xbf16> to vector<64x128xbf16>
    %cst_26 = arith.constant dense<0.000000e+00> : vector<64x128xf32>
    %36 = tpu.matmul %33, %35, %cst_26 {dimension_numbers = #tpu.dot_dimension_numbers<[1], [0], [0], [1], [0, 0, 1, 1], [], []>} : vector<64x64xbf16>, vector<64x128xbf16>, vector<64x128xf32> -> vector<64x128xf32>
    %37 = arith.addf %28, %36 : vector<64x128xf32>
    %c1_i32 = arith.constant 1 : i32
    %38 = arith.addi %0, %c1_i32 : i32
    %c0_27 = arith.constant 0 : index
    %39 = arith.index_cast %38 : i32 to index
    %c0_28 = arith.constant 0 : index
    %c0_29 = arith.constant 0 : index
    %40 = vector.load %arg2[%c0_27, %39, %c0_28, %c0_29] : memref<1x7x19x64xbf16, #tpu.memory_space<vmem>>, vector<1x4x16x64xbf16>
    %41 = vector.shape_cast %40 : vector<1x4x16x64xbf16> to vector<4x16x64xbf16>
    %42 = vector.shape_cast %41 : vector<4x16x64xbf16> to vector<64x64xbf16>
    %c4 = arith.constant 4 : index
    %c0_30 = arith.constant 0 : index
    %c0_31 = arith.constant 0 : index
    %43 = vector.load %arg3[%c4, %c0_30, %c0_31] : memref<16x64x128xbf16, #tpu.memory_space<vmem>>, vector<1x64x128xbf16>
    %44 = vector.shape_cast %43 : vector<1x64x128xbf16> to vector<64x128xbf16>
    %cst_32 = arith.constant dense<0.000000e+00> : vector<64x128xf32>
    %45 = tpu.matmul %42, %44, %cst_32 {dimension_numbers = #tpu.dot_dimension_numbers<[1], [0], [0], [1], [0, 0, 1, 1], [], []>} : vector<64x64xbf16>, vector<64x128xbf16>, vector<64x128xf32> -> vector<64x128xf32>
    %46 = arith.addf %37, %45 : vector<64x128xf32>
    %c1_i32_33 = arith.constant 1 : i32
    %47 = arith.addi %0, %c1_i32_33 : i32
    %c0_34 = arith.constant 0 : index
    %48 = arith.index_cast %47 : i32 to index
    %c1_35 = arith.constant 1 : index
    %c0_36 = arith.constant 0 : index
    %49 = vector.load %arg2[%c0_34, %48, %c1_35, %c0_36] : memref<1x7x19x64xbf16, #tpu.memory_space<vmem>>, vector<1x4x16x64xbf16>
    %50 = vector.shape_cast %49 : vector<1x4x16x64xbf16> to vector<4x16x64xbf16>
    %51 = vector.shape_cast %50 : vector<4x16x64xbf16> to vector<64x64xbf16>
    %c5 = arith.constant 5 : index
    %c0_37 = arith.constant 0 : index
    %c0_38 = arith.constant 0 : index
    %52 = vector.load %arg3[%c5, %c0_37, %c0_38] : memref<16x64x128xbf16, #tpu.memory_space<vmem>>, vector<1x64x128xbf16>
    %53 = vector.shape_cast %52 : vector<1x64x128xbf16> to vector<64x128xbf16>
    %cst_39 = arith.constant dense<0.000000e+00> : vector<64x128xf32>
    %54 = tpu.matmul %51, %53, %cst_39 {dimension_numbers = #tpu.dot_dimension_numbers<[1], [0], [0], [1], [0, 0, 1, 1], [], []>} : vector<64x64xbf16>, vector<64x128xbf16>, vector<64x128xf32> -> vector<64x128xf32>
    %55 = arith.addf %46, %54 : vector<64x128xf32>
    %c1_i32_40 = arith.constant 1 : i32
    %56 = arith.addi %0, %c1_i32_40 : i32
    %c0_41 = arith.constant 0 : index
    %57 = arith.index_cast %56 : i32 to index
    %c2_42 = arith.constant 2 : index
    %c0_43 = arith.constant 0 : index
    %58 = vector.load %arg2[%c0_41, %57, %c2_42, %c0_43] : memref<1x7x19x64xbf16, #tpu.memory_space<vmem>>, vector<1x4x16x64xbf16>
    %59 = vector.shape_cast %58 : vector<1x4x16x64xbf16> to vector<4x16x64xbf16>
    %60 = vector.shape_cast %59 : vector<4x16x64xbf16> to vector<64x64xbf16>
    %c6 = arith.constant 6 : index
    %c0_44 = arith.constant 0 : index
    %c0_45 = arith.constant 0 : index
    %61 = vector.load %arg3[%c6, %c0_44, %c0_45] : memref<16x64x128xbf16, #tpu.memory_space<vmem>>, vector<1x64x128xbf16>
    %62 = vector.shape_cast %61 : vector<1x64x128xbf16> to vector<64x128xbf16>
    %cst_46 = arith.constant dense<0.000000e+00> : vector<64x128xf32>
    %63 = tpu.matmul %60, %62, %cst_46 {dimension_numbers = #tpu.dot_dimension_numbers<[1], [0], [0], [1], [0, 0, 1, 1], [], []>} : vector<64x64xbf16>, vector<64x128xbf16>, vector<64x128xf32> -> vector<64x128xf32>
    %64 = arith.addf %55, %63 : vector<64x128xf32>
    %c1_i32_47 = arith.constant 1 : i32
    %65 = arith.addi %0, %c1_i32_47 : i32
    %c0_48 = arith.constant 0 : index
    %66 = arith.index_cast %65 : i32 to index
    %c3_49 = arith.constant 3 : index
    %c0_50 = arith.constant 0 : index
    %67 = vector.load %arg2[%c0_48, %66, %c3_49, %c0_50] : memref<1x7x19x64xbf16, #tpu.memory_space<vmem>>, vector<1x4x16x64xbf16>
    %68 = vector.shape_cast %67 : vector<1x4x16x64xbf16> to vector<4x16x64xbf16>
    %69 = vector.shape_cast %68 : vector<4x16x64xbf16> to vector<64x64xbf16>
    %c7 = arith.constant 7 : index
    %c0_51 = arith.constant 0 : index
    %c0_52 = arith.constant 0 : index
    %70 = vector.load %arg3[%c7, %c0_51, %c0_52] : memref<16x64x128xbf16, #tpu.memory_space<vmem>>, vector<1x64x128xbf16>
    %71 = vector.shape_cast %70 : vector<1x64x128xbf16> to vector<64x128xbf16>
    %cst_53 = arith.constant dense<0.000000e+00> : vector<64x128xf32>
    %72 = tpu.matmul %69, %71, %cst_53 {dimension_numbers = #tpu.dot_dimension_numbers<[1], [0], [0], [1], [0, 0, 1, 1], [], []>} : vector<64x64xbf16>, vector<64x128xbf16>, vector<64x128xf32> -> vector<64x128xf32>
    %73 = arith.addf %64, %72 : vector<64x128xf32>
    %c2_i32 = arith.constant 2 : i32
    %74 = arith.addi %0, %c2_i32 : i32
    %c0_54 = arith.constant 0 : index
    %75 = arith.index_cast %74 : i32 to index
    %c0_55 = arith.constant 0 : index
    %c0_56 = arith.constant 0 : index
    %76 = vector.load %arg2[%c0_54, %75, %c0_55, %c0_56] : memref<1x7x19x64xbf16, #tpu.memory_space<vmem>>, vector<1x4x16x64xbf16>
    %77 = vector.shape_cast %76 : vector<1x4x16x64xbf16> to vector<4x16x64xbf16>
    %78 = vector.shape_cast %77 : vector<4x16x64xbf16> to vector<64x64xbf16>
    %c8 = arith.constant 8 : index
    %c0_57 = arith.constant 0 : index
    %c0_58 = arith.constant 0 : index
    %79 = vector.load %arg3[%c8, %c0_57, %c0_58] : memref<16x64x128xbf16, #tpu.memory_space<vmem>>, vector<1x64x128xbf16>
    %80 = vector.shape_cast %79 : vector<1x64x128xbf16> to vector<64x128xbf16>
    %cst_59 = arith.constant dense<0.000000e+00> : vector<64x128xf32>
    %81 = tpu.matmul %78, %80, %cst_59 {dimension_numbers = #tpu.dot_dimension_numbers<[1], [0], [0], [1], [0, 0, 1, 1], [], []>} : vector<64x64xbf16>, vector<64x128xbf16>, vector<64x128xf32> -> vector<64x128xf32>
    %82 = arith.addf %73, %81 : vector<64x128xf32>
    %c2_i32_60 = arith.constant 2 : i32
    %83 = arith.addi %0, %c2_i32_60 : i32
    %c0_61 = arith.constant 0 : index
    %84 = arith.index_cast %83 : i32 to index
    %c1_62 = arith.constant 1 : index
    %c0_63 = arith.constant 0 : index
    %85 = vector.load %arg2[%c0_61, %84, %c1_62, %c0_63] : memref<1x7x19x64xbf16, #tpu.memory_space<vmem>>, vector<1x4x16x64xbf16>
    %86 = vector.shape_cast %85 : vector<1x4x16x64xbf16> to vector<4x16x64xbf16>
    %87 = vector.shape_cast %86 : vector<4x16x64xbf16> to vector<64x64xbf16>
    %c9 = arith.constant 9 : index
    %c0_64 = arith.constant 0 : index
    %c0_65 = arith.constant 0 : index
    %88 = vector.load %arg3[%c9, %c0_64, %c0_65] : memref<16x64x128xbf16, #tpu.memory_space<vmem>>, vector<1x64x128xbf16>
    %89 = vector.shape_cast %88 : vector<1x64x128xbf16> to vector<64x128xbf16>
    %cst_66 = arith.constant dense<0.000000e+00> : vector<64x128xf32>
    %90 = tpu.matmul %87, %89, %cst_66 {dimension_numbers = #tpu.dot_dimension_numbers<[1], [0], [0], [1], [0, 0, 1, 1], [], []>} : vector<64x64xbf16>, vector<64x128xbf16>, vector<64x128xf32> -> vector<64x128xf32>
    %91 = arith.addf %82, %90 : vector<64x128xf32>
    %c2_i32_67 = arith.constant 2 : i32
    %92 = arith.addi %0, %c2_i32_67 : i32
    %c0_68 = arith.constant 0 : index
    %93 = arith.index_cast %92 : i32 to index
    %c2_69 = arith.constant 2 : index
    %c0_70 = arith.constant 0 : index
    %94 = vector.load %arg2[%c0_68, %93, %c2_69, %c0_70] : memref<1x7x19x64xbf16, #tpu.memory_space<vmem>>, vector<1x4x16x64xbf16>
    %95 = vector.shape_cast %94 : vector<1x4x16x64xbf16> to vector<4x16x64xbf16>
    %96 = vector.shape_cast %95 : vector<4x16x64xbf16> to vector<64x64xbf16>
    %c10 = arith.constant 10 : index
    %c0_71 = arith.constant 0 : index
    %c0_72 = arith.constant 0 : index
    %97 = vector.load %arg3[%c10, %c0_71, %c0_72] : memref<16x64x128xbf16, #tpu.memory_space<vmem>>, vector<1x64x128xbf16>
    %98 = vector.shape_cast %97 : vector<1x64x128xbf16> to vector<64x128xbf16>
    %cst_73 = arith.constant dense<0.000000e+00> : vector<64x128xf32>
    %99 = tpu.matmul %96, %98, %cst_73 {dimension_numbers = #tpu.dot_dimension_numbers<[1], [0], [0], [1], [0, 0, 1, 1], [], []>} : vector<64x64xbf16>, vector<64x128xbf16>, vector<64x128xf32> -> vector<64x128xf32>
    %100 = arith.addf %91, %99 : vector<64x128xf32>
    %c2_i32_74 = arith.constant 2 : i32
    %101 = arith.addi %0, %c2_i32_74 : i32
    %c0_75 = arith.constant 0 : index
    %102 = arith.index_cast %101 : i32 to index
    %c3_76 = arith.constant 3 : index
    %c0_77 = arith.constant 0 : index
    %103 = vector.load %arg2[%c0_75, %102, %c3_76, %c0_77] : memref<1x7x19x64xbf16, #tpu.memory_space<vmem>>, vector<1x4x16x64xbf16>
    %104 = vector.shape_cast %103 : vector<1x4x16x64xbf16> to vector<4x16x64xbf16>
    %105 = vector.shape_cast %104 : vector<4x16x64xbf16> to vector<64x64xbf16>
    %c11 = arith.constant 11 : index
    %c0_78 = arith.constant 0 : index
    %c0_79 = arith.constant 0 : index
    %106 = vector.load %arg3[%c11, %c0_78, %c0_79] : memref<16x64x128xbf16, #tpu.memory_space<vmem>>, vector<1x64x128xbf16>
    %107 = vector.shape_cast %106 : vector<1x64x128xbf16> to vector<64x128xbf16>
    %cst_80 = arith.constant dense<0.000000e+00> : vector<64x128xf32>
    %108 = tpu.matmul %105, %107, %cst_80 {dimension_numbers = #tpu.dot_dimension_numbers<[1], [0], [0], [1], [0, 0, 1, 1], [], []>} : vector<64x64xbf16>, vector<64x128xbf16>, vector<64x128xf32> -> vector<64x128xf32>
    %109 = arith.addf %100, %108 : vector<64x128xf32>
    %c3_i32 = arith.constant 3 : i32
    %110 = arith.addi %0, %c3_i32 : i32
    %c0_81 = arith.constant 0 : index
    %111 = arith.index_cast %110 : i32 to index
    %c0_82 = arith.constant 0 : index
    %c0_83 = arith.constant 0 : index
    %112 = vector.load %arg2[%c0_81, %111, %c0_82, %c0_83] : memref<1x7x19x64xbf16, #tpu.memory_space<vmem>>, vector<1x4x16x64xbf16>
    %113 = vector.shape_cast %112 : vector<1x4x16x64xbf16> to vector<4x16x64xbf16>
    %114 = vector.shape_cast %113 : vector<4x16x64xbf16> to vector<64x64xbf16>
    %c12 = arith.constant 12 : index
    %c0_84 = arith.constant 0 : index
    %c0_85 = arith.constant 0 : index
    %115 = vector.load %arg3[%c12, %c0_84, %c0_85] : memref<16x64x128xbf16, #tpu.memory_space<vmem>>, vector<1x64x128xbf16>
    %116 = vector.shape_cast %115 : vector<1x64x128xbf16> to vector<64x128xbf16>
    %cst_86 = arith.constant dense<0.000000e+00> : vector<64x128xf32>
    %117 = tpu.matmul %114, %116, %cst_86 {dimension_numbers = #tpu.dot_dimension_numbers<[1], [0], [0], [1], [0, 0, 1, 1], [], []>} : vector<64x64xbf16>, vector<64x128xbf16>, vector<64x128xf32> -> vector<64x128xf32>
    %118 = arith.addf %109, %117 : vector<64x128xf32>
    %c3_i32_87 = arith.constant 3 : i32
    %119 = arith.addi %0, %c3_i32_87 : i32
    %c0_88 = arith.constant 0 : index
    %120 = arith.index_cast %119 : i32 to index
    %c1_89 = arith.constant 1 : index
    %c0_90 = arith.constant 0 : index
    %121 = vector.load %arg2[%c0_88, %120, %c1_89, %c0_90] : memref<1x7x19x64xbf16, #tpu.memory_space<vmem>>, vector<1x4x16x64xbf16>
    %122 = vector.shape_cast %121 : vector<1x4x16x64xbf16> to vector<4x16x64xbf16>
    %123 = vector.shape_cast %122 : vector<4x16x64xbf16> to vector<64x64xbf16>
    %c13 = arith.constant 13 : index
    %c0_91 = arith.constant 0 : index
    %c0_92 = arith.constant 0 : index
    %124 = vector.load %arg3[%c13, %c0_91, %c0_92] : memref<16x64x128xbf16, #tpu.memory_space<vmem>>, vector<1x64x128xbf16>
    %125 = vector.shape_cast %124 : vector<1x64x128xbf16> to vector<64x128xbf16>
    %cst_93 = arith.constant dense<0.000000e+00> : vector<64x128xf32>
    %126 = tpu.matmul %123, %125, %cst_93 {dimension_numbers = #tpu.dot_dimension_numbers<[1], [0], [0], [1], [0, 0, 1, 1], [], []>} : vector<64x64xbf16>, vector<64x128xbf16>, vector<64x128xf32> -> vector<64x128xf32>
    %127 = arith.addf %118, %126 : vector<64x128xf32>
    %c3_i32_94 = arith.constant 3 : i32
    %128 = arith.addi %0, %c3_i32_94 : i32
    %c0_95 = arith.constant 0 : index
    %129 = arith.index_cast %128 : i32 to index
    %c2_96 = arith.constant 2 : index
    %c0_97 = arith.constant 0 : index
    %130 = vector.load %arg2[%c0_95, %129, %c2_96, %c0_97] : memref<1x7x19x64xbf16, #tpu.memory_space<vmem>>, vector<1x4x16x64xbf16>
    %131 = vector.shape_cast %130 : vector<1x4x16x64xbf16> to vector<4x16x64xbf16>
    %132 = vector.shape_cast %131 : vector<4x16x64xbf16> to vector<64x64xbf16>
    %c14 = arith.constant 14 : index
    %c0_98 = arith.constant 0 : index
    %c0_99 = arith.constant 0 : index
    %133 = vector.load %arg3[%c14, %c0_98, %c0_99] : memref<16x64x128xbf16, #tpu.memory_space<vmem>>, vector<1x64x128xbf16>
    %134 = vector.shape_cast %133 : vector<1x64x128xbf16> to vector<64x128xbf16>
    %cst_100 = arith.constant dense<0.000000e+00> : vector<64x128xf32>
    %135 = tpu.matmul %132, %134, %cst_100 {dimension_numbers = #tpu.dot_dimension_numbers<[1], [0], [0], [1], [0, 0, 1, 1], [], []>} : vector<64x64xbf16>, vector<64x128xbf16>, vector<64x128xf32> -> vector<64x128xf32>
    %136 = arith.addf %127, %135 : vector<64x128xf32>
    %c3_i32_101 = arith.constant 3 : i32
    %137 = arith.addi %0, %c3_i32_101 : i32
    %c0_102 = arith.constant 0 : index
    %138 = arith.index_cast %137 : i32 to index
    %c3_103 = arith.constant 3 : index
    %c0_104 = arith.constant 0 : index
    %139 = vector.load %arg2[%c0_102, %138, %c3_103, %c0_104] : memref<1x7x19x64xbf16, #tpu.memory_space<vmem>>, vector<1x4x16x64xbf16>
    %140 = vector.shape_cast %139 : vector<1x4x16x64xbf16> to vector<4x16x64xbf16>
    %141 = vector.shape_cast %140 : vector<4x16x64xbf16> to vector<64x64xbf16>
    %c15 = arith.constant 15 : index
    %c0_105 = arith.constant 0 : index
    %c0_106 = arith.constant 0 : index
    %142 = vector.load %arg3[%c15, %c0_105, %c0_106] : memref<16x64x128xbf16, #tpu.memory_space<vmem>>, vector<1x64x128xbf16>
    %143 = vector.shape_cast %142 : vector<1x64x128xbf16> to vector<64x128xbf16>
    %cst_107 = arith.constant dense<0.000000e+00> : vector<64x128xf32>
    %144 = tpu.matmul %141, %143, %cst_107 {dimension_numbers = #tpu.dot_dimension_numbers<[1], [0], [0], [1], [0, 0, 1, 1], [], []>} : vector<64x64xbf16>, vector<64x128xbf16>, vector<64x128xf32> -> vector<64x128xf32>
    %145 = arith.addf %136, %144 : vector<64x128xf32>
    %c0_108 = arith.constant 0 : index
    %c0_109 = arith.constant 0 : index
    %146 = vector.load %arg4[%c0_108, %c0_109] : memref<1x128xf32, #tpu.memory_space<vmem>>, vector<1x128xf32>
    %147 = vector.broadcast %146 : vector<1x128xf32> to vector<64x128xf32>
    %148 = arith.addf %145, %147 : vector<64x128xf32>
    %c4_i32_110 = arith.constant 4 : i32
    %149 = arith.subi %c4_i32_110, %0 : i32
    %c4_i32_111 = arith.constant 4 : i32
    %150 = arith.minsi %c4_i32_111, %149 : i32
    %151 = tpu.iota {dimensions = array<i32: 0>} : vector<64x1xi32>
    %c16_i32 = arith.constant 16 : i32
    %152 = arith.muli %150, %c16_i32 : i32
    %153 = vector.broadcast %152 : i32 to vector<64x1xi32>
    %154 = arith.cmpi slt, %151, %153 : vector<64x1xi32>
    %c0_112 = arith.constant 0 : index
    %c0_113 = arith.constant 0 : index
    %155 = vector.load %arg5[%c0_112, %c0_113] : memref<64x1xf32, #tpu.memory_space<vmem>>, vector<64x1xf32>
    %cst_114 = arith.constant 0.000000e+00 : f32
    %156 = vector.broadcast %cst_114 : f32 to vector<64x1xf32>
    %157 = arith.select %154, %155, %156 : vector<64x1xi1>, vector<64x1xf32>
    %158 = vector.broadcast %157 : vector<64x1xf32> to vector<64x128xf32>
    %159 = arith.mulf %148, %158 : vector<64x128xf32>
    %cst_115 = arith.constant dense<0.000000e+00> : vector<128xf32>
    %160 = vector.multi_reduction <add>, %159, %cst_115 [0] : vector<64x128xf32> to vector<128xf32>
    %161 = vector.shape_cast %160 : vector<128xf32> to vector<1x128xf32>
    %162 = arith.mulf %159, %159 : vector<64x128xf32>
    %cst_116 = arith.constant dense<0.000000e+00> : vector<128xf32>
    %163 = vector.multi_reduction <add>, %162, %cst_116 [0] : vector<64x128xf32> to vector<128xf32>
    %164 = vector.shape_cast %163 : vector<128xf32> to vector<1x128xf32>
    %165 = tpu.concatenate %161, %164 in 0 : vector<1x128xf32>, vector<1x128xf32> -> vector<2x128xf32>
    %c0_117 = arith.constant 0 : index
    %c0_118 = arith.constant 0 : index
    %c0_119 = arith.constant 0 : index
    %c0_120 = arith.constant 0 : index
    %166 = vector.load %arg7[%c0_117, %c0_118, %c0_119, %c0_120] : memref<1x1x2x128xf32, #tpu.memory_space<vmem>>, vector<1x1x2x128xf32>
    %167 = vector.shape_cast %166 : vector<1x1x2x128xf32> to vector<2x128xf32>
    %168 = vector.shape_cast %165 : vector<2x128xf32> to vector<1x1x2x128xf32>
    tpu.vector_store %arg7[%c0_117, %c0_118, %c0_119, %c0_120], %168 {strides = array<i32>} : memref<1x1x2x128xf32, #tpu.memory_space<vmem>>, vector<1x1x2x128xf32>,
    %169 = arith.truncf %148 : vector<64x128xf32> to vector<64x128xbf16>
    %c0_121 = arith.constant 0 : index
    %c0_122 = arith.constant 0 : index
    %c0_123 = arith.constant 0 : index
    %170 = vector.load %arg6[%c0_121, %c0_122, %c0_123] : memref<1x64x128xbf16, #tpu.memory_space<vmem>>, vector<1x64x128xbf16>
    %171 = vector.shape_cast %170 : vector<1x64x128xbf16> to vector<64x128xbf16>
    %172 = vector.shape_cast %169 : vector<64x128xbf16> to vector<1x64x128xbf16>
    tpu.vector_store %arg6[%c0_121, %c0_122, %c0_123], %172 {strides = array<i32>} : memref<1x64x128xbf16, #tpu.memory_space<vmem>>, vector<1x64x128xbf16>,
    return
  }
  func.func @transform_0(%arg0: i32, %arg1: i32) -> (i32, i32, i32, i32) {
    %c0_i32 = arith.constant 0 : i32
    %c0_i32_0 = arith.constant 0 : i32
    %c0_i32_1 = arith.constant 0 : i32
    %c0_i32_2 = arith.constant 0 : i32
    return %arg0, %c0_i32, %c0_i32_0, %c0_i32_1 : i32, i32, i32, i32
  }
  func.func @transform_1(%arg0: i32, %arg1: i32) -> (i32, i32, i32) {
    %c0_i32 = arith.constant 0 : i32
    %c0_i32_0 = arith.constant 0 : i32
    %c0_i32_1 = arith.constant 0 : i32
    %c0_i32_2 = arith.constant 0 : i32
    return %c0_i32, %c0_i32_0, %c0_i32_1 : i32, i32, i32
  }
  func.func @transform_2(%arg0: i32, %arg1: i32) -> (i32, i32) {
    %c0_i32 = arith.constant 0 : i32
    %c0_i32_0 = arith.constant 0 : i32
    %c0_i32_1 = arith.constant 0 : i32
    return %c0_i32, %c0_i32_0 : i32, i32
  }
  func.func @transform_3(%arg0: i32, %arg1: i32) -> (i32, i32) {
    %c0_i32 = arith.constant 0 : i32
    %c0_i32_0 = arith.constant 0 : i32
    %c0_i32_1 = arith.constant 0 : i32
    return %c0_i32, %c0_i32_0 : i32, i32
  }
  func.func @transform_4(%arg0: i32, %arg1: i32) -> (i32, i32, i32) {
    %c0_i32 = arith.constant 0 : i32
    %c0_i32_0 = arith.constant 0 : i32
    return %arg0, %arg1, %c0_i32 : i32, i32, i32
  }
  func.func @transform_5(%arg0: i32, %arg1: i32) -> (i32, i32, i32, i32) {
    %c0_i32 = arith.constant 0 : i32
    %c0_i32_0 = arith.constant 0 : i32
    %c0_i32_1 = arith.constant 0 : i32
    return %arg0, %arg1, %c0_i32, %c0_i32_0 : i32, i32, i32, i32
  }
}

module attributes {stable_mosaic.version = 11 : i64} {
  func.func @_conv_kernel(%arg0: i32, %arg1: i32, %arg2: memref<1x8x19x128xbf16, #tpu.memory_space<vmem>>, %arg3: memref<16x128x128xbf16, #tpu.memory_space<vmem>>, %arg4: memref<1x128xf32, #tpu.memory_space<vmem>>, %arg5: memref<80x1xf32, #tpu.memory_space<vmem>>, %arg6: memref<1x80x1xf32, #tpu.memory_space<vmem>>) attributes {dimension_semantics = [#tpu.dimension_semantics<parallel>, #tpu.dimension_semantics<parallel>], iteration_bounds = array<i64: 2, 1>, scalar_prefetch = 0 : i64, scratch_operands = 0 : i64, tpu.core_type = #tpu.core_type<tc>, window_params = [{transform_indices = @transform_0, window_bounds = array<i64: 1, 8, 19, 128>}, {pipeline_mode = #tpu.pipeline_mode<synchronous>, transform_indices = @transform_1, window_bounds = array<i64: 16, 128, 128>}, {pipeline_mode = #tpu.pipeline_mode<synchronous>, transform_indices = @transform_2, window_bounds = array<i64: 1, 128>}, {pipeline_mode = #tpu.pipeline_mode<synchronous>, transform_indices = @transform_3, window_bounds = array<i64: 80, 1>}, {transform_indices = @transform_4, window_bounds = array<i64: 1, 80, 1>}]} {
    %c5_i32 = arith.constant 5 : i32
    %0 = arith.muli %arg1, %c5_i32 : i32
    %cst = arith.constant 0.000000e+00 : f32
    %1 = vector.broadcast %cst : f32 to vector<80x128xf32>
    %c0_i32 = arith.constant 0 : i32
    %2 = arith.addi %0, %c0_i32 : i32
    %c0 = arith.constant 0 : index
    %3 = arith.index_cast %2 : i32 to index
    %c0_0 = arith.constant 0 : index
    %c0_1 = arith.constant 0 : index
    %4 = vector.load %arg2[%c0, %3, %c0_0, %c0_1] : memref<1x8x19x128xbf16, #tpu.memory_space<vmem>>, vector<1x5x16x128xbf16>
    %5 = vector.shape_cast %4 : vector<1x5x16x128xbf16> to vector<5x16x128xbf16>
    %6 = vector.shape_cast %5 : vector<5x16x128xbf16> to vector<80x128xbf16>
    %c0_2 = arith.constant 0 : index
    %c0_3 = arith.constant 0 : index
    %c0_4 = arith.constant 0 : index
    %7 = vector.load %arg3[%c0_2, %c0_3, %c0_4] : memref<16x128x128xbf16, #tpu.memory_space<vmem>>, vector<1x128x128xbf16>
    %8 = vector.shape_cast %7 : vector<1x128x128xbf16> to vector<128x128xbf16>
    %cst_5 = arith.constant dense<0.000000e+00> : vector<80x128xf32>
    %9 = tpu.matmul %6, %8, %cst_5 {dimension_numbers = #tpu.dot_dimension_numbers<[1], [0], [0], [1], [0, 0, 1, 1], [], []>} : vector<80x128xbf16>, vector<128x128xbf16>, vector<80x128xf32> -> vector<80x128xf32>
    %10 = arith.addf %1, %9 : vector<80x128xf32>
    %c0_i32_6 = arith.constant 0 : i32
    %11 = arith.addi %0, %c0_i32_6 : i32
    %c0_7 = arith.constant 0 : index
    %12 = arith.index_cast %11 : i32 to index
    %c1 = arith.constant 1 : index
    %c0_8 = arith.constant 0 : index
    %13 = vector.load %arg2[%c0_7, %12, %c1, %c0_8] : memref<1x8x19x128xbf16, #tpu.memory_space<vmem>>, vector<1x5x16x128xbf16>
    %14 = vector.shape_cast %13 : vector<1x5x16x128xbf16> to vector<5x16x128xbf16>
    %15 = vector.shape_cast %14 : vector<5x16x128xbf16> to vector<80x128xbf16>
    %c1_9 = arith.constant 1 : index
    %c0_10 = arith.constant 0 : index
    %c0_11 = arith.constant 0 : index
    %16 = vector.load %arg3[%c1_9, %c0_10, %c0_11] : memref<16x128x128xbf16, #tpu.memory_space<vmem>>, vector<1x128x128xbf16>
    %17 = vector.shape_cast %16 : vector<1x128x128xbf16> to vector<128x128xbf16>
    %cst_12 = arith.constant dense<0.000000e+00> : vector<80x128xf32>
    %18 = tpu.matmul %15, %17, %cst_12 {dimension_numbers = #tpu.dot_dimension_numbers<[1], [0], [0], [1], [0, 0, 1, 1], [], []>} : vector<80x128xbf16>, vector<128x128xbf16>, vector<80x128xf32> -> vector<80x128xf32>
    %19 = arith.addf %10, %18 : vector<80x128xf32>
    %c0_i32_13 = arith.constant 0 : i32
    %20 = arith.addi %0, %c0_i32_13 : i32
    %c0_14 = arith.constant 0 : index
    %21 = arith.index_cast %20 : i32 to index
    %c2 = arith.constant 2 : index
    %c0_15 = arith.constant 0 : index
    %22 = vector.load %arg2[%c0_14, %21, %c2, %c0_15] : memref<1x8x19x128xbf16, #tpu.memory_space<vmem>>, vector<1x5x16x128xbf16>
    %23 = vector.shape_cast %22 : vector<1x5x16x128xbf16> to vector<5x16x128xbf16>
    %24 = vector.shape_cast %23 : vector<5x16x128xbf16> to vector<80x128xbf16>
    %c2_16 = arith.constant 2 : index
    %c0_17 = arith.constant 0 : index
    %c0_18 = arith.constant 0 : index
    %25 = vector.load %arg3[%c2_16, %c0_17, %c0_18] : memref<16x128x128xbf16, #tpu.memory_space<vmem>>, vector<1x128x128xbf16>
    %26 = vector.shape_cast %25 : vector<1x128x128xbf16> to vector<128x128xbf16>
    %cst_19 = arith.constant dense<0.000000e+00> : vector<80x128xf32>
    %27 = tpu.matmul %24, %26, %cst_19 {dimension_numbers = #tpu.dot_dimension_numbers<[1], [0], [0], [1], [0, 0, 1, 1], [], []>} : vector<80x128xbf16>, vector<128x128xbf16>, vector<80x128xf32> -> vector<80x128xf32>
    %28 = arith.addf %19, %27 : vector<80x128xf32>
    %c0_i32_20 = arith.constant 0 : i32
    %29 = arith.addi %0, %c0_i32_20 : i32
    %c0_21 = arith.constant 0 : index
    %30 = arith.index_cast %29 : i32 to index
    %c3 = arith.constant 3 : index
    %c0_22 = arith.constant 0 : index
    %31 = vector.load %arg2[%c0_21, %30, %c3, %c0_22] : memref<1x8x19x128xbf16, #tpu.memory_space<vmem>>, vector<1x5x16x128xbf16>
    %32 = vector.shape_cast %31 : vector<1x5x16x128xbf16> to vector<5x16x128xbf16>
    %33 = vector.shape_cast %32 : vector<5x16x128xbf16> to vector<80x128xbf16>
    %c3_23 = arith.constant 3 : index
    %c0_24 = arith.constant 0 : index
    %c0_25 = arith.constant 0 : index
    %34 = vector.load %arg3[%c3_23, %c0_24, %c0_25] : memref<16x128x128xbf16, #tpu.memory_space<vmem>>, vector<1x128x128xbf16>
    %35 = vector.shape_cast %34 : vector<1x128x128xbf16> to vector<128x128xbf16>
    %cst_26 = arith.constant dense<0.000000e+00> : vector<80x128xf32>
    %36 = tpu.matmul %33, %35, %cst_26 {dimension_numbers = #tpu.dot_dimension_numbers<[1], [0], [0], [1], [0, 0, 1, 1], [], []>} : vector<80x128xbf16>, vector<128x128xbf16>, vector<80x128xf32> -> vector<80x128xf32>
    %37 = arith.addf %28, %36 : vector<80x128xf32>
    %c1_i32 = arith.constant 1 : i32
    %38 = arith.addi %0, %c1_i32 : i32
    %c0_27 = arith.constant 0 : index
    %39 = arith.index_cast %38 : i32 to index
    %c0_28 = arith.constant 0 : index
    %c0_29 = arith.constant 0 : index
    %40 = vector.load %arg2[%c0_27, %39, %c0_28, %c0_29] : memref<1x8x19x128xbf16, #tpu.memory_space<vmem>>, vector<1x5x16x128xbf16>
    %41 = vector.shape_cast %40 : vector<1x5x16x128xbf16> to vector<5x16x128xbf16>
    %42 = vector.shape_cast %41 : vector<5x16x128xbf16> to vector<80x128xbf16>
    %c4 = arith.constant 4 : index
    %c0_30 = arith.constant 0 : index
    %c0_31 = arith.constant 0 : index
    %43 = vector.load %arg3[%c4, %c0_30, %c0_31] : memref<16x128x128xbf16, #tpu.memory_space<vmem>>, vector<1x128x128xbf16>
    %44 = vector.shape_cast %43 : vector<1x128x128xbf16> to vector<128x128xbf16>
    %cst_32 = arith.constant dense<0.000000e+00> : vector<80x128xf32>
    %45 = tpu.matmul %42, %44, %cst_32 {dimension_numbers = #tpu.dot_dimension_numbers<[1], [0], [0], [1], [0, 0, 1, 1], [], []>} : vector<80x128xbf16>, vector<128x128xbf16>, vector<80x128xf32> -> vector<80x128xf32>
    %46 = arith.addf %37, %45 : vector<80x128xf32>
    %c1_i32_33 = arith.constant 1 : i32
    %47 = arith.addi %0, %c1_i32_33 : i32
    %c0_34 = arith.constant 0 : index
    %48 = arith.index_cast %47 : i32 to index
    %c1_35 = arith.constant 1 : index
    %c0_36 = arith.constant 0 : index
    %49 = vector.load %arg2[%c0_34, %48, %c1_35, %c0_36] : memref<1x8x19x128xbf16, #tpu.memory_space<vmem>>, vector<1x5x16x128xbf16>
    %50 = vector.shape_cast %49 : vector<1x5x16x128xbf16> to vector<5x16x128xbf16>
    %51 = vector.shape_cast %50 : vector<5x16x128xbf16> to vector<80x128xbf16>
    %c5 = arith.constant 5 : index
    %c0_37 = arith.constant 0 : index
    %c0_38 = arith.constant 0 : index
    %52 = vector.load %arg3[%c5, %c0_37, %c0_38] : memref<16x128x128xbf16, #tpu.memory_space<vmem>>, vector<1x128x128xbf16>
    %53 = vector.shape_cast %52 : vector<1x128x128xbf16> to vector<128x128xbf16>
    %cst_39 = arith.constant dense<0.000000e+00> : vector<80x128xf32>
    %54 = tpu.matmul %51, %53, %cst_39 {dimension_numbers = #tpu.dot_dimension_numbers<[1], [0], [0], [1], [0, 0, 1, 1], [], []>} : vector<80x128xbf16>, vector<128x128xbf16>, vector<80x128xf32> -> vector<80x128xf32>
    %55 = arith.addf %46, %54 : vector<80x128xf32>
    %c1_i32_40 = arith.constant 1 : i32
    %56 = arith.addi %0, %c1_i32_40 : i32
    %c0_41 = arith.constant 0 : index
    %57 = arith.index_cast %56 : i32 to index
    %c2_42 = arith.constant 2 : index
    %c0_43 = arith.constant 0 : index
    %58 = vector.load %arg2[%c0_41, %57, %c2_42, %c0_43] : memref<1x8x19x128xbf16, #tpu.memory_space<vmem>>, vector<1x5x16x128xbf16>
    %59 = vector.shape_cast %58 : vector<1x5x16x128xbf16> to vector<5x16x128xbf16>
    %60 = vector.shape_cast %59 : vector<5x16x128xbf16> to vector<80x128xbf16>
    %c6 = arith.constant 6 : index
    %c0_44 = arith.constant 0 : index
    %c0_45 = arith.constant 0 : index
    %61 = vector.load %arg3[%c6, %c0_44, %c0_45] : memref<16x128x128xbf16, #tpu.memory_space<vmem>>, vector<1x128x128xbf16>
    %62 = vector.shape_cast %61 : vector<1x128x128xbf16> to vector<128x128xbf16>
    %cst_46 = arith.constant dense<0.000000e+00> : vector<80x128xf32>
    %63 = tpu.matmul %60, %62, %cst_46 {dimension_numbers = #tpu.dot_dimension_numbers<[1], [0], [0], [1], [0, 0, 1, 1], [], []>} : vector<80x128xbf16>, vector<128x128xbf16>, vector<80x128xf32> -> vector<80x128xf32>
    %64 = arith.addf %55, %63 : vector<80x128xf32>
    %c1_i32_47 = arith.constant 1 : i32
    %65 = arith.addi %0, %c1_i32_47 : i32
    %c0_48 = arith.constant 0 : index
    %66 = arith.index_cast %65 : i32 to index
    %c3_49 = arith.constant 3 : index
    %c0_50 = arith.constant 0 : index
    %67 = vector.load %arg2[%c0_48, %66, %c3_49, %c0_50] : memref<1x8x19x128xbf16, #tpu.memory_space<vmem>>, vector<1x5x16x128xbf16>
    %68 = vector.shape_cast %67 : vector<1x5x16x128xbf16> to vector<5x16x128xbf16>
    %69 = vector.shape_cast %68 : vector<5x16x128xbf16> to vector<80x128xbf16>
    %c7 = arith.constant 7 : index
    %c0_51 = arith.constant 0 : index
    %c0_52 = arith.constant 0 : index
    %70 = vector.load %arg3[%c7, %c0_51, %c0_52] : memref<16x128x128xbf16, #tpu.memory_space<vmem>>, vector<1x128x128xbf16>
    %71 = vector.shape_cast %70 : vector<1x128x128xbf16> to vector<128x128xbf16>
    %cst_53 = arith.constant dense<0.000000e+00> : vector<80x128xf32>
    %72 = tpu.matmul %69, %71, %cst_53 {dimension_numbers = #tpu.dot_dimension_numbers<[1], [0], [0], [1], [0, 0, 1, 1], [], []>} : vector<80x128xbf16>, vector<128x128xbf16>, vector<80x128xf32> -> vector<80x128xf32>
    %73 = arith.addf %64, %72 : vector<80x128xf32>
    %c2_i32 = arith.constant 2 : i32
    %74 = arith.addi %0, %c2_i32 : i32
    %c0_54 = arith.constant 0 : index
    %75 = arith.index_cast %74 : i32 to index
    %c0_55 = arith.constant 0 : index
    %c0_56 = arith.constant 0 : index
    %76 = vector.load %arg2[%c0_54, %75, %c0_55, %c0_56] : memref<1x8x19x128xbf16, #tpu.memory_space<vmem>>, vector<1x5x16x128xbf16>
    %77 = vector.shape_cast %76 : vector<1x5x16x128xbf16> to vector<5x16x128xbf16>
    %78 = vector.shape_cast %77 : vector<5x16x128xbf16> to vector<80x128xbf16>
    %c8 = arith.constant 8 : index
    %c0_57 = arith.constant 0 : index
    %c0_58 = arith.constant 0 : index
    %79 = vector.load %arg3[%c8, %c0_57, %c0_58] : memref<16x128x128xbf16, #tpu.memory_space<vmem>>, vector<1x128x128xbf16>
    %80 = vector.shape_cast %79 : vector<1x128x128xbf16> to vector<128x128xbf16>
    %cst_59 = arith.constant dense<0.000000e+00> : vector<80x128xf32>
    %81 = tpu.matmul %78, %80, %cst_59 {dimension_numbers = #tpu.dot_dimension_numbers<[1], [0], [0], [1], [0, 0, 1, 1], [], []>} : vector<80x128xbf16>, vector<128x128xbf16>, vector<80x128xf32> -> vector<80x128xf32>
    %82 = arith.addf %73, %81 : vector<80x128xf32>
    %c2_i32_60 = arith.constant 2 : i32
    %83 = arith.addi %0, %c2_i32_60 : i32
    %c0_61 = arith.constant 0 : index
    %84 = arith.index_cast %83 : i32 to index
    %c1_62 = arith.constant 1 : index
    %c0_63 = arith.constant 0 : index
    %85 = vector.load %arg2[%c0_61, %84, %c1_62, %c0_63] : memref<1x8x19x128xbf16, #tpu.memory_space<vmem>>, vector<1x5x16x128xbf16>
    %86 = vector.shape_cast %85 : vector<1x5x16x128xbf16> to vector<5x16x128xbf16>
    %87 = vector.shape_cast %86 : vector<5x16x128xbf16> to vector<80x128xbf16>
    %c9 = arith.constant 9 : index
    %c0_64 = arith.constant 0 : index
    %c0_65 = arith.constant 0 : index
    %88 = vector.load %arg3[%c9, %c0_64, %c0_65] : memref<16x128x128xbf16, #tpu.memory_space<vmem>>, vector<1x128x128xbf16>
    %89 = vector.shape_cast %88 : vector<1x128x128xbf16> to vector<128x128xbf16>
    %cst_66 = arith.constant dense<0.000000e+00> : vector<80x128xf32>
    %90 = tpu.matmul %87, %89, %cst_66 {dimension_numbers = #tpu.dot_dimension_numbers<[1], [0], [0], [1], [0, 0, 1, 1], [], []>} : vector<80x128xbf16>, vector<128x128xbf16>, vector<80x128xf32> -> vector<80x128xf32>
    %91 = arith.addf %82, %90 : vector<80x128xf32>
    %c2_i32_67 = arith.constant 2 : i32
    %92 = arith.addi %0, %c2_i32_67 : i32
    %c0_68 = arith.constant 0 : index
    %93 = arith.index_cast %92 : i32 to index
    %c2_69 = arith.constant 2 : index
    %c0_70 = arith.constant 0 : index
    %94 = vector.load %arg2[%c0_68, %93, %c2_69, %c0_70] : memref<1x8x19x128xbf16, #tpu.memory_space<vmem>>, vector<1x5x16x128xbf16>
    %95 = vector.shape_cast %94 : vector<1x5x16x128xbf16> to vector<5x16x128xbf16>
    %96 = vector.shape_cast %95 : vector<5x16x128xbf16> to vector<80x128xbf16>
    %c10 = arith.constant 10 : index
    %c0_71 = arith.constant 0 : index
    %c0_72 = arith.constant 0 : index
    %97 = vector.load %arg3[%c10, %c0_71, %c0_72] : memref<16x128x128xbf16, #tpu.memory_space<vmem>>, vector<1x128x128xbf16>
    %98 = vector.shape_cast %97 : vector<1x128x128xbf16> to vector<128x128xbf16>
    %cst_73 = arith.constant dense<0.000000e+00> : vector<80x128xf32>
    %99 = tpu.matmul %96, %98, %cst_73 {dimension_numbers = #tpu.dot_dimension_numbers<[1], [0], [0], [1], [0, 0, 1, 1], [], []>} : vector<80x128xbf16>, vector<128x128xbf16>, vector<80x128xf32> -> vector<80x128xf32>
    %100 = arith.addf %91, %99 : vector<80x128xf32>
    %c2_i32_74 = arith.constant 2 : i32
    %101 = arith.addi %0, %c2_i32_74 : i32
    %c0_75 = arith.constant 0 : index
    %102 = arith.index_cast %101 : i32 to index
    %c3_76 = arith.constant 3 : index
    %c0_77 = arith.constant 0 : index
    %103 = vector.load %arg2[%c0_75, %102, %c3_76, %c0_77] : memref<1x8x19x128xbf16, #tpu.memory_space<vmem>>, vector<1x5x16x128xbf16>
    %104 = vector.shape_cast %103 : vector<1x5x16x128xbf16> to vector<5x16x128xbf16>
    %105 = vector.shape_cast %104 : vector<5x16x128xbf16> to vector<80x128xbf16>
    %c11 = arith.constant 11 : index
    %c0_78 = arith.constant 0 : index
    %c0_79 = arith.constant 0 : index
    %106 = vector.load %arg3[%c11, %c0_78, %c0_79] : memref<16x128x128xbf16, #tpu.memory_space<vmem>>, vector<1x128x128xbf16>
    %107 = vector.shape_cast %106 : vector<1x128x128xbf16> to vector<128x128xbf16>
    %cst_80 = arith.constant dense<0.000000e+00> : vector<80x128xf32>
    %108 = tpu.matmul %105, %107, %cst_80 {dimension_numbers = #tpu.dot_dimension_numbers<[1], [0], [0], [1], [0, 0, 1, 1], [], []>} : vector<80x128xbf16>, vector<128x128xbf16>, vector<80x128xf32> -> vector<80x128xf32>
    %109 = arith.addf %100, %108 : vector<80x128xf32>
    %c3_i32 = arith.constant 3 : i32
    %110 = arith.addi %0, %c3_i32 : i32
    %c0_81 = arith.constant 0 : index
    %111 = arith.index_cast %110 : i32 to index
    %c0_82 = arith.constant 0 : index
    %c0_83 = arith.constant 0 : index
    %112 = vector.load %arg2[%c0_81, %111, %c0_82, %c0_83] : memref<1x8x19x128xbf16, #tpu.memory_space<vmem>>, vector<1x5x16x128xbf16>
    %113 = vector.shape_cast %112 : vector<1x5x16x128xbf16> to vector<5x16x128xbf16>
    %114 = vector.shape_cast %113 : vector<5x16x128xbf16> to vector<80x128xbf16>
    %c12 = arith.constant 12 : index
    %c0_84 = arith.constant 0 : index
    %c0_85 = arith.constant 0 : index
    %115 = vector.load %arg3[%c12, %c0_84, %c0_85] : memref<16x128x128xbf16, #tpu.memory_space<vmem>>, vector<1x128x128xbf16>
    %116 = vector.shape_cast %115 : vector<1x128x128xbf16> to vector<128x128xbf16>
    %cst_86 = arith.constant dense<0.000000e+00> : vector<80x128xf32>
    %117 = tpu.matmul %114, %116, %cst_86 {dimension_numbers = #tpu.dot_dimension_numbers<[1], [0], [0], [1], [0, 0, 1, 1], [], []>} : vector<80x128xbf16>, vector<128x128xbf16>, vector<80x128xf32> -> vector<80x128xf32>
    %118 = arith.addf %109, %117 : vector<80x128xf32>
    %c3_i32_87 = arith.constant 3 : i32
    %119 = arith.addi %0, %c3_i32_87 : i32
    %c0_88 = arith.constant 0 : index
    %120 = arith.index_cast %119 : i32 to index
    %c1_89 = arith.constant 1 : index
    %c0_90 = arith.constant 0 : index
    %121 = vector.load %arg2[%c0_88, %120, %c1_89, %c0_90] : memref<1x8x19x128xbf16, #tpu.memory_space<vmem>>, vector<1x5x16x128xbf16>
    %122 = vector.shape_cast %121 : vector<1x5x16x128xbf16> to vector<5x16x128xbf16>
    %123 = vector.shape_cast %122 : vector<5x16x128xbf16> to vector<80x128xbf16>
    %c13 = arith.constant 13 : index
    %c0_91 = arith.constant 0 : index
    %c0_92 = arith.constant 0 : index
    %124 = vector.load %arg3[%c13, %c0_91, %c0_92] : memref<16x128x128xbf16, #tpu.memory_space<vmem>>, vector<1x128x128xbf16>
    %125 = vector.shape_cast %124 : vector<1x128x128xbf16> to vector<128x128xbf16>
    %cst_93 = arith.constant dense<0.000000e+00> : vector<80x128xf32>
    %126 = tpu.matmul %123, %125, %cst_93 {dimension_numbers = #tpu.dot_dimension_numbers<[1], [0], [0], [1], [0, 0, 1, 1], [], []>} : vector<80x128xbf16>, vector<128x128xbf16>, vector<80x128xf32> -> vector<80x128xf32>
    %127 = arith.addf %118, %126 : vector<80x128xf32>
    %c3_i32_94 = arith.constant 3 : i32
    %128 = arith.addi %0, %c3_i32_94 : i32
    %c0_95 = arith.constant 0 : index
    %129 = arith.index_cast %128 : i32 to index
    %c2_96 = arith.constant 2 : index
    %c0_97 = arith.constant 0 : index
    %130 = vector.load %arg2[%c0_95, %129, %c2_96, %c0_97] : memref<1x8x19x128xbf16, #tpu.memory_space<vmem>>, vector<1x5x16x128xbf16>
    %131 = vector.shape_cast %130 : vector<1x5x16x128xbf16> to vector<5x16x128xbf16>
    %132 = vector.shape_cast %131 : vector<5x16x128xbf16> to vector<80x128xbf16>
    %c14 = arith.constant 14 : index
    %c0_98 = arith.constant 0 : index
    %c0_99 = arith.constant 0 : index
    %133 = vector.load %arg3[%c14, %c0_98, %c0_99] : memref<16x128x128xbf16, #tpu.memory_space<vmem>>, vector<1x128x128xbf16>
    %134 = vector.shape_cast %133 : vector<1x128x128xbf16> to vector<128x128xbf16>
    %cst_100 = arith.constant dense<0.000000e+00> : vector<80x128xf32>
    %135 = tpu.matmul %132, %134, %cst_100 {dimension_numbers = #tpu.dot_dimension_numbers<[1], [0], [0], [1], [0, 0, 1, 1], [], []>} : vector<80x128xbf16>, vector<128x128xbf16>, vector<80x128xf32> -> vector<80x128xf32>
    %136 = arith.addf %127, %135 : vector<80x128xf32>
    %c3_i32_101 = arith.constant 3 : i32
    %137 = arith.addi %0, %c3_i32_101 : i32
    %c0_102 = arith.constant 0 : index
    %138 = arith.index_cast %137 : i32 to index
    %c3_103 = arith.constant 3 : index
    %c0_104 = arith.constant 0 : index
    %139 = vector.load %arg2[%c0_102, %138, %c3_103, %c0_104] : memref<1x8x19x128xbf16, #tpu.memory_space<vmem>>, vector<1x5x16x128xbf16>
    %140 = vector.shape_cast %139 : vector<1x5x16x128xbf16> to vector<5x16x128xbf16>
    %141 = vector.shape_cast %140 : vector<5x16x128xbf16> to vector<80x128xbf16>
    %c15 = arith.constant 15 : index
    %c0_105 = arith.constant 0 : index
    %c0_106 = arith.constant 0 : index
    %142 = vector.load %arg3[%c15, %c0_105, %c0_106] : memref<16x128x128xbf16, #tpu.memory_space<vmem>>, vector<1x128x128xbf16>
    %143 = vector.shape_cast %142 : vector<1x128x128xbf16> to vector<128x128xbf16>
    %cst_107 = arith.constant dense<0.000000e+00> : vector<80x128xf32>
    %144 = tpu.matmul %141, %143, %cst_107 {dimension_numbers = #tpu.dot_dimension_numbers<[1], [0], [0], [1], [0, 0, 1, 1], [], []>} : vector<80x128xbf16>, vector<128x128xbf16>, vector<80x128xf32> -> vector<80x128xf32>
    %145 = arith.addf %136, %144 : vector<80x128xf32>
    %c0_108 = arith.constant 0 : index
    %c0_109 = arith.constant 0 : index
    %146 = vector.load %arg4[%c0_108, %c0_109] : memref<1x128xf32, #tpu.memory_space<vmem>>, vector<1x128xf32>
    %147 = vector.broadcast %146 : vector<1x128xf32> to vector<80x128xf32>
    %148 = arith.addf %145, %147 : vector<80x128xf32>
    %149 = vector.extract_strided_slice %148 {offsets = [0, 0], sizes = [80, 1], strides = [1, 1]} : vector<80x128xf32> to vector<80x1xf32>
    %c0_110 = arith.constant 0 : index
    %c0_111 = arith.constant 0 : index
    %c0_112 = arith.constant 0 : index
    %150 = vector.load %arg6[%c0_110, %c0_111, %c0_112] : memref<1x80x1xf32, #tpu.memory_space<vmem>>, vector<1x80x1xf32>
    %151 = vector.shape_cast %150 : vector<1x80x1xf32> to vector<80x1xf32>
    %152 = vector.shape_cast %149 : vector<80x1xf32> to vector<1x80x1xf32>
    tpu.vector_store %arg6[%c0_110, %c0_111, %c0_112], %152 {strides = array<i32>} : memref<1x80x1xf32, #tpu.memory_space<vmem>>, vector<1x80x1xf32>,
    return
  }
  func.func @transform_0(%arg0: i32, %arg1: i32) -> (i32, i32, i32, i32) {
    %c0_i32 = arith.constant 0 : i32
    %c0_i32_0 = arith.constant 0 : i32
    %c0_i32_1 = arith.constant 0 : i32
    %c0_i32_2 = arith.constant 0 : i32
    return %arg0, %c0_i32, %c0_i32_0, %c0_i32_1 : i32, i32, i32, i32
  }
  func.func @transform_1(%arg0: i32, %arg1: i32) -> (i32, i32, i32) {
    %c0_i32 = arith.constant 0 : i32
    %c0_i32_0 = arith.constant 0 : i32
    %c0_i32_1 = arith.constant 0 : i32
    %c0_i32_2 = arith.constant 0 : i32
    return %c0_i32, %c0_i32_0, %c0_i32_1 : i32, i32, i32
  }
  func.func @transform_2(%arg0: i32, %arg1: i32) -> (i32, i32) {
    %c0_i32 = arith.constant 0 : i32
    %c0_i32_0 = arith.constant 0 : i32
    %c0_i32_1 = arith.constant 0 : i32
    return %c0_i32, %c0_i32_0 : i32, i32
  }
  func.func @transform_3(%arg0: i32, %arg1: i32) -> (i32, i32) {
    %c0_i32 = arith.constant 0 : i32
    %c0_i32_0 = arith.constant 0 : i32
    %c0_i32_1 = arith.constant 0 : i32
    return %c0_i32, %c0_i32_0 : i32, i32
  }
  func.func @transform_4(%arg0: i32, %arg1: i32) -> (i32, i32, i32) {
    %c0_i32 = arith.constant 0 : i32
    %c0_i32_0 = arith.constant 0 : i32
    return %arg0, %arg1, %c0_i32 : i32, i32, i32
  }
}

</mosaic_0001>

<bundles_post_ra>
// kernel: tpu_custom_call.1
= control target key start
LH: loop header
LB: loop body
LE: loop exit
PB: predicated region body
PF: predicated region fallthrough
CT: control target
= control target key end

     0   :  { %6 = vsyncpa [#allocation3], 0  ;;  %s441_s0 = inlined_call_operand.hbm [shape: f32[8,128], index: 0, kind: input, shape index: {}]   ;;  %s442_s1 = inlined_call_operand.hbm [shape: f32[16,128], index: 1, kind: output, shape index: {}]  }
   0x1   :  { %7 = vsyncpa [#allocation4], 0 }
   0x2   :  { %9 = vsyncpa [#allocation4 + $0x1], 0  ;;  %s357_s6 = smov 0   ;;  %s359_s7 = smov 0  }
   0x3   :  { %s361_s8 = smov 0   ;;  %s363_s9 = smov 0  }
   0x4 LB: > { %s378_s10 = sadd.s32 4294967295, %s344_s9   ;;  %s188_s11 = sadd.s32 4294967294, %s344_s9   ;;  %s344_s9 = sphi %s363_s9, %s448_s9   ;;  %s340_s8 = sphi %s361_s8, %s447_s8   ;;  %s336_s7 = sphi %s359_s7, %s446_s7   ;;  %s332_s6 = sphi %s357_s6, %s445_s6  }
   0x5   : > { %s382_s12 = sadd.s32 1, %s344_s9   ;;  %s43_s13 = sadd.s32 1, %s340_s8 }
   0x6   : > { %s40_s14 = ssub.s32 %s344_s9, %s382_s12  ;;  %p53_p0 = scmp.ne.s32.totalorder %s340_s8, %s336_s7 }
   0x7   : > { %p41_p1 = scmp.eq.s32.totalorder %s40_s14, 0  ;;  %p54_p2 = scmp.eq.s32.totalorder %s378_s10, 1 }
   0x8   : > { %p59_p3 = scmp.ne.s32.totalorder %s336_s7, %s332_s6  ;;  %p60_p4 = scmp.eq.s32.totalorder %s188_s11, 1 }
   0x9   : > { %s393_s15 = scalar_select %p41_p1, %s340_s8, %s43_s13  }
   0xa   : > { %p395_p5 = por %p54_p2, %p53_p0  ;;  %p399_p6 = por %p60_p4, %p59_p3 }
   0xb   : > { %p189_p7 = scmp.ge.s32.totalorder %s344_s9, 1  ;;  %p67_p8 = scmp.lt.s32.totalorder %s344_s9, 3 }
   0xc   : > { %p212_p9 = scmp.eq.s32.totalorder %s378_s10, 0  ;;  %s79_s20 = sshll.u32 %s441_s0, 4  ;;  %s80_s20 = int_to_ptr.hbm [resolvable:$true] %s79_s20 }
   0xd   : > { %p68_p10 = pnand %p189_p7, %p67_p8  ;;  %s346_s21 = smov [#allocation2]  }
   0xe   : > { %s81_s22 = sshll.u32 %s346_s21, 4  ;;  %s82_s22 = int_to_ptr.vmem [resolvable:$true] %s81_s22 }
   0xf   : > { %p204_p11 = pneg %p68_p10  ;;  %94 = sbr.rel (%p68_p10) target bundleno = 37 (0x25), region = 24 }
  0x11   : > { %p205_p12 = pnand %p212_p9, %p204_p11 }
  0x13   : > { %207 = dma.hbm_to_vmem [thread:$0]  (!%p205_p12), %s80_s20, 128, %s82_s22, [#allocation3]  }
  0x14   : > { %323 = dma.done.wait (%p212_p9), [#allocation3], 128  }
  0x15   : > { %325 = vsyncadd (%p212_p9), [#allocation3], 4294967168  ;;  %s107_s23 = sand.u32 1, %s336_s7   ;;  %s195_s24 = sshll.u32 %s378_s10, 3  ;;  %v110_v0 = vld [vmem:[#allocation2] sm:$0xff] }
  0x16   : > { %s193_s25 = sshll.u32 %s107_s23, 3  ;;  %s124_s28 = scalar_lea.hbm %s442_s1, %s195_s24  ;;  %v111_v1 = vadd.f32 1.0, %v110_v0 }
  0x17   : > { %s109_s29 = scalar_lea.vmem [#allocation5], %s193_s25  ;;  %s128_s2 = sshll.u32 %s124_s28, 4  ;;  %s129_s2 = int_to_ptr.hbm [resolvable:$true] %s128_s2 }
  0x18   : > { %s126_s30 = sshll.u32 %s109_s29, 4  ;;  %112 = vst [vmem:[%s109_s29] sm:$0xff] %v111_v1  ;;  %s114_s3 = scalar_lea.sflag [#allocation4], %s107_s23  ;;  %s127_s30 = int_to_ptr.vmem [resolvable:$true] %s126_s30 }
  0x19   : > { %s292_s4 = sshra.s32 %s129_s2, 4  ;;  %s298_s13 = scalar_lea.hbm %s442_s1, 16  ;;  %s293_s4 = int_to_ptr.hbm [resolvable:$true] %s292_s4 }
  0x1a   : > { %s294_s5 = scalar_lea.hbm %s293_s4, 8  ;;  %p299_p2 = scmp.lt.s32.totalorder %s293_s4, %s442_s1 }
  0x1b   : > { %p295_p13 = scmp.ne.s32.totalorder %s293_s4, %s294_s5  ;;  %p300_p3 = scmp.lt.s32.totalorder %s298_s13, %s294_s5 }
  0x1d   : > { %p296_p0 = pnand %p295_p13, %p395_p5  ;;  %p301_p4 = por %p300_p3, %p299_p2 }
  0x1f   : > { %p297_p1 = pneg %p296_p0 }
  0x21   : > { %p302_p7 = pnand %p301_p4, %p297_p1 }
  0x23   : > { %305 = shalt.err (!%p302_p7)
}
  0x24   : > { %202 = dma.vmem_to_hbm [thread:$0]  (%p395_p5), %s127_s30, 128, %s129_s2, %s114_s3  }
  0x25 PF: > { %p214_p8 = scmp.ge.s32.totalorder %s344_s9, 2  ;;  %s140_s19 = sand.u32 1, %s332_s6  }
  0x26   : > { %s141_s20 = scalar_lea.sflag [#allocation4], %s140_s19 }
  0x27   : > { %p209_p9 = pnand %p214_p8, %p399_p6 }
  0x29   : > { %p210_p10 = pneg %p209_p9 }
  0x2b   : > { %327 = dma.done.wait (%p210_p10), %s141_s20, 128  }
  0x2c   : > { %329 = vsyncadd (%p210_p10), %s141_s20, 4294967168  ;;  %p12_p11 = scmp.ge.s32.totalorder %s382_s12, 4   ;;  %s445_s6 = smov %s336_s7 }
  0x2d   : > { %s446_s7 = smov %s340_s8  ;;  %s447_s8 = smov %s393_s15 }
  0x2e   : > { %s448_s9 = smov %s382_s12  ;;  %14 = sbr.rel (!%p12_p11) target bundleno = 4 (0x4), region = 61 }
  0x33   :  { %147 = vsyncpa [#allocation3], 1 }
  0x34   :  { %149 = vsyncpa [#allocation3 + $0x1], 1 }
  0x35   :  { %150 = vsyncpa [#allocation4], 1 }
  0x36   :  { %152 = vsyncpa [#allocation4 + $0x1], 1 }

// kernel: nlayer_discriminator_forward.5
= control target key start
LH: loop header
LB: loop body
LE: loop exit
PB: predicated region body
PF: predicated region fallthrough
CT: control target
= control target key end

     0   :  { %s1759_s15 = smov 0   ;;  %s1761_s16 = smov 0   ;;  %s2057_s0 = inlined_call_operand.vmem [shape: bf16[2,10,17,16], index: 0, kind: input, shape index: {}]   ;;  %s2058_s1 = inlined_call_operand.vmem [shape: bf16[4,16,128], index: 1, kind: input, shape index: {}]   ;;  %s2059_s2 = inlined_call_operand.vmem [shape: f32[1,128], index: 2, kind: input, shape index: {}]   ;;  %s2060_s3 = inlined_call_operand.vmem [shape: f32[144,1], index: 3, kind: input, shape index: {}]   ;;  %s2061_s4 = inlined_call_operand.vmem [shape: bf16[2,144,16], index: 4, kind: output, shape index: {}]  }
   0x1   :  { %s1763_s17 = smov 0  }
   0x2 LB: > { %s26_s3 = sadd.s32 1, %s1728_s16  ;;  %p1481_p0 = scmp.ge.s32.totalorder %s1732_s17, 1  ;;  %s1732_s17 = sphi %s1763_s17, %s14_s17   ;;  %s1728_s16 = sphi %s1761_s16, %s2065_s16   ;;  %s1724_s15 = sphi %s1759_s15, %s2064_s15  }
   0x3   : > { %p28_p1 = scmp.ge.s32.totalorder %s26_s3, 2  ;;  %p176_p2 = scmp.lt.s32.totalorder %s1732_s17, 3 }
   0x5   : > { %s2067_s3 = smov (%p28_p1, %s26_s3), 0  ;;  %p177_p3 = pnand %p1481_p0, %p176_p2 }
   0x6   : > { %p206_p4 = scmp.lt.s32.totalorder (!%p177_p3), %s1724_s15, 1 }
   0x7   : > { %180 = sbr.rel (%p177_p3) target bundleno = 312 (0x138), region = 36 }
   0xc   : > { %v1681_v0 = vld [vmem:[%s2058_s1 + $0x10] sm:$0xff]  ;;  %v1670_v1 = vld [vmem:[%s2058_s1] sm:$0xff]  ;;  %v1671_v2 = vld [vmem:[%s2058_s1 + $0x8] sm:$0xff]  ;;  %s2069_s15 = smov (!%p206_p4, %s1724_s15), 1  ;;  %vm510_vm0 = vcmask 130048   ;;  %vm1371_vm5 = vcmask 125952  }
   0xd   : > { %v1682_v3 = vld [vmem:[%s2058_s1 + $0x18] sm:$0xff]  ;;  %834 = vmatpush.bf16.msra.mxu2 %v1681_v0  ;;  %677 = vmatpush.bf16.msra.mxu1 %v1670_v1  ;;  %s1683_s26 = smul.u32 120, %s2069_s15  ;;  %vm255_vm1 = vsmask.f32 3328  ;;  %vm256_vm2 = vsmask.f32 7440 }
   0xe   : > { %545 = vmatpush.bf16.msra.mxu0 %v1671_v2  ;;  %1212 = vmatpush.bf16.msra.mxu3 %v1682_v3  ;;  %vm1810_vm3 = vmor %vm255_vm1, %vm256_vm2  ;;  %s1684_s6 = smul.u32 72, %s2069_s15 }
   0xf   : > { %s1795_s29 = scalar_lea.vmem %s2057_s0, %s1683_s26 }
  0x10   : > { %v1672_v4 = vld [vmem:[%s1795_s29 + $0xc] sm:$0xff]  ;;  %v1661_v5 = vld [vmem:[%s1795_s29] sm:$0xff]  ;;  %v246_v8 = vld [vmem:[%s1795_s29 + $0x8] sm:$0x1]  ;;  %s1993_s9 = scalar_lea.vmem %s2061_s4, %s1684_s6 }
  0x11   : > { %v226_v6 = vld [vmem:[%s1795_s29] sm:$0xf]  ;;  %v227_v7 = vld [vmem:[%s1795_s29 + $0x4] sm:$0xf]  ;;  %1608 = vmatmul.msk.bf16.vlgmr.msra.gmra.mxu2 %vm510_vm0, %v1672_v4  ;;  %1539 = vmatmul.msk.bf16.vlgmr.msra.gmra.mxu1 %vm510_vm0, %v1661_v5  ;;  %v278_v13 = vshll.u32 %v246_v8, 16  ;;  %v1673_v2 = vld [vmem:[%s1795_s29 + $0x18] sm:$0xff] }
  0x12   : > { %v259_v9 = vshrl.u32 %v226_v6, 16  ;;  %v262_v10 = vshll.u32 %v226_v6, 16  ;;  %v268_v11 = vshll.u32 %v227_v7, 16  ;;  %v272_v12 = vshrl.u32 %v227_v7, 16  ;;  %v1617_v14 = vld [vmem:[%s1795_s29 + $0xc] sm:$0xf] }
  0x13   : > { %v1618_v17 = vld [vmem:[%s1795_s29 + $0x10] sm:$0xf]  ;;  %v1619_v18 = vld [vmem:[%s1795_s29 + $0x14] sm:$0x1]  ;;  %v927_v21 = vshrl.u32 %v1617_v14, 16  ;;  %v930_v23 = vshll.u32 %v1617_v14, 16 }
  0x14   : > { %v261_v15 = vrot.slane %v259_v9, 4  ;;  %v264_v16 = vrot.slane %v262_v10, 5  ;;  %v270_v19 = vrot.slane %v268_v11, 5  ;;  %v274_v20 = vrot.slane %v272_v12, 4  ;;  %v228_v26 = vld [vmem:[%s1795_s29 + $0xc] sm:$0xf] }
  0x15   : > { %v936_v24 = vshll.u32 %v1618_v17, 16  ;;  %v940_v25 = vshrl.u32 %v1618_v17, 16  ;;  %v280_v29 = vrot.slane %v278_v13, 5  ;;  %v929_v30 = vrot.slane %v927_v21, 4  ;;  %v229_v32 = vld [vmem:[%s1795_s29 + $0x10] sm:$0xf] }
  0x16   : > { %v265_v22 = vor.u32 %v264_v16, %v261_v15  ;;  %v275_v28 = vor.u32 %v274_v20, %v270_v19  ;;  %v946_v31 = vshll.u32 %v1619_v18, 16  ;;  %v932_v34 = vrot.slane %v930_v23, 5  ;;  %v247_v44 = vld [vmem:[%s1795_s29 + $0x14] sm:$0x1]  ;;  %v1620_v46 = vld [vmem:[%s1795_s29 + $0x18] sm:$0xf] }
  0x17   : > { %v938_v35 = vrot.slane %v936_v24, 5  ;;  %v942_v36 = vrot.slane %v940_v25, 4  ;;  %v283_v39 = vshrl.u32 %v228_v26, 16  ;;  %v286_v40 = vshll.u32 %v228_v26, 16  ;;  %v1621_v58 = vld [vmem:[%s1795_s29 + $0x1c] sm:$0xf] }
  0x18   : > { %v266_v33 = vrot.slane %v265_v22, 4  ;;  %v276_v37 = vrot.slane %v275_v28, 4  ;;  %v948_v38 = vrot.slane %v946_v31, 5  ;;  %v933_v42 = vor.u32 %v932_v34, %v929_v30  ;;  %v1662_v3 = vld [vmem:[%s1795_s29 + $0xc] sm:$0xff]  ;;  %v1622_v5 = vld [vmem:[%s1795_s29 + $0x20] sm:$0x1] }
  0x19   : > { %v943_v43 = vor.u32 %v942_v36, %v938_v35  ;;  %v292_v45 = vshll.u32 %v229_v32, 16  ;;  %v285_v49 = vrot.slane %v283_v39, 4  ;;  %v288_v50 = vrot.slane %v286_v40, 5  ;;  %v230_v10 = vld [vmem:[%s1795_s29 + $0x18] sm:$0xf] }
  0x1a   : > { %v271_v41 = vsel %vm1810_vm3, %v266_v33, %v270_v19  ;;  %v281_v47 = vsel %vm1810_vm3, %v276_v37, %v280_v29  ;;  %v934_v52 = vrot.slane %v933_v42, 4  ;;  %v296_v56 = vshrl.u32 %v229_v32, 16  ;;  %v231_v18 = vld [vmem:[%s1795_s29 + $0x1c] sm:$0xf]  ;;  %v1623_v31 = vld [vmem:[%s1795_s29 + $0x24] sm:$0xf] }
  0x1b   : > { %v477_v48 = vunpack.c.l.b16 %v271_v41  ;;  %v478_v51 = vunpack.c.l.b16 %v281_v47  ;;  %v944_v53 = vrot.slane %v943_v43, 4  ;;  %v294_v54 = vrot.slane %v292_v45, 5  ;;  %v1624_v32 = vld [vmem:[%s1795_s29 + $0x28] sm:$0xf]  ;;  %v248_v45 = vld [vmem:[%s1795_s29 + $0x20] sm:$0x1] }
  0x1c   : > { %v289_v55 = vor.u32 %v288_v50, %v285_v49  ;;  %v302_v57 = vshll.u32 %v247_v44, 16  ;;  %v951_v59 = vshrl.u32 %v1620_v46, 16  ;;  %v939_v61 = vsel %vm1810_vm3, %v934_v52, %v938_v35 }
  0x1d   : > { %v495_v60 = vpack.c.b16 %v478_v51, %v477_v48  ;;  %v949_v62 = vsel %vm1810_vm3, %v944_v53, %v948_v38  ;;  %v954_v63 = vshll.u32 %v1620_v46, 16  ;;  %v1145_v0 = vunpack.c.l.b16 %v939_v61 }
  0x1e   : > { %v1146_v1 = vunpack.c.l.b16 %v949_v62  ;;  %v298_v4 = vrot.slane %v296_v56, 4  ;;  %v290_v6 = vrot.slane %v289_v55, 4  ;;  %v953_v7 = vrot.slane %v951_v59, 4  ;;  %v1625_v56 = vld [vmem:[%s1795_s29 + $0x2c] sm:$0x1] }
  0x1f   : > { %1490 = vmatmul.msk.bf16.vlgmr.msra.gmra.mxu0 %vm510_vm0, %v495_v60  ;;  %v956_v8 = vrot.slane %v954_v63, 5  ;;  %v960_v9 = vshll.u32 %v1621_v58, 16  ;;  %v304_v13 = vrot.slane %v302_v57, 5  ;;  %v964_v14 = vshrl.u32 %v1621_v58, 16  ;;  %v1674_v60 = vld [vmem:[%s1795_s29 + $0x24] sm:$0xff]  ;;  %v1663_v63 = vld [vmem:[%s1795_s29 + $0x18] sm:$0xff] }
  0x20   : > { %v1163_v11 = vpack.c.b16 %v1146_v1, %v1145_v0  ;;  %v299_v12 = vor.u32 %v298_v4, %v294_v54  ;;  %v970_v17 = vshll.u32 %v1622_v5, 16  ;;  %v307_v21 = vshrl.u32 %v230_v10, 16  ;;  %v232_v62 = vld [vmem:[%s1795_s29 + $0x24] sm:$0xf] }
  0x21   : > { %v957_v15 = vor.u32 %v956_v8, %v953_v7  ;;  %v962_v16 = vrot.slane %v960_v9, 5  ;;  %1609 = vmatmul.msk.bf16.gmra.mxu2 %vm510_vm0, %v1673_v2  ;;  %v966_v20 = vrot.slane %v964_v14, 4  ;;  %v310_v22 = vshll.u32 %v230_v10, 16  ;;  %1540 = vmatmul.msk.bf16.gmra.mxu1 %vm510_vm0, %v1662_v3  ;;  %v233_v2 = vld [vmem:[%s1795_s29 + $0x28] sm:$0xf] }
  0x22   : > { %1650 = vmatmul.msk.bf16.vlgmr.msra.gmra.mxu3 %vm510_vm0, %v1163_v11  ;;  %v300_v19 = vrot.slane %v299_v12, 4  ;;  %v295_v23 = vsel %vm1810_vm3, %v290_v6, %v294_v54  ;;  %v972_v25 = vrot.slane %v970_v17, 5  ;;  %v316_v29 = vshll.u32 %v231_v18, 16 }
  0x23   : > { %v958_v24 = vrot.slane %v957_v15, 4  ;;  %v967_v28 = vor.u32 %v966_v20, %v962_v16  ;;  %v320_v30 = vshrl.u32 %v231_v18, 16  ;;  %v479_v33 = vunpack.c.l.b16 %v295_v23  ;;  %v1627_v15 = vld [vmem:[%s1795_s29 + $0x34] sm:$0xf]  ;;  %v249_v20 = vld [vmem:[%s1795_s29 + $0x2c] sm:$0x1] }
  0x24   : > { %v305_v26 = vsel %vm1810_vm3, %v300_v19, %v304_v13  ;;  %v309_v35 = vrot.slane %v307_v21, 4  ;;  %v312_v36 = vrot.slane %v310_v22, 5  ;;  %v975_v39 = vshrl.u32 %v1623_v31, 16  ;;  %v1626_v13 = vld [vmem:[%s1795_s29 + $0x30] sm:$0xf] }
  0x25   : > { %v968_v34 = vrot.slane %v967_v28, 4  ;;  %v480_v37 = vunpack.c.l.b16 %v305_v26  ;;  %v963_v38 = vsel %vm1810_vm3, %v958_v24, %v962_v16  ;;  %v978_v40 = vshll.u32 %v1623_v31, 16 }
  0x26   : > { %v318_v42 = vrot.slane %v316_v29, 5  ;;  %v322_v43 = vrot.slane %v320_v30, 4  ;;  %v984_v44 = vshll.u32 %v1624_v32, 16  ;;  %v977_v46 = vrot.slane %v975_v39, 4 }
  0x27   : > { %v973_v41 = vsel %vm1810_vm3, %v968_v34, %v972_v25  ;;  %v980_v47 = vrot.slane %v978_v40, 5  ;;  %v1147_v48 = vunpack.c.l.b16 %v963_v38  ;;  %v313_v50 = vor.u32 %v312_v36, %v309_v35  ;;  %v1628_v35 = vld [vmem:[%s1795_s29 + $0x38] sm:$0x1] }
  0x28   : > { %v1148_v49 = vunpack.c.l.b16 %v973_v41  ;;  %v988_v51 = vshrl.u32 %v1624_v32, 16  ;;  %v496_v52 = vpack.c.b16 %v480_v37, %v479_v33  ;;  %v986_v53 = vrot.slane %v984_v44, 5  ;;  %v1675_v44 = vld [vmem:[%s1795_s29 + $0x30] sm:$0xff] }
  0x29   : > { %v323_v54 = vor.u32 %v322_v43, %v318_v42  ;;  %v326_v55 = vshll.u32 %v248_v45, 16  ;;  %v981_v58 = vor.u32 %v980_v47, %v977_v46  ;;  %v314_v61 = vrot.slane %v313_v50, 4 }
  0x2a   : > { %v990_v57 = vrot.slane %v988_v51, 4  ;;  %v1164_v59 = vpack.c.b16 %v1148_v49, %v1147_v48  ;;  %v994_v1 = vshll.u32 %v1625_v56, 16  ;;  %v331_v6 = vshrl.u32 %v232_v62, 16  ;;  %v234_v48 = vld [vmem:[%s1795_s29 + $0x30] sm:$0xf]  ;;  %v1664_v49 = vld [vmem:[%s1795_s29 + $0x24] sm:$0xff] }
  0x2b   : > { %v324_v3 = vrot.slane %v323_v54, 4  ;;  %v328_v4 = vrot.slane %v326_v55, 5  ;;  %v982_v5 = vrot.slane %v981_v58, 4  ;;  %v334_v7 = vshll.u32 %v232_v62, 16  ;;  %v235_v51 = vld [vmem:[%s1795_s29 + $0x34] sm:$0xf] }
  0x2c   : > { %v991_v0 = vor.u32 %v990_v57, %v986_v53  ;;  %v319_v8 = vsel %vm1810_vm3, %v314_v61, %v318_v42  ;;  %v340_v9 = vshll.u32 %v233_v2, 16  ;;  %v344_v10 = vshrl.u32 %v233_v2, 16  ;;  %v1629_v57 = vld [vmem:[%s1795_s29 + $0x3c] sm:$0xf]  ;;  %v1630_v62 = vld [vmem:[%s1795_s29 + $0x40] sm:$0xf] }
  0x2d   : > { %v996_v12 = vrot.slane %v994_v1, 5  ;;  %v329_v14 = vsel %vm1810_vm3, %v324_v3, %v328_v4  ;;  %v481_v16 = vunpack.c.l.b16 %v319_v8  ;;  %v987_v17 = vsel %vm1810_vm3, %v982_v5, %v986_v53 }
  0x2e   : > { %v992_v11 = vrot.slane %v991_v0, 4  ;;  %v333_v18 = vrot.slane %v331_v6, 4  ;;  %v336_v19 = vrot.slane %v334_v7, 5  ;;  %v342_v21 = vrot.slane %v340_v9, 5 }
  0x2f   : > { %1491 = vmatmul.msk.bf16.gmra.mxu0 %vm510_vm0, %v496_v52  ;;  %v346_v22 = vrot.slane %v344_v10, 4  ;;  %v999_v23 = vshrl.u32 %v1626_v13, 16  ;;  %v1002_v24 = vshll.u32 %v1626_v13, 16  ;;  %v482_v25 = vunpack.c.l.b16 %v329_v14 }
  0x30   : > { %v997_v26 = vsel %vm1810_vm3, %v992_v11, %v996_v12  ;;  %v1008_v28 = vshll.u32 %v1627_v15, 16  ;;  %v1012_v29 = vshrl.u32 %v1627_v15, 16  ;;  %v1149_v30 = vunpack.c.l.b16 %v987_v17  ;;  %v250_v11 = vld [vmem:[%s1795_s29 + $0x38] sm:$0x1] }
  0x31   : > { %1610 = vmatmul.msk.bf16.gmra.mxu2 %vm510_vm0, %v1674_v60  ;;  %1541 = vmatmul.msk.bf16.gmra.mxu1 %vm510_vm0, %v1663_v63  ;;  %v337_v31 = vor.u32 %v336_v19, %v333_v18  ;;  %v350_v32 = vshll.u32 %v249_v20, 16  ;;  %v1150_v33 = vunpack.c.l.b16 %v997_v26  ;;  %v347_v34 = vor.u32 %v346_v22, %v342_v21  ;;  %v1631_v22 = vld [vmem:[%s1795_s29 + $0x44] sm:$0x1] }
  0x32   : > { %1651 = vmatmul.msk.bf16.gmra.mxu3 %vm510_vm0, %v1164_v59  ;;  %v1001_v36 = vrot.slane %v999_v23, 4  ;;  %v1004_v37 = vrot.slane %v1002_v24, 5  ;;  %v497_v38 = vpack.c.b16 %v482_v25, %v481_v16  ;;  %v1010_v39 = vrot.slane %v1008_v28, 5  ;;  %v1676_v24 = vld [vmem:[%s1795_s29 + $0x3c] sm:$0xff] }
  0x33   : > { %v1014_v40 = vrot.slane %v1012_v29, 4  ;;  %v352_v41 = vrot.slane %v350_v32, 5  ;;  %v1018_v42 = vshll.u32 %v1628_v35, 16  ;;  %v1165_v43 = vpack.c.b16 %v1150_v33, %v1149_v30  ;;  %v1665_v29 = vld [vmem:[%s1795_s29 + $0x30] sm:$0xff]  ;;  %v236_v33 = vld [vmem:[%s1795_s29 + $0x3c] sm:$0xf] }
  0x34   : > { %v338_v45 = vrot.slane %v337_v31, 4  ;;  %v348_v46 = vrot.slane %v347_v34, 4  ;;  %v1005_v47 = vor.u32 %v1004_v37, %v1001_v36  ;;  %v355_v52 = vshrl.u32 %v234_v48, 16  ;;  %v237_v34 = vld [vmem:[%s1795_s29 + $0x40] sm:$0xf] }
  0x35   : > { %v1015_v50 = vor.u32 %v1014_v40, %v1010_v39  ;;  %v1020_v56 = vrot.slane %v1018_v42, 5  ;;  %v358_v59 = vshll.u32 %v234_v48, 16  ;;  %v364_v60 = vshll.u32 %v235_v51, 16  ;;  %v1632_v35 = vld [vmem:[%s1795_s29 + $0x48] sm:$0xf] }
  0x36   : > { %v343_v53 = vsel %vm1810_vm3, %v338_v45, %v342_v21  ;;  %v353_v54 = vsel %vm1810_vm3, %v348_v46, %v352_v41  ;;  %v1006_v55 = vrot.slane %v1005_v47, 4  ;;  %v368_v61 = vshrl.u32 %v235_v51, 16  ;;  %v1633_v45 = vld [vmem:[%s1795_s29 + $0x4c] sm:$0xf] }
  0x37   : > { %v1016_v58 = vrot.slane %v1015_v50, 4  ;;  %v483_v63 = vunpack.c.l.b16 %v343_v53  ;;  %v484_v0 = vunpack.c.l.b16 %v353_v54  ;;  %v357_v1 = vrot.slane %v355_v52, 4 }
  0x38   : > { %v1023_v2 = vshrl.u32 %v1629_v57, 16  ;;  %v1011_v3 = vsel %vm1810_vm3, %v1006_v55, %v1010_v39  ;;  %v1026_v4 = vshll.u32 %v1629_v57, 16  ;;  %v1032_v5 = vshll.u32 %v1630_v62, 16 }
  0x39   : > { %v1036_v6 = vshrl.u32 %v1630_v62, 16  ;;  %v1021_v7 = vsel %vm1810_vm3, %v1016_v58, %v1020_v56  ;;  %v360_v8 = vrot.slane %v358_v59, 5  ;;  %v366_v9 = vrot.slane %v364_v60, 5  ;;  %v251_v60 = vld [vmem:[%s1795_s29 + $0x44] sm:$0x1] }
  0x3a   : > { %v370_v10 = vrot.slane %v368_v61, 4  ;;  %v1151_v12 = vunpack.c.l.b16 %v1011_v3  ;;  %v1025_v13 = vrot.slane %v1023_v2, 4  ;;  %v1152_v14 = vunpack.c.l.b16 %v1021_v7 }
  0x3b   : > { %v1028_v15 = vrot.slane %v1026_v4, 5  ;;  %v1034_v16 = vrot.slane %v1032_v5, 5  ;;  %v1038_v17 = vrot.slane %v1036_v6, 4  ;;  %v498_v18 = vpack.c.b16 %v484_v0, %v483_v63  ;;  %v1634_v5 = vld [vmem:[%s1795_s29 + $0x50] sm:$0x1] }
  0x3c   : > { %v361_v19 = vor.u32 %v360_v8, %v357_v1  ;;  %v371_v20 = vor.u32 %v370_v10, %v366_v9  ;;  %v374_v21 = vshll.u32 %v250_v11, 16  ;;  %v1166_v23 = vpack.c.b16 %v1152_v14, %v1151_v12  ;;  %v1677_v8 = vld [vmem:[%s1795_s29 + $0x48] sm:$0xff]  ;;  %v1666_v10 = vld [vmem:[%s1795_s29 + $0x3c] sm:$0xff] }
  0x3d   : > { %v1029_v25 = vor.u32 %v1028_v15, %v1025_v13  ;;  %v1039_v26 = vor.u32 %v1038_v17, %v1034_v16  ;;  %v1042_v28 = vshll.u32 %v1631_v22, 16  ;;  %v379_v41 = vshrl.u32 %v236_v33, 16  ;;  %v239_v13 = vld [vmem:[%s1795_s29 + $0x4c] sm:$0xf]  ;;  %v1635_v22 = vld [vmem:[%s1795_s29 + $0x54] sm:$0xf] }
  0x3e   : > { %v362_v30 = vrot.slane %v361_v19, 4  ;;  %v372_v31 = vrot.slane %v371_v20, 4  ;;  %v376_v32 = vrot.slane %v374_v21, 5  ;;  %v382_v42 = vshll.u32 %v236_v33, 16 }
  0x3f   : > { %1492 = vmatmul.msk.bf16.gmra.mxu0 %vm510_vm0, %v497_v38  ;;  %v1030_v36 = vrot.slane %v1029_v25, 4  ;;  %v1040_v37 = vrot.slane %v1039_v26, 4  ;;  %v1044_v38 = vrot.slane %v1042_v28, 5  ;;  %v1047_v46 = vshrl.u32 %v1632_v35, 16 }
  0x40   : > { %v367_v39 = vsel %vm1810_vm3, %v362_v30, %v366_v9  ;;  %v377_v40 = vsel %vm1810_vm3, %v372_v31, %v376_v32  ;;  %v1050_v47 = vshll.u32 %v1632_v35, 16  ;;  %v381_v52 = vrot.slane %v379_v41, 4  ;;  %v238_v9 = vld [vmem:[%s1795_s29 + $0x48] sm:$0xf]  ;;  %v252_v41 = vld [vmem:[%s1795_s29 + $0x50] sm:$0x1] }
  0x41   : > { %1611 = vmatmul.msk.bf16.gmra.mxu2 %vm510_vm0, %v1675_v44  ;;  %1542 = vmatmul.msk.bf16.gmra.mxu1 %vm510_vm0, %v1664_v49  ;;  %v392_v44 = vshrl.u32 %v237_v34, 16  ;;  %v485_v48 = vunpack.c.l.b16 %v367_v39  ;;  %v486_v49 = vunpack.c.l.b16 %v377_v40  ;;  %v1035_v50 = vsel %vm1810_vm3, %v1030_v36, %v1034_v16 }
  0x42   : > { %1652 = vmatmul.msk.bf16.gmra.mxu3 %vm510_vm0, %v1165_v43  ;;  %v388_v43 = vshll.u32 %v237_v34, 16  ;;  %v1045_v51 = vsel %vm1810_vm3, %v1040_v37, %v1044_v38  ;;  %v384_v53 = vrot.slane %v382_v42, 5  ;;  %v1056_v54 = vshll.u32 %v1633_v45, 16 }
  0x43   : > { %v1060_v55 = vshrl.u32 %v1633_v45, 16  ;;  %v394_v57 = vrot.slane %v392_v44, 4  ;;  %v1049_v58 = vrot.slane %v1047_v46, 4  ;;  %v1052_v59 = vrot.slane %v1050_v47, 5 }
  0x44   : > { %v390_v56 = vrot.slane %v388_v43, 5  ;;  %v1153_v61 = vunpack.c.l.b16 %v1035_v50  ;;  %v1154_v62 = vunpack.c.l.b16 %v1045_v51  ;;  %v499_v63 = vpack.c.b16 %v486_v49, %v485_v48  ;;  %v1637_v51 = vld [vmem:[%s1795_s29 + $0x5c] sm:$0x1] }
  0x45   : > { %v1058_v0 = vrot.slane %v1056_v54, 5  ;;  %v1062_v1 = vrot.slane %v1060_v55, 4  ;;  %v385_v2 = vor.u32 %v384_v53, %v381_v52  ;;  %v398_v4 = vshll.u32 %v251_v60, 16 }
  0x46   : > { %v395_v3 = vor.u32 %v394_v57, %v390_v56  ;;  %v1053_v6 = vor.u32 %v1052_v59, %v1049_v58  ;;  %v1167_v7 = vpack.c.b16 %v1154_v62, %v1153_v61  ;;  %v1066_v12 = vshll.u32 %v1634_v5, 16  ;;  %v1678_v57 = vld [vmem:[%s1795_s29 + $0x54] sm:$0xff]  ;;  %v1667_v61 = vld [vmem:[%s1795_s29 + $0x48] sm:$0xff] }
  0x47   : > { %v1063_v11 = vor.u32 %v1062_v1, %v1058_v0  ;;  %v386_v14 = vrot.slane %v385_v2, 4  ;;  %v400_v16 = vrot.slane %v398_v4, 5  ;;  %v406_v19 = vshll.u32 %v238_v9, 16  ;;  %v240_v62 = vld [vmem:[%s1795_s29 + $0x54] sm:$0xf] }
  0x48   : > { %v396_v15 = vrot.slane %v395_v3, 4  ;;  %v1054_v17 = vrot.slane %v1053_v6, 4  ;;  %v412_v20 = vshll.u32 %v239_v13, 16  ;;  %v416_v21 = vshrl.u32 %v239_v13, 16 }
  0x49   : > { %v1068_v25 = vrot.slane %v1066_v12, 5  ;;  %v391_v26 = vsel %vm1810_vm3, %v386_v14, %v390_v56  ;;  %v1071_v30 = vshrl.u32 %v1635_v22, 16  ;;  %v1074_v31 = vshll.u32 %v1635_v22, 16 }
  0x4a   : > { %v401_v28 = vsel %vm1810_vm3, %v396_v15, %v400_v16  ;;  %v408_v35 = vrot.slane %v406_v19, 5  ;;  %v414_v36 = vrot.slane %v412_v20, 5  ;;  %v418_v37 = vrot.slane %v416_v21, 4 }
  0x4b   : > { %v487_v38 = vunpack.c.l.b16 %v391_v26  ;;  %v488_v39 = vunpack.c.l.b16 %v401_v28  ;;  %v1073_v43 = vrot.slane %v1071_v30, 4  ;;  %v1076_v44 = vrot.slane %v1074_v31, 5 }
  0x4c   : > { %v419_v49 = vor.u32 %v418_v37, %v414_v36  ;;  %v422_v50 = vshll.u32 %v252_v41, 16  ;;  %v1090_v55 = vshll.u32 %v1637_v51, 16  ;;  %v427_v5 = vshrl.u32 %v240_v62, 16  ;;  %v1679_v37 = vld [vmem:[%s1795_s29 + $0x60] sm:$0xff]  ;;  %v1668_v41 = vld [vmem:[%s1795_s29 + $0x54] sm:$0xff] }
  0x4d   : > { %v500_v52 = vpack.c.b16 %v488_v39, %v487_v38  ;;  %v1077_v53 = vor.u32 %v1076_v44, %v1073_v43  ;;  %v430_v6 = vshll.u32 %v240_v62, 16 }
  0x4e   : > { %v420_v59 = vrot.slane %v419_v49, 4  ;;  %v424_v60 = vrot.slane %v422_v50, 5  ;;  %v1092_v2 = vrot.slane %v1090_v55, 5  ;;  %v429_v19 = vrot.slane %v427_v5, 4 }
  0x4f   : > { %1493 = vmatmul.msk.bf16.gmra.mxu0 %vm510_vm0, %v498_v18  ;;  %v403_v18 = vshrl.u32 %v238_v9, 16  ;;  %v1638_v9 = vld [vmem:[%s1795_s29 + $0x60] sm:$0xf]  ;;  %v432_v20 = vrot.slane %v430_v6, 5  ;;  %v254_v6 = vld [vmem:[%s1795_s29 + $0x68] sm:$0x1] }
  0x50   : > { %v425_v4 = vsel %vm1810_vm3, %v420_v59, %v424_v60  ;;  %v1095_v15 = vshrl.u32 %v1638_v9, 16  ;;  %v1098_v16 = vshll.u32 %v1638_v9, 16 }
  0x51   : > { %1612 = vmatmul.msk.bf16.gmra.mxu2 %vm510_vm0, %v1676_v24  ;;  %1543 = vmatmul.msk.bf16.gmra.mxu1 %vm510_vm0, %v1665_v29  ;;  %v1064_v24 = vrot.slane %v1063_v11, 4  ;;  %v1059_v29 = vsel %vm1810_vm3, %v1054_v17, %v1058_v0  ;;  %v405_v34 = vrot.slane %v403_v18, 4  ;;  %v1078_v0 = vrot.slane %v1077_v53, 4 }
  0x52   : > { %1653 = vmatmul.msk.bf16.gmra.mxu3 %vm510_vm0, %v1166_v23  ;;  %v1636_v23 = vld [vmem:[%s1795_s29 + $0x58] sm:$0xf]  ;;  %v1155_v42 = vunpack.c.l.b16 %v1059_v29  ;;  %v490_v12 = vunpack.c.l.b16 %v425_v4  ;;  %v1097_v26 = vrot.slane %v1095_v15, 4  ;;  %v1100_v28 = vrot.slane %v1098_v16, 5 }
  0x53   : > { %v1080_v32 = vshll.u32 %v1636_v23, 16  ;;  %v1084_v33 = vshrl.u32 %v1636_v23, 16  ;;  %v1069_v40 = vsel %vm1810_vm3, %v1064_v24, %v1068_v25  ;;  %v409_v48 = vor.u32 %v408_v35, %v405_v34  ;;  %v253_v23 = vld [vmem:[%s1795_s29 + $0x5c] sm:$0x1]  ;;  %v1640_v35 = vld [vmem:[%s1795_s29 + $0x68] sm:$0x1] }
  0x54   : > { %v1156_v47 = vunpack.c.l.b16 %v1069_v40  ;;  %v446_v34 = vshll.u32 %v253_v23, 16  ;;  %v1101_v38 = vor.u32 %v1100_v28, %v1097_v26  ;;  %v1114_v40 = vshll.u32 %v1640_v35, 16 }
  0x55   : > { %v1082_v45 = vrot.slane %v1080_v32, 5  ;;  %v1086_v46 = vrot.slane %v1084_v33, 4  ;;  %v410_v58 = vrot.slane %v409_v48, 4  ;;  %v433_v32 = vor.u32 %v432_v20, %v429_v19  ;;  %v1680_v19 = vld [vmem:[%s1795_s29 + $0x6c] sm:$0xff] }
  0x56   : > { %v1168_v56 = vpack.c.b16 %v1156_v47, %v1155_v42  ;;  %v448_v44 = vrot.slane %v446_v34, 5  ;;  %v1102_v47 = vrot.slane %v1101_v38, 4  ;;  %v1116_v49 = vrot.slane %v1114_v40, 5 }
  0x57   : > { %v1087_v54 = vor.u32 %v1086_v46, %v1082_v45  ;;  %v415_v3 = vsel %vm1810_vm3, %v410_v58, %v414_v36  ;;  %v1083_v13 = vsel %vm1810_vm3, %v1078_v0, %v1082_v45  ;;  %v434_v42 = vrot.slane %v433_v32, 4  ;;  %v242_v45 = vld [vmem:[%s1795_s29 + $0x60] sm:$0xf]  ;;  %v243_v46 = vld [vmem:[%s1795_s29 + $0x64] sm:$0xf] }
  0x58   : > { %v489_v11 = vunpack.c.l.b16 %v415_v3  ;;  %v1157_v24 = vunpack.c.l.b16 %v1083_v13  ;;  %v451_v53 = vshrl.u32 %v242_v45, 16  ;;  %v460_v55 = vshll.u32 %v243_v46, 16 }
  0x59   : > { %v1088_v1 = vrot.slane %v1087_v54, 4  ;;  %v454_v54 = vshll.u32 %v242_v45, 16  ;;  %v470_v16 = vshll.u32 %v254_v6, 16 }
  0x5a   : > { %v501_v31 = vpack.c.b16 %v490_v12, %v489_v11  ;;  %v462_v4 = vrot.slane %v460_v55, 5 }
  0x5b   : > { %v1093_v14 = vsel %vm1810_vm3, %v1088_v1, %v1092_v2  ;;  %v453_v2 = vrot.slane %v451_v53, 4  ;;  %v456_v3 = vrot.slane %v454_v54, 5  ;;  %v472_v28 = vrot.slane %v470_v16, 5 }
  0x5c   : > { %v1158_v25 = vunpack.c.l.b16 %v1093_v14 }
  0x5d   : > { %v457_v14 = vor.u32 %v456_v3, %v453_v2 }
  0x5e   : > { %v1169_v36 = vpack.c.b16 %v1158_v25, %v1157_v24 }
  0x5f   : > { %1494 = vmatmul.msk.bf16.gmra.mxu0 %vm510_vm0, %v499_v63  ;;  %v241_v63 = vld [vmem:[%s1795_s29 + $0x58] sm:$0xf]  ;;  %v458_v25 = vrot.slane %v457_v14, 4 }
  0x61   : > { %1613 = vmatmul.msk.bf16.gmra.mxu2 %vm510_vm0, %v1677_v8  ;;  %1544 = vmatmul.msk.bf16.gmra.mxu1 %vm510_vm0, %v1666_v10  ;;  %v440_v8 = vshrl.u32 %v241_v63, 16  ;;  %v1639_v10 = vld [vmem:[%s1795_s29 + $0x64] sm:$0xf]  ;;  %v463_v32 = vsel %vm1810_vm3, %v458_v25, %v462_v4 }
  0x62   : > { %1654 = vmatmul.msk.bf16.gmra.mxu3 %vm510_vm0, %v1167_v7  ;;  %v436_v7 = vshll.u32 %v241_v63, 16  ;;  %v1104_v17 = vshll.u32 %v1639_v10, 16  ;;  %v1108_v18 = vshrl.u32 %v1639_v10, 16 }
  0x63   : > { %v442_v22 = vrot.slane %v440_v8, 4 }
  0x64   : > { %v438_v21 = vrot.slane %v436_v7, 5  ;;  %v1106_v29 = vrot.slane %v1104_v17, 5  ;;  %v1110_v30 = vrot.slane %v1108_v18, 4  ;;  %v1643_v17 = vld [vmem:[%s1795_s29 + $0x74] sm:$0x1] }
  0x65   : > { %v1138_v24 = vshll.u32 %v1643_v17, 16 }
  0x66   : > { %v443_v33 = vor.u32 %v442_v22, %v438_v21  ;;  %v1111_v39 = vor.u32 %v1110_v30, %v1106_v29  ;;  %v439_v50 = vsel %vm1810_vm3, %v434_v42, %v438_v21  ;;  %v1107_v60 = vsel %vm1810_vm3, %v1102_v47, %v1106_v29  ;;  %v1669_v21 = vld [vmem:[%s1795_s29 + $0x60] sm:$0xff] }
  0x67   : > { %v491_v58 = vunpack.c.l.b16 %v439_v50  ;;  %v1159_v8 = vunpack.c.l.b16 %v1107_v60 }
  0x68   : > { %v444_v43 = vrot.slane %v443_v33, 4  ;;  %v1112_v48 = vrot.slane %v1111_v39, 4 }
  0x6a   : > { %v449_v51 = vsel %vm1810_vm3, %v444_v43, %v448_v44 }
  0x6b   : > { %v492_v59 = vunpack.c.l.b16 %v449_v51 }
  0x6d   : > { %v502_v7 = vpack.c.b16 %v492_v59, %v491_v58 }
  0x6f   : > { %1495 = vmatmul.msk.bf16.gmra.mxu0 %vm510_vm0, %v500_v52  ;;  %v1641_v52 = vld [vmem:[%s1795_s29 + $0x6c] sm:$0xf] }
  0x70   : > { %v1119_v62 = vshrl.u32 %v1641_v52, 16  ;;  %v1122_v63 = vshll.u32 %v1641_v52, 16 }
  0x71   : > { %1614 = vmatmul.msk.bf16.gmra.mxu2 %vm510_vm0, %v1678_v57  ;;  %1545 = vmatmul.msk.bf16.gmra.mxu1 %vm510_vm0, %v1667_v61  ;;  %v1642_v57 = vld [vmem:[%s1795_s29 + $0x70] sm:$0xf]  ;;  %v1117_v61 = vsel %vm1810_vm3, %v1112_v48, %v1116_v49  ;;  %v1986_v49 = vld [vmem:[%s2059_s2] ss:$0 sm:$0xff] }
  0x72   : > { %1655 = vmatmul.msk.bf16.gmra.mxu3 %vm510_vm0, %v1168_v56  ;;  %v464_v56 = vshrl.u32 %v243_v46, 16  ;;  %v1128_v0 = vshll.u32 %v1642_v57, 16  ;;  %v1132_v1 = vshrl.u32 %v1642_v57, 16  ;;  %v1160_v9 = vunpack.c.l.b16 %v1117_v61 }
  0x73   : > { %v1121_v10 = vrot.slane %v1119_v62, 4  ;;  %v1124_v11 = vrot.slane %v1122_v63, 5 }
  0x74   : > { %v466_v5 = vrot.slane %v464_v56, 4  ;;  %v1130_v12 = vrot.slane %v1128_v0, 5  ;;  %v1134_v13 = vrot.slane %v1132_v1, 4  ;;  %v1170_v18 = vpack.c.b16 %v1160_v9, %v1159_v8 }
  0x75   : > { %v1125_v22 = vor.u32 %v1124_v11, %v1121_v10 }
  0x76   : > { %v467_v15 = vor.u32 %v466_v5, %v462_v4  ;;  %v1135_v23 = vor.u32 %v1134_v13, %v1130_v12 }
  0x77   : > { %v1126_v29 = vrot.slane %v1125_v22, 4 }
  0x78   : > { %v468_v26 = vrot.slane %v467_v15, 4  ;;  %v1136_v30 = vrot.slane %v1135_v23, 4 }
  0x79   : > { %v1131_v38 = vsel %vm1810_vm3, %v1126_v29, %v1130_v12 }
  0x7a   : > { %v473_v33 = vsel %vm1810_vm3, %v468_v26, %v472_v28  ;;  %v1161_v40 = vunpack.c.l.b16 %v1131_v38 }
  0x7f   : > { %1496 = vmatmul.msk.bf16.gmra.mxu0 %vm510_vm0, %v501_v31  ;;  %v1140_v31 = vrot.slane %v1138_v24, 5 }
  0x81   : > { %1615 = vmatmul.msk.bf16.gmra.mxu2 %vm510_vm0, %v1679_v37  ;;  %1546 = vmatmul.msk.bf16.gmra.mxu1 %vm510_vm0, %v1668_v41  ;;  %v494_v37 = vunpack.c.l.b16 %v473_v33  ;;  %v1141_v39 = vsel %vm1810_vm3, %v1136_v30, %v1140_v31 }
  0x82   : > { %1656 = vmatmul.msk.bf16.gmra.mxu3 %vm510_vm0, %v1169_v36  ;;  %v493_v36 = vunpack.c.l.b16 %v463_v32  ;;  %v1162_v41 = vunpack.c.l.b16 %v1141_v39 }
  0x84   : > { %v503_v42 = vpack.c.b16 %v494_v37, %v493_v36  ;;  %v1171_v46 = vpack.c.b16 %v1162_v41, %v1161_v40 }
  0x8e   : > { %v679_v20 = vpop.f32.mrf.mxu1 }
  0x8f   : > { %1497 = vmatmul.msk.bf16.gmra.mxu0 %vm510_vm0, %v502_v7 }
  0x91   : > { %1616 = vmatmul.msk.bf16.gmra.mxu2 %vm510_vm0, %v1680_v19  ;;  %1547 = vmatmul.msk.bf16.gmra.mxu1 %vm510_vm0, %v1669_v21 }
  0x92   : > { %1657 = vmatmul.msk.bf16.gmra.mxu3 %vm510_vm0, %v1170_v18 }
  0x94   : > { %v836_v34 = vpop.f32.mrf.mxu2 }
  0x96   : > { %v681_v35 = vpop.f32.mrf.mxu1 }
  0x9c   : > { %v547_v43 = vpop.f32.mrf.mxu0  ;;  %v838_v44 = vpop.f32.mrf.mxu2 }
  0x9d   : > { %v680_v45 = vadd.f32 %v679_v20, %v547_v43 }
  0x9e   : > { %v684_v47 = vpop.f32.mrf.mxu1 }
  0x9f   : > { %1498 = vmatmul.msk.bf16.gmra.mxu0 %vm510_vm0, %v503_v42  ;;  %v881_v48 = vadd.f32 %v836_v34, %v680_v45 }
  0xa2   : > { %1658 = vmatmul.msk.bf16.gmra.mxu3 %vm510_vm0, %v1171_v46 }
  0xa4   : > { %v549_v27 = vpop.f32.mrf.mxu0  ;;  %v841_v51 = vpop.f32.mrf.mxu2 }
  0xa5   : > { %v1214_v50 = vpop.f32.mrf.mxu3  ;;  %v682_v54 = vadd.f32 %v681_v35, %v549_v27 }
  0xa6   : > { %v1259_v52 = vadd.f32 %v1214_v50, %v881_v48  ;;  %v686_v55 = vpop.f32.mrf.mxu1 }
  0xa7   : > { %v882_v58 = vadd.f32 %v838_v44, %v682_v54 }
  0xa8   : > { %v1281_v53 = vadd.f32 %v1986_v49, %v1259_v52 }
  0xaa   : > { %vm1299_vm4 = vcmp.ge.f32.partialorder %v1281_v53, 0.0  ;;  %v1317_v56 = vmul.f32 0.2, %v1281_v53 }
  0xac   : > { %v1335_v57 = vsel %vm1299_vm4, %v1281_v53, %v1317_v56  ;;  %v552_v59 = vpop.f32.mrf.mxu0  ;;  %v843_v62 = vpop.f32.mrf.mxu2 }
  0xad   : > { %v1353_v60 = vpack.c.bf16 %v1335_v57, %v1335_v57  ;;  %v1216_v61 = vpop.f32.mrf.mxu3  ;;  %v685_v0 = vadd.f32 %v684_v47, %v552_v59 }
  0xae   : > { %v1260_v63 = vadd.f32 %v1216_v61, %v882_v58  ;;  %v689_v2 = vpop.f32.mrf.mxu1 }
  0xaf   : > { %1372 = vst.msk [vmem:[%s1993_s9] sm:$0xf] %vm1371_vm5, %v1353_v60  ;;  %v883_v4 = vadd.f32 %v841_v51, %v685_v0 }
  0xb0   : > { %v1282_v1 = vadd.f32 %v1986_v49, %v1260_v63 }
  0xb2   : > { %vm1300_vm6 = vcmp.ge.f32.partialorder %v1282_v1, 0.0  ;;  %v1318_v3 = vmul.f32 0.2, %v1282_v1 }
  0xb4   : > { %v1336_v5 = vsel %vm1300_vm6, %v1282_v1, %v1318_v3  ;;  %v554_v6 = vpop.f32.mrf.mxu0  ;;  %v846_v9 = vpop.f32.mrf.mxu2 }
  0xb5   : > { %v1354_v7 = vpack.c.bf16 %v1336_v5, %v1336_v5  ;;  %v1219_v8 = vpop.f32.mrf.mxu3  ;;  %v687_v12 = vadd.f32 %v686_v55, %v554_v6 }
  0xb6   : > { %v1261_v10 = vadd.f32 %v1219_v8, %v883_v4  ;;  %v691_v13 = vpop.f32.mrf.mxu1 }
  0xb7   : > { %1373 = vst.msk [vmem:[%s1993_s9 + $0x4] sm:$0xf] %vm1371_vm5, %v1354_v7  ;;  %v884_v16 = vadd.f32 %v843_v62, %v687_v12 }
  0xb8   : > { %v1283_v11 = vadd.f32 %v1986_v49, %v1261_v10 }
  0xba   : > { %vm1301_vm7 = vcmp.ge.f32.partialorder %v1283_v11, 0.0  ;;  %v1319_v14 = vmul.f32 0.2, %v1283_v11 }
  0xbc   : > { %v1337_v15 = vsel %vm1301_vm7, %v1283_v11, %v1319_v14  ;;  %v557_v17 = vpop.f32.mrf.mxu0  ;;  %v848_v20 = vpop.f32.mrf.mxu2 }
  0xbd   : > { %v1355_v18 = vpack.c.bf16 %v1337_v15, %v1337_v15  ;;  %v1221_v19 = vpop.f32.mrf.mxu3  ;;  %v690_v22 = vadd.f32 %v689_v2, %v557_v17 }
  0xbe   : > { %v1262_v21 = vadd.f32 %v1221_v19, %v884_v16  ;;  %v694_v24 = vpop.f32.mrf.mxu1 }
  0xbf   : > { %1374 = vst.msk [vmem:[%s1993_s9 + $0x8] sm:$0xf] %vm1371_vm5, %v1355_v18  ;;  %v885_v26 = vadd.f32 %v846_v9, %v690_v22 }
  0xc0   : > { %v1284_v23 = vadd.f32 %v1986_v49, %v1262_v21 }
  0xc2   : > { %vm1302_vm8 = vcmp.ge.f32.partialorder %v1284_v23, 0.0  ;;  %v1320_v25 = vmul.f32 0.2, %v1284_v23 }
  0xc4   : > { %v1338_v28 = vsel %vm1302_vm8, %v1284_v23, %v1320_v25  ;;  %v559_v29 = vpop.f32.mrf.mxu0  ;;  %v851_v32 = vpop.f32.mrf.mxu2 }
  0xc5   : > { %v1356_v30 = vpack.c.bf16 %v1338_v28, %v1338_v28  ;;  %v1224_v31 = vpop.f32.mrf.mxu3  ;;  %v692_v35 = vadd.f32 %v691_v13, %v559_v29 }
  0xc6   : > { %v1263_v33 = vadd.f32 %v1224_v31, %v885_v26  ;;  %v696_v36 = vpop.f32.mrf.mxu1 }
  0xc7   : > { %1375 = vst.msk [vmem:[%s1993_s9 + $0xc] sm:$0xf] %vm1371_vm5, %v1356_v30  ;;  %v886_v39 = vadd.f32 %v848_v20, %v692_v35 }
  0xc8   : > { %v1285_v34 = vadd.f32 %v1986_v49, %v1263_v33 }
  0xca   : > { %vm1303_vm9 = vcmp.ge.f32.partialorder %v1285_v34, 0.0  ;;  %v1321_v37 = vmul.f32 0.2, %v1285_v34 }
  0xcc   : > { %v1339_v38 = vsel %vm1303_vm9, %v1285_v34, %v1321_v37  ;;  %v562_v40 = vpop.f32.mrf.mxu0  ;;  %v853_v43 = vpop.f32.mrf.mxu2 }
  0xcd   : > { %v1357_v41 = vpack.c.bf16 %v1339_v38, %v1339_v38  ;;  %v1226_v42 = vpop.f32.mrf.mxu3  ;;  %v695_v45 = vadd.f32 %v694_v24, %v562_v40 }
  0xce   : > { %v1264_v44 = vadd.f32 %v1226_v42, %v886_v39  ;;  %v699_v47 = vpop.f32.mrf.mxu1 }
  0xcf   : > { %1376 = vst.msk [vmem:[%s1993_s9 + $0x10] sm:$0xf] %vm1371_vm5, %v1357_v41  ;;  %v887_v27 = vadd.f32 %v851_v32, %v695_v45 }
  0xd0   : > { %v1286_v46 = vadd.f32 %v1986_v49, %v1264_v44 }
  0xd2   : > { %vm1304_vm10 = vcmp.ge.f32.partialorder %v1286_v46, 0.0  ;;  %v1322_v48 = vmul.f32 0.2, %v1286_v46 }
  0xd4   : > { %v1340_v50 = vsel %vm1304_vm10, %v1286_v46, %v1322_v48  ;;  %v564_v51 = vpop.f32.mrf.mxu0  ;;  %v856_v54 = vpop.f32.mrf.mxu2 }
  0xd5   : > { %v1358_v52 = vpack.c.bf16 %v1340_v50, %v1340_v50  ;;  %v1229_v53 = vpop.f32.mrf.mxu3  ;;  %v697_v57 = vadd.f32 %v696_v36, %v564_v51 }
  0xd6   : > { %v1265_v55 = vadd.f32 %v1229_v53, %v887_v27  ;;  %v701_v58 = vpop.f32.mrf.mxu1 }
  0xd7   : > { %1377 = vst.msk [vmem:[%s1993_s9 + $0x14] sm:$0xf] %vm1371_vm5, %v1358_v52  ;;  %v888_v61 = vadd.f32 %v853_v43, %v697_v57 }
  0xd8   : > { %v1287_v56 = vadd.f32 %v1986_v49, %v1265_v55 }
  0xda   : > { %vm1305_vm11 = vcmp.ge.f32.partialorder %v1287_v56, 0.0  ;;  %v1323_v59 = vmul.f32 0.2, %v1287_v56 }
  0xdc   : > { %v1341_v60 = vsel %vm1305_vm11, %v1287_v56, %v1323_v59  ;;  %v567_v62 = vpop.f32.mrf.mxu0  ;;  %v858_v1 = vpop.f32.mrf.mxu2 }
  0xdd   : > { %v1359_v63 = vpack.c.bf16 %v1341_v60, %v1341_v60  ;;  %v1231_v0 = vpop.f32.mrf.mxu3  ;;  %v700_v3 = vadd.f32 %v699_v47, %v567_v62 }
  0xde   : > { %v1266_v2 = vadd.f32 %v1231_v0, %v888_v61  ;;  %v704_v5 = vpop.f32.mrf.mxu1 }
  0xdf   : > { %1378 = vst.msk [vmem:[%s1993_s9 + $0x18] sm:$0xf] %vm1371_vm5, %v1359_v63  ;;  %v889_v7 = vadd.f32 %v856_v54, %v700_v3 }
  0xe0   : > { %v1288_v4 = vadd.f32 %v1986_v49, %v1266_v2 }
  0xe2   : > { %vm1306_vm12 = vcmp.ge.f32.partialorder %v1288_v4, 0.0  ;;  %v1324_v6 = vmul.f32 0.2, %v1288_v4 }
  0xe4   : > { %v1342_v8 = vsel %vm1306_vm12, %v1288_v4, %v1324_v6  ;;  %v569_v9 = vpop.f32.mrf.mxu0  ;;  %v861_v12 = vpop.f32.mrf.mxu2 }
  0xe5   : > { %v1360_v10 = vpack.c.bf16 %v1342_v8, %v1342_v8  ;;  %v1234_v11 = vpop.f32.mrf.mxu3  ;;  %v702_v15 = vadd.f32 %v701_v58, %v569_v9 }
  0xe6   : > { %v1267_v13 = vadd.f32 %v1234_v11, %v889_v7  ;;  %v706_v17 = vpop.f32.mrf.mxu1 }
  0xe7   : > { %1379 = vst.msk [vmem:[%s1993_s9 + $0x1c] sm:$0xf] %vm1371_vm5, %v1360_v10  ;;  %v890_v19 = vadd.f32 %v858_v1, %v702_v15 }
  0xe8   : > { %v1289_v14 = vadd.f32 %v1986_v49, %v1267_v13 }
  0xea   : > { %vm1307_vm13 = vcmp.ge.f32.partialorder %v1289_v14, 0.0  ;;  %v1325_v16 = vmul.f32 0.2, %v1289_v14 }
  0xec   : > { %v1343_v18 = vsel %vm1307_vm13, %v1289_v14, %v1325_v16  ;;  %v572_v20 = vpop.f32.mrf.mxu0  ;;  %v863_v25 = vpop.f32.mrf.mxu2 }
  0xed   : > { %v1361_v21 = vpack.c.bf16 %v1343_v18, %v1343_v18  ;;  %v1236_v22 = vpop.f32.mrf.mxu3  ;;  %v705_v24 = vadd.f32 %v704_v5, %v572_v20 }
  0xee   : > { %v1268_v23 = vadd.f32 %v1236_v22, %v890_v19  ;;  %v709_v34 = vpop.f32.mrf.mxu1 }
  0xef   : > { %1380 = vst.msk [vmem:[%s1993_s9 + $0x20] sm:$0xf] %vm1371_vm5, %v1361_v21  ;;  %v891_v29 = vadd.f32 %v861_v12, %v705_v24 }
  0xf0   : > { %v1290_v26 = vadd.f32 %v1986_v49, %v1268_v23 }
  0xf2   : > { %vm1308_vm14 = vcmp.ge.f32.partialorder %v1290_v26, 0.0  ;;  %v1326_v28 = vmul.f32 0.2, %v1290_v26 }
  0xf4   : > { %v1344_v30 = vsel %vm1308_vm14, %v1290_v26, %v1326_v28  ;;  %v574_v31 = vpop.f32.mrf.mxu0  ;;  %v866_v38 = vpop.f32.mrf.mxu2 }
  0xf5   : > { %v1362_v32 = vpack.c.bf16 %v1344_v30, %v1344_v30  ;;  %v1239_v33 = vpop.f32.mrf.mxu3  ;;  %v707_v37 = vadd.f32 %v706_v17, %v574_v31 }
  0xf6   : > { %v1269_v35 = vadd.f32 %v1239_v33, %v891_v29  ;;  %v711_v47 = vpop.f32.mrf.mxu1 }
  0xf7   : > { %1381 = vst.msk [vmem:[%s1993_s9 + $0x24] sm:$0xf] %vm1371_vm5, %v1362_v32  ;;  %v892_v41 = vadd.f32 %v863_v25, %v707_v37 }
  0xf8   : > { %v1291_v36 = vadd.f32 %v1986_v49, %v1269_v35 }
  0xfa   : > { %vm1309_vm15 = vcmp.ge.f32.partialorder %v1291_v36, 0.0  ;;  %v1327_v39 = vmul.f32 0.2, %v1291_v36 }
  0xfc   : > { %v1345_v40 = vsel %vm1309_vm15, %v1291_v36, %v1327_v39  ;;  %v577_v42 = vpop.f32.mrf.mxu0  ;;  %v868_v51 = vpop.f32.mrf.mxu2 }
  0xfd   : > { %v1363_v43 = vpack.c.bf16 %v1345_v40, %v1345_v40  ;;  %v1241_v44 = vpop.f32.mrf.mxu3  ;;  %v710_v46 = vadd.f32 %v709_v34, %v577_v42 }
  0xfe   : > { %v1270_v45 = vadd.f32 %v1241_v44, %v892_v41  ;;  %v714_v59 = vpop.f32.mrf.mxu1 }
  0xff   : > { %1382 = vst.msk [vmem:[%s1993_s9 + $0x28] sm:$0xf] %vm1371_vm5, %v1363_v43  ;;  %v893_v50 = vadd.f32 %v866_v38, %v710_v46 }
 0x100   : > { %v1292_v48 = vadd.f32 %v1986_v49, %v1270_v45 }
 0x102   : > { %vm1310_vm0 = vcmp.ge.f32.partialorder %v1292_v48, 0.0  ;;  %v1328_v27 = vmul.f32 0.2, %v1292_v48 }
 0x104   : > { %v1346_v52 = vsel %vm1310_vm0, %v1292_v48, %v1328_v27  ;;  %v579_v53 = vpop.f32.mrf.mxu0  ;;  %v871_v1 = vpop.f32.mrf.mxu2 }
 0x105   : > { %v1364_v54 = vpack.c.bf16 %v1346_v52, %v1346_v52  ;;  %v1244_v55 = vpop.f32.mrf.mxu3  ;;  %v712_v58 = vadd.f32 %v711_v47, %v579_v53 }
 0x106   : > { %v1271_v56 = vadd.f32 %v1244_v55, %v893_v50  ;;  %v716_v8 = vpop.f32.mrf.mxu1 }
 0x107   : > { %1383 = vst.msk [vmem:[%s1993_s9 + $0x2c] sm:$0xf] %vm1371_vm5, %v1364_v54  ;;  %v894_v62 = vadd.f32 %v868_v51, %v712_v58 }
 0x108   : > { %v1293_v57 = vadd.f32 %v1986_v49, %v1271_v56 }
 0x10a   : > { %vm1311_vm1 = vcmp.ge.f32.partialorder %v1293_v57, 0.0  ;;  %v1329_v60 = vmul.f32 0.2, %v1293_v57 }
 0x10c   : > { %v1347_v61 = vsel %vm1311_vm1, %v1293_v57, %v1329_v60  ;;  %v582_v63 = vpop.f32.mrf.mxu0  ;;  %v873_v14 = vpop.f32.mrf.mxu2 }
 0x10d   : > { %v1365_v0 = vpack.c.bf16 %v1347_v61, %v1347_v61  ;;  %v1246_v2 = vpop.f32.mrf.mxu3  ;;  %v715_v4 = vadd.f32 %v714_v59, %v582_v63 }
 0x10e   : > { %v1272_v3 = vadd.f32 %v1246_v2, %v894_v62  ;;  %v719_v22 = vpop.f32.mrf.mxu1 }
 0x10f   : > { %1384 = vst.msk [vmem:[%s1993_s9 + $0x30] sm:$0xf] %vm1371_vm5, %v1365_v0  ;;  %v895_v7 = vadd.f32 %v871_v1, %v715_v4 }
 0x110   : > { %v1294_v5 = vadd.f32 %v1986_v49, %v1272_v3 }
 0x112   : > { %vm1312_vm2 = vcmp.ge.f32.partialorder %v1294_v5, 0.0  ;;  %v1330_v6 = vmul.f32 0.2, %v1294_v5 }
 0x114   : > { %v1348_v9 = vsel %vm1312_vm2, %v1294_v5, %v1330_v6  ;;  %v584_v10 = vpop.f32.mrf.mxu0  ;;  %v876_v28 = vpop.f32.mrf.mxu2 }
 0x115   : > { %v1366_v11 = vpack.c.bf16 %v1348_v9, %v1348_v9  ;;  %v1249_v12 = vpop.f32.mrf.mxu3  ;;  %v717_v16 = vadd.f32 %v716_v8, %v584_v10 }
 0x116   : > { %v1273_v13 = vadd.f32 %v1249_v12, %v895_v7  ;;  %v721_v36 = vpop.f32.mrf.mxu1 }
 0x117   : > { %1385 = vst.msk [vmem:[%s1993_s9 + $0x34] sm:$0xf] %vm1371_vm5, %v1366_v11  ;;  %v896_v19 = vadd.f32 %v873_v14, %v717_v16 }
 0x118   : > { %v1295_v15 = vadd.f32 %v1986_v49, %v1273_v13 }
 0x11a   : > { %vm1313_vm3 = vcmp.ge.f32.partialorder %v1295_v15, 0.0  ;;  %v1331_v17 = vmul.f32 0.2, %v1295_v15 }
 0x11c   : > { %v1349_v18 = vsel %vm1313_vm3, %v1295_v15, %v1331_v17  ;;  %v587_v20 = vpop.f32.mrf.mxu0  ;;  %v878_v40 = vpop.f32.mrf.mxu2 }
 0x11d   : > { %v1367_v21 = vpack.c.bf16 %v1349_v18, %v1349_v18  ;;  %v1251_v23 = vpop.f32.mrf.mxu3  ;;  %v720_v25 = vadd.f32 %v719_v22, %v587_v20 }
 0x11e   : > { %v1274_v24 = vadd.f32 %v1251_v23, %v896_v19 }
 0x11f   : > { %1386 = vst.msk [vmem:[%s1993_s9 + $0x38] sm:$0xf] %vm1371_vm5, %v1367_v21  ;;  %v897_v30 = vadd.f32 %v876_v28, %v720_v25 }
 0x120   : > { %v1296_v26 = vadd.f32 %v1986_v49, %v1274_v24 }
 0x122   : > { %vm1314_vm4 = vcmp.ge.f32.partialorder %v1296_v26, 0.0  ;;  %v1332_v29 = vmul.f32 0.2, %v1296_v26 }
 0x124   : > { %v1350_v31 = vsel %vm1314_vm4, %v1296_v26, %v1332_v29  ;;  %v589_v34 = vpop.f32.mrf.mxu0 }
 0x125   : > { %v1368_v32 = vpack.c.bf16 %v1350_v31, %v1350_v31  ;;  %v1254_v33 = vpop.f32.mrf.mxu3  ;;  %v722_v38 = vadd.f32 %v721_v36, %v589_v34 }
 0x126   : > { %v1275_v35 = vadd.f32 %v1254_v33, %v897_v30 }
 0x127   : > { %1387 = vst.msk [vmem:[%s1993_s9 + $0x3c] sm:$0xf] %vm1371_vm5, %v1368_v32  ;;  %v898_v42 = vadd.f32 %v878_v40, %v722_v38 }
 0x128   : > { %v1297_v37 = vadd.f32 %v1986_v49, %v1275_v35 }
 0x12a   : > { %vm1315_vm6 = vcmp.ge.f32.partialorder %v1297_v37, 0.0  ;;  %v1333_v39 = vmul.f32 0.2, %v1297_v37 }
 0x12c   : > { %v1351_v41 = vsel %vm1315_vm6, %v1297_v37, %v1333_v39 }
 0x12d   : > { %v1369_v43 = vpack.c.bf16 %v1351_v41, %v1351_v41  ;;  %v1256_v44 = vpop.f32.mrf.mxu3 }
 0x12e   : > { %v1276_v45 = vadd.f32 %v1256_v44, %v898_v42 }
 0x12f   : > { %1388 = vst.msk [vmem:[%s1993_s9 + $0x40] sm:$0xf] %vm1371_vm5, %v1369_v43 }
 0x130   : > { %v1298_v46 = vadd.f32 %v1986_v49, %v1276_v45 }
 0x132   : > { %vm1316_vm7 = vcmp.ge.f32.partialorder %v1298_v46, 0.0  ;;  %v1334_v47 = vmul.f32 0.2, %v1298_v46 }
 0x134   : > { %v1352_v48 = vsel %vm1316_vm7, %v1298_v46, %v1334_v47 }
 0x135   : > { %v1370_v27 = vpack.c.bf16 %v1352_v48, %v1352_v48 }
 0x137   : > { %1389 = vst.msk [vmem:[%s1993_s9 + $0x44] sm:$0xf] %vm1371_vm5, %v1370_v27 }
 0x138 PF: > { %s14_s17 = sadd.s32 1, %s1732_s17   ;;  %s2064_s15 = smov %s1728_s16 }
 0x139   : > { %p11_p5 = scmp.ge.s32.totalorder %s14_s17, 4   ;;  %s2065_s16 = smov %s2067_s3 }
 0x13b   :  { %13 = sbr.rel (!%p11_p5) target bundleno = 2 (0x2), region = 71 }

// kernel: nlayer_discriminator_forward.6
= control target key start
LH: loop header
LB: loop body
LE: loop exit
PB: predicated region body
PF: predicated region fallthrough
CT: control target
= control target key end

     0   :  { %s1594_s18 = smov 0   ;;  %s1596_s19 = smov 0   ;;  %s1876_s0 = inlined_call_operand.vmem [shape: bf16[2,7,17,64], index: 0, kind: input, shape index: {}]   ;;  %s1877_s1 = inlined_call_operand.vmem [shape: bf16[4,64,128], index: 1, kind: input, shape index: {}]   ;;  %s1878_s2 = inlined_call_operand.vmem [shape: f32[1,128], index: 2, kind: input, shape index: {}]   ;;  %s1879_s3 = inlined_call_operand.vmem [shape: f32[80,1], index: 3, kind: input, shape index: {}]   ;;  %s1880_s4 = inlined_call_operand.vmem [shape: bf16[2,80,32], index: 4, kind: output, shape index: {0}]   ;;  %s1881_s5 = inlined_call_operand.vmem [shape: f32[2,1,2,128], index: 5, kind: output, shape index: {1}]  }
   0x1   :  { %s1598_s20 = smov 0  }
   0x2 LB: > { %s28_s21 = sadd.s32 1, %s1557_s19  ;;  %p1303_p0 = scmp.ge.s32.totalorder %s1561_s20, 1  ;;  %s1561_s20 = sphi %s1598_s20, %s16_s20   ;;  %s1557_s19 = sphi %s1596_s19, %s1885_s19   ;;  %s1553_s18 = sphi %s1594_s18, %s1884_s18  }
   0x3   : > { %p30_p1 = scmp.ge.s32.totalorder %s28_s21, 2  ;;  %p206_p2 = scmp.lt.s32.totalorder %s1561_s20, 3 }
   0x5   : > { %s1887_s21 = smov (%p30_p1, %s28_s21), 0  ;;  %p207_p3 = pnand %p1303_p0, %p206_p2 }
   0x6   : > { %p245_p4 = scmp.lt.s32.totalorder (!%p207_p3), %s1553_s18, 1 }
   0x7   : > { %210 = sbr.rel (%p207_p3) target bundleno = 262 (0x106), region = 36 }
   0xc   : > { %v1490_v0 = vld [vmem:[%s1877_s1 + $0x18] sm:$0xff]  ;;  %v1489_v4 = vld [vmem:[%s1877_s1 + $0x10] sm:$0xff]  ;;  %s1889_s18 = smov (!%p245_p4, %s1553_s18), 1  ;;  %v1488_v8 = vld [vmem:[%s1877_s1 + $0x8] sm:$0xff]  ;;  %vm295_vm0 = vsmask.f32 3328 }
   0xd   : > { %v1503_v1 = vld [vmem:[%s1877_s1 + $0x58] sm:$0xff]  ;;  %584 = vmatpush.bf16.msra.mxu1 %v1490_v0  ;;  %v1502_v5 = vld [vmem:[%s1877_s1 + $0x50] sm:$0xff]  ;;  %s1508_s13 = smul.u32 84, %s1889_s18  ;;  %v1501_v9 = vld [vmem:[%s1877_s1 + $0x48] sm:$0xff]  ;;  %vm296_vm1 = vsmask.f32 7440 }
   0xe   : > { %v1494_v2 = vld [vmem:[%s1877_s1 + $0x38] sm:$0xff]  ;;  %705 = vmatpush.bf16.msra.mxu2 %v1503_v1  ;;  %v1493_v6 = vld [vmem:[%s1877_s1 + $0x30] sm:$0xff]  ;;  %v1492_v10 = vld [vmem:[%s1877_s1 + $0x28] sm:$0xff]  ;;  %vm466_vm2 = vcmask 523264   ;;  %vm1160_vm4 = vcmask 257024   ;;  %s1306_s17 = sshll.u32 %s1889_s18, 1 }
   0xf   : > { %v1507_v3 = vld [vmem:[%s1877_s1 + $0x78] sm:$0xff]  ;;  %486 = vmatpush.bf16.msra.mxu0 %v1494_v2  ;;  %v1506_v7 = vld [vmem:[%s1877_s1 + $0x70] sm:$0xff]  ;;  %s1648_s24 = scalar_lea.vmem %s1876_s0, %s1508_s13  ;;  %v1505_v11 = vld [vmem:[%s1877_s1 + $0x68] sm:$0xff]  ;;  %vm1147_vm5 = vcmask 1040384   ;;  %s266_s25 = scalar_lea.vmem %s1881_s5, %s1306_s17 }
  0x10   : > { %947 = vmatpush.bf16.msra.mxu3 %v1507_v3  ;;  %v272_v12 = vld [vmem:[%s1648_s24] sm:$0xf]  ;;  %v273_v14 = vld [vmem:[%s1648_s24 + $0x4] sm:$0xf]  ;;  %v290_v15 = vld [vmem:[%s1648_s24 + $0x8] sm:$0x1] }
  0x11   : > { %585 = vmatpush.bf16.msra.mxu1 %v1489_v4  ;;  %v1487_v13 = vld [vmem:[%s1877_s1] sm:$0xff]  ;;  %v299_v16 = vshrl.u32 %v272_v12, 16  ;;  %v302_v17 = vshll.u32 %v272_v12, 16  ;;  %v308_v19 = vshll.u32 %v273_v14, 16  ;;  %v312_v20 = vshrl.u32 %v273_v14, 16  ;;  %v1495_v38 = vld [vmem:[%s1648_s24 + $0xc] sm:$0xff]  ;;  %vm1679_vm3 = vmor %vm295_vm0, %vm296_vm1 }
  0x12   : > { %706 = vmatpush.bf16.msra.mxu2 %v1502_v5  ;;  %v1500_v18 = vld [vmem:[%s1877_s1 + $0x40] sm:$0xff]  ;;  %v318_v21 = vshll.u32 %v290_v15, 16  ;;  %v1436_v22 = vld [vmem:[%s1648_s24 + $0xc] sm:$0xf]  ;;  %v1437_v25 = vld [vmem:[%s1648_s24 + $0x10] sm:$0xf] }
  0x13   : > { %487 = vmatpush.bf16.msra.mxu0 %v1493_v6  ;;  %v301_v23 = vrot.slane %v299_v16, 4  ;;  %v304_v24 = vrot.slane %v302_v17, 5  ;;  %v1438_v26 = vld [vmem:[%s1648_s24 + $0x14] sm:$0x1]  ;;  %v1491_v27 = vld [vmem:[%s1877_s1 + $0x20] sm:$0xff]  ;;  %v310_v29 = vrot.slane %v308_v19, 5 }
  0x14   : > { %948 = vmatpush.bf16.msra.mxu3 %v1506_v7  ;;  %v1504_v28 = vld [vmem:[%s1877_s1 + $0x60] sm:$0xff]  ;;  %v314_v30 = vrot.slane %v312_v20, 4  ;;  %v761_v31 = vshrl.u32 %v1436_v22, 16  ;;  %v764_v34 = vshll.u32 %v1436_v22, 16  ;;  %v770_v35 = vshll.u32 %v1437_v25, 16 }
  0x15   : > { %586 = vmatpush.bf16.msra.mxu1 %v1488_v8  ;;  %v1482_v32 = vld [vmem:[%s1648_s24] sm:$0xff]  ;;  %v305_v33 = vor.u32 %v304_v24, %v301_v23  ;;  %v774_v36 = vshrl.u32 %v1437_v25, 16  ;;  %v274_v37 = vld [vmem:[%s1648_s24 + $0xc] sm:$0xf]  ;;  %v320_v41 = vrot.slane %v318_v21, 5  ;;  %v780_v43 = vshll.u32 %v1438_v26, 16 }
  0x16   : > { %707 = vmatpush.bf16.msra.mxu2 %v1501_v9  ;;  %v315_v40 = vor.u32 %v314_v30, %v310_v29  ;;  %v763_v42 = vrot.slane %v761_v31, 4  ;;  %v275_v44 = vld [vmem:[%s1648_s24 + $0x10] sm:$0xf]  ;;  %v766_v46 = vrot.slane %v764_v34, 5  ;;  %v772_v47 = vrot.slane %v770_v35, 5  ;;  %v1027_v30 = vld [vmem:[%s1879_s3] sm:$0xff] }
  0x17   : > { %488 = vmatpush.bf16.msra.mxu0 %v1492_v10  ;;  %v306_v45 = vrot.slane %v305_v33, 4  ;;  %v776_v48 = vrot.slane %v774_v36, 4  ;;  %v782_v50 = vrot.slane %v780_v43, 5  ;;  %v323_v51 = vshrl.u32 %v274_v37, 16  ;;  %v291_v56 = vld [vmem:[%s1648_s24 + $0x14] sm:$0x1] }
  0x18   : > { %949 = vmatpush.bf16.msra.mxu3 %v1505_v11  ;;  %v316_v49 = vrot.slane %v315_v40, 4  ;;  %v326_v52 = vshll.u32 %v274_v37, 16  ;;  %v767_v54 = vor.u32 %v766_v46, %v763_v42  ;;  %v332_v57 = vshll.u32 %v275_v44, 16  ;;  %v1439_v58 = vld [vmem:[%s1648_s24 + $0x18] sm:$0xf]  ;;  %v1029_v34 = vld [vmem:[%s1879_s3 + $0x10] sm:$0xff] }
  0x19   : > { %587 = vmatpush.bf16.msra.mxu1 %v1487_v13  ;;  %v311_v53 = vsel %vm1679_vm3, %v306_v45, %v310_v29  ;;  %v777_v55 = vor.u32 %v776_v48, %v772_v47  ;;  %v325_v61 = vrot.slane %v323_v51, 4  ;;  %v336_v4 = vshrl.u32 %v275_v44, 16  ;;  %v1440_v6 = vld [vmem:[%s1648_s24 + $0x1c] sm:$0xf]  ;;  %v1441_v16 = vld [vmem:[%s1648_s24 + $0x20] sm:$0x1] }
  0x1a   : > { %708 = vmatpush.bf16.msra.mxu2 %v1500_v18  ;;  %v321_v59 = vsel %vm1679_vm3, %v316_v49, %v320_v41  ;;  %v427_v60 = vunpack.c.l.b16 %v311_v53  ;;  %v328_v62 = vrot.slane %v326_v52, 5  ;;  %v768_v0 = vrot.slane %v767_v54, 4  ;;  %v276_v20 = vld [vmem:[%s1648_s24 + $0x18] sm:$0xf]  ;;  %v277_v25 = vld [vmem:[%s1648_s24 + $0x1c] sm:$0xf] }
  0x1b   : > { %489 = vmatpush.bf16.msra.mxu0 %v1491_v27  ;;  %v428_v63 = vunpack.c.l.b16 %v321_v59  ;;  %v778_v1 = vrot.slane %v777_v55, 4  ;;  %v334_v2 = vrot.slane %v332_v57, 5  ;;  %v342_v5 = vshll.u32 %v291_v56, 16  ;;  %v1442_v46 = vld [vmem:[%s1648_s24 + $0x24] sm:$0xf]  ;;  %v1483_v51 = vld [vmem:[%s1648_s24 + $0xc] sm:$0xff] }
  0x1c   : > { %950 = vmatpush.bf16.msra.mxu3 %v1504_v28  ;;  %1372 = vmatmul.msk.bf16.vlgmr.msra.gmra.mxu1 %vm466_vm2, %v1482_v32  ;;  %v329_v3 = vor.u32 %v328_v62, %v325_v61  ;;  %v785_v7 = vshrl.u32 %v1439_v58, 16  ;;  %v773_v9 = vsel %vm1679_vm3, %v768_v0, %v772_v47  ;;  %v788_v11 = vshll.u32 %v1439_v58, 16  ;;  %v1496_v52 = vld [vmem:[%s1648_s24 + $0x18] sm:$0xff]  ;;  %v1444_v0 = vld [vmem:[%s1648_s24 + $0x2c] sm:$0x1]  ;;  %v1035_v39 = vld [vmem:[%s1879_s3 + $0x40] sm:$0xff] }
  0x1d   : > { %1431 = vmatmul.msk.bf16.vlgmr.msra.gmra.mxu2 %vm466_vm2, %v1495_v38  ;;  %v437_v8 = vpack.c.b16 %v428_v63, %v427_v60  ;;  %v783_v10 = vsel %vm1679_vm3, %v778_v1, %v782_v50  ;;  %v889_v12 = vunpack.c.l.b16 %v773_v9  ;;  %v338_v15 = vrot.slane %v336_v4, 4  ;;  %v292_v38 = vld [vmem:[%s1648_s24 + $0x20] sm:$0x1]  ;;  %v1443_v50 = vld [vmem:[%s1648_s24 + $0x28] sm:$0xf] }
  0x1e   : > { %v890_v13 = vunpack.c.l.b16 %v783_v10  ;;  %v330_v14 = vrot.slane %v329_v3, 4  ;;  %v787_v17 = vrot.slane %v785_v7, 4  ;;  %v790_v18 = vrot.slane %v788_v11, 5  ;;  %v1030_v7 = vld [vmem:[%s1879_s3 + $0x18] sm:$0xff] }
  0x1f   : > { %1331 = vmatmul.msk.bf16.vlgmr.msra.gmra.mxu0 %vm466_vm2, %v437_v8  ;;  %v794_v19 = vshll.u32 %v1440_v6, 16  ;;  %v339_v22 = vor.u32 %v338_v15, %v334_v2  ;;  %v344_v23 = vrot.slane %v342_v5, 5  ;;  %v798_v24 = vshrl.u32 %v1440_v6, 16 }
  0x20   : > { %v899_v21 = vpack.c.b16 %v890_v13, %v889_v12  ;;  %v335_v26 = vsel %vm1679_vm3, %v330_v14, %v334_v2  ;;  %v791_v27 = vor.u32 %v790_v18, %v787_v17  ;;  %v804_v29 = vshll.u32 %v1441_v16, 16  ;;  %v1028_v2 = vld [vmem:[%s1879_s3 + $0x8] sm:$0xff]  ;;  %v278_v12 = vld [vmem:[%s1648_s24 + $0x24] sm:$0xf] }
  0x21   : > { %v796_v28 = vrot.slane %v794_v19, 5  ;;  %v340_v31 = vrot.slane %v339_v22, 4  ;;  %v800_v32 = vrot.slane %v798_v24, 4  ;;  %v347_v33 = vshrl.u32 %v276_v20, 16  ;;  %v279_v17 = vld [vmem:[%s1648_s24 + $0x28] sm:$0xf] }
  0x22   : > { %1475 = vmatmul.msk.bf16.vlgmr.msra.gmra.mxu3 %vm466_vm2, %v899_v21  ;;  %v792_v35 = vrot.slane %v791_v27, 4  ;;  %v806_v36 = vrot.slane %v804_v29, 5  ;;  %v1563_v37 = vmov 0   ;;  %v350_v40 = vshll.u32 %v276_v20, 16 }
  0x23   : > { %1535 = vset.pattern.permute.xlu0 %v1563_v37  ;;  %v356_v41 = vshll.u32 %v277_v25, 16  ;;  %1536 = vset.pattern.permute.xlu1 %v1563_v37  ;;  %v345_v42 = vsel %vm1679_vm3, %v340_v31, %v344_v23  ;;  %v801_v43 = vor.u32 %v800_v32, %v796_v28  ;;  %v349_v44 = vrot.slane %v347_v33, 4 }
  0x24   : > { %1049 = vperm.xlu0 %1535, %v1027_v30   ;;  %v360_v45 = vshrl.u32 %v277_v25, 16  ;;  %1059 = vperm.xlu1 %1536, %v1029_v34   ;;  %v797_v47 = vsel %vm1679_vm3, %v792_v35, %v796_v28  ;;  %v352_v48 = vrot.slane %v350_v40, 5  ;;  %v429_v53 = vunpack.c.l.b16 %v335_v26  ;;  %v293_v25 = vld [vmem:[%s1648_s24 + $0x2c] sm:$0x1]  ;;  %v1445_v28 = vld [vmem:[%s1648_s24 + $0x30] sm:$0xf] }
  0x25   : > { %v358_v49 = vrot.slane %v356_v41, 5  ;;  %1537 = vset.pattern.permute.xlu2 %v1563_v37  ;;  %v802_v54 = vrot.slane %v801_v43, 4  ;;  %v366_v56 = vshll.u32 %v292_v38, 16  ;;  %v430_v57 = vunpack.c.l.b16 %v345_v42  ;;  %v1033_v38 = vld [vmem:[%s1879_s3 + $0x30] sm:$0xff] }
  0x26   : > { %v362_v55 = vrot.slane %v360_v45, 4  ;;  %v353_v58 = vor.u32 %v352_v48, %v349_v44  ;;  %v809_v59 = vshrl.u32 %v1442_v46, 16  ;;  %v812_v60 = vshll.u32 %v1442_v46, 16  ;;  %v1446_v42 = vld [vmem:[%s1648_s24 + $0x34] sm:$0xf] }
  0x27   : > { %v807_v61 = vsel %vm1679_vm3, %v802_v54, %v806_v36  ;;  %v891_v62 = vunpack.c.l.b16 %v797_v47  ;;  %v818_v1 = vshll.u32 %v1443_v50, 16  ;;  %v368_v4 = vrot.slane %v366_v56, 5  ;;  %v280_v44 = vld [vmem:[%s1648_s24 + $0x30] sm:$0xf] }
  0x28   : > { %v363_v63 = vor.u32 %v362_v55, %v358_v49  ;;  %v354_v3 = vrot.slane %v353_v58, 4  ;;  %v811_v5 = vrot.slane %v809_v59, 4  ;;  %v814_v6 = vrot.slane %v812_v60, 5  ;;  %v1447_v58 = vld [vmem:[%s1648_s24 + $0x38] sm:$0x1] }
  0x29   : > { %v892_v8 = vunpack.c.l.b16 %v807_v61  ;;  %v820_v10 = vrot.slane %v818_v1, 5  ;;  %v822_v11 = vshrl.u32 %v1443_v50, 16  ;;  %v438_v13 = vpack.c.b16 %v430_v57, %v429_v53  ;;  %v1448_v50 = vld [vmem:[%s1648_s24 + $0x3c] sm:$0xf] }
  0x2a   : > { %v364_v9 = vrot.slane %v363_v63, 4  ;;  %v815_v14 = vor.u32 %v814_v6, %v811_v5  ;;  %v828_v16 = vshll.u32 %v1444_v0, 16  ;;  %v359_v18 = vsel %vm1679_vm3, %v354_v3, %v358_v49  ;;  %v281_v49 = vld [vmem:[%s1648_s24 + $0x34] sm:$0xf]  ;;  %v294_v63 = vld [vmem:[%s1648_s24 + $0x38] sm:$0x1] }
  0x2b   : > { %v824_v15 = vrot.slane %v822_v11, 4  ;;  %v371_v20 = vshrl.u32 %v278_v12, 16  ;;  %v374_v21 = vshll.u32 %v278_v12, 16  ;;  %v900_v22 = vpack.c.b16 %v892_v8, %v891_v62  ;;  %v1450_v12 = vld [vmem:[%s1648_s24 + $0x44] sm:$0x1] }
  0x2c   : > { %1373 = vmatmul.msk.bf16.gmra.mxu1 %vm466_vm2, %v1483_v51  ;;  %1054 = vperm.xlu0 %1535, %v1028_v2   ;;  %v369_v19 = vsel %vm1679_vm3, %v364_v9, %v368_v4  ;;  %v816_v23 = vrot.slane %v815_v14, 4  ;;  %v380_v26 = vshll.u32 %v279_v17, 16  ;;  %v384_v27 = vshrl.u32 %v279_v17, 16  ;;  %v1484_v51 = vld [vmem:[%s1648_s24 + $0x18] sm:$0xff] }
  0x2d   : > { %1432 = vmatmul.msk.bf16.gmra.mxu2 %vm466_vm2, %v1496_v52  ;;  %1064 = vperm.xlu1 %1536, %v1030_v7   ;;  %v825_v24 = vor.u32 %v824_v15, %v820_v10  ;;  %v1739_v29 = vunpack.c.l.b16 %v359_v18  ;;  %v1741_v30 = vunpack.c.l.b16 %v369_v19  ;;  %v830_v32 = vrot.slane %v828_v16, 5  ;;  %v1497_v52 = vld [vmem:[%s1648_s24 + $0x24] sm:$0xff]  ;;  %v1449_v7 = vld [vmem:[%s1648_s24 + $0x40] sm:$0xf] }
  0x2e   : > { %v373_v33 = vrot.slane %v371_v20, 4  ;;  %v376_v34 = vrot.slane %v374_v21, 5  ;;  %v821_v35 = vsel %vm1679_vm3, %v816_v23, %v820_v10  ;;  %v390_v36 = vshll.u32 %v293_v25, 16 }
  0x2f   : > { %1332 = vmatmul.msk.bf16.gmra.mxu0 %vm466_vm2, %v438_v13  ;;  %v826_v31 = vrot.slane %v825_v24, 4  ;;  %v833_v37 = vshrl.u32 %v1445_v28, 16  ;;  %v1749_v40 = vrot.slane %v380_v26, 5  ;;  %v386_v41 = vrot.slane %v384_v27, 4 }
  0x30   : > { %v439_v43 = vpack.c.b16 %v1741_v30, %v1739_v29  ;;  %v893_v46 = vunpack.c.l.b16 %v821_v35  ;;  %v377_v47 = vor.u32 %v376_v34, %v373_v33  ;;  %v836_v48 = vshll.u32 %v1445_v28, 16 }
  0x31   : > { %v831_v45 = vsel %vm1679_vm3, %v826_v31, %v830_v32  ;;  %v1761_v53 = vrot.slane %v390_v36, 5  ;;  %v835_v54 = vrot.slane %v833_v37, 4  ;;  %v842_v55 = vshll.u32 %v1446_v42, 16 }
  0x32   : > { %1476 = vmatmul.msk.bf16.gmra.mxu3 %vm466_vm2, %v900_v22  ;;  %v395_v56 = vshrl.u32 %v280_v44, 16  ;;  %v387_v57 = vor.u32 %v386_v41, %v1749_v40  ;;  %v846_v59 = vshrl.u32 %v1446_v42, 16  ;;  %v398_v60 = vshll.u32 %v280_v44, 16  ;;  %v1036_v44 = vld [vmem:[%s1879_s3 + $0x48] sm:$0xff] }
  0x33   : > { %v404_v61 = vshll.u32 %v281_v49, 16  ;;  %v894_v62 = vunpack.c.l.b16 %v831_v45  ;;  %v408_v1 = vshrl.u32 %v281_v49, 16  ;;  %v857_v2 = vshrl.u32 %v1448_v50, 16  ;;  %v1034_v45 = vld [vmem:[%s1879_s3 + $0x38] sm:$0xff] }
  0x34   : > { %1079 = vperm.xlu0 %1535, %v1033_v38   ;;  %v397_v0 = vrot.slane %v395_v56, 4  ;;  %v378_v3 = vrot.slane %v377_v47, 4  ;;  %v838_v4 = vrot.slane %v836_v48, 5  ;;  %v400_v5 = vrot.slane %v398_v60, 5  ;;  %v1498_v56 = vld [vmem:[%s1648_s24 + $0x30] sm:$0xff] }
  0x35   : > { %v406_v6 = vrot.slane %v404_v61, 5  ;;  %v844_v8 = vrot.slane %v842_v55, 5  ;;  %v852_v9 = vshll.u32 %v1447_v58, 16  ;;  %v410_v10 = vrot.slane %v408_v1, 4  ;;  %1084 = vperm.xlu1 %1536, %v1034_v45   ;;  %v1485_v55 = vld [vmem:[%s1648_s24 + $0x24] sm:$0xff] }
  0x36   : > { %v414_v11 = vshll.u32 %v294_v63, 16  ;;  %v848_v13 = vrot.slane %v846_v59, 4  ;;  %v401_v14 = vor.u32 %v400_v5, %v397_v0  ;;  %v859_v15 = vrot.slane %v857_v2, 4  ;;  %v1486_v2 = vld [vmem:[%s1648_s24 + $0x30] sm:$0xff] }
  0x37   : > { %v860_v16 = vshll.u32 %v1448_v50, 16  ;;  %v411_v17 = vor.u32 %v410_v10, %v406_v6  ;;  %v866_v19 = vshll.u32 %v1449_v7, 16  ;;  %v870_v20 = vshrl.u32 %v1449_v7, 16 }
  0x38   : > { %v416_v18 = vrot.slane %v414_v11, 5  ;;  %v388_v21 = vrot.slane %v387_v57, 4  ;;  %v402_v22 = vrot.slane %v401_v14, 4  ;;  %v876_v24 = vshll.u32 %v1450_v12, 16  ;;  %v1820_v11 = vld [vmem:[%s1878_s2] ss:$0 sm:$0xff] }
  0x39   : > { %v862_v23 = vrot.slane %v860_v16, 5  ;;  %v901_v25 = vpack.c.b16 %v894_v62, %v893_v46  ;;  %v412_v26 = vrot.slane %v411_v17, 4  ;;  %v868_v27 = vrot.slane %v866_v19, 5  ;;  %v1031_v46 = vld [vmem:[%s1879_s3 + $0x20] sm:$0xff] }
  0x3a   : > { %v872_v28 = vrot.slane %v870_v20, 4  ;;  %v839_v29 = vor.u32 %v838_v4, %v835_v54  ;;  %v849_v30 = vor.u32 %v848_v13, %v844_v8  ;;  %v407_v31 = vsel %vm1679_vm3, %v402_v22, %v406_v6  ;;  %1069 = vperm.xlu2 %1537, %v1031_v46  }
  0x3b   : > { %v863_v32 = vor.u32 %v862_v23, %v859_v15  ;;  %v417_v33 = vsel %vm1679_vm3, %v412_v26, %v416_v18  ;;  %v435_v34 = vunpack.c.l.b16 %v407_v31  ;;  %v878_v36 = vrot.slane %v876_v24, 5 }
  0x3c   : > { %1374 = vmatmul.msk.bf16.gmra.mxu1 %vm466_vm2, %v1484_v51  ;;  %v873_v35 = vor.u32 %v872_v28, %v868_v27  ;;  %v436_v37 = vunpack.c.l.b16 %v417_v33  ;;  %v383_v41 = vsel %vm1679_vm3, %v378_v3, %v1749_v40  ;;  %v854_v42 = vrot.slane %v852_v9, 5  ;;  %1094 = vperm.xlu0 %1535, %v1036_v44   ;;  %v1499_v3 = vld [vmem:[%s1648_s24 + $0x3c] sm:$0xff]  ;;  %s1509_s24 = smul.u32 40, %s1889_s18 }
  0x3d   : > { %1433 = vmatmul.msk.bf16.gmra.mxu2 %vm466_vm2, %v1497_v52  ;;  %v864_v38 = vrot.slane %v863_v32, 4  ;;  %v840_v47 = vrot.slane %v839_v29, 4  ;;  %v850_v48 = vrot.slane %v849_v30, 4  ;;  %v393_v50 = vsel %vm1679_vm3, %v388_v21, %v1761_v53  ;;  %v1032_v53 = vld [vmem:[%s1879_s3 + $0x28] sm:$0xff] }
  0x3e   : > { %v441_v49 = vpack.c.b16 %v436_v37, %v435_v34  ;;  %v433_v57 = vunpack.c.l.b16 %v383_v41  ;;  %v434_v58 = vunpack.c.l.b16 %v393_v50  ;;  %s1829_s16 = scalar_lea.vmem %s1880_s4, %s1509_s24 }
  0x3f   : > { %1333 = vmatmul.msk.bf16.gmra.mxu0 %vm466_vm2, %v439_v43  ;;  %v874_v43 = vrot.slane %v873_v35, 4  ;;  %v869_v40 = vsel %vm1679_vm3, %v864_v38, %v868_v27  ;;  %v845_v59 = vsel %vm1679_vm3, %v840_v47, %v844_v8  ;;  %v855_v60 = vsel %vm1679_vm3, %v850_v48, %v854_v42 }
  0x40   : > { %v897_v52 = vunpack.c.l.b16 %v869_v40  ;;  %v895_v62 = vunpack.c.l.b16 %v845_v59  ;;  %v896_v63 = vunpack.c.l.b16 %v855_v60  ;;  %v440_v0 = vpack.c.b16 %v434_v58, %v433_v57 }
  0x41   : > { %v879_v51 = vsel %vm1679_vm3, %v874_v43, %v878_v36 }
  0x42   : > { %1477 = vmatmul.msk.bf16.gmra.mxu3 %vm466_vm2, %v901_v25  ;;  %v898_v54 = vunpack.c.l.b16 %v879_v51  ;;  %1074 = vperm.xlu2 %1537, %v1032_v53   ;;  %v902_v1 = vpack.c.b16 %v896_v63, %v895_v62 }
  0x44   : > { %v903_v61 = vpack.c.b16 %v898_v54, %v897_v52 }
  0x4a   : > { %1089 = vperm.xlu2 %1537, %v1035_v39  }
  0x4c   : > { %1375 = vmatmul.msk.bf16.gmra.mxu1 %vm466_vm2, %v1485_v55 }
  0x4d   : > { %1434 = vmatmul.msk.bf16.gmra.mxu2 %vm466_vm2, %v1498_v56 }
  0x4f   : > { %1334 = vmatmul.msk.bf16.gmra.mxu0 %vm466_vm2, %v440_v0 }
  0x52   : > { %1478 = vmatmul.msk.bf16.gmra.mxu3 %vm466_vm2, %v902_v1 }
  0x5c   : > { %1376 = vmatmul.msk.bf16.gmra.mxu1 %vm466_vm2, %v1486_v2 }
  0x5d   : > { %1435 = vmatmul.msk.bf16.gmra.mxu2 %vm466_vm2, %v1499_v3 }
  0x5f   : > { %1335 = vmatmul.msk.bf16.gmra.mxu0 %vm466_vm2, %v441_v49 }
  0x62   : > { %1479 = vmatmul.msk.bf16.gmra.mxu3 %vm466_vm2, %v903_v61 }
  0x96   : > { %v1050_v62 = vpop.permute.xlu0 %1049  ;;  %v1060_v2 = vpop.permute.xlu1 %1059 }
  0x99   : > { %v589_v4 = vpop.f32.mrf.mxu1 }
  0x9c   : > { %v491_v5 = vpop.f32.mrf.mxu0 }
  0x9d   : > { %v590_v7 = vadd.f32 %v589_v4, %v491_v5 }
  0xa0   : > { %v710_v6 = vpop.f32.mrf.mxu2 }
  0xa1   : > { %v591_v8 = vpop.f32.mrf.mxu1  ;;  %v735_v9 = vadd.f32 %v710_v6, %v590_v7 }
  0xa4   : > { %v493_v10 = vpop.f32.mrf.mxu0 }
  0xa5   : > { %v952_v12 = vpop.f32.mrf.mxu3  ;;  %v592_v16 = vadd.f32 %v591_v8, %v493_v10  ;;  %v1055_v10 = vpop.permute.xlu0 %1054 }
  0xa6   : > { %v977_v14 = vadd.f32 %v952_v12, %v735_v9  ;;  %v1070_v9 = vpop.permute.xlu2 %1069 }
  0xa8   : > { %v712_v13 = vpop.f32.mrf.mxu2  ;;  %v1824_v17 = vadd.f32 %v1820_v11, %v977_v14 }
  0xa9   : > { %v594_v15 = vpop.f32.mrf.mxu1  ;;  %v736_v19 = vadd.f32 %v712_v13, %v592_v16 }
  0xaa   : > { %v1150_v18 = vpack.c.bf16 %v1824_v17, %v1824_v17 }
  0xac   : > { %1161 = vst.msk [vmem:[%s1829_s16] sm:$0xf] %vm1160_vm4, %v1150_v18  ;;  %v496_v20 = vpop.f32.mrf.mxu0 }
  0xad   : > { %v954_v21 = vpop.f32.mrf.mxu3  ;;  %v595_v24 = vadd.f32 %v594_v15, %v496_v20 }
  0xae   : > { %v978_v23 = vadd.f32 %v954_v21, %v736_v19  ;;  %v1065_v19 = vpop.permute.xlu1 %1064 }
  0xb0   : > { %v715_v22 = vpop.f32.mrf.mxu2  ;;  %v992_v26 = vadd.f32 %v1820_v11, %v978_v23 }
  0xb1   : > { %v596_v25 = vpop.f32.mrf.mxu1  ;;  %v737_v28 = vadd.f32 %v715_v22, %v595_v24  ;;  %v1097_v22 = vmul.f32 %v1050_v62, %v1824_v17 }
  0xb2   : > { %v1151_v27 = vpack.c.bf16 %v992_v26, %v992_v26  ;;  %v1098_v15 = vmul.f32 %v1055_v10, %v992_v26  ;;  %v1075_v26 = vpop.permute.xlu2 %1074 }
  0xb4   : > { %1162 = vst.msk [vmem:[%s1829_s16 + $0x4] sm:$0xf] %vm1160_vm4, %v1151_v27  ;;  %v498_v29 = vpop.f32.mrf.mxu0  ;;  %v1123_v27 = vmul.f32 %v1098_v15, %v1098_v15 }
  0xb5   : > { %v957_v30 = vpop.f32.mrf.mxu3  ;;  %v597_v34 = vadd.f32 %v596_v25, %v498_v29 }
  0xb6   : > { %v979_v32 = vadd.f32 %v957_v30, %v737_v28 }
  0xb8   : > { %v717_v31 = vpop.f32.mrf.mxu2  ;;  %v993_v35 = vadd.f32 %v1820_v11, %v979_v32 }
  0xb9   : > { %v599_v33 = vpop.f32.mrf.mxu1  ;;  %v738_v37 = vadd.f32 %v717_v31, %v597_v34  ;;  %v1122_v31 = vmul.f32 %v1097_v22, %v1097_v22  ;;  %v1107_v34 = vadd.f32 %v1098_v15, %v1097_v22 }
  0xba   : > { %v1152_v36 = vpack.c.bf16 %v993_v35, %v993_v35  ;;  %v1099_v23 = vmul.f32 %v1060_v2, %v993_v35 }
  0xbc   : > { %1163 = vst.msk [vmem:[%s1829_s16 + $0x8] sm:$0xf] %vm1160_vm4, %v1152_v36  ;;  %v501_v38 = vpop.f32.mrf.mxu0  ;;  %v1124_v32 = vmul.f32 %v1099_v23, %v1099_v23  ;;  %v1132_v36 = vadd.f32 %v1123_v27, %v1122_v31  ;;  %v1108_v17 = vadd.f32 %v1107_v34, %v1099_v23 }
  0xbd   : > { %v959_v41 = vpop.f32.mrf.mxu3  ;;  %v600_v44 = vadd.f32 %v599_v33, %v501_v38 }
  0xbe   : > { %v980_v43 = vadd.f32 %v959_v41, %v738_v37 }
  0xc0   : > { %v720_v42 = vpop.f32.mrf.mxu2  ;;  %v994_v46 = vadd.f32 %v1820_v11, %v980_v43  ;;  %v1133_v43 = vadd.f32 %v1132_v36, %v1124_v32 }
  0xc1   : > { %v601_v45 = vpop.f32.mrf.mxu1  ;;  %v739_v48 = vadd.f32 %v720_v42, %v600_v44 }
  0xc2   : > { %v1153_v47 = vpack.c.bf16 %v994_v46, %v994_v46  ;;  %v1100_v28 = vmul.f32 %v1065_v19, %v994_v46 }
  0xc4   : > { %1164 = vst.msk [vmem:[%s1829_s16 + $0xc] sm:$0xf] %vm1160_vm4, %v1153_v47  ;;  %v503_v49 = vpop.f32.mrf.mxu0  ;;  %v1125_v37 = vmul.f32 %v1100_v28, %v1100_v28  ;;  %v1109_v47 = vadd.f32 %v1108_v17, %v1100_v28 }
  0xc5   : > { %v962_v40 = vpop.f32.mrf.mxu3  ;;  %v602_v52 = vadd.f32 %v601_v45, %v503_v49  ;;  %v1080_v45 = vpop.permute.xlu0 %1079 }
  0xc6   : > { %v981_v51 = vadd.f32 %v962_v40, %v739_v48 }
  0xc8   : > { %v722_v50 = vpop.f32.mrf.mxu2  ;;  %v995_v54 = vadd.f32 %v1820_v11, %v981_v51  ;;  %v1085_v51 = vpop.permute.xlu1 %1084 }
  0xc9   : > { %v604_v55 = vpop.f32.mrf.mxu1  ;;  %v740_v57 = vadd.f32 %v722_v50, %v602_v52  ;;  %v1134_v50 = vadd.f32 %v1133_v43, %v1125_v37 }
  0xca   : > { %v1154_v56 = vpack.c.bf16 %v995_v54, %v995_v54  ;;  %v1101_v33 = vmul.f32 %v1070_v9, %v995_v54 }
  0xcc   : > { %1165 = vst.msk [vmem:[%s1829_s16 + $0x10] sm:$0xf] %vm1160_vm4, %v1154_v56  ;;  %v506_v58 = vpop.f32.mrf.mxu0  ;;  %v1126_v44 = vmul.f32 %v1101_v33, %v1101_v33  ;;  %v1110_v54 = vadd.f32 %v1109_v47, %v1101_v33 }
  0xcd   : > { %v964_v59 = vpop.f32.mrf.mxu3  ;;  %v605_v53 = vadd.f32 %v604_v55, %v506_v58 }
  0xce   : > { %v982_v61 = vadd.f32 %v964_v59, %v740_v57  ;;  %v1135_v58 = vadd.f32 %v1134_v50, %v1126_v44  ;;  %v1090_v59 = vpop.permute.xlu2 %1089 }
  0xd0   : > { %v725_v60 = vpop.f32.mrf.mxu2  ;;  %v996_v63 = vadd.f32 %v1820_v11, %v982_v61 }
  0xd1   : > { %v741_v1 = vadd.f32 %v725_v60, %v605_v53  ;;  %v606_v39 = vpop.f32.mrf.mxu1 }
  0xd2   : > { %v1155_v0 = vpack.c.bf16 %v996_v63, %v996_v63  ;;  %v1102_v35 = vmul.f32 %v1075_v26, %v996_v63 }
  0xd4   : > { %1166 = vst.msk [vmem:[%s1829_s16 + $0x14] sm:$0xf] %vm1160_vm4, %v1155_v0  ;;  %v508_v3 = vpop.f32.mrf.mxu0  ;;  %v1127_v55 = vmul.f32 %v1102_v35, %v1102_v35  ;;  %v1111_v60 = vadd.f32 %v1110_v54, %v1102_v35 }
  0xd5   : > { %v967_v4 = vpop.f32.mrf.mxu3  ;;  %v607_v8 = vadd.f32 %v606_v39, %v508_v3 }
  0xd6   : > { %v983_v6 = vadd.f32 %v967_v4, %v741_v1  ;;  %v1136_v0 = vadd.f32 %v1135_v58, %v1127_v55 }
  0xd8   : > { %v727_v5 = vpop.f32.mrf.mxu2  ;;  %v997_v7 = vadd.f32 %v1820_v11, %v983_v6 }
  0xd9   : > { %v742_v13 = vadd.f32 %v727_v5, %v607_v8  ;;  %v609_v16 = vpop.f32.mrf.mxu1 }
  0xda   : > { %v1156_v12 = vpack.c.bf16 %v997_v7, %v997_v7  ;;  %v1103_v48 = vmul.f32 %v1080_v45, %v997_v7  ;;  %v1095_v7 = vpop.permute.xlu0 %1094 }
  0xdc   : > { %1167 = vst.msk [vmem:[%s1829_s16 + $0x18] sm:$0xf] %vm1160_vm4, %v1156_v12  ;;  %v511_v14 = vpop.f32.mrf.mxu0  ;;  %v1128_v61 = vmul.f32 %v1103_v48, %v1103_v48  ;;  %v1112_v1 = vadd.f32 %v1111_v60, %v1103_v48 }
  0xdd   : > { %v969_v18 = vpop.f32.mrf.mxu3  ;;  %v610_v21 = vadd.f32 %v609_v16, %v511_v14 }
  0xde   : > { %v984_v20 = vadd.f32 %v969_v18, %v742_v13  ;;  %v1137_v3 = vadd.f32 %v1136_v0, %v1128_v61 }
  0xe0   : > { %v730_v24 = vpop.f32.mrf.mxu2  ;;  %v998_v25 = vadd.f32 %v1820_v11, %v984_v20 }
  0xe1   : > { %v743_v30 = vadd.f32 %v730_v24, %v610_v21  ;;  %v611_v46 = vpop.f32.mrf.mxu1 }
  0xe2   : > { %v1157_v29 = vpack.c.bf16 %v998_v25, %v998_v25  ;;  %v1104_v56 = vmul.f32 %v1085_v51, %v998_v25 }
  0xe4   : > { %1168 = vst.msk [vmem:[%s1829_s16 + $0x1c] sm:$0xf] %vm1160_vm4, %v1157_v29  ;;  %v513_v41 = vpop.f32.mrf.mxu0  ;;  %v1129_v39 = vmul.f32 %v1104_v56, %v1104_v56  ;;  %v1113_v4 = vadd.f32 %v1112_v1, %v1104_v56 }
  0xe5   : > { %v972_v38 = vpop.f32.mrf.mxu3  ;;  %v612_v40 = vadd.f32 %v611_v46, %v513_v41 }
  0xe6   : > { %v985_v42 = vadd.f32 %v972_v38, %v743_v30  ;;  %v1138_v8 = vadd.f32 %v1137_v3, %v1129_v39 }
  0xe8   : > { %v999_v49 = vadd.f32 %v1820_v11, %v985_v42  ;;  %v732_v52 = vpop.f32.mrf.mxu2 }
  0xe9   : > { %v744_v62 = vadd.f32 %v732_v52, %v612_v40 }
  0xea   : > { %v1158_v57 = vpack.c.bf16 %v999_v49, %v999_v49  ;;  %v1105_v53 = vmul.f32 %v1090_v59, %v999_v49 }
  0xec   : > { %1169 = vst.msk [vmem:[%s1829_s16 + $0x20] sm:$0xf] %vm1160_vm4, %v1158_v57  ;;  %v1130_v5 = vmul.f32 %v1105_v53, %v1105_v53  ;;  %v1114_v9 = vadd.f32 %v1113_v4, %v1105_v53 }
  0xed   : > { %v974_v63 = vpop.f32.mrf.mxu3 }
  0xee   : > { %v986_v2 = vadd.f32 %v974_v63, %v744_v62  ;;  %v1139_v13 = vadd.f32 %v1138_v8, %v1130_v5 }
  0xf0   : > { %v1000_v6 = vadd.f32 %v1820_v11, %v986_v2 }
  0xf2   : > { %v1106_v10 = vmul.f32 %v1095_v7, %v1000_v6  ;;  %v1159_v12 = vpack.c.bf16 %v1000_v6, %v1000_v6 }
  0xf4   : > { %v1115_v14 = vadd.f32 %v1114_v9, %v1106_v10  ;;  %v1131_v15 = vmul.f32 %v1106_v10, %v1106_v10  ;;  %1170 = vst.msk [vmem:[%s1829_s16 + $0x24] sm:$0xf] %vm1160_vm4, %v1159_v12 }
  0xf6   : > { %v1116_v16 = vrot.slane %v1115_v14, 4  ;;  %v1140_v18 = vadd.f32 %v1139_v13, %v1131_v15 }
  0xf8   : > { %v1117_v19 = vadd.f32 %v1116_v16, %v1115_v14  ;;  %v1141_v20 = vrot.slane %v1140_v18, 4 }
  0xfa   : > { %v1118_v21 = vrot.slane %v1117_v19, 2  ;;  %v1142_v22 = vadd.f32 %v1141_v20, %v1140_v18 }
  0xfc   : > { %v1119_v23 = vadd.f32 %v1118_v21, %v1117_v19  ;;  %v1143_v24 = vrot.slane %v1142_v22, 2 }
  0xfe   : > { %v1120_v11 = vrot.slane %v1119_v23, 1  ;;  %v1144_v25 = vadd.f32 %v1143_v24, %v1142_v22 }
 0x100   : > { %v1145_v27 = vrot.slane %v1144_v25, 1  ;;  %v1121_v28 = vadd.f32 %v1120_v11, %v1119_v23 }
 0x102   : > { %v1146_v29 = vadd.f32 %v1145_v27, %v1144_v25 }
 0x104   : > { %v1148_v30 = vsel %vm1147_vm5, %v1121_v28, %v1146_v29 }
 0x105   : > { %1149 = vst [vmem:[%s266_s25] sm:$0x3] %v1148_v30 }
 0x106 PF: > { %s16_s20 = sadd.s32 1, %s1561_s20   ;;  %s1884_s18 = smov %s1557_s19 }
 0x107   : > { %p13_p5 = scmp.ge.s32.totalorder %s16_s20, 4   ;;  %s1885_s19 = smov %s1887_s21 }
 0x109   :  { %15 = sbr.rel (!%p13_p5) target bundleno = 2 (0x2), region = 83 }

// kernel: nlayer_discriminator_forward.7
= control target key start
LH: loop header
LB: loop body
LE: loop exit
PB: predicated region body
PF: predicated region fallthrough
CT: control target
= control target key end

     0   :  { %s1470_s18 = smov 0   ;;  %s1472_s19 = smov 0   ;;  %s1710_s0 = inlined_call_operand.vmem [shape: bf16[2,5,17,128], index: 0, kind: input, shape index: {}]   ;;  %s1711_s1 = inlined_call_operand.vmem [shape: bf16[4,128,128], index: 1, kind: input, shape index: {}]   ;;  %s1712_s2 = inlined_call_operand.vmem [shape: f32[1,128], index: 2, kind: input, shape index: {}]   ;;  %s1713_s3 = inlined_call_operand.vmem [shape: f32[48,1], index: 3, kind: input, shape index: {}]   ;;  %s1714_s4 = inlined_call_operand.vmem [shape: bf16[2,48,64], index: 4, kind: output, shape index: {0}]   ;;  %s1715_s5 = inlined_call_operand.vmem [shape: f32[2,1,2,128], index: 5, kind: output, shape index: {1}]  }
   0x1   :  { %s1474_s20 = smov 0  }
   0x2 LB: > { %s28_s21 = sadd.s32 1, %s1433_s19  ;;  %p1125_p0 = scmp.ge.s32.totalorder %s1437_s20, 1  ;;  %s1437_s20 = sphi %s1474_s20, %s16_s20   ;;  %s1433_s19 = sphi %s1472_s19, %s1719_s19   ;;  %s1429_s18 = sphi %s1470_s18, %s1718_s18  }
   0x3   : > { %p30_p1 = scmp.ge.s32.totalorder %s28_s21, 2  ;;  %p206_p2 = scmp.lt.s32.totalorder %s1437_s20, 3 }
   0x5   : > { %s1721_s21 = smov (%p30_p1, %s28_s21), 0  ;;  %p207_p3 = pnand %p1125_p0, %p206_p2 }
   0x6   : > { %p245_p4 = scmp.lt.s32.totalorder (!%p207_p3), %s1429_s18, 1 }
   0x7   : > { %210 = sbr.rel (%p207_p3) target bundleno = 244 (0xf4), region = 36 }
   0xc   : > { %v1364_v0 = vld [vmem:[%s1711_s1 + $0x78] sm:$0xff]  ;;  %v1363_v4 = vld [vmem:[%s1711_s1 + $0x70] sm:$0xff]  ;;  %s1723_s18 = smov (!%p245_p4, %s1429_s18), 1  ;;  %v1362_v8 = vld [vmem:[%s1711_s1 + $0x68] sm:$0xff]  ;;  %vm296_vm0 = vsmask.f32 3328 }
   0xd   : > { %v1356_v1 = vld [vmem:[%s1711_s1 + $0x38] sm:$0xff]  ;;  %448 = vmatpush.bf16.msra.mxu0 %v1364_v0  ;;  %v1355_v5 = vld [vmem:[%s1711_s1 + $0x30] sm:$0xff]  ;;  %s1384_s13 = smul.u32 60, %s1723_s18  ;;  %v1354_v9 = vld [vmem:[%s1711_s1 + $0x28] sm:$0xff]  ;;  %vm297_vm1 = vsmask.f32 7440 }
   0xe   : > { %v1375_v2 = vld [vmem:[%s1711_s1 + $0xb8] sm:$0xff]  ;;  %538 = vmatpush.bf16.msra.mxu1 %v1356_v1  ;;  %v1374_v6 = vld [vmem:[%s1711_s1 + $0xb0] sm:$0xff]  ;;  %v1373_v10 = vld [vmem:[%s1711_s1 + $0xa8] sm:$0xff]  ;;  %s1385_s22 = smul.u32 24, %s1723_s18  ;;  %vm986_vm3 = vcmask 519168   ;;  %s1128_s25 = sshll.u32 %s1723_s18, 1 }
   0xf   : > { %v1383_v3 = vld [vmem:[%s1711_s1 + $0xf8] sm:$0xff]  ;;  %655 = vmatpush.bf16.msra.mxu2 %v1375_v2  ;;  %v1382_v7 = vld [vmem:[%s1711_s1 + $0xf0] sm:$0xff]  ;;  %v1381_v11 = vld [vmem:[%s1711_s1 + $0xe8] sm:$0xff]  ;;  %s1530_s28 = scalar_lea.vmem %s1710_s0, %s1384_s13  ;;  %vm977_vm4 = vcmask 1040384   ;;  %s266_s29 = scalar_lea.vmem %s1715_s5, %s1128_s25 }
  0x10   : > { %843 = vmatpush.bf16.msra.mxu3 %v1383_v3  ;;  %v1361_v12 = vld [vmem:[%s1711_s1 + $0x60] sm:$0xff]  ;;  %v293_v18 = vld [vmem:[%s1530_s28 + $0x8] sm:$0x1]  ;;  %v1360_v21 = vld [vmem:[%s1711_s1 + $0x58] sm:$0xff]  ;;  %s1678_s24 = scalar_lea.vmem %s1714_s4, %s1385_s22 }
  0x11   : > { %449 = vmatpush.bf16.msra.mxu0 %v1363_v4  ;;  %v1353_v13 = vld [vmem:[%s1711_s1 + $0x20] sm:$0xff]  ;;  %v319_v24 = vshll.u32 %v293_v18, 16  ;;  %v1287_v27 = vld [vmem:[%s1530_s28 + $0xc] sm:$0xf]  ;;  %v1288_v28 = vld [vmem:[%s1530_s28 + $0x10] sm:$0xf] }
  0x12   : > { %539 = vmatpush.bf16.msra.mxu1 %v1355_v5  ;;  %v1372_v14 = vld [vmem:[%s1711_s1 + $0xa0] sm:$0xff]  ;;  %v1352_v29 = vld [vmem:[%s1711_s1 + $0x18] sm:$0xff]  ;;  %v1289_v32 = vld [vmem:[%s1530_s28 + $0x14] sm:$0x1]  ;;  %v695_v33 = vshrl.u32 %v1287_v27, 16  ;;  %v698_v37 = vshll.u32 %v1287_v27, 16 }
  0x13   : > { %656 = vmatpush.bf16.msra.mxu2 %v1374_v6  ;;  %v1380_v15 = vld [vmem:[%s1711_s1 + $0xe0] sm:$0xff]  ;;  %v1371_v34 = vld [vmem:[%s1711_s1 + $0x98] sm:$0xff]  ;;  %v704_v38 = vshll.u32 %v1288_v28, 16  ;;  %v708_v39 = vshrl.u32 %v1288_v28, 16  ;;  %v321_v41 = vrot.slane %v319_v24, 5  ;;  %v714_v43 = vshll.u32 %v1289_v32, 16  ;;  %vm1564_vm2 = vmor %vm296_vm0, %vm297_vm1 }
  0x14   : > { %844 = vmatpush.bf16.msra.mxu3 %v1382_v7  ;;  %v271_v16 = vld [vmem:[%s1530_s28] sm:$0xf]  ;;  %v272_v17 = vld [vmem:[%s1530_s28 + $0x4] sm:$0xf]  ;;  %v1379_v35 = vld [vmem:[%s1711_s1 + $0xd8] sm:$0xff]  ;;  %v697_v42 = vrot.slane %v695_v33, 4 }
  0x15   : > { %450 = vmatpush.bf16.msra.mxu0 %v1362_v8  ;;  %v300_v19 = vshrl.u32 %v271_v16, 16  ;;  %v303_v20 = vshll.u32 %v271_v16, 16  ;;  %v309_v22 = vshll.u32 %v272_v17, 16  ;;  %v313_v23 = vshrl.u32 %v272_v17, 16  ;;  %v273_v49 = vld [vmem:[%s1530_s28 + $0xc] sm:$0xf] }
  0x16   : > { %540 = vmatpush.bf16.msra.mxu1 %v1354_v9  ;;  %v700_v46 = vrot.slane %v698_v37, 5  ;;  %v706_v47 = vrot.slane %v704_v38, 5  ;;  %v710_v48 = vrot.slane %v708_v39, 4  ;;  %v1359_v50 = vld [vmem:[%s1711_s1 + $0x50] sm:$0xff]  ;;  %v716_v58 = vrot.slane %v714_v43, 5  ;;  %v1358_v3 = vld [vmem:[%s1711_s1 + $0x48] sm:$0xff] }
  0x17   : > { %657 = vmatpush.bf16.msra.mxu2 %v1373_v10  ;;  %v302_v25 = vrot.slane %v300_v19, 4  ;;  %v305_v26 = vrot.slane %v303_v20, 5  ;;  %v311_v30 = vrot.slane %v309_v22, 5  ;;  %v315_v31 = vrot.slane %v313_v23, 4  ;;  %v1351_v51 = vld [vmem:[%s1711_s1 + $0x10] sm:$0xff]  ;;  %v1350_v4 = vld [vmem:[%s1711_s1 + $0x8] sm:$0xff] }
  0x18   : > { %845 = vmatpush.bf16.msra.mxu3 %v1381_v11  ;;  %v274_v53 = vld [vmem:[%s1530_s28 + $0x10] sm:$0xf]  ;;  %v701_v56 = vor.u32 %v700_v46, %v697_v42  ;;  %v711_v57 = vor.u32 %v710_v48, %v706_v47  ;;  %v1290_v59 = vld [vmem:[%s1530_s28 + $0x18] sm:$0xf]  ;;  %v324_v61 = vshrl.u32 %v273_v49, 16  ;;  %v327_v62 = vshll.u32 %v273_v49, 16 }
  0x19   : > { %451 = vmatpush.bf16.msra.mxu0 %v1361_v12  ;;  %v306_v36 = vor.u32 %v305_v26, %v302_v25  ;;  %v316_v40 = vor.u32 %v315_v31, %v311_v30  ;;  %v1370_v54 = vld [vmem:[%s1711_s1 + $0x90] sm:$0xff]  ;;  %v333_v2 = vshll.u32 %v274_v53, 16  ;;  %v337_v5 = vshrl.u32 %v274_v53, 16  ;;  %v1291_v6 = vld [vmem:[%s1530_s28 + $0x1c] sm:$0xf]  ;;  %v1369_v8 = vld [vmem:[%s1711_s1 + $0x88] sm:$0xff] }
  0x1a   : > { %541 = vmatpush.bf16.msra.mxu1 %v1353_v13  ;;  %v1378_v55 = vld [vmem:[%s1711_s1 + $0xd0] sm:$0xff]  ;;  %v702_v0 = vrot.slane %v701_v56, 4  ;;  %v712_v1 = vrot.slane %v711_v57, 4  ;;  %v719_v7 = vshrl.u32 %v1290_v59, 16  ;;  %v1377_v9 = vld [vmem:[%s1711_s1 + $0xc8] sm:$0xff]  ;;  %v722_v12 = vshll.u32 %v1290_v59, 16 }
  0x1b   : > { %658 = vmatpush.bf16.msra.mxu2 %v1372_v14  ;;  %v307_v45 = vrot.slane %v306_v36, 4  ;;  %v317_v52 = vrot.slane %v316_v40, 4  ;;  %v329_v16 = vrot.slane %v327_v62, 5  ;;  %v1604_v19 = vrot.slane %v333_v2, 5  ;;  %v1349_v22 = vld [vmem:[%s1711_s1] sm:$0xff]  ;;  %v1365_v38 = vld [vmem:[%s1530_s28 + $0xc] sm:$0xff] }
  0x1c   : > { %846 = vmatpush.bf16.msra.mxu3 %v1380_v15  ;;  %v707_v10 = vsel %vm1564_vm2, %v702_v0, %v706_v47  ;;  %v717_v11 = vsel %vm1564_vm2, %v712_v1, %v716_v58  ;;  %v326_v15 = vrot.slane %v324_v61, 4  ;;  %v728_v20 = vshll.u32 %v1291_v6, 16  ;;  %v1368_v27 = vld [vmem:[%s1711_s1 + $0x80] sm:$0xff]  ;;  %v275_v47 = vld [vmem:[%s1530_s28 + $0x18] sm:$0xf]  ;;  %v902_v59 = vld [vmem:[%s1713_s3 + $0x8] sm:$0xff] }
  0x1d   : > { %452 = vmatpush.bf16.msra.mxu0 %v1360_v21  ;;  %v312_v60 = vsel %vm1564_vm2, %v307_v45, %v311_v30  ;;  %v322_v63 = vsel %vm1564_vm2, %v317_v52, %v321_v41  ;;  %v783_v17 = vunpack.c.l.b16 %v707_v10  ;;  %v784_v18 = vunpack.c.l.b16 %v717_v11  ;;  %v1357_v21 = vld [vmem:[%s1711_s1 + $0x40] sm:$0xff]  ;;  %v276_v48 = vld [vmem:[%s1530_s28 + $0x1c] sm:$0xf]  ;;  %v903_v52 = vld [vmem:[%s1713_s3 + $0x10] sm:$0xff] }
  0x1e   : > { %542 = vmatpush.bf16.msra.mxu1 %v1352_v29  ;;  %v388_v13 = vunpack.c.l.b16 %v312_v60  ;;  %v389_v14 = vunpack.c.l.b16 %v322_v63  ;;  %v339_v23 = vrot.slane %v337_v5, 4  ;;  %v721_v24 = vrot.slane %v719_v7, 4  ;;  %v1376_v28 = vld [vmem:[%s1711_s1 + $0xc0] sm:$0xff]  ;;  %v294_v29 = vld [vmem:[%s1530_s28 + $0x14] sm:$0x1]  ;;  %v904_v7 = vld [vmem:[%s1713_s3 + $0x18] sm:$0xff] }
  0x1f   : > { %659 = vmatpush.bf16.msra.mxu2 %v1371_v34  ;;  %v724_v25 = vrot.slane %v722_v12, 5  ;;  %v732_v26 = vshrl.u32 %v1291_v6, 16  ;;  %v730_v30 = vrot.slane %v728_v20, 5  ;;  %v1292_v31 = vld [vmem:[%s1530_s28 + $0x20] sm:$0x1]  ;;  %v1439_v36 = vmov 0  }
  0x20   : > { %847 = vmatpush.bf16.msra.mxu3 %v1379_v35  ;;  %v394_v33 = vpack.c.b16 %v389_v14, %v388_v13  ;;  %v1346_v34 = vld [vmem:[%s1530_s28] sm:$0xff]  ;;  %v330_v35 = vor.u32 %v329_v16, %v326_v15  ;;  %1411 = vset.pattern.permute.xlu0 %v1439_v36  ;;  %v789_v39 = vpack.c.b16 %v784_v18, %v783_v17  ;;  %v343_v41 = vshll.u32 %v294_v29, 16  ;;  %v1294_v57 = vld [vmem:[%s1530_s28 + $0x28] sm:$0xf] }
  0x21   : > { %453 = vmatpush.bf16.msra.mxu0 %v1359_v50  ;;  %v734_v32 = vrot.slane %v732_v26, 4  ;;  %v901_v37 = vld [vmem:[%s1713_s3] sm:$0xff]  ;;  %1412 = vset.pattern.permute.xlu1 %v1439_v36  ;;  %v340_v40 = vor.u32 %v339_v23, %v1604_v19  ;;  %v725_v42 = vor.u32 %v724_v25, %v721_v24  ;;  %v738_v45 = vshll.u32 %v1292_v31, 16  ;;  %v1347_v24 = vld [vmem:[%s1530_s28 + $0xc] sm:$0xff]  ;;  %v1366_v25 = vld [vmem:[%s1530_s28 + $0x18] sm:$0xff] }
  0x22   : > { %543 = vmatpush.bf16.msra.mxu1 %v1351_v51  ;;  %915 = vperm.xlu0 %1411, %v901_v37   ;;  %v331_v46 = vrot.slane %v330_v35, 4  ;;  %v345_v50 = vrot.slane %v343_v41, 5  ;;  %v905_v53 = vld [vmem:[%s1713_s3 + $0x20] sm:$0xff]  ;;  %v348_v60 = vshrl.u32 %v275_v47, 16  ;;  %v351_v61 = vshll.u32 %v275_v47, 16 }
  0x23   : > { %660 = vmatpush.bf16.msra.mxu2 %v1370_v54  ;;  %v735_v43 = vor.u32 %v734_v32, %v730_v30  ;;  %1413 = vset.pattern.permute.xlu2 %v1439_v36  ;;  %v341_v49 = vrot.slane %v340_v40, 4  ;;  %v726_v51 = vrot.slane %v725_v42, 4  ;;  %v1293_v56 = vld [vmem:[%s1530_s28 + $0x24] sm:$0xf]  ;;  %v357_v62 = vshll.u32 %v276_v48, 16 }
  0x24   : > { %848 = vmatpush.bf16.msra.mxu3 %v1378_v55  ;;  %v740_v55 = vrot.slane %v738_v45, 5  ;;  %925 = vperm.xlu1 %1412, %v903_v52   ;;  %v336_v58 = vsel %vm1564_vm2, %v331_v46, %v1604_v19  ;;  %v361_v1 = vshrl.u32 %v276_v48, 16  ;;  %v743_v2 = vshrl.u32 %v1293_v56, 16  ;;  %v295_v17 = vld [vmem:[%s1530_s28 + $0x20] sm:$0x1] }
  0x25   : > { %454 = vmatpush.bf16.msra.mxu0 %v1358_v3  ;;  %v736_v54 = vrot.slane %v735_v43, 4  ;;  %935 = vperm.xlu2 %1413, %v905_v53   ;;  %v346_v63 = vsel %vm1564_vm2, %v341_v49, %v345_v50  ;;  %v731_v0 = vsel %vm1564_vm2, %v726_v51, %v730_v30  ;;  %v752_v5 = vshll.u32 %v1294_v57, 16  ;;  %v1348_v49 = vld [vmem:[%s1530_s28 + $0x18] sm:$0xff]  ;;  %v1367_v50 = vld [vmem:[%s1530_s28 + $0x24] sm:$0xff] }
  0x26   : > { %544 = vmatpush.bf16.msra.mxu1 %v1350_v4  ;;  %v746_v4 = vshll.u32 %v1293_v56, 16  ;;  %v756_v6 = vshrl.u32 %v1294_v57, 16  ;;  %v391_v10 = vunpack.c.l.b16 %v346_v63  ;;  %v350_v11 = vrot.slane %v348_v60, 4 }
  0x27   : > { %661 = vmatpush.bf16.msra.mxu2 %v1369_v8  ;;  %v741_v3 = vsel %vm1564_vm2, %v736_v54, %v740_v55  ;;  %v906_v8 = vld [vmem:[%s1713_s3 + $0x28] sm:$0xff]  ;;  %v353_v12 = vrot.slane %v351_v61, 5  ;;  %v785_v13 = vunpack.c.l.b16 %v731_v0  ;;  %v359_v15 = vrot.slane %v357_v62, 5 }
  0x28   : > { %849 = vmatpush.bf16.msra.mxu3 %v1377_v9  ;;  %v390_v9 = vunpack.c.l.b16 %v336_v58  ;;  %v786_v14 = vunpack.c.l.b16 %v741_v3  ;;  %v363_v16 = vrot.slane %v361_v1, 4  ;;  %v745_v18 = vrot.slane %v743_v2, 4 }
  0x29   : > { %455 = vmatpush.bf16.msra.mxu0 %v1357_v21  ;;  %v748_v19 = vrot.slane %v746_v4, 5  ;;  %v754_v20 = vrot.slane %v752_v5, 5  ;;  %v758_v21 = vrot.slane %v756_v6, 4  ;;  %v367_v29 = vshll.u32 %v295_v17, 16 }
  0x2a   : > { %545 = vmatpush.bf16.msra.mxu1 %v1349_v22  ;;  %920 = vperm.xlu0 %1411, %v902_v59   ;;  %v1295_v22 = vld [vmem:[%s1530_s28 + $0x2c] sm:$0x1]  ;;  %v395_v23 = vpack.c.b16 %v391_v10, %v390_v9  ;;  %v790_v26 = vpack.c.b16 %v786_v14, %v785_v13  ;;  %v1671_v59 = vld [vmem:[%s1712_s2] ss:$0 sm:$0xff] }
  0x2b   : > { %662 = vmatpush.bf16.msra.mxu2 %v1368_v27  ;;  %v354_v27 = vor.u32 %v353_v12, %v350_v11  ;;  %v749_v30 = vor.u32 %v748_v19, %v745_v18  ;;  %v759_v31 = vor.u32 %v758_v21, %v754_v20  ;;  %v762_v32 = vshll.u32 %v1295_v22, 16 }
  0x2c   : > { %850 = vmatpush.bf16.msra.mxu3 %v1376_v28  ;;  %456 = vmatmul.bf16.vlgmr.msra.gmra.mxu0 %v394_v33  ;;  %v364_v28 = vor.u32 %v363_v16, %v359_v15  ;;  %v369_v35 = vrot.slane %v367_v29, 5 }
  0x2d   : > { %546 = vmatmul.bf16.vlgmr.msra.gmra.mxu1 %v1346_v34  ;;  %930 = vperm.xlu1 %1412, %v904_v7   ;;  %v355_v33 = vrot.slane %v354_v27, 4  ;;  %v750_v36 = vrot.slane %v749_v30, 4  ;;  %v760_v37 = vrot.slane %v759_v31, 4 }
  0x2e   : > { %663 = vmatmul.bf16.vlgmr.msra.gmra.mxu2 %v1365_v38  ;;  %940 = vperm.xlu2 %1413, %v906_v8   ;;  %v365_v34 = vrot.slane %v364_v28, 4  ;;  %v764_v38 = vrot.slane %v762_v32, 5 }
  0x2f   : > { %851 = vmatmul.bf16.vlgmr.msra.gmra.mxu3 %v789_v39  ;;  %v360_v39 = vsel %vm1564_vm2, %v355_v33, %v359_v15  ;;  %v755_v41 = vsel %vm1564_vm2, %v750_v36, %v754_v20 }
  0x30   : > { %v370_v40 = vsel %vm1564_vm2, %v365_v34, %v369_v35  ;;  %v765_v42 = vsel %vm1564_vm2, %v760_v37, %v764_v38  ;;  %v392_v43 = vunpack.c.l.b16 %v360_v39  ;;  %v787_v46 = vunpack.c.l.b16 %v755_v41 }
  0x31   : > { %v393_v45 = vunpack.c.l.b16 %v370_v40  ;;  %v788_v47 = vunpack.c.l.b16 %v765_v42 }
  0x33   : > { %v396_v48 = vpack.c.b16 %v393_v45, %v392_v43  ;;  %v791_v51 = vpack.c.b16 %v788_v47, %v787_v46 }
  0x3c   : > { %461 = vmatmul.bf16.gmra.mxu0 %v395_v23 }
  0x3d   : > { %551 = vmatmul.bf16.gmra.mxu1 %v1347_v24 }
  0x3e   : > { %668 = vmatmul.bf16.gmra.mxu2 %v1366_v25 }
  0x3f   : > { %856 = vmatmul.bf16.gmra.mxu3 %v790_v26 }
  0x4c   : > { %466 = vmatmul.bf16.gmra.mxu0 %v396_v48 }
  0x4d   : > { %556 = vmatmul.bf16.gmra.mxu1 %v1348_v49 }
  0x4e   : > { %673 = vmatmul.bf16.gmra.mxu2 %v1367_v50 }
  0x4f   : > { %861 = vmatmul.bf16.gmra.mxu3 %v791_v51 }
  0x7f   : > { %v936_v34 = vpop.permute.xlu2 %935 }
  0x94   : > { %v916_v15 = vpop.permute.xlu0 %915 }
  0x96   : > { %v926_v21 = vpop.permute.xlu1 %925 }
  0x9c   : > { %v921_v28 = vpop.permute.xlu0 %920 }
  0x9f   : > { %v931_v35 = vpop.permute.xlu1 %930 }
  0xa9   : > { %v457_v52 = vpop.f32.mrf.mxu0 }
  0xaa   : > { %v547_v53 = vpop.f32.mrf.mxu1 }
  0xab   : > { %v548_v54 = vadd.f32 %v547_v53, %v457_v52 }
  0xb1   : > { %v664_v55 = vpop.f32.mrf.mxu2  ;;  %v459_v57 = vpop.f32.mrf.mxu0 }
  0xb2   : > { %v852_v56 = vpop.f32.mrf.mxu3  ;;  %v679_v44 = vadd.f32 %v664_v55, %v548_v54  ;;  %v549_v58 = vpop.f32.mrf.mxu1 }
  0xb3   : > { %v550_v62 = vadd.f32 %v549_v58, %v459_v57 }
  0xb4   : > { %v867_v60 = vadd.f32 %v852_v56, %v679_v44 }
  0xb6   : > { %v877_v61 = vadd.f32 %v1671_v59, %v867_v60 }
  0xb8   : > { %v980_v63 = vpack.c.bf16 %v877_v61, %v877_v61  ;;  %v943_v37 = vmul.f32 %v916_v15, %v877_v61 }
  0xb9   : > { %v666_v0 = vpop.f32.mrf.mxu2  ;;  %v462_v3 = vpop.f32.mrf.mxu0 }
  0xba   : > { %v854_v1 = vpop.f32.mrf.mxu3  ;;  %987 = vst.msk [vmem:[%s1678_s24] sm:$0xf] %vm986_vm3, %v980_v63  ;;  %v680_v2 = vadd.f32 %v666_v0, %v550_v62  ;;  %v552_v4 = vpop.f32.mrf.mxu1  ;;  %v960_v47 = vmul.f32 %v943_v37, %v943_v37 }
  0xbb   : > { %v553_v6 = vadd.f32 %v552_v4, %v462_v3  ;;  %v941_v62 = vpop.permute.xlu2 %940 }
  0xbc   : > { %v868_v5 = vadd.f32 %v854_v1, %v680_v2 }
  0xbe   : > { %v878_v7 = vadd.f32 %v1671_v59, %v868_v5 }
  0xc0   : > { %v981_v8 = vpack.c.bf16 %v878_v7, %v878_v7  ;;  %v944_v33 = vmul.f32 %v921_v28, %v878_v7 }
  0xc1   : > { %v669_v9 = vpop.f32.mrf.mxu2  ;;  %v464_v12 = vpop.f32.mrf.mxu0 }
  0xc2   : > { %v857_v10 = vpop.f32.mrf.mxu3  ;;  %988 = vst.msk [vmem:[%s1678_s24 + $0x4] sm:$0xf] %vm986_vm3, %v981_v8  ;;  %v681_v11 = vadd.f32 %v669_v9, %v553_v6  ;;  %v554_v13 = vpop.f32.mrf.mxu1  ;;  %v961_v42 = vmul.f32 %v944_v33, %v944_v33  ;;  %v949_v49 = vadd.f32 %v944_v33, %v943_v37 }
  0xc3   : > { %v555_v17 = vadd.f32 %v554_v13, %v464_v12 }
  0xc4   : > { %v869_v14 = vadd.f32 %v857_v10, %v681_v11  ;;  %v966_v54 = vadd.f32 %v961_v42, %v960_v47 }
  0xc6   : > { %v879_v16 = vadd.f32 %v1671_v59, %v869_v14 }
  0xc8   : > { %v982_v18 = vpack.c.bf16 %v879_v16, %v879_v16  ;;  %v945_v40 = vmul.f32 %v926_v21, %v879_v16 }
  0xc9   : > { %v671_v19 = vpop.f32.mrf.mxu2  ;;  %v467_v23 = vpop.f32.mrf.mxu0 }
  0xca   : > { %v859_v20 = vpop.f32.mrf.mxu3  ;;  %989 = vst.msk [vmem:[%s1678_s24 + $0x8] sm:$0xf] %vm986_vm3, %v982_v18  ;;  %v682_v22 = vadd.f32 %v671_v19, %v555_v17  ;;  %v557_v24 = vpop.f32.mrf.mxu1  ;;  %v962_v50 = vmul.f32 %v945_v40, %v945_v40  ;;  %v950_v55 = vadd.f32 %v949_v49, %v945_v40 }
  0xcb   : > { %v558_v26 = vadd.f32 %v557_v24, %v467_v23 }
  0xcc   : > { %v870_v25 = vadd.f32 %v859_v20, %v682_v22  ;;  %v967_v57 = vadd.f32 %v966_v54, %v962_v50 }
  0xce   : > { %v880_v27 = vadd.f32 %v1671_v59, %v870_v25 }
  0xd0   : > { %v983_v29 = vpack.c.bf16 %v880_v27, %v880_v27  ;;  %v946_v43 = vmul.f32 %v931_v35, %v880_v27 }
  0xd1   : > { %v674_v30 = vpop.f32.mrf.mxu2  ;;  %v469_v38 = vpop.f32.mrf.mxu0 }
  0xd2   : > { %v862_v31 = vpop.f32.mrf.mxu3  ;;  %990 = vst.msk [vmem:[%s1678_s24 + $0xc] sm:$0xf] %vm986_vm3, %v983_v29  ;;  %v683_v32 = vadd.f32 %v674_v30, %v558_v26  ;;  %v559_v39 = vpop.f32.mrf.mxu1  ;;  %v963_v56 = vmul.f32 %v946_v43, %v946_v43  ;;  %v951_v58 = vadd.f32 %v950_v55, %v946_v43 }
  0xd3   : > { %v560_v46 = vadd.f32 %v559_v39, %v469_v38 }
  0xd4   : > { %v871_v36 = vadd.f32 %v862_v31, %v683_v32  ;;  %v968_v63 = vadd.f32 %v967_v57, %v963_v56 }
  0xd6   : > { %v881_v41 = vadd.f32 %v1671_v59, %v871_v36 }
  0xd8   : > { %v984_v45 = vpack.c.bf16 %v881_v41, %v881_v41  ;;  %v947_v51 = vmul.f32 %v936_v34, %v881_v41 }
  0xd9   : > { %v676_v48 = vpop.f32.mrf.mxu2 }
  0xda   : > { %991 = vst.msk [vmem:[%s1678_s24 + $0x10] sm:$0xf] %vm986_vm3, %v984_v45  ;;  %v684_v52 = vadd.f32 %v676_v48, %v560_v46  ;;  %v864_v53 = vpop.f32.mrf.mxu3  ;;  %v964_v60 = vmul.f32 %v947_v51, %v947_v51  ;;  %v952_v0 = vadd.f32 %v951_v58, %v947_v51 }
  0xdc   : > { %v872_v44 = vadd.f32 %v864_v53, %v684_v52  ;;  %v969_v3 = vadd.f32 %v968_v63, %v964_v60 }
  0xde   : > { %v882_v61 = vadd.f32 %v1671_v59, %v872_v44 }
  0xe0   : > { %v948_v1 = vmul.f32 %v941_v62, %v882_v61  ;;  %v985_v2 = vpack.c.bf16 %v882_v61, %v882_v61 }
  0xe2   : > { %v953_v4 = vadd.f32 %v952_v0, %v948_v1  ;;  %v965_v5 = vmul.f32 %v948_v1, %v948_v1  ;;  %992 = vst.msk [vmem:[%s1678_s24 + $0x14] sm:$0xf] %vm986_vm3, %v985_v2 }
  0xe4   : > { %v954_v6 = vrot.slane %v953_v4, 4  ;;  %v970_v7 = vadd.f32 %v969_v3, %v965_v5 }
  0xe6   : > { %v955_v8 = vadd.f32 %v954_v6, %v953_v4  ;;  %v971_v9 = vrot.slane %v970_v7, 4 }
  0xe8   : > { %v956_v10 = vrot.slane %v955_v8, 2  ;;  %v972_v11 = vadd.f32 %v971_v9, %v970_v7 }
  0xea   : > { %v957_v12 = vadd.f32 %v956_v10, %v955_v8  ;;  %v973_v13 = vrot.slane %v972_v11, 2 }
  0xec   : > { %v958_v59 = vrot.slane %v957_v12, 1  ;;  %v974_v14 = vadd.f32 %v973_v13, %v972_v11 }
  0xee   : > { %v975_v15 = vrot.slane %v974_v14, 1  ;;  %v959_v16 = vadd.f32 %v958_v59, %v957_v12 }
  0xf0   : > { %v976_v17 = vadd.f32 %v975_v15, %v974_v14 }
  0xf2   : > { %v978_v18 = vsel %vm977_vm4, %v959_v16, %v976_v17 }
  0xf3   : > { %979 = vst [vmem:[%s266_s29] sm:$0x3] %v978_v18 }
  0xf4 PF: > { %s16_s20 = sadd.s32 1, %s1437_s20   ;;  %s1718_s18 = smov %s1433_s19 }
  0xf5   : > { %p13_p5 = scmp.ge.s32.totalorder %s16_s20, 4   ;;  %s1719_s19 = smov %s1721_s21 }
  0xf7   :  { %15 = sbr.rel (!%p13_p5) target bundleno = 2 (0x2), region = 83 }

// kernel: nlayer_discriminator_forward.8
= control target key start
LH: loop header
LB: loop body
LE: loop exit
PB: predicated region body
PF: predicated region fallthrough
CT: control target
= control target key end

     0   :  { %s3916_s18 = smov 0   ;;  %s3918_s19 = smov 0   ;;  %s4816_s0 = inlined_call_operand.vmem [shape: bf16[2,7,19,64], index: 0, kind: input, shape index: {}]   ;;  %s4817_s1 = inlined_call_operand.vmem [shape: bf16[16,64,128], index: 1, kind: input, shape index: {}]   ;;  %s4818_s2 = inlined_call_operand.vmem [shape: f32[1,128], index: 2, kind: input, shape index: {}]   ;;  %s4819_s3 = inlined_call_operand.vmem [shape: f32[64,1], index: 3, kind: input, shape index: {}]   ;;  %s4820_s4 = inlined_call_operand.vmem [shape: bf16[2,64,128], index: 4, kind: output, shape index: {0}]   ;;  %s4821_s5 = inlined_call_operand.vmem [shape: f32[2,1,2,128], index: 5, kind: output, shape index: {1}]  }
   0x1   :  { %s3920_s20 = smov 0  }
   0x2 LB: > { %s28_s21 = sadd.s32 1, %s3879_s19  ;;  %p3116_p0 = scmp.ge.s32.totalorder %s3883_s20, 1  ;;  %s3883_s20 = sphi %s3920_s20, %s16_s20   ;;  %s3879_s19 = sphi %s3918_s19, %s4829_s19   ;;  %s3875_s18 = sphi %s3916_s18, %s4828_s18  }
   0x3   : > { %p30_p1 = scmp.ge.s32.totalorder %s28_s21, 2  ;;  %p206_p2 = scmp.lt.s32.totalorder %s3883_s20, 3 }
   0x5   : > { %s4831_s21 = smov (%p30_p1, %s28_s21), 0  ;;  %p207_p3 = pnand %p3116_p0, %p206_p2 }
   0x6   : > { %p245_p4 = scmp.lt.s32.totalorder (!%p207_p3), %s3875_s18, 1 }
   0x7   : > { %210 = sbr.rel (%p207_p3) target bundleno = 439 (0x1b7), region = 36 }
   0xc   : > { %v3735_v0 = vld [vmem:[%s4817_s1 + $0x18] sm:$0xff]  ;;  %v3734_v4 = vld [vmem:[%s4817_s1 + $0x10] sm:$0xff]  ;;  %s4833_s18 = smov (!%p245_p4, %s3875_s18), 1  ;;  %v3733_v8 = vld [vmem:[%s4817_s1 + $0x8] sm:$0xff]  ;;  %vm575_vm0 = vcmask 1042432   ;;  %vm576_vm1 = vcmask 1046532  }
   0xd   : > { %v3743_v1 = vld [vmem:[%s4817_s1 + $0x58] sm:$0xff]  ;;  %538 = vmatpush.bf16.msra.mxu1 %v3735_v0  ;;  %v3742_v5 = vld [vmem:[%s4817_s1 + $0x50] sm:$0xff]  ;;  %s3831_s13 = smul.u32 84, %s4833_s18  ;;  %vm292_vm2 = vsmask.f32 3328  ;;  %v3741_v9 = vld [vmem:[%s4817_s1 + $0x48] sm:$0xff] }
   0xe   : > { %v3739_v2 = vld [vmem:[%s4817_s1 + $0x38] sm:$0xff]  ;;  %667 = vmatpush.bf16.msra.mxu2 %v3743_v1  ;;  %v3738_v6 = vld [vmem:[%s4817_s1 + $0x30] sm:$0xff]  ;;  %v3737_v10 = vld [vmem:[%s4817_s1 + $0x28] sm:$0xff]  ;;  %vm436_vm3 = vcmask 523264   ;;  %vm293_vm4 = vsmask.f32 7440 }
   0xf   : > { %v3747_v3 = vld [vmem:[%s4817_s1 + $0x78] sm:$0xff]  ;;  %453 = vmatpush.bf16.msra.mxu0 %v3739_v2  ;;  %v3746_v7 = vld [vmem:[%s4817_s1 + $0x70] sm:$0xff]  ;;  %v3745_v11 = vld [vmem:[%s4817_s1 + $0x68] sm:$0xff]  ;;  %s3976_s28 = scalar_lea.vmem %s4816_s0, %s3831_s13  ;;  %vm704_vm5 = vsmask.f32 2304  ;;  %s3727_s30 = sshll.u32 %s4833_s18, 5 }
  0x10   : > { %860 = vmatpush.bf16.msra.mxu3 %v3747_v3  ;;  %v273_v12 = vld [vmem:[%s3976_s28 + $0x4] sm:$0xf]  ;;  %v288_v13 = vld [vmem:[%s3976_s28 + $0x8] sm:$0x1]  ;;  %vm705_vm6 = vsmask.f32 6416  ;;  %vm3983_vm7 = vmor %vm575_vm0, %vm576_vm1  ;;  %s4775_s8 = scalar_lea.vmem %s4820_s4, %s3727_s30 }
  0x11   : > { %539 = vmatpush.bf16.msra.mxu1 %v3734_v4  ;;  %v563_v14 = vld [vmem:[%s3976_s28] sm:$0xe]  ;;  %v580_v16 = vrot.slane %v273_v12, 5  ;;  %v583_v17 = vrot.slane %v288_v13, 5  ;;  %v305_v23 = vshll.u32 %v273_v12, 16  ;;  %v309_v27 = vshrl.u32 %v273_v12, 16  ;;  %vm4020_vm8 = vmor %vm292_vm2, %vm293_vm4 }
  0x12   : > { %668 = vmatpush.bf16.msra.mxu2 %v3742_v5  ;;  %v272_v18 = vld [vmem:[%s3976_s28] sm:$0xf]  ;;  %v3185_v20 = vrot.slane %v563_v14, 9  ;;  %v315_v28 = vshll.u32 %v288_v13, 16  ;;  %v708_v29 = vshrl.u32 %v563_v14, 16  ;;  %v3763_v38 = vld [vmem:[%s4817_s1 + $0xd8] sm:$0xff]  ;;  %vm4050_vm9 = vmor %vm704_vm5, %vm705_vm6 }
  0x13   : > { %454 = vmatpush.bf16.msra.mxu0 %v3738_v6  ;;  %v3732_v19 = vld [vmem:[%s4817_s1] sm:$0xff]  ;;  %v296_v21 = vshrl.u32 %v272_v18, 16  ;;  %v299_v22 = vshll.u32 %v272_v18, 16  ;;  %v582_v26 = vrot.slane %v580_v16, 4  ;;  %v307_v34 = vrot.slane %v305_v23, 5  ;;  %v3755_v41 = vld [vmem:[%s4817_s1 + $0x98] sm:$0xff] }
  0x14   : > { %861 = vmatpush.bf16.msra.mxu3 %v3746_v7  ;;  %v3740_v24 = vld [vmem:[%s4817_s1 + $0x40] sm:$0xff]  ;;  %v581_v30 = vsel %vm3983_vm7, %v3185_v20, %v580_v16  ;;  %v700_v35 = vld [vmem:[%s3976_s28 + $0x8] sm:$0x3]  ;;  %v311_v39 = vrot.slane %v309_v27, 4  ;;  %v317_v40 = vrot.slane %v315_v28, 5  ;;  %v710_v45 = vrot.slane %v708_v29, 5 }
  0x15   : > { %540 = vmatpush.bf16.msra.mxu1 %v3733_v8  ;;  %v3736_v25 = vld [vmem:[%s4817_s1 + $0x20] sm:$0xff]  ;;  %v298_v32 = vrot.slane %v296_v21, 4  ;;  %v301_v33 = vrot.slane %v299_v22, 5  ;;  %v584_v36 = vsel %vm3983_vm7, %v582_v26, %v583_v17  ;;  %v615_v37 = vunpack.c.l.b16 %v581_v30  ;;  %v3767_v47 = vld [vmem:[%s4817_s1 + $0xf8] sm:$0xff]  ;;  %v4016_v48 = vld [vmem:[%s3976_s28 + $0x10] sm:$0xf] }
  0x16   : > { %669 = vmatpush.bf16.msra.mxu2 %v3741_v9  ;;  %v3744_v31 = vld [vmem:[%s4817_s1 + $0x60] sm:$0xff]  ;;  %v616_v43 = vunpack.c.l.b16 %v584_v36  ;;  %v711_v46 = vshll.u32 %v563_v14, 16  ;;  %v312_v50 = vor.u32 %v311_v39, %v307_v34  ;;  %v716_v51 = vrot.slane %v309_v27, 5  ;;  %v3759_v54 = vld [vmem:[%s4817_s1 + $0xb8] sm:$0xff]  ;;  %v4028_v55 = vld [vmem:[%s3976_s28 + $0x14] sm:$0x1] }
  0x17   : > { %455 = vmatpush.bf16.msra.mxu0 %v3737_v10  ;;  %v3728_v42 = vld [vmem:[%s3976_s28] sm:$0xff]  ;;  %v302_v44 = vor.u32 %v301_v33, %v298_v32  ;;  %v717_v52 = vrot.slane %v305_v23, 6  ;;  %v722_v53 = vshrl.u32 %v700_v35, 16  ;;  %v725_v59 = vshll.u32 %v700_v35, 16  ;;  %v4031_v60 = vld [vmem:[%s3976_s28 + $0xc] sm:$0xe] }
  0x18   : > { %862 = vmatpush.bf16.msra.mxu3 %v3745_v11  ;;  %v623_v56 = vpack.c.b16 %v616_v43, %v615_v37  ;;  %v713_v58 = vrot.slane %v711_v46, 6  ;;  %v313_v61 = vrot.slane %v312_v50, 4  ;;  %v3186_v0 = vrot.slane %v4031_v60, 9  ;;  %v3762_v1 = vld [vmem:[%s4817_s1 + $0xd0] sm:$0xff]  ;;  %v274_v7 = vld [vmem:[%s3976_s28 + $0xc] sm:$0xf] }
  0x19   : > { %541 = vmatpush.bf16.msra.mxu1 %v3732_v19  ;;  %v303_v57 = vrot.slane %v302_v44, 4  ;;  %v718_v62 = vor.u32 %v717_v52, %v716_v51  ;;  %v724_v63 = vrot.slane %v722_v53, 5  ;;  %v3754_v2 = vld [vmem:[%s4817_s1 + $0x90] sm:$0xff]  ;;  %v727_v5 = vrot.slane %v725_v59, 6  ;;  %v4080_v46 = vld [vmem:[%s3976_s28 + $0x1c] sm:$0xf] }
  0x1a   : > { %670 = vmatpush.bf16.msra.mxu2 %v3740_v24  ;;  %v714_v4 = vor.u32 %v713_v58, %v710_v45  ;;  %v587_v6 = vrot.slane %v4016_v48, 5  ;;  %v318_v8 = vsel %vm4020_vm8, %v313_v61, %v317_v40  ;;  %v590_v12 = vrot.slane %v4028_v55, 5  ;;  %v3766_v13 = vld [vmem:[%s4817_s1 + $0xf0] sm:$0xff]  ;;  %v3761_v24 = vld [vmem:[%s4817_s1 + $0xc8] sm:$0xff]  ;;  %v565_v58 = vld [vmem:[%s3976_s28 + $0x18] sm:$0xe] }
  0x1b   : > { %456 = vmatpush.bf16.msra.mxu0 %v3736_v25  ;;  %v308_v3 = vsel %vm4020_vm8, %v303_v57, %v307_v34  ;;  %v720_v11 = vrot.slane %v718_v62, 4  ;;  %v3758_v14 = vld [vmem:[%s4817_s1 + $0xb0] sm:$0xff]  ;;  %v401_v16 = vunpack.c.l.b16 %v318_v8  ;;  %v728_v18 = vor.u32 %v727_v5, %v724_v63  ;;  %v3753_v52 = vld [vmem:[%s4817_s1 + $0x88] sm:$0xff]  ;;  %v2863_v10 = vld [vmem:[%s4819_s3 + $0x20] sm:$0xff]  ;;  %s3120_s9 = sshll.u32 %s4833_s18, 1 }
  0x1c   : > { %863 = vmatpush.bf16.msra.mxu3 %v3744_v31  ;;  %3181 = vmatmul.msk.bf16.vlgmr.msra.gmra.mxu1 %vm436_vm3, %v3728_v42  ;;  %v400_v9 = vunpack.c.l.b16 %v308_v3  ;;  %v715_v17 = vrot.slane %v714_v4, 4  ;;  %v588_v19 = vsel %vm3983_vm7, %v3186_v0, %v587_v6  ;;  %v589_v20 = vrot.slane %v587_v6, 4  ;;  %v701_v39 = vld [vmem:[%s3976_s28 + $0x14] sm:$0x3]  ;;  %v3765_v53 = vld [vmem:[%s4817_s1 + $0xe8] sm:$0xff]  ;;  %s266_s12 = scalar_lea.vmem %s4821_s5, %s3120_s9 }
  0x1d   : > { %3213 = vmatmul.msk.bf16.vlgmr.msra.gmra.mxu2 %vm436_vm3, %v623_v56  ;;  %1176 = vmatpush.bf16.msrb.mxu1 %v3759_v54  ;;  %v617_v21 = vunpack.c.l.b16 %v588_v19  ;;  %v320_v22 = vshrl.u32 %v274_v7, 16  ;;  %v323_v23 = vshll.u32 %v274_v7, 16  ;;  %v729_v27 = vsel %vm4050_vm9, %v720_v11, %v728_v18  ;;  %v3757_v59 = vld [vmem:[%s4817_s1 + $0xa8] sm:$0xff]  ;;  %v276_v6 = vld [vmem:[%s3976_s28 + $0x18] sm:$0xf] }
  0x1e   : > { %1314 = vmatpush.bf16.msrb.mxu2 %v3763_v38  ;;  %v408_v25 = vpack.c.b16 %v401_v16, %v400_v9  ;;  %v719_v26 = vsel %vm4050_vm9, %v715_v17, %v718_v62  ;;  %v329_v28 = vshll.u32 %v4016_v48, 16  ;;  %v809_v30 = vunpack.c.l.b16 %v729_v27  ;;  %v290_v62 = vld [vmem:[%s3976_s28 + $0x20] sm:$0x1] }
  0x1f   : > { %974 = vmatpush.bf16.msrb.mxu0 %v3755_v41  ;;  %v808_v29 = vunpack.c.l.b16 %v719_v26  ;;  %v591_v31 = vsel %vm3983_vm7, %v589_v20, %v590_v12  ;;  %v322_v32 = vrot.slane %v320_v22, 4  ;;  %v325_v34 = vrot.slane %v323_v23, 5  ;;  %v3760_v23 = vld [vmem:[%s4817_s1 + $0xc0] sm:$0xff] }
  0x20   : > { %1504 = vmatpush.bf16.msrb.mxu3 %v3767_v47  ;;  %3145 = vmatmul.msk.bf16.vlgmr.msra.gmra.mxu0 %vm436_vm3, %v408_v25  ;;  %v618_v33 = vunpack.c.l.b16 %v591_v31  ;;  %v331_v35 = vrot.slane %v329_v28, 5  ;;  %v333_v36 = vshrl.u32 %v4016_v48, 16  ;;  %v339_v38 = vshll.u32 %v4028_v55, 16 }
  0x21   : > { %1177 = vmatpush.bf16.msrb.mxu1 %v3758_v14  ;;  %v816_v37 = vpack.c.b16 %v809_v30, %v808_v29  ;;  %v731_v40 = vshrl.u32 %v4031_v60, 16  ;;  %v734_v41 = vshll.u32 %v4031_v60, 16  ;;  %v326_v43 = vor.u32 %v325_v34, %v322_v32 }
  0x22   : > { %1315 = vmatpush.bf16.msrb.mxu2 %v3762_v1  ;;  %v624_v42 = vpack.c.b16 %v618_v33, %v617_v21  ;;  %v335_v44 = vrot.slane %v333_v36, 4  ;;  %v739_v45 = vrot.slane %v333_v36, 5  ;;  %v341_v47 = vrot.slane %v339_v38, 5  ;;  %v3729_v1 = vld [vmem:[%s3976_s28 + $0xc] sm:$0xff]  ;;  %v702_v33 = vld [vmem:[%s3976_s28 + $0x20] sm:$0x3] }
  0x23   : > { %975 = vmatpush.bf16.msrb.mxu0 %v3754_v2  ;;  %3241 = vmatmul.msk.bf16.vlgmr.msra.gmra.mxu3 %vm436_vm3, %v816_v37  ;;  %v733_v48 = vrot.slane %v731_v40, 5  ;;  %v736_v50 = vrot.slane %v734_v41, 6  ;;  %v740_v51 = vrot.slane %v329_v28, 6  ;;  %v327_v54 = vrot.slane %v326_v43, 4 }
  0x24   : > { %1505 = vmatpush.bf16.msrb.mxu3 %v3766_v13  ;;  %v336_v55 = vor.u32 %v335_v44, %v331_v35  ;;  %v745_v56 = vshrl.u32 %v701_v39, 16  ;;  %v748_v57 = vshll.u32 %v701_v39, 16  ;;  %v3187_v63 = vrot.slane %v565_v58, 9 }
  0x25   : > { %v737_v60 = vor.u32 %v736_v50, %v733_v48  ;;  %v741_v61 = vor.u32 %v740_v51, %v739_v45  ;;  %v594_v0 = vrot.slane %v4080_v46, 5  ;;  %v332_v2 = vsel %vm4020_vm8, %v327_v54, %v331_v35  ;;  %1178 = vmatpush.bf16.msrb.mxu1 %v3757_v59  ;;  %v4119_v48 = vld [vmem:[%s3976_s28 + $0x28] sm:$0xf] }
  0x26   : > { %1316 = vmatpush.bf16.msrb.mxu2 %v3761_v24  ;;  %v337_v3 = vrot.slane %v336_v55, 4  ;;  %v747_v4 = vrot.slane %v745_v56, 5  ;;  %v750_v5 = vrot.slane %v748_v57, 6  ;;  %v402_v7 = vunpack.c.l.b16 %v332_v2  ;;  %v278_v57 = vld [vmem:[%s3976_s28 + $0x24] sm:$0xf] }
  0x27   : > { %976 = vmatpush.bf16.msrb.mxu0 %v3753_v52  ;;  %v738_v8 = vrot.slane %v737_v60, 4  ;;  %v743_v9 = vrot.slane %v741_v61, 4  ;;  %v595_v13 = vsel %vm3983_vm7, %v3187_v63, %v594_v0  ;;  %v596_v14 = vrot.slane %v594_v0, 4  ;;  %v3756_v63 = vld [vmem:[%s4817_s1 + $0xa0] sm:$0xff]  ;;  %v291_v2 = vld [vmem:[%s3976_s28 + $0x2c] sm:$0x1] }
  0x28   : > { %1506 = vmatpush.bf16.msrb.mxu3 %v3765_v53  ;;  %v342_v11 = vsel %vm4020_vm8, %v337_v3, %v341_v47  ;;  %v751_v12 = vor.u32 %v750_v5, %v747_v4  ;;  %v597_v18 = vrot.slane %v290_v62, 5  ;;  %v344_v19 = vshrl.u32 %v276_v6, 16  ;;  %v566_v5 = vld [vmem:[%s3976_s28 + $0x24] sm:$0xe] }
  0x29   : > { %v403_v16 = vunpack.c.l.b16 %v342_v11  ;;  %v742_v17 = vsel %vm4050_vm9, %v738_v8, %v741_v61  ;;  %v347_v22 = vshll.u32 %v276_v6, 16  ;;  %v619_v25 = vunpack.c.l.b16 %v595_v13  ;;  %v3752_v61 = vld [vmem:[%s4817_s1 + $0x80] sm:$0xff]  ;;  %1179 = vmatpush.bf16.msrb.mxu1 %v3756_v63 }
  0x2a   : > { %v752_v20 = vsel %vm4050_vm9, %v743_v9, %v751_v12  ;;  %v810_v21 = vunpack.c.l.b16 %v742_v17  ;;  %v346_v26 = vrot.slane %v344_v19, 4  ;;  %v353_v29 = vshll.u32 %v4080_v46, 16  ;;  %1317 = vmatpush.bf16.msrb.mxu2 %v3760_v23 }
  0x2b   : > { %v811_v24 = vunpack.c.l.b16 %v752_v20  ;;  %v409_v27 = vpack.c.b16 %v403_v16, %v402_v7  ;;  %v349_v28 = vrot.slane %v347_v22, 5  ;;  %v357_v30 = vshrl.u32 %v4080_v46, 16  ;;  %977 = vmatpush.bf16.msrb.mxu0 %v3752_v61  ;;  %v3730_v7 = vld [vmem:[%s3976_s28 + $0x18] sm:$0xff] }
  0x2c   : > { %3182 = vmatmul.msk.bf16.gmra.mxu1 %vm436_vm3, %v3729_v1  ;;  %v598_v31 = vsel %vm3983_vm7, %v596_v14, %v597_v18  ;;  %v363_v32 = vshll.u32 %v290_v62, 16  ;;  %v754_v34 = vshrl.u32 %v565_v58, 16  ;;  %v757_v35 = vshll.u32 %v565_v58, 16  ;;  %v3764_v62 = vld [vmem:[%s4817_s1 + $0xe0] sm:$0xff] }
  0x2d   : > { %3214 = vmatmul.msk.bf16.gmra.mxu2 %vm436_vm3, %v624_v42  ;;  %v817_v36 = vpack.c.b16 %v811_v24, %v810_v21  ;;  %v350_v37 = vor.u32 %v349_v28, %v346_v26  ;;  %v355_v38 = vrot.slane %v353_v29, 5  ;;  %v359_v39 = vrot.slane %v357_v30, 4  ;;  %1507 = vmatpush.bf16.msrb.mxu3 %v3764_v62  ;;  %v703_v24 = vld [vmem:[%s3976_s28 + $0x2c] sm:$0x3] }
  0x2e   : > { %v756_v40 = vrot.slane %v754_v34, 5  ;;  %v759_v41 = vrot.slane %v757_v35, 6  ;;  %v762_v42 = vrot.slane %v357_v30, 5  ;;  %v763_v43 = vrot.slane %v353_v29, 6 }
  0x2f   : > { %v351_v44 = vrot.slane %v350_v37, 4  ;;  %v360_v45 = vor.u32 %v359_v39, %v355_v38  ;;  %v768_v46 = vshrl.u32 %v702_v33, 16  ;;  %v771_v47 = vshll.u32 %v702_v33, 16 }
  0x30   : > { %3146 = vmatmul.msk.bf16.gmra.mxu0 %vm436_vm3, %v409_v27  ;;  %v620_v50 = vunpack.c.l.b16 %v598_v31  ;;  %v365_v51 = vrot.slane %v363_v32, 5  ;;  %v760_v52 = vor.u32 %v759_v41, %v756_v40  ;;  %v764_v53 = vor.u32 %v763_v43, %v762_v42  ;;  %v3297_v31 = vld [vmem:[%s3976_s28 + $0xc] sm:$0xf]  ;;  %v3783_v32 = vld [vmem:[%s4817_s1 + $0x158] sm:$0xff]  ;;  %v4154_v43 = vld [vmem:[%s3976_s28 + $0x10] sm:$0xf] }
  0x31   : > { %v361_v54 = vrot.slane %v360_v45, 4  ;;  %v770_v55 = vrot.slane %v768_v46, 5  ;;  %v773_v56 = vrot.slane %v771_v47, 6  ;;  %v601_v60 = vrot.slane %v4119_v48, 5  ;;  %1958 = vmatpush.bf16.msra.mxu2 %v3783_v32 }
  0x32   : > { %v761_v58 = vrot.slane %v760_v52, 4  ;;  %v766_v59 = vrot.slane %v764_v53, 4  ;;  %v356_v0 = vsel %vm4020_vm8, %v351_v44, %v355_v38  ;;  %v625_v3 = vpack.c.b16 %v620_v50, %v619_v25 }
  0x33   : > { %3242 = vmatmul.msk.bf16.gmra.mxu3 %vm436_vm3, %v817_v36  ;;  %v774_v1 = vor.u32 %v773_v56, %v770_v55  ;;  %v366_v4 = vsel %vm4020_vm8, %v361_v54, %v365_v51  ;;  %v368_v6 = vshrl.u32 %v278_v57, 16  ;;  %v3188_v11 = vrot.slane %v566_v5, 9 }
  0x34   : > { %v765_v8 = vsel %vm4050_vm9, %v761_v58, %v764_v53  ;;  %v371_v12 = vshll.u32 %v278_v57, 16  ;;  %v404_v13 = vunpack.c.l.b16 %v356_v0  ;;  %v603_v14 = vrot.slane %v601_v60, 4 }
  0x35   : > { %v775_v9 = vsel %vm4050_vm9, %v766_v59, %v774_v1  ;;  %v604_v16 = vrot.slane %v291_v2, 5  ;;  %v370_v17 = vrot.slane %v368_v6, 4  ;;  %v405_v18 = vunpack.c.l.b16 %v366_v4  ;;  %v3787_v6 = vld [vmem:[%s4817_s1 + $0x178] sm:$0xff] }
  0x36   : > { %v373_v19 = vrot.slane %v371_v12, 5  ;;  %v377_v20 = vshll.u32 %v4119_v48, 16  ;;  %v381_v21 = vshrl.u32 %v4119_v48, 16  ;;  %v812_v22 = vunpack.c.l.b16 %v765_v8  ;;  %2148 = vmatpush.bf16.msra.mxu3 %v3787_v6  ;;  %v3786_v6 = vld [vmem:[%s4817_s1 + $0x170] sm:$0xff] }
  0x37   : > { %v813_v23 = vunpack.c.l.b16 %v775_v9  ;;  %v777_v25 = vshrl.u32 %v566_v5, 16  ;;  %v780_v26 = vshll.u32 %v566_v5, 16  ;;  %v387_v30 = vshll.u32 %v291_v2, 16  ;;  %v3337_v2 = vld [vmem:[%s3976_s28 + $0xc] sm:$0xe]  ;;  %v3775_v5 = vld [vmem:[%s4817_s1 + $0x118] sm:$0xff] }
  0x38   : > { %v374_v27 = vor.u32 %v373_v19, %v370_v17  ;;  %v379_v28 = vrot.slane %v377_v20, 5  ;;  %v383_v29 = vrot.slane %v381_v21, 4  ;;  %v785_v35 = vrot.slane %v381_v21, 5  ;;  %1618 = vmatpush.bf16.msra.mxu0 %v3775_v5  ;;  %v3731_v17 = vld [vmem:[%s3976_s28 + $0x24] sm:$0xff]  ;;  %v3774_v5 = vld [vmem:[%s4817_s1 + $0x110] sm:$0xff] }
  0x39   : > { %v779_v33 = vrot.slane %v777_v25, 5  ;;  %v782_v34 = vrot.slane %v780_v26, 6  ;;  %v786_v36 = vrot.slane %v377_v20, 6  ;;  %v410_v37 = vpack.c.b16 %v405_v18, %v404_v13 }
  0x3a   : > { %v384_v38 = vor.u32 %v383_v29, %v379_v28  ;;  %v791_v39 = vshrl.u32 %v703_v24, 16  ;;  %v794_v40 = vshll.u32 %v703_v24, 16  ;;  %v1020_v44 = vshrl.u32 %v3297_v31, 16  ;;  %v3373_v24 = vld [vmem:[%s3976_s28 + $0x14] sm:$0x3]  ;;  %2149 = vmatpush.bf16.msra.mxu3 %v3786_v6 }
  0x3b   : > { %v783_v41 = vor.u32 %v782_v34, %v779_v33  ;;  %v787_v42 = vor.u32 %v786_v36, %v785_v35  ;;  %v1023_v45 = vshll.u32 %v3297_v31, 16  ;;  %v602_v46 = vsel %vm3983_vm7, %v3188_v11, %v601_v60  ;;  %v3299_v60 = vld [vmem:[%s3976_s28 + $0x14] sm:$0x1] }
  0x3c   : > { %3183 = vmatmul.msk.bf16.gmra.mxu1 %vm436_vm3, %v3730_v7  ;;  %v605_v47 = vsel %vm3983_vm7, %v603_v14, %v604_v16  ;;  %v793_v48 = vrot.slane %v791_v39, 5  ;;  %v796_v50 = vrot.slane %v794_v40, 6  ;;  %v818_v51 = vpack.c.b16 %v813_v23, %v812_v22  ;;  %v3779_v7 = vld [vmem:[%s4817_s1 + $0x138] sm:$0xff]  ;;  %1619 = vmatpush.bf16.msra.mxu0 %v3774_v5 }
  0x3d   : > { %3215 = vmatmul.msk.bf16.gmra.mxu2 %vm436_vm3, %v625_v3  ;;  %v375_v52 = vrot.slane %v374_v27, 4  ;;  %v385_v53 = vrot.slane %v384_v38, 4  ;;  %v389_v54 = vrot.slane %v387_v30, 5  ;;  %v784_v55 = vrot.slane %v783_v41, 4  ;;  %1820 = vmatpush.bf16.msra.mxu1 %v3779_v7  ;;  %v3300_v39 = vld [vmem:[%s3976_s28 + $0x18] sm:$0xf] }
  0x3e   : > { %v1022_v56 = vrot.slane %v1020_v44, 4  ;;  %v1025_v57 = vrot.slane %v1023_v45, 5  ;;  %v1029_v58 = vshll.u32 %v4154_v43, 16  ;;  %v789_v59 = vrot.slane %v787_v42, 4  ;;  %v3778_v7 = vld [vmem:[%s4817_s1 + $0x130] sm:$0xff] }
  0x3f   : > { %v797_v61 = vor.u32 %v796_v50, %v793_v48  ;;  %v1033_v62 = vshrl.u32 %v4154_v43, 16  ;;  %v621_v63 = vunpack.c.l.b16 %v602_v46  ;;  %v622_v0 = vunpack.c.l.b16 %v605_v47 }
  0x40   : > { %3147 = vmatmul.msk.bf16.gmra.mxu0 %vm436_vm3, %v410_v37  ;;  %v1031_v1 = vrot.slane %v1029_v58, 5  ;;  %v380_v3 = vsel %vm4020_vm8, %v375_v52, %v379_v28  ;;  %v390_v8 = vsel %vm4020_vm8, %v385_v53, %v389_v54  ;;  %v788_v9 = vsel %vm4050_vm9, %v784_v55, %v787_v42  ;;  %v3782_v37 = vld [vmem:[%s4817_s1 + $0x150] sm:$0xff]  ;;  %v4193_v42 = vld [vmem:[%s3976_s28 + $0x1c] sm:$0xf] }
  0x41   : > { %v1035_v4 = vrot.slane %v1033_v62, 4  ;;  %v1026_v11 = vor.u32 %v1025_v57, %v1022_v56  ;;  %v1039_v12 = vshll.u32 %v3299_v60, 16  ;;  %v798_v13 = vsel %vm4050_vm9, %v789_v59, %v797_v61  ;;  %1959 = vmatpush.bf16.msra.mxu2 %v3782_v37  ;;  %v3338_v59 = vld [vmem:[%s3976_s28 + $0x18] sm:$0xe]  ;;  %1821 = vmatpush.bf16.msra.mxu1 %v3778_v7 }
  0x42   : > { %v1227_v16 = vrot.slane %v4154_v43, 5  ;;  %v626_v18 = vpack.c.b16 %v622_v0, %v621_v63  ;;  %v1352_v19 = vshrl.u32 %v3337_v2, 16  ;;  %v1355_v20 = vshll.u32 %v3337_v2, 16  ;;  %v3302_v63 = vld [vmem:[%s3976_s28 + $0x20] sm:$0x1] }
  0x43   : > { %3243 = vmatmul.msk.bf16.gmra.mxu3 %vm436_vm3, %v818_v51  ;;  %v1036_v14 = vor.u32 %v1035_v4, %v1031_v1  ;;  %v406_v21 = vunpack.c.l.b16 %v380_v3  ;;  %v407_v22 = vunpack.c.l.b16 %v390_v8  ;;  %v814_v23 = vunpack.c.l.b16 %v788_v9 }
  0x44   : > { %v815_v25 = vunpack.c.l.b16 %v798_v13  ;;  %v1027_v26 = vrot.slane %v1026_v11, 4  ;;  %v1041_v27 = vrot.slane %v1039_v12, 5  ;;  %v3341_v28 = vrot.slane %v3337_v2, 9  ;;  %v3374_v12 = vld [vmem:[%s3976_s28 + $0x20] sm:$0x3] }
  0x45   : > { %v1037_v29 = vrot.slane %v1036_v14, 4  ;;  %v1229_v30 = vrot.slane %v1227_v16, 4  ;;  %v1230_v31 = vrot.slane %v3299_v60, 5  ;;  %v1360_v32 = vrot.slane %v1033_v62, 5 }
  0x46   : > { %v1354_v33 = vrot.slane %v1352_v19, 5  ;;  %v1357_v34 = vrot.slane %v1355_v20, 6  ;;  %v1361_v35 = vrot.slane %v1029_v58, 6  ;;  %v1366_v36 = vshrl.u32 %v3373_v24, 16 }
  0x47   : > { %v1369_v38 = vshll.u32 %v3373_v24, 16  ;;  %v411_v40 = vpack.c.b16 %v407_v22, %v406_v21  ;;  %v819_v41 = vpack.c.b16 %v815_v25, %v814_v23  ;;  %v1032_v43 = vsel %vm4020_vm8, %v1027_v26, %v1031_v1 }
  0x48   : > { %v1042_v44 = vsel %vm4020_vm8, %v1037_v29, %v1041_v27  ;;  %v1228_v45 = vsel %vm3983_vm7, %v3341_v28, %v1227_v16  ;;  %v1231_v46 = vsel %vm3983_vm7, %v1229_v30, %v1230_v31  ;;  %v1358_v47 = vor.u32 %v1357_v34, %v1354_v33  ;;  %v3303_v27 = vld [vmem:[%s3976_s28 + $0x24] sm:$0xf]  ;;  %v3781_v33 = vld [vmem:[%s4817_s1 + $0x148] sm:$0xff] }
  0x49   : > { %v1362_v48 = vor.u32 %v1361_v35, %v1360_v32  ;;  %v1368_v50 = vrot.slane %v1366_v36, 5  ;;  %v1044_v51 = vshrl.u32 %v3300_v39, 16  ;;  %v1371_v52 = vrot.slane %v1369_v38, 6  ;;  %v4228_v32 = vld [vmem:[%s3976_s28 + $0x28] sm:$0xf]  ;;  %v3748_v38 = vld [vmem:[%s3976_s28 + $0xc] sm:$0xff]  ;;  %1960 = vmatpush.bf16.msra.mxu2 %v3781_v33 }
  0x4a   : > { %v1047_v53 = vshll.u32 %v3300_v39, 16  ;;  %v1053_v54 = vshll.u32 %v4193_v42, 16  ;;  %v1057_v55 = vshrl.u32 %v4193_v42, 16  ;;  %v1124_v56 = vunpack.c.l.b16 %v1032_v43  ;;  %v3306_v33 = vld [vmem:[%s3976_s28 + $0x30] sm:$0xf] }
  0x4b   : > { %v1262_v57 = vunpack.c.l.b16 %v1228_v45  ;;  %v1263_v58 = vunpack.c.l.b16 %v1231_v46  ;;  %v1125_v61 = vunpack.c.l.b16 %v1042_v44  ;;  %v1359_v60 = vrot.slane %v1358_v47, 4 }
  0x4c   : > { %3184 = vmatmul.msk.bf16.gmra.mxu1 %vm436_vm3, %v3731_v17  ;;  %v1364_v62 = vrot.slane %v1362_v48, 4  ;;  %v1046_v0 = vrot.slane %v1044_v51, 4  ;;  %v1372_v1 = vor.u32 %v1371_v52, %v1368_v50  ;;  %v1049_v2 = vrot.slane %v1047_v53, 5 }
  0x4d   : > { %3216 = vmatmul.msk.bf16.gmra.mxu2 %vm436_vm3, %v626_v18  ;;  %v1055_v3 = vrot.slane %v1053_v54, 5  ;;  %v1059_v4 = vrot.slane %v1057_v55, 4  ;;  %v1375_v8 = vshrl.u32 %v3338_v59, 16  ;;  %v1378_v9 = vshll.u32 %v3338_v59, 16 }
  0x4e   : > { %v1270_v11 = vpack.c.b16 %v1263_v58, %v1262_v57  ;;  %v1132_v13 = vpack.c.b16 %v1125_v61, %v1124_v56  ;;  %v1363_v14 = vsel %vm4050_vm9, %v1359_v60, %v1362_v48  ;;  %v1063_v16 = vshll.u32 %v3302_v63, 16  ;;  %v3305_v57 = vld [vmem:[%s3976_s28 + $0x2c] sm:$0x1] }
  0x4f   : > { %v1234_v17 = vrot.slane %v4193_v42, 5  ;;  %v1373_v18 = vsel %vm4050_vm9, %v1364_v62, %v1372_v1  ;;  %v1050_v19 = vor.u32 %v1049_v2, %v1046_v0  ;;  %v1060_v20 = vor.u32 %v1059_v4, %v1055_v3  ;;  %v3339_v1 = vld [vmem:[%s3976_s28 + $0x24] sm:$0xe]  ;;  %v3773_v2 = vld [vmem:[%s4817_s1 + $0x108] sm:$0xff] }
  0x50   : > { %3148 = vmatmul.msk.bf16.gmra.mxu0 %vm436_vm3, %v411_v40  ;;  %v1383_v21 = vrot.slane %v1057_v55, 5  ;;  %v1377_v22 = vrot.slane %v1375_v8, 5  ;;  %v1380_v23 = vrot.slane %v1378_v9, 6  ;;  %v1384_v24 = vrot.slane %v1053_v54, 6  ;;  %v3777_v4 = vld [vmem:[%s4817_s1 + $0x128] sm:$0xff] }
  0x51   : > { %v1389_v25 = vshrl.u32 %v3374_v12, 16  ;;  %v1392_v26 = vshll.u32 %v3374_v12, 16  ;;  %v1452_v28 = vunpack.c.l.b16 %v1363_v14  ;;  %v1453_v29 = vunpack.c.l.b16 %v1373_v18  ;;  %1620 = vmatpush.bf16.msra.mxu0 %v3773_v2  ;;  %1822 = vmatpush.bf16.msra.mxu1 %v3777_v4  ;;  %v3375_v18 = vld [vmem:[%s3976_s28 + $0x2c] sm:$0x3] }
  0x52   : > { %v1065_v30 = vrot.slane %v1063_v16, 5  ;;  %v3342_v31 = vrot.slane %v3338_v59, 9  ;;  %v1051_v34 = vrot.slane %v1050_v19, 4  ;;  %v1061_v35 = vrot.slane %v1060_v20, 4 }
  0x53   : > { %3244 = vmatmul.msk.bf16.gmra.mxu3 %vm436_vm3, %v819_v41  ;;  %v1236_v36 = vrot.slane %v1234_v17, 4  ;;  %v1237_v37 = vrot.slane %v3302_v63, 5  ;;  %v1381_v39 = vor.u32 %v1380_v23, %v1377_v22  ;;  %v1385_v40 = vor.u32 %v1384_v24, %v1383_v21 }
  0x54   : > { %v1391_v41 = vrot.slane %v1389_v25, 5  ;;  %v1068_v42 = vshrl.u32 %v3303_v27, 16  ;;  %v1394_v43 = vrot.slane %v1392_v26, 6  ;;  %v1071_v44 = vshll.u32 %v3303_v27, 16 }
  0x55   : > { %v1077_v45 = vshll.u32 %v4228_v32, 16  ;;  %v1081_v46 = vshrl.u32 %v4228_v32, 16  ;;  %v1235_v47 = vsel %vm3983_vm7, %v3342_v31, %v1234_v17  ;;  %v1460_v48 = vpack.c.b16 %v1453_v29, %v1452_v28  ;;  %v3780_v31 = vld [vmem:[%s4817_s1 + $0x140] sm:$0xff] }
  0x56   : > { %v1056_v50 = vsel %vm4020_vm8, %v1051_v34, %v1055_v3  ;;  %v1066_v51 = vsel %vm4020_vm8, %v1061_v35, %v1065_v30  ;;  %v1238_v52 = vsel %vm3983_vm7, %v1236_v36, %v1237_v37  ;;  %v1382_v53 = vrot.slane %v1381_v39, 4  ;;  %v3785_v3 = vld [vmem:[%s4817_s1 + $0x168] sm:$0xff]  ;;  %v3749_v34 = vld [vmem:[%s3976_s28 + $0x18] sm:$0xff]  ;;  %v4273_v36 = vld [vmem:[%s3976_s28 + $0x34] sm:$0xf]  ;;  %1961 = vmatpush.bf16.msra.mxu2 %v3780_v31 }
  0x57   : > { %v1387_v54 = vrot.slane %v1385_v40, 4  ;;  %v1070_v55 = vrot.slane %v1068_v42, 4  ;;  %v1395_v56 = vor.u32 %v1394_v43, %v1391_v41  ;;  %v1073_v58 = vrot.slane %v1071_v44, 5  ;;  %2150 = vmatpush.bf16.msra.mxu3 %v3785_v3  ;;  %v3750_v31 = vld [vmem:[%s3976_s28 + $0x24] sm:$0xff] }
  0x58   : > { %v1079_v59 = vrot.slane %v1077_v45, 5  ;;  %v1083_v61 = vrot.slane %v1081_v46, 4  ;;  %v1126_v60 = vunpack.c.l.b16 %v1056_v50  ;;  %v1127_v62 = vunpack.c.l.b16 %v1066_v51 }
  0x59   : > { %v1264_v63 = vunpack.c.l.b16 %v1235_v47  ;;  %v1265_v0 = vunpack.c.l.b16 %v1238_v52  ;;  %v1386_v5 = vsel %vm4050_vm9, %v1382_v53, %v1385_v40  ;;  %v1087_v6 = vshll.u32 %v3305_v57, 16  ;;  %v3340_v53 = vld [vmem:[%s3976_s28 + $0x30] sm:$0xe] }
  0x5a   : > { %v1241_v7 = vrot.slane %v4228_v32, 5  ;;  %v1396_v8 = vsel %vm4050_vm9, %v1387_v54, %v1395_v56  ;;  %v1074_v9 = vor.u32 %v1073_v58, %v1070_v55  ;;  %v1133_v12 = vpack.c.b16 %v1127_v62, %v1126_v60 }
  0x5b   : > { %v1398_v14 = vshrl.u32 %v3339_v1, 16  ;;  %v1401_v16 = vshll.u32 %v3339_v1, 16  ;;  %v3343_v17 = vrot.slane %v3339_v1, 9  ;;  %v1454_v19 = vunpack.c.l.b16 %v1386_v5  ;;  %v3776_v1 = vld [vmem:[%s4817_s1 + $0x120] sm:$0xff] }
  0x5c   : > { %3333 = vmatmul.msk.bf16.vlgmr.msrb.gmra.mxu1 %vm436_vm3, %v1132_v13  ;;  %v1271_v13 = vpack.c.b16 %v1265_v0, %v1264_v63  ;;  %v1455_v20 = vunpack.c.l.b16 %v1396_v8  ;;  %v1089_v21 = vrot.slane %v1087_v6, 5  ;;  %v1243_v22 = vrot.slane %v1241_v7, 4  ;;  %v3772_v63 = vld [vmem:[%s4817_s1 + $0x100] sm:$0xff]  ;;  %v3376_v8 = vld [vmem:[%s3976_s28 + $0x38] sm:$0x3] }
  0x5d   : > { %3369 = vmatmul.msk.bf16.vlgmr.msrb.gmra.mxu2 %vm436_vm3, %v1270_v11  ;;  %v1084_v11 = vor.u32 %v1083_v61, %v1079_v59  ;;  %v1075_v23 = vrot.slane %v1074_v9, 4  ;;  %v1244_v25 = vrot.slane %v3305_v57, 5  ;;  %v1406_v26 = vrot.slane %v1081_v46, 5  ;;  %v3308_v57 = vld [vmem:[%s3976_s28 + $0x38] sm:$0x1]  ;;  %v3784_v0 = vld [vmem:[%s4817_s1 + $0x160] sm:$0xff]  ;;  %1621 = vmatpush.bf16.msra.mxu0 %v3772_v63 }
  0x5e   : > { %v1400_v27 = vrot.slane %v1398_v14, 5  ;;  %v1403_v28 = vrot.slane %v1401_v16, 6  ;;  %v1407_v29 = vrot.slane %v1077_v45, 6  ;;  %v1412_v30 = vshrl.u32 %v3375_v18, 16  ;;  %2151 = vmatpush.bf16.msra.mxu3 %v3784_v0  ;;  %1823 = vmatpush.bf16.msra.mxu1 %v3776_v1 }
  0x5f   : > { %v1085_v24 = vrot.slane %v1084_v11, 4  ;;  %v1415_v32 = vshll.u32 %v3375_v18, 16  ;;  %v1242_v35 = vsel %vm3983_vm7, %v3343_v17, %v1241_v7  ;;  %v1461_v37 = vpack.c.b16 %v1455_v20, %v1454_v19 }
  0x60   : > { %3293 = vmatmul.msk.bf16.vlgmr.msrb.gmra.mxu0 %vm436_vm3, %v3748_v38  ;;  %v1080_v38 = vsel %vm4020_vm8, %v1075_v23, %v1079_v59  ;;  %v1245_v40 = vsel %vm3983_vm7, %v1243_v22, %v1244_v25  ;;  %v1404_v41 = vor.u32 %v1403_v28, %v1400_v27  ;;  %v1408_v42 = vor.u32 %v1407_v29, %v1406_v26  ;;  %v4306_v26 = vld [vmem:[%s3976_s28 + $0x1c] sm:$0xf] }
  0x61   : > { %v1090_v39 = vsel %vm4020_vm8, %v1085_v24, %v1089_v21  ;;  %v1414_v43 = vrot.slane %v1412_v30, 5  ;;  %v1092_v44 = vshrl.u32 %v3306_v33, 16  ;;  %v1417_v45 = vrot.slane %v1415_v32, 6  ;;  %v3457_v21 = vld [vmem:[%s3976_s28 + $0x18] sm:$0xf] }
  0x62   : > { %v1095_v46 = vshll.u32 %v3306_v33, 16  ;;  %v1101_v47 = vshll.u32 %v4273_v36, 16  ;;  %v1128_v50 = vunpack.c.l.b16 %v1080_v38  ;;  %v1266_v51 = vunpack.c.l.b16 %v1242_v35 }
  0x63   : > { %3401 = vmatmul.msk.bf16.vlgmr.msrb.gmra.mxu3 %vm436_vm3, %v1460_v48  ;;  %v1105_v48 = vshrl.u32 %v4273_v36, 16  ;;  %v1267_v52 = vunpack.c.l.b16 %v1245_v40  ;;  %v1129_v54 = vunpack.c.l.b16 %v1090_v39  ;;  %v1405_v55 = vrot.slane %v1404_v41, 4  ;;  %v3803_v41 = vld [vmem:[%s4817_s1 + $0x1d8] sm:$0xff] }
  0x64   : > { %v1410_v56 = vrot.slane %v1408_v42, 4  ;;  %v1094_v58 = vrot.slane %v1092_v44, 4  ;;  %v1418_v59 = vor.u32 %v1417_v45, %v1414_v43  ;;  %v1097_v61 = vrot.slane %v1095_v46, 5  ;;  %2602 = vmatpush.bf16.msrb.mxu2 %v3803_v41 }
  0x65   : > { %v1103_v60 = vrot.slane %v1101_v47, 5  ;;  %v1107_v62 = vrot.slane %v1105_v48, 4  ;;  %v1421_v2 = vshrl.u32 %v3340_v53, 16  ;;  %v1424_v3 = vshll.u32 %v3340_v53, 16 }
  0x66   : > { %v1134_v4 = vpack.c.b16 %v1129_v54, %v1128_v50  ;;  %v1272_v5 = vpack.c.b16 %v1267_v52, %v1266_v51  ;;  %v1409_v6 = vsel %vm4050_vm9, %v1405_v55, %v1408_v42  ;;  %v1111_v7 = vshll.u32 %v3308_v57, 16  ;;  %v3459_v52 = vld [vmem:[%s3976_s28 + $0x20] sm:$0x1] }
  0x67   : > { %v1419_v9 = vsel %vm4050_vm9, %v1410_v56, %v1418_v59  ;;  %v1098_v11 = vor.u32 %v1097_v61, %v1094_v58  ;;  %v1423_v14 = vrot.slane %v1421_v2, 5  ;;  %v1426_v16 = vrot.slane %v1424_v3, 6  ;;  %v3497_v59 = vld [vmem:[%s3976_s28 + $0x18] sm:$0xe] }
  0x68   : > { %v1429_v17 = vrot.slane %v1105_v48, 5  ;;  %v1430_v18 = vrot.slane %v1101_v47, 6  ;;  %v1435_v19 = vshrl.u32 %v3376_v8, 16  ;;  %v1438_v20 = vshll.u32 %v3376_v8, 16  ;;  %v3795_v61 = vld [vmem:[%s4817_s1 + $0x198] sm:$0xff] }
  0x69   : > { %v1456_v22 = vunpack.c.l.b16 %v1409_v6  ;;  %v1457_v23 = vunpack.c.l.b16 %v1419_v9  ;;  %v1113_v24 = vrot.slane %v1111_v7, 5  ;;  %v3344_v25 = vrot.slane %v3340_v53, 9  ;;  %2262 = vmatpush.bf16.msrb.mxu0 %v3795_v61  ;;  %v3806_v61 = vld [vmem:[%s4817_s1 + $0x1f0] sm:$0xff] }
  0x6a   : > { %v1099_v27 = vrot.slane %v1098_v11, 4  ;;  %v1251_v30 = vrot.slane %v3308_v57, 5  ;;  %v1427_v32 = vor.u32 %v1426_v16, %v1423_v14  ;;  %v1431_v33 = vor.u32 %v1430_v18, %v1429_v17  ;;  %v3533_v14 = vld [vmem:[%s3976_s28 + $0x20] sm:$0x3]  ;;  %v3460_v16 = vld [vmem:[%s3976_s28 + $0x24] sm:$0xf] }
  0x6b   : > { %v1667_v35 = vshll.u32 %v3457_v21, 16  ;;  %v1673_v38 = vshll.u32 %v4306_v26, 16  ;;  %v1677_v39 = vshrl.u32 %v4306_v26, 16  ;;  %v1462_v40 = vpack.c.b16 %v1457_v23, %v1456_v22 }
  0x6c   : > { %3334 = vmatmul.msk.bf16.gmra.mxu1 %vm436_vm3, %v1133_v12  ;;  %v1108_v12 = vor.u32 %v1107_v62, %v1103_v60  ;;  %v1104_v42 = vsel %vm4020_vm8, %v1099_v27, %v1103_v60  ;;  %v1428_v46 = vrot.slane %v1427_v32, 4  ;;  %v1433_v50 = vrot.slane %v1431_v33, 4  ;;  %v3807_v60 = vld [vmem:[%s4817_s1 + $0x1f8] sm:$0xff] }
  0x6d   : > { %3370 = vmatmul.msk.bf16.gmra.mxu2 %vm436_vm3, %v1271_v13  ;;  %v1248_v13 = vrot.slane %v4273_v36, 5  ;;  %v1437_v36 = vrot.slane %v1435_v19, 5  ;;  %v1669_v48 = vrot.slane %v1667_v35, 5  ;;  %v4324_v53 = vrot.slane %v1673_v38, 5  ;;  %v3799_v62 = vld [vmem:[%s4817_s1 + $0x1b8] sm:$0xff]  ;;  %2792 = vmatpush.bf16.msrb.mxu3 %v3807_v60  ;;  %v3798_v60 = vld [vmem:[%s4817_s1 + $0x1b0] sm:$0xff] }
  0x6e   : > { %v1109_v28 = vrot.slane %v1108_v12, 4  ;;  %v1679_v54 = vrot.slane %v1677_v39, 4  ;;  %v1130_v55 = vunpack.c.l.b16 %v1104_v42  ;;  %v1683_v0 = vshll.u32 %v3459_v52, 16  ;;  %2464 = vmatpush.bf16.msrb.mxu1 %v3799_v62 }
  0x6f   : > { %v1250_v29 = vrot.slane %v1248_v13, 4  ;;  %v1249_v44 = vsel %vm3983_vm7, %v3344_v25, %v1248_v13  ;;  %v1432_v1 = vsel %vm4050_vm9, %v1428_v46, %v1431_v33  ;;  %v1996_v7 = vshrl.u32 %v3497_v59, 16 }
  0x70   : > { %3294 = vmatmul.msk.bf16.gmra.mxu0 %vm436_vm3, %v3749_v34  ;;  %v1664_v34 = vshrl.u32 %v3457_v21, 16  ;;  %v1114_v43 = vsel %vm4020_vm8, %v1109_v28, %v1113_v24  ;;  %v1268_v57 = vunpack.c.l.b16 %v1249_v44  ;;  %v1680_v3 = vor.u32 %v1679_v54, %v4324_v53  ;;  %v4346_v21 = vld [vmem:[%s3976_s28 + $0x28] sm:$0xf]  ;;  %v3802_v44 = vld [vmem:[%s4817_s1 + $0x1d0] sm:$0xff] }
  0x71   : > { %v1252_v45 = vsel %vm3983_vm7, %v1250_v29, %v1251_v30  ;;  %v1131_v56 = vunpack.c.l.b16 %v1114_v43  ;;  %v1999_v8 = vshll.u32 %v3497_v59, 16  ;;  %v1458_v9 = vunpack.c.l.b16 %v1432_v1  ;;  %v3751_v30 = vld [vmem:[%s3976_s28 + $0x30] sm:$0xff]  ;;  %2603 = vmatpush.bf16.msrb.mxu2 %v3802_v44  ;;  %2793 = vmatpush.bf16.msrb.mxu3 %v3806_v61 }
  0x72   : > { %v1666_v47 = vrot.slane %v1664_v34, 4  ;;  %v1269_v58 = vunpack.c.l.b16 %v1252_v45  ;;  %v1685_v13 = vrot.slane %v1683_v0, 5  ;;  %v1681_v17 = vrot.slane %v1680_v3, 4  ;;  %v3462_v45 = vld [vmem:[%s3976_s28 + $0x2c] sm:$0x1]  ;;  %2465 = vmatpush.bf16.msrb.mxu1 %v3798_v60 }
  0x73   : > { %3402 = vmatmul.msk.bf16.gmra.mxu3 %vm436_vm3, %v1461_v37  ;;  %v1440_v37 = vrot.slane %v1438_v20, 6  ;;  %v3501_v18 = vrot.slane %v3497_v59, 9  ;;  %v1874_v20 = vrot.slane %v3459_v52, 5  ;;  %v1998_v22 = vrot.slane %v1996_v7, 5  ;;  %v3794_v59 = vld [vmem:[%s4817_s1 + $0x190] sm:$0xff] }
  0x74   : > { %v1670_v63 = vor.u32 %v1669_v48, %v1666_v47  ;;  %v1273_v6 = vpack.c.b16 %v1269_v58, %v1268_v57  ;;  %v2001_v23 = vrot.slane %v1999_v8, 6  ;;  %v2004_v24 = vrot.slane %v1677_v39, 5  ;;  %2263 = vmatpush.bf16.msrb.mxu0 %v3794_v59 }
  0x75   : > { %v1441_v51 = vor.u32 %v1440_v37, %v1437_v36  ;;  %v2005_v25 = vrot.slane %v1673_v38, 6  ;;  %v2013_v27 = vshll.u32 %v3533_v14, 16  ;;  %v1688_v28 = vshrl.u32 %v3460_v16, 16 }
  0x76   : > { %v1671_v12 = vrot.slane %v1670_v63, 4  ;;  %v1691_v29 = vshll.u32 %v3460_v16, 16  ;;  %v1701_v32 = vshrl.u32 %v4346_v21, 16  ;;  %v1686_v36 = vsel %vm4020_vm8, %v1681_v17, %v1685_v13 }
  0x77   : > { %v1442_v2 = vsel %vm4050_vm9, %v1433_v50, %v1441_v51  ;;  %v2002_v38 = vor.u32 %v2001_v23, %v1998_v22  ;;  %v2006_v39 = vor.u32 %v2005_v25, %v2004_v24  ;;  %v2015_v41 = vrot.slane %v2013_v27, 6  ;;  %v3498_v50 = vld [vmem:[%s3976_s28 + $0x24] sm:$0xe]  ;;  %v4389_v22 = vld [vmem:[%s3976_s28 + $0x34] sm:$0xf] }
  0x78   : > { %v1459_v11 = vunpack.c.l.b16 %v1442_v2  ;;  %v1676_v34 = vsel %vm4020_vm8, %v1671_v12, %v4324_v53  ;;  %v1690_v42 = vrot.slane %v1688_v28, 4  ;;  %v1693_v43 = vrot.slane %v1691_v29, 5  ;;  %v3463_v12 = vld [vmem:[%s3976_s28 + $0x30] sm:$0xf]  ;;  %v3768_v29 = vld [vmem:[%s3976_s28 + $0x18] sm:$0xff] }
  0x79   : > { %v1703_v47 = vrot.slane %v1701_v32, 4  ;;  %v1768_v48 = vunpack.c.l.b16 %v1676_v34  ;;  %v1769_v51 = vunpack.c.l.b16 %v1686_v36  ;;  %v2003_v54 = vrot.slane %v2002_v38, 4 }
  0x7a   : > { %v1463_v33 = vpack.c.b16 %v1459_v11, %v1458_v9  ;;  %v1694_v57 = vor.u32 %v1693_v43, %v1690_v42  ;;  %v1707_v58 = vshll.u32 %v3462_v45, 16  ;;  %v1878_v63 = vrot.slane %v4346_v21, 5 }
  0x7b   : > { %v2019_v0 = vshrl.u32 %v3498_v50, 16  ;;  %v2022_v1 = vshll.u32 %v3498_v50, 16  ;;  %v1776_v2 = vpack.c.b16 %v1769_v51, %v1768_v48  ;;  %v3502_v11 = vrot.slane %v3498_v50, 9  ;;  %v4412_v48 = vld [vmem:[%s3976_s28 + $0x38] sm:$0x1] }
  0x7c   : > { %3335 = vmatmul.msk.bf16.gmra.mxu1 %vm436_vm3, %v1134_v4  ;;  %v1871_v4 = vrot.slane %v4306_v26, 5  ;;  %v2010_v26 = vshrl.u32 %v3533_v14, 16  ;;  %v1695_v8 = vrot.slane %v1694_v57, 4  ;;  %v1709_v9 = vrot.slane %v1707_v58, 5 }
  0x7d   : > { %3371 = vmatmul.msk.bf16.gmra.mxu2 %vm436_vm3, %v1272_v5  ;;  %v1135_v5 = vpack.c.b16 %v1131_v56, %v1130_v55  ;;  %v2008_v55 = vrot.slane %v2006_v39, 4  ;;  %v1880_v14 = vrot.slane %v1878_v63, 4  ;;  %v1881_v16 = vrot.slane %v3462_v45, 5 }
  0x7e   : > { %v1873_v19 = vrot.slane %v1871_v4, 4  ;;  %v1872_v35 = vsel %vm3983_vm7, %v3501_v18, %v1871_v4  ;;  %v2007_v4 = vsel %vm4050_vm9, %v2003_v54, %v2006_v39  ;;  %v2021_v17 = vrot.slane %v2019_v0, 5  ;;  %v3805_v0 = vld [vmem:[%s4817_s1 + $0x1e8] sm:$0xff] }
  0x7f   : > { %v1906_v52 = vunpack.c.l.b16 %v1872_v35  ;;  %v2024_v18 = vrot.slane %v2022_v1, 6  ;;  %v1712_v24 = vshrl.u32 %v3463_v12, 16  ;;  %v1715_v25 = vshll.u32 %v3463_v12, 16  ;;  %v3797_v1 = vld [vmem:[%s4817_s1 + $0x1a8] sm:$0xff]  ;;  %2794 = vmatpush.bf16.msrb.mxu3 %v3805_v0 }
  0x80   : > { %3295 = vmatmul.msk.bf16.gmra.mxu0 %vm436_vm3, %v3750_v31  ;;  %v1697_v31 = vshll.u32 %v4346_v21, 16  ;;  %v1875_v37 = vsel %vm3983_vm7, %v1873_v19, %v1874_v20  ;;  %v2027_v19 = vrot.slane %v1701_v32, 5  ;;  %v1721_v32 = vshll.u32 %v4389_v22, 16  ;;  %2466 = vmatpush.bf16.msrb.mxu1 %v3797_v1 }
  0x81   : > { %v1907_v53 = vunpack.c.l.b16 %v1875_v37  ;;  %v1882_v36 = vsel %vm3983_vm7, %v1880_v14, %v1881_v16  ;;  %v2025_v37 = vor.u32 %v2024_v18, %v2021_v17  ;;  %v1714_v42 = vrot.slane %v1712_v24, 4  ;;  %v3535_v16 = vld [vmem:[%s3976_s28 + $0x38] sm:$0x3] }
  0x82   : > { %v4367_v46 = vrot.slane %v1697_v31, 5  ;;  %v2028_v20 = vrot.slane %v1697_v31, 6  ;;  %v1879_v31 = vsel %vm3983_vm7, %v3502_v11, %v1878_v63  ;;  %v1717_v43 = vrot.slane %v1715_v25, 5  ;;  %v3793_v63 = vld [vmem:[%s4817_s1 + $0x188] sm:$0xff] }
  0x83   : > { %3403 = vmatmul.msk.bf16.gmra.mxu3 %vm436_vm3, %v1462_v40  ;;  %v2012_v40 = vrot.slane %v2010_v26, 5  ;;  %v1914_v3 = vpack.c.b16 %v1907_v53, %v1906_v52  ;;  %v2096_v26 = vunpack.c.l.b16 %v2007_v4  ;;  %v4416_v50 = vrot.slane %v1721_v32, 5  ;;  %2264 = vmatpush.bf16.msrb.mxu0 %v3793_v63 }
  0x84   : > { %v1704_v62 = vor.u32 %v1703_v47, %v4367_v46  ;;  %v1700_v28 = vsel %vm4020_vm8, %v1695_v8, %v4367_v46  ;;  %v4405_v38 = vor.u32 %v2028_v20, %v2027_v19  ;;  %v3801_v46 = vld [vmem:[%s4817_s1 + $0x1c8] sm:$0xff]  ;;  %v1908_v54 = vunpack.c.l.b16 %v1879_v31 }
  0x85   : > { %v2016_v56 = vor.u32 %v2015_v41, %v2012_v40  ;;  %v1770_v52 = vunpack.c.l.b16 %v1700_v28  ;;  %2604 = vmatpush.bf16.msrb.mxu2 %v3801_v46  ;;  %v2026_v57 = vrot.slane %v2025_v37, 4  ;;  %v1718_v61 = vor.u32 %v1717_v43, %v1714_v42  ;;  %v4444_v28 = vld [vmem:[%s3976_s28 + $0x40] sm:$0xf]  ;;  %v3769_v42 = vld [vmem:[%s3976_s28 + $0x24] sm:$0xff] }
  0x86   : > { %v1705_v13 = vrot.slane %v1704_v62, 4  ;;  %v2031_v58 = vrot.slane %v4405_v38, 4  ;;  %v1731_v60 = vshll.u32 %v4412_v48, 16  ;;  %v1885_v62 = vrot.slane %v4389_v22, 5 }
  0x87   : > { %v2017_v7 = vsel %vm4050_vm9, %v2008_v55, %v2016_v56  ;;  %v1909_v55 = vunpack.c.l.b16 %v1882_v36  ;;  %v3499_v56 = vld [vmem:[%s3976_s28 + $0x30] sm:$0xe]  ;;  %v2030_v12 = vsel %vm4050_vm9, %v2026_v57, %v4405_v38  ;;  %v1719_v14 = vrot.slane %v1718_v61, 4  ;;  %v3800_v61 = vld [vmem:[%s4817_s1 + $0x1c0] sm:$0xff] }
  0x88   : > { %v2097_v27 = vunpack.c.l.b16 %v2017_v7  ;;  %v2045_v8 = vshll.u32 %v3499_v56, 16  ;;  %v1733_v19 = vrot.slane %v1731_v60, 5  ;;  %v3503_v20 = vrot.slane %v3499_v56, 9 }
  0x89   : > { %v1915_v7 = vpack.c.b16 %v1909_v55, %v1908_v54  ;;  %v2051_v31 = vrot.slane %v1721_v32, 6  ;;  %v2098_v38 = vunpack.c.l.b16 %v2030_v12  ;;  %2605 = vmatpush.bf16.msrb.mxu2 %v3800_v61  ;;  %v3804_v12 = vld [vmem:[%s4817_s1 + $0x1e0] sm:$0xff]  ;;  %vm2957_vm10 = vcmask 1040384  }
  0x8a   : > { %v2104_v44 = vpack.c.b16 %v2097_v27, %v2096_v26  ;;  %v1888_v26 = vrot.slane %v4412_v48, 5  ;;  %2795 = vmatpush.bf16.msrb.mxu3 %v3804_v12 }
  0x8c   : > { %3336 = vmatmul.msk.bf16.gmra.mxu1 %vm436_vm3, %v1135_v5  ;;  %v3534_v5 = vld [vmem:[%s3976_s28 + $0x2c] sm:$0x3] }
  0x8d   : > { %3372 = vmatmul.msk.bf16.gmra.mxu2 %vm436_vm3, %v1273_v6  ;;  %v2033_v21 = vshrl.u32 %v3534_v5, 16  ;;  %v2036_v23 = vshll.u32 %v3534_v5, 16 }
  0x8f   : > { %v2035_v39 = vrot.slane %v2033_v21, 5  ;;  %v2038_v41 = vrot.slane %v2036_v23, 6  ;;  %v1887_v21 = vrot.slane %v1885_v62, 4  ;;  %v3466_v23 = vld [vmem:[%s3976_s28 + $0x3c] sm:$0xf] }
  0x90   : > { %3296 = vmatmul.msk.bf16.gmra.mxu0 %vm436_vm3, %v3751_v30  ;;  %v1710_v30 = vsel %vm4020_vm8, %v1705_v13, %v1709_v9  ;;  %v1736_v36 = vshrl.u32 %v3466_v23, 16  ;;  %v1739_v37 = vshll.u32 %v3466_v23, 16 }
  0x91   : > { %v1771_v53 = vunpack.c.l.b16 %v1710_v30  ;;  %v2039_v59 = vor.u32 %v2038_v41, %v2035_v39  ;;  %v1749_v41 = vshrl.u32 %v4444_v28, 16 }
  0x92   : > { %v1741_v54 = vrot.slane %v1739_v37, 5 }
  0x93   : > { %3404 = vmatmul.msk.bf16.gmra.mxu3 %vm436_vm3, %v1463_v33  ;;  %v1725_v33 = vshrl.u32 %v4389_v22, 16  ;;  %v2040_v13 = vsel %vm4050_vm9, %v2031_v58, %v2039_v59  ;;  %v1724_v22 = vsel %vm4020_vm8, %v1719_v14, %v4416_v50  ;;  %v1751_v59 = vrot.slane %v1749_v41, 4 }
  0x94   : > { %v2099_v39 = vunpack.c.l.b16 %v2040_v13  ;;  %v1772_v63 = vunpack.c.l.b16 %v1724_v22  ;;  %v3796_v13 = vld [vmem:[%s4817_s1 + $0x1a0] sm:$0xff]  ;;  %v1892_v14 = vrot.slane %v4444_v28, 5 }
  0x95   : > { %v1727_v51 = vrot.slane %v1725_v33, 4  ;;  %v2050_v30 = vrot.slane %v1725_v33, 5  ;;  %v1886_v33 = vsel %vm3983_vm7, %v3503_v20, %v1885_v62  ;;  %v4477_v62 = vld [vmem:[%s3976_s28 + $0x44] sm:$0x1]  ;;  %2467 = vmatpush.bf16.msrb.mxu1 %v3796_v13 }
  0x96   : > { %v1910_v1 = vunpack.c.l.b16 %v1886_v33  ;;  %v1895_v22 = vrot.slane %v4477_v62, 5  ;;  %v4505_v33 = vld [vmem:[%s3976_s28 + $0x28] sm:$0xf] }
  0x99   : > { %v543_v6 = vpop.f32.mrf.mxu1 }
  0x9c   : > { %3493 = vmatmul.msk.bf16.vlgmr.msra.gmra.mxu1 %vm436_vm3, %v1776_v2  ;;  %v1728_v2 = vor.u32 %v1727_v51, %v4416_v50  ;;  %v1738_v50 = vrot.slane %v1736_v36, 4 }
  0x9d   : > { %3529 = vmatmul.msk.bf16.vlgmr.msra.gmra.mxu2 %vm436_vm3, %v1914_v3  ;;  %v458_v34 = vpop.f32.mrf.mxu0  ;;  %v2042_v3 = vshrl.u32 %v3499_v56, 16  ;;  %v2105_v56 = vpack.c.b16 %v2099_v39, %v2098_v38  ;;  %v3617_v38 = vld [vmem:[%s3976_s28 + $0x24] sm:$0xf] }
  0x9e   : > { %v544_v40 = vadd.f32 %v543_v6, %v458_v34  ;;  %v1777_v6 = vpack.c.b16 %v1771_v53, %v1770_v52  ;;  %v1729_v25 = vrot.slane %v1728_v2, 4  ;;  %v2056_v34 = vshrl.u32 %v3535_v16, 16 }
  0x9f   : > { %v2044_v27 = vrot.slane %v2042_v3, 5  ;;  %v3500_v3 = vld [vmem:[%s3976_s28 + $0x3c] sm:$0xe] }
  0xa0   : > { %v672_v35 = vpop.f32.mrf.mxu2  ;;  %3453 = vmatmul.msk.bf16.vlgmr.msra.gmra.mxu0 %vm436_vm3, %v3768_v29  ;;  %v2047_v29 = vrot.slane %v2045_v8, 6  ;;  %v1734_v32 = vsel %vm4020_vm8, %v1729_v25, %v1733_v19  ;;  %v2058_v48 = vrot.slane %v2056_v34, 5  ;;  %v2068_v23 = vshll.u32 %v3500_v3, 16 }
  0xa1   : > { %v545_v45 = vpop.f32.mrf.mxu1  ;;  %v692_v47 = vadd.f32 %v672_v35, %v544_v40  ;;  %v2059_v35 = vshll.u32 %v3535_v16, 16  ;;  %v1745_v40 = vshll.u32 %v4444_v28, 16  ;;  %v1773_v0 = vunpack.c.l.b16 %v1734_v32 }
  0xa2   : > { %v2048_v46 = vor.u32 %v2047_v29, %v2044_v27  ;;  %v2065_v16 = vshrl.u32 %v3500_v3, 16  ;;  %v3504_v37 = vrot.slane %v3500_v3, 9 }
  0xa3   : > { %3561 = vmatmul.msk.bf16.vlgmr.msra.gmra.mxu3 %vm436_vm3, %v2104_v44  ;;  %v2061_v53 = vrot.slane %v2059_v35, 6  ;;  %v4468_v58 = vrot.slane %v1745_v40, 5  ;;  %v1778_v20 = vpack.c.b16 %v1773_v0, %v1772_v63 }
  0xa4   : > { %v2067_v32 = vrot.slane %v2065_v16, 5 }
  0xa5   : > { %v460_v4 = vpop.f32.mrf.mxu0  ;;  %v1752_v8 = vor.u32 %v1751_v59, %v4468_v58 }
  0xa6   : > { %v865_v9 = vpop.f32.mrf.mxu3  ;;  %v546_v11 = vadd.f32 %v545_v45, %v460_v4  ;;  %v1889_v45 = vsel %vm3983_vm7, %v1887_v21, %v1888_v26  ;;  %v2049_v4 = vrot.slane %v2048_v46, 4 }
  0xa7   : > { %v4439_v17 = vadd.f32 %v865_v9, %v692_v47  ;;  %v4462_v47 = vor.u32 %v2051_v31, %v2050_v30  ;;  %v1911_v2 = vunpack.c.l.b16 %v1889_v45  ;;  %v1755_v9 = vshll.u32 %v4477_v62, 16  ;;  %v3536_v30 = vld [vmem:[%s3976_s28 + $0x44] sm:$0x3] }
  0xa8   : > { %v674_v5 = vpop.f32.mrf.mxu2  ;;  %v1753_v35 = vrot.slane %v1752_v8, 4  ;;  %v2074_v45 = vrot.slane %v1745_v40, 6  ;;  %v2079_v46 = vshrl.u32 %v3536_v30, 16 }
  0xa9   : > { %v548_v18 = vpop.f32.mrf.mxu1  ;;  %v693_v24 = vadd.f32 %v674_v5, %v546_v11  ;;  %v2054_v5 = vrot.slane %v4462_v47, 4  ;;  %v3792_v11 = vld [vmem:[%s4817_s1 + $0x180] sm:$0xff]  ;;  %v1916_v21 = vpack.c.b16 %v1911_v2, %v1910_v1  ;;  %v2053_v26 = vsel %vm4050_vm9, %v2049_v4, %v4462_v47 }
  0xaa   : > { %2265 = vmatpush.bf16.msrb.mxu0 %v3792_v11  ;;  %v1757_v36 = vrot.slane %v1755_v9, 5  ;;  %v2082_v47 = vshll.u32 %v3536_v30, 16  ;;  %v2081_v63 = vrot.slane %v2079_v46, 5  ;;  %v3619_v11 = vld [vmem:[%s3976_s28 + $0x2c] sm:$0x1] }
  0xac   : > { %3494 = vmatmul.msk.bf16.gmra.mxu1 %vm436_vm3, %v1777_v6  ;;  %v2062_v6 = vor.u32 %v2061_v53, %v2058_v48  ;;  %v2308_v48 = vshrl.u32 %v3617_v38, 16  ;;  %v1758_v40 = vsel %vm4020_vm8, %v1753_v35, %v1757_v36  ;;  %v2084_v2 = vrot.slane %v2082_v47, 6  ;;  %v3620_v47 = vld [vmem:[%s3976_s28 + $0x30] sm:$0xf] }
  0xad   : > { %3530 = vmatmul.msk.bf16.gmra.mxu2 %vm436_vm3, %v1915_v7  ;;  %v463_v43 = vpop.f32.mrf.mxu0  ;;  %v1742_v7 = vor.u32 %v1741_v54, %v1738_v50  ;;  %v2317_v50 = vshll.u32 %v4505_v33, 16  ;;  %v2321_v54 = vshrl.u32 %v4505_v33, 16  ;;  %v1775_v13 = vunpack.c.l.b16 %v1758_v40 }
  0xae   : > { %v867_v51 = vpop.f32.mrf.mxu3  ;;  %v549_v52 = vadd.f32 %v548_v18, %v463_v43  ;;  %v2063_v27 = vsel %vm4050_vm9, %v2054_v5, %v2062_v6  ;;  %v2070_v43 = vrot.slane %v2068_v23, 6 }
  0xaf   : > { %v4464_v55 = vadd.f32 %v867_v51, %v693_v24  ;;  %v1743_v29 = vrot.slane %v1742_v7, 4  ;;  %v2311_v51 = vshll.u32 %v3617_v38, 16  ;;  %v2101_v53 = vunpack.c.l.b16 %v2063_v27 }
  0xb0   : > { %v677_v44 = vpop.f32.mrf.mxu2  ;;  %3454 = vmatmul.msk.bf16.gmra.mxu0 %vm436_vm3, %v3769_v42  ;;  %v1894_v42 = vrot.slane %v1892_v14, 4  ;;  %v4527_v7 = vrot.slane %v2317_v50, 5  ;;  %v2323_v8 = vrot.slane %v2321_v54, 4  ;;  %v2648_v40 = vrot.slane %v2321_v54, 5 }
  0xb1   : > { %v550_v57 = vpop.f32.mrf.mxu1  ;;  %v694_v60 = vadd.f32 %v677_v44, %v549_v52  ;;  %v2073_v44 = vrot.slane %v1749_v41, 5  ;;  %v2100_v52 = vunpack.c.l.b16 %v2053_v26  ;;  %v1748_v28 = vsel %vm4020_vm8, %v1743_v29, %v4468_v58 }
  0xb2   : > { %v1893_v41 = vsel %vm3983_vm7, %v3504_v37, %v1892_v14  ;;  %v1896_v61 = vsel %vm3983_vm7, %v1894_v42, %v1895_v22  ;;  %v2310_v58 = vrot.slane %v2308_v48, 4  ;;  %v2313_v3 = vrot.slane %v2311_v51, 5 }
  0xb3   : > { %3562 = vmatmul.msk.bf16.gmra.mxu3 %vm436_vm3, %v2105_v56  ;;  %v3770_v56 = vld [vmem:[%s3976_s28 + $0x30] sm:$0xff]  ;;  %v2075_v62 = vor.u32 %v2074_v45, %v2073_v44  ;;  %v2106_v5 = vpack.c.b16 %v2101_v53, %v2100_v52  ;;  %v1774_v12 = vunpack.c.l.b16 %v1748_v28  ;;  %v1912_v14 = vunpack.c.l.b16 %v1893_v41 }
  0xb4   : > { %v1913_v16 = vunpack.c.l.b16 %v1896_v61  ;;  %v2314_v23 = vor.u32 %v2313_v3, %v2310_v58  ;;  %v2515_v26 = vrot.slane %v4505_v33, 5  ;;  %v2518_v52 = vrot.slane %v3619_v11, 5 }
  0xb5   : > { %v465_v18 = vpop.f32.mrf.mxu0  ;;  %v2649_v41 = vrot.slane %v2317_v50, 6  ;;  %v2332_v61 = vshrl.u32 %v3620_v47, 16 }
  0xb6   : > { %v870_v24 = vpop.f32.mrf.mxu3  ;;  %v551_v25 = vadd.f32 %v550_v57, %v465_v18  ;;  %v3657_v18 = vld [vmem:[%s3976_s28 + $0x24] sm:$0xe]  ;;  %v1917_v35 = vpack.c.b16 %v1913_v16, %v1912_v14  ;;  %v2315_v22 = vrot.slane %v2314_v23, 4  ;;  %v2517_v51 = vrot.slane %v2515_v26, 4 }
  0xb7   : > { %v4500_v31 = vadd.f32 %v870_v24, %v694_v60  ;;  %v2071_v60 = vor.u32 %v2070_v43, %v2067_v32  ;;  %v2324_v24 = vor.u32 %v2323_v8, %v4527_v7  ;;  %v2640_v27 = vshrl.u32 %v3657_v18, 16  ;;  %v3693_v32 = vld [vmem:[%s3976_s28 + $0x2c] sm:$0x3] }
  0xb8   : > { %v679_v19 = vpop.f32.mrf.mxu2  ;;  %v2643_v36 = vshll.u32 %v3657_v18, 16  ;;  %v3661_v46 = vrot.slane %v3657_v18, 9  ;;  %v2320_v54 = vsel %vm4020_vm8, %v2315_v22, %v4527_v7  ;;  %v2334_v7 = vrot.slane %v2332_v61, 4 }
  0xb9   : > { %v553_v34 = vpop.f32.mrf.mxu1  ;;  %v695_v39 = vadd.f32 %v679_v19, %v551_v25  ;;  %v2072_v19 = vrot.slane %v2071_v60, 4  ;;  %v2327_v25 = vshll.u32 %v3619_v11, 16  ;;  %v2325_v44 = vrot.slane %v2324_v24, 4 }
  0xba   : > { %v2642_v53 = vrot.slane %v2640_v27, 5  ;;  %v2645_v28 = vrot.slane %v2643_v36, 6  ;;  %v2335_v60 = vshll.u32 %v3620_v47, 16  ;;  %v2516_v58 = vsel %vm3983_vm7, %v3661_v46, %v2515_v26  ;;  %v4572_v26 = vld [vmem:[%s3976_s28 + $0x38] sm:$0x1] }
  0xbb   : > { %v2329_v45 = vrot.slane %v2327_v25, 5  ;;  %v2412_v25 = vunpack.c.l.b16 %v2320_v54 }
  0xbc   : > { %3495 = vmatmul.msk.bf16.gmra.mxu1 %vm436_vm3, %v1778_v20  ;;  %v2077_v20 = vrot.slane %v2075_v62, 4  ;;  %v2646_v8 = vor.u32 %v2645_v28, %v2642_v53  ;;  %v2337_v16 = vrot.slane %v2335_v60, 5 }
  0xbd   : > { %3531 = vmatmul.msk.bf16.gmra.mxu2 %vm436_vm3, %v1916_v21  ;;  %v468_v57 = vpop.f32.mrf.mxu0  ;;  %v2085_v21 = vor.u32 %v2084_v2, %v2081_v63  ;;  %v3771_v2 = vld [vmem:[%s3976_s28 + $0x3c] sm:$0xff]  ;;  %v2330_v50 = vsel %vm4020_vm8, %v2325_v44, %v2329_v45 }
  0xbe   : > { %v872_v0 = vpop.f32.mrf.mxu3  ;;  %v554_v1 = vadd.f32 %v553_v34, %v468_v57  ;;  %v1779_v34 = vpack.c.b16 %v1775_v13, %v1774_v12  ;;  %v2654_v57 = vshrl.u32 %v3693_v32, 16  ;;  %v2413_v27 = vunpack.c.l.b16 %v2330_v50 }
  0xbf   : > { %v4525_v4 = vadd.f32 %v872_v0, %v695_v39  ;;  %v2076_v39 = vsel %vm4050_vm9, %v2072_v19, %v2075_v62  ;;  %v2086_v42 = vsel %vm4050_vm9, %v2077_v20, %v2085_v21 }
  0xc0   : > { %v682_v59 = vpop.f32.mrf.mxu2  ;;  %3455 = vmatmul.msk.bf16.gmra.mxu0 %vm436_vm3, %v3770_v56  ;;  %v4544_v56 = vld [vmem:[%s3976_s28 + $0x34] sm:$0xf]  ;;  %v2102_v62 = vunpack.c.l.b16 %v2076_v39  ;;  %v2103_v63 = vunpack.c.l.b16 %v2086_v42  ;;  %v2656_v11 = vrot.slane %v2654_v57, 5  ;;  %v2351_v42 = vshll.u32 %v4572_v26, 16 }
  0xc1   : > { %v555_v6 = vpop.f32.mrf.mxu1  ;;  %v696_v9 = vadd.f32 %v682_v59, %v554_v1  ;;  %v2657_v59 = vshll.u32 %v3693_v32, 16  ;;  %v2341_v0 = vshll.u32 %v4544_v56, 16  ;;  %v2345_v1 = vshrl.u32 %v4544_v56, 16 }
  0xc2   : > { %v2107_v19 = vpack.c.b16 %v2103_v63, %v2102_v62  ;;  %v2522_v22 = vrot.slane %v4544_v56, 5  ;;  %v2420_v45 = vpack.c.b16 %v2413_v27, %v2412_v25  ;;  %v2353_v61 = vrot.slane %v2351_v42, 5  ;;  %v2859_v63 = vld [vmem:[%s4819_s3] sm:$0xff] }
  0xc3   : > { %3563 = vmatmul.msk.bf16.gmra.mxu3 %vm436_vm3, %v2106_v5  ;;  %v2659_v14 = vrot.slane %v2657_v59, 6  ;;  %v4566_v21 = vrot.slane %v2341_v0, 5  ;;  %v2347_v23 = vrot.slane %v2345_v1, 4  ;;  %v3885_v62 = vmov 0  }
  0xc4   : > { %3857 = vset.pattern.permute.xlu0 %v3885_v62  ;;  %3858 = vset.pattern.permute.xlu1 %v3885_v62  ;;  %v2524_v50 = vrot.slane %v2522_v22, 4 }
  0xc5   : > { %v470_v29 = vpop.f32.mrf.mxu0  ;;  %v2348_v39 = vor.u32 %v2347_v23, %v4566_v21  ;;  %2877 = vperm.xlu0 %3857, %v2859_v63   ;;  %3859 = vset.pattern.permute.xlu2 %v3885_v62  ;;  %v3788_v23 = vld [vmem:[%s3976_s28 + $0x24] sm:$0xff] }
  0xc6   : > { %v875_v37 = vpop.f32.mrf.mxu3  ;;  %v556_v38 = vadd.f32 %v555_v6, %v470_v29  ;;  %v2519_v6 = vsel %vm3983_vm7, %v2517_v51, %v2518_v52  ;;  %v2550_v29 = vunpack.c.l.b16 %v2516_v58  ;;  %v2525_v58 = vrot.slane %v4572_v26, 5  ;;  %2897 = vperm.xlu2 %3859, %v2863_v10  }
  0xc7   : > { %v4540_v43 = vadd.f32 %v875_v37, %v696_v9  ;;  %v4560_v9 = vor.u32 %v2649_v41, %v2648_v40  ;;  %v2660_v37 = vor.u32 %v2659_v14, %v2656_v11  ;;  %v3694_v40 = vld [vmem:[%s3976_s28 + $0x38] sm:$0x3]  ;;  %v2349_v59 = vrot.slane %v2348_v39, 4 }
  0xc8   : > { %v684_v30 = vpop.f32.mrf.mxu2  ;;  %v2677_v11 = vshrl.u32 %v3694_v40, 16  ;;  %v2526_v26 = vsel %vm3983_vm7, %v2524_v50, %v2525_v58 }
  0xc9   : > { %v558_v33 = vpop.f32.mrf.mxu1  ;;  %v697_v48 = vadd.f32 %v684_v30, %v556_v38  ;;  %v2551_v30 = vunpack.c.l.b16 %v2519_v6  ;;  %v2652_v36 = vrot.slane %v4560_v9, 4  ;;  %v2338_v38 = vor.u32 %v2337_v16, %v2334_v7 }
  0xcb   : > { %v2558_v46 = vpack.c.b16 %v2551_v30, %v2550_v29  ;;  %v2661_v53 = vsel %vm4050_vm9, %v2652_v36, %v2660_v37  ;;  %v2339_v28 = vrot.slane %v2338_v38, 4  ;;  %v2679_v30 = vrot.slane %v2677_v11, 5 }
  0xcc   : > { %3496 = vmatmul.msk.bf16.gmra.mxu1 %vm436_vm3, %v1779_v34  ;;  %v2647_v34 = vrot.slane %v2646_v8, 4  ;;  %v2671_v8 = vrot.slane %v2345_v1, 5  ;;  %v2741_v16 = vunpack.c.l.b16 %v2661_v53 }
  0xcd   : > { %3532 = vmatmul.msk.bf16.gmra.mxu2 %vm436_vm3, %v1917_v35  ;;  %v473_v3 = vpop.f32.mrf.mxu0  ;;  %v3658_v35 = vld [vmem:[%s3976_s28 + $0x30] sm:$0xe]  ;;  %v2344_v56 = vsel %vm4020_vm8, %v2339_v28, %v4566_v21 }
  0xce   : > { %v877_v12 = vpop.f32.mrf.mxu3  ;;  %v559_v13 = vadd.f32 %v558_v33, %v473_v3  ;;  %v2663_v32 = vshrl.u32 %v3658_v35, 16  ;;  %v2651_v47 = vsel %vm4050_vm9, %v2647_v34, %v4560_v9  ;;  %v3662_v60 = vrot.slane %v3658_v35, 9 }
  0xcf   : > { %v4562_v18 = vadd.f32 %v877_v12, %v697_v48  ;;  %v2666_v48 = vshll.u32 %v3658_v35, 16  ;;  %v2672_v9 = vrot.slane %v2341_v0, 6  ;;  %v2680_v12 = vshll.u32 %v3694_v40, 16 }
  0xd0   : > { %v687_v5 = vpop.f32.mrf.mxu2  ;;  %3456 = vmatmul.msk.bf16.gmra.mxu0 %vm436_vm3, %v3771_v2  ;;  %v3623_v2 = vld [vmem:[%s3976_s28 + $0x3c] sm:$0xf]  ;;  %v2665_v3 = vrot.slane %v2663_v32, 5  ;;  %v2740_v7 = vunpack.c.l.b16 %v2651_v47  ;;  %v2354_v0 = vsel %vm4020_vm8, %v2349_v59, %v2353_v61  ;;  %v2523_v1 = vsel %vm3983_vm7, %v3662_v60, %v2522_v22  ;;  %v2860_v22 = vld [vmem:[%s4819_s3 + $0x8] sm:$0xff] }
  0xd1   : > { %v560_v20 = vpop.f32.mrf.mxu1  ;;  %v698_v24 = vadd.f32 %v687_v5, %v559_v13  ;;  %v4594_v5 = vld [vmem:[%s3976_s28 + $0x40] sm:$0xf]  ;;  %v2668_v6 = vrot.slane %v2666_v48, 6  ;;  %v2356_v13 = vshrl.u32 %v3623_v2, 16  ;;  %v2359_v14 = vshll.u32 %v3623_v2, 16  ;;  %2882 = vperm.xlu0 %3857, %v2860_v22  }
  0xd2   : > { %v4614_v29 = vor.u32 %v2672_v9, %v2671_v8  ;;  %v2682_v21 = vrot.slane %v2680_v12, 6  ;;  %v2748_v39 = vpack.c.b16 %v2741_v16, %v2740_v7  ;;  %v2552_v47 = vunpack.c.l.b16 %v2523_v1 }
  0xd3   : > { %3564 = vmatmul.msk.bf16.gmra.mxu3 %vm436_vm3, %v2107_v19  ;;  %v2365_v19 = vshll.u32 %v4594_v5, 16  ;;  %v2669_v27 = vor.u32 %v2668_v6, %v2665_v3  ;;  %v2358_v36 = vrot.slane %v2356_v13, 4  ;;  %v2361_v37 = vrot.slane %v2359_v14, 5  ;;  %v3695_v13 = vld [vmem:[%s3976_s28 + $0x44] sm:$0x3] }
  0xd4   : > { %v2553_v48 = vunpack.c.l.b16 %v2526_v26  ;;  %v2675_v28 = vrot.slane %v4614_v29, 4  ;;  %v2683_v40 = vor.u32 %v2682_v21, %v2679_v30  ;;  %v2529_v60 = vrot.slane %v4594_v5, 5 }
  0xd5   : > { %v475_v33 = vpop.f32.mrf.mxu0  ;;  %v4624_v32 = vrot.slane %v2365_v19, 5  ;;  %v2362_v59 = vor.u32 %v2361_v37, %v2358_v36 }
  0xd6   : > { %v880_v51 = vpop.f32.mrf.mxu3  ;;  %v561_v52 = vadd.f32 %v560_v20, %v475_v33  ;;  %v2369_v20 = vshrl.u32 %v4594_v5, 16  ;;  %v2559_v58 = vpack.c.b16 %v2553_v48, %v2552_v47  ;;  %v2684_v9 = vsel %vm4050_vm9, %v2675_v28, %v2683_v40 }
  0xd7   : > { %v4586_v41 = vadd.f32 %v880_v51, %v698_v24  ;;  %v2670_v51 = vrot.slane %v2669_v27, 4  ;;  %v2363_v11 = vrot.slane %v2362_v59, 4  ;;  %v2695_v27 = vrot.slane %v2365_v19, 6 }
  0xd8   : > { %v689_v44 = vpop.f32.mrf.mxu2  ;;  %v2371_v33 = vrot.slane %v2369_v20, 4  ;;  %v2694_v26 = vrot.slane %v2369_v20, 5  ;;  %v2743_v36 = vunpack.c.l.b16 %v2684_v9  ;;  %v3789_v20 = vld [vmem:[%s3976_s28 + $0x30] sm:$0xff] }
  0xd9   : > { %v1181_v57 = vpop.f32.mrf.mxu1  ;;  %v699_v54 = vadd.f32 %v689_v44, %v561_v52  ;;  %v2414_v44 = vunpack.c.l.b16 %v2344_v56  ;;  %v3659_v52 = vld [vmem:[%s3976_s28 + $0x3c] sm:$0xe]  ;;  %v2674_v3 = vsel %vm4050_vm9, %v2670_v51, %v4614_v29  ;;  %v2700_v29 = vshrl.u32 %v3695_v13, 16 }
  0xda   : > { %v2686_v62 = vshrl.u32 %v3659_v52, 16  ;;  %v2689_v63 = vshll.u32 %v3659_v52, 16  ;;  %v3663_v12 = vrot.slane %v3659_v52, 9  ;;  %v2742_v21 = vunpack.c.l.b16 %v2674_v3 }
  0xdb   : > { %v2368_v37 = vsel %vm4020_vm8, %v2363_v11, %v4624_v32  ;;  %v3628_v11 = vld [vmem:[%s3976_s28 + $0x50] sm:$0x1] }
  0xdc   : > { %3653 = vmatmul.msk.bf16.vlgmr.msrb.gmra.mxu1 %vm436_vm3, %v2420_v45  ;;  %v3625_v45 = vld [vmem:[%s3976_s28 + $0x44] sm:$0x1]  ;;  %v2530_v19 = vsel %vm3983_vm7, %v3663_v12, %v2529_v60  ;;  %v2749_v40 = vpack.c.b16 %v2743_v36, %v2742_v21  ;;  %v3660_v12 = vld [vmem:[%s3976_s28 + $0x48] sm:$0xe] }
  0xdd   : > { %3689 = vmatmul.msk.bf16.vlgmr.msrb.gmra.mxu2 %vm436_vm3, %v2558_v46  ;;  %v979_v24 = vpop.f32.mrf.mxu0  ;;  %v2415_v46 = vunpack.c.l.b16 %v2354_v0  ;;  %v2375_v61 = vshll.u32 %v3625_v45, 16  ;;  %v2532_v56 = vrot.slane %v3625_v45, 5  ;;  %v2861_v0 = vld [vmem:[%s4819_s3 + $0x10] sm:$0xff]  ;;  %v2702_v45 = vrot.slane %v2700_v29, 5 }
  0xde   : > { %v882_v34 = vpop.f32.mrf.mxu3  ;;  %v999_v35 = vadd.f32 %v979_v24, %v4439_v17  ;;  %v2688_v24 = vrot.slane %v2686_v62, 5  ;;  %2887 = vperm.xlu1 %3858, %v2861_v0   ;;  %v2554_v62 = vunpack.c.l.b16 %v2530_v19 }
  0xdf   : > { %v4617_v38 = vadd.f32 %v882_v34, %v699_v54  ;;  %v2421_v50 = vpack.c.b16 %v2415_v46, %v2414_v44  ;;  %v2703_v34 = vshll.u32 %v3695_v13, 16  ;;  %v2696_v44 = vor.u32 %v2695_v27, %v2694_v26 }
  0xe0   : > { %v1319_v25 = vpop.f32.mrf.mxu2  ;;  %v1201_v17 = vadd.f32 %v1181_v57, %v999_v35  ;;  %3613 = vmatmul.msk.bf16.vlgmr.msrb.gmra.mxu0 %vm436_vm3, %v3788_v23  ;;  %v2372_v57 = vor.u32 %v2371_v33, %v4624_v32  ;;  %v2377_v23 = vrot.slane %v2375_v61, 5  ;;  %v3626_v35 = vld [vmem:[%s3976_s28 + $0x48] sm:$0xf]  ;;  %v2862_v61 = vld [vmem:[%s4819_s3 + $0x18] sm:$0xff]  ;;  %v2399_v26 = vshll.u32 %v3628_v11, 16 }
  0xe1   : > { %v1183_v42 = vpop.f32.mrf.mxu1  ;;  %v2380_v46 = vshrl.u32 %v3626_v35, 16  ;;  %v2383_v47 = vshll.u32 %v3626_v35, 16  ;;  %v2705_v51 = vrot.slane %v2703_v34, 6  ;;  %v2709_v34 = vshrl.u32 %v3660_v12, 16 }
  0xe2   : > { %v1339_v53 = vadd.f32 %v1319_v25, %v1201_v17  ;;  %v2373_v16 = vrot.slane %v2372_v57, 4  ;;  %v2691_v25 = vrot.slane %v2689_v63, 6  ;;  %v2416_v57 = vunpack.c.l.b16 %v2368_v37 }
  0xe3   : > { %3721 = vmatmul.msk.bf16.vlgmr.msrb.gmra.mxu3 %vm436_vm3, %v2748_v39  ;;  %v4658_v39 = vld [vmem:[%s3976_s28 + $0x4c] sm:$0xf]  ;;  %v2712_v35 = vshll.u32 %v3660_v12, 16 }
  0xe4   : > { %v2378_v5 = vsel %vm4020_vm8, %v2373_v16, %v2377_v23  ;;  %v2692_v22 = vor.u32 %v2691_v25, %v2688_v24  ;;  %v2389_v52 = vshll.u32 %v4658_v39, 16 }
  0xe5   : > { %v981_v2 = vpop.f32.mrf.mxu0 }
  0xe6   : > { %v1509_v6 = vpop.f32.mrf.mxu3  ;;  %v1000_v8 = vadd.f32 %v981_v2, %v4464_v55  ;;  %v2531_v55 = vrot.slane %v2529_v60, 4  ;;  %2892 = vperm.xlu1 %3858, %v2862_v61   ;;  %v2693_v2 = vrot.slane %v2692_v22, 4  ;;  %v3664_v22 = vrot.slane %v3660_v12, 9 }
  0xe7   : > { %v4642_v14 = vadd.f32 %v1509_v6, %v1339_v53  ;;  %v2393_v53 = vshrl.u32 %v4658_v39, 16  ;;  %v2706_v6 = vor.u32 %v2705_v51, %v2702_v45  ;;  %v2714_v45 = vrot.slane %v2712_v35, 6 }
  0xe8   : > { %v1321_v54 = vpop.f32.mrf.mxu2  ;;  %v1202_v1 = vadd.f32 %v1183_v42, %v1000_v8  ;;  %v2533_v42 = vsel %vm3983_vm7, %v2531_v55, %v2532_v56  ;;  %v2391_v8 = vrot.slane %v2389_v52, 5  ;;  %v2697_v56 = vsel %vm4050_vm9, %v2693_v2, %v2696_v44 }
  0xe9   : > { %v1186_v7 = vpop.f32.mrf.mxu1  ;;  %v2555_v63 = vunpack.c.l.b16 %v2533_v42  ;;  %v2395_v9 = vrot.slane %v2393_v53, 4  ;;  %v2744_v36 = vunpack.c.l.b16 %v2697_v56  ;;  %v2401_v42 = vrot.slane %v2399_v26, 5 }
  0xea   : > { %v1340_v30 = vadd.f32 %v1321_v54, %v1202_v1  ;;  %v2698_v54 = vrot.slane %v2696_v44, 4  ;;  %v2711_v44 = vrot.slane %v2709_v34, 5 }
  0xeb   : > { %v2560_v23 = vpack.c.b16 %v2555_v63, %v2554_v62  ;;  %v2396_v25 = vor.u32 %v2395_v9, %v2391_v8 }
  0xec   : > { %3654 = vmatmul.msk.bf16.gmra.mxu1 %vm436_vm3, %v2421_v50  ;;  %v2382_v50 = vrot.slane %v2380_v46, 4  ;;  %v2707_v24 = vsel %vm4050_vm9, %v2698_v54, %v2706_v6  ;;  %v3790_v46 = vld [vmem:[%s3976_s28 + $0x3c] sm:$0xff]  ;;  %v2715_v54 = vor.u32 %v2714_v45, %v2711_v44 }
  0xed   : > { %3690 = vmatmul.msk.bf16.gmra.mxu2 %vm436_vm3, %v2559_v58  ;;  %v984_v33 = vpop.f32.mrf.mxu0  ;;  %v2385_v58 = vrot.slane %v2383_v47, 5  ;;  %v2745_v37 = vunpack.c.l.b16 %v2707_v24  ;;  %v2717_v47 = vrot.slane %v2393_v53, 5 }
  0xee   : > { %v1511_v32 = vpop.f32.mrf.mxu3  ;;  %v1001_v48 = vadd.f32 %v984_v33, %v4500_v31  ;;  %v2417_v31 = vunpack.c.l.b16 %v2378_v5  ;;  %v3696_v5 = vld [vmem:[%s3976_s28 + $0x50] sm:$0x3]  ;;  %v2716_v15 = vrot.slane %v2715_v54, 4 }
  0xef   : > { %v4670_v28 = vadd.f32 %v1511_v32, %v1340_v30  ;;  %v2386_v0 = vor.u32 %v2385_v58, %v2382_v50  ;;  %v2536_v30 = vrot.slane %v4658_v39, 5  ;;  %v2865_v39 = vld [vmem:[%s4819_s3 + $0x30] sm:$0xff]  ;;  %v2718_v32 = vrot.slane %v2389_v52, 6 }
  0xf0   : > { %v1324_v17 = vpop.f32.mrf.mxu2  ;;  %v1203_v60 = vadd.f32 %v1186_v7, %v1001_v48  ;;  %3614 = vmatmul.msk.bf16.gmra.mxu0 %vm436_vm3, %v3789_v20  ;;  %v2422_v16 = vpack.c.b16 %v2417_v31, %v2416_v57  ;;  %2907 = vperm.xlu0 %3857, %v2865_v39   ;;  %v2723_v48 = vshrl.u32 %v3696_v5, 16  ;;  %v2726_v51 = vshll.u32 %v3696_v5, 16 }
  0xf1   : > { %v1188_v59 = vpop.f32.mrf.mxu1  ;;  %v2387_v20 = vrot.slane %v2386_v0, 4  ;;  %v2538_v33 = vrot.slane %v2536_v30, 4  ;;  %v2537_v62 = vsel %vm3983_vm7, %v3664_v22, %v2536_v30  ;;  %v2719_v58 = vor.u32 %v2718_v32, %v2717_v47  ;;  %v2864_v47 = vld [vmem:[%s4819_s3 + $0x28] sm:$0xff] }
  0xf2   : > { %v1341_v3 = vadd.f32 %v1324_v17, %v1203_v60  ;;  %v2539_v17 = vrot.slane %v3628_v11, 5  ;;  %v2750_v60 = vpack.c.b16 %v2745_v37, %v2744_v36  ;;  %v2728_v6 = vrot.slane %v2726_v51, 6  ;;  %v3791_v36 = vld [vmem:[%s3976_s28 + $0x48] sm:$0xff]  ;;  %2902 = vperm.xlu2 %3859, %v2864_v47  }
  0xf3   : > { %3722 = vmatmul.msk.bf16.gmra.mxu3 %vm436_vm3, %v2749_v40  ;;  %v2392_v31 = vsel %vm4020_vm8, %v2387_v20, %v2391_v8  ;;  %v2556_v49 = vunpack.c.l.b16 %v2537_v62 }
  0xf4   : > { %v2540_v53 = vsel %vm3983_vm7, %v2538_v33, %v2539_v17  ;;  %v2418_v8 = vunpack.c.l.b16 %v2392_v31 }
  0xf5   : > { %v986_v13 = vpop.f32.mrf.mxu0  ;;  %v2557_v12 = vunpack.c.l.b16 %v2540_v53 }
  0xf6   : > { %v1514_v1 = vpop.f32.mrf.mxu3  ;;  %v1002_v55 = vadd.f32 %v986_v13, %v4525_v4  ;;  %v2397_v4 = vrot.slane %v2396_v25, 4  ;;  %v2721_v13 = vrot.slane %v2719_v58, 4 }
  0xf7   : > { %v4684_v27 = vadd.f32 %v1514_v1, %v1341_v3  ;;  %v2725_v3 = vrot.slane %v2723_v48, 5 }
  0xf8   : > { %v1326_v7 = vpop.f32.mrf.mxu2  ;;  %v1204_v21 = vadd.f32 %v1188_v59, %v1002_v55  ;;  %v2402_v52 = vsel %vm4020_vm8, %v2397_v4, %v2401_v42  ;;  %v2561_v55 = vpack.c.b16 %v2557_v12, %v2556_v49 }
  0xf9   : > { %v1191_v29 = vpop.f32.mrf.mxu1  ;;  %v2419_v11 = vunpack.c.l.b16 %v2402_v52 }
  0xfa   : > { %v1342_v19 = vadd.f32 %v1326_v7, %v1204_v21  ;;  %v2729_v7 = vor.u32 %v2728_v6, %v2725_v3 }
  0xfb   : > { %v2423_v1 = vpack.c.b16 %v2419_v11, %v2418_v8 }
  0xfc   : > { %3655 = vmatmul.msk.bf16.gmra.mxu1 %vm436_vm3, %v2422_v16  ;;  %v2730_v30 = vsel %vm4050_vm9, %v2721_v13, %v2729_v7 }
  0xfd   : > { %3691 = vmatmul.msk.bf16.gmra.mxu2 %vm436_vm3, %v2560_v23  ;;  %v989_v40 = vpop.f32.mrf.mxu0  ;;  %v2747_v21 = vunpack.c.l.b16 %v2730_v30 }
  0xfe   : > { %v1516_v57 = vpop.f32.mrf.mxu3  ;;  %v1003_v61 = vadd.f32 %v989_v40, %v4540_v43  ;;  %v2866_v43 = vld [vmem:[%s4819_s3 + $0x38] sm:$0xff] }
  0xff   : > { %v4699_v63 = vadd.f32 %v1516_v57, %v1342_v19  ;;  %2912 = vperm.xlu1 %3858, %v2866_v43  }
 0x100   : > { %v1329_v59 = vpop.f32.mrf.mxu2  ;;  %v1205_v50 = vadd.f32 %v1191_v29, %v1003_v61  ;;  %3615 = vmatmul.msk.bf16.gmra.mxu0 %vm436_vm3, %v3790_v46  ;;  %v2720_v29 = vsel %vm4050_vm9, %v2716_v15, %v2719_v58 }
 0x101   : > { %v1193_v2 = vpop.f32.mrf.mxu1  ;;  %v2746_v35 = vunpack.c.l.b16 %v2720_v29 }
 0x102   : > { %v1343_v9 = vadd.f32 %v1329_v59, %v1205_v50 }
 0x103   : > { %3723 = vmatmul.msk.bf16.gmra.mxu3 %vm436_vm3, %v2750_v60  ;;  %v2751_v4 = vpack.c.b16 %v2747_v21, %v2746_v35 }
 0x105   : > { %v991_v16 = vpop.f32.mrf.mxu0 }
 0x106   : > { %v1519_v56 = vpop.f32.mrf.mxu3  ;;  %v1004_v0 = vadd.f32 %v991_v16, %v4562_v18 }
 0x107   : > { %v1533_v24 = vadd.f32 %v1519_v56, %v1343_v9 }
 0x108   : > { %v1331_v23 = vpop.f32.mrf.mxu2  ;;  %v1206_v26 = vadd.f32 %v1193_v2, %v1004_v0 }
 0x109   : > { %v1196_v25 = vpop.f32.mrf.mxu1 }
 0x10a   : > { %v1344_v34 = vadd.f32 %v1331_v23, %v1206_v26 }
 0x10c   : > { %3656 = vmatmul.msk.bf16.gmra.mxu1 %vm436_vm3, %v2423_v1 }
 0x10d   : > { %3692 = vmatmul.msk.bf16.gmra.mxu2 %vm436_vm3, %v2561_v55  ;;  %v994_v18 = vpop.f32.mrf.mxu0 }
 0x10e   : > { %v1521_v20 = vpop.f32.mrf.mxu3  ;;  %v1005_v5 = vadd.f32 %v994_v18, %v4586_v41 }
 0x10f   : > { %v4719_v19 = vadd.f32 %v1521_v20, %v1344_v34 }
 0x110   : > { %v1334_v37 = vpop.f32.mrf.mxu2  ;;  %v1207_v22 = vadd.f32 %v1196_v25, %v1005_v5  ;;  %3616 = vmatmul.msk.bf16.gmra.mxu0 %vm436_vm3, %v3791_v36 }
 0x111   : > { %v1198_v42 = vpop.f32.mrf.mxu1 }
 0x112   : > { %v1345_v39 = vadd.f32 %v1334_v37, %v1207_v22 }
 0x113   : > { %3724 = vmatmul.msk.bf16.gmra.mxu3 %vm436_vm3, %v2751_v4 }
 0x115   : > { %v996_v33 = vpop.f32.mrf.mxu0 }
 0x116   : > { %v1524_v44 = vpop.f32.mrf.mxu3  ;;  %v1006_v41 = vadd.f32 %v996_v33, %v4617_v38 }
 0x117   : > { %v4727_v45 = vadd.f32 %v1524_v44, %v1345_v39 }
 0x118   : > { %v1336_v17 = vpop.f32.mrf.mxu2  ;;  %v1208_v32 = vadd.f32 %v1198_v42, %v1006_v41 }
 0x119   : > { %v1825_v46 = vpop.f32.mrf.mxu1 }
 0x11a   : > { %v1346_v48 = vadd.f32 %v1336_v17, %v1208_v32 }
 0x11d   : > { %v1623_v51 = vpop.f32.mrf.mxu0 }
 0x11e   : > { %v1526_v59 = vpop.f32.mrf.mxu3  ;;  %v1643_v57 = vadd.f32 %v1623_v51, %v4642_v14 }
 0x11f   : > { %v4733_v61 = vadd.f32 %v1526_v59, %v1346_v48 }
 0x120   : > { %v1963_v40 = vpop.f32.mrf.mxu2  ;;  %v1845_v31 = vadd.f32 %v1825_v46, %v1643_v57 }
 0x121   : > { %v1827_v60 = vpop.f32.mrf.mxu1 }
 0x122   : > { %v1983_v38 = vadd.f32 %v1963_v40, %v1845_v31 }
 0x125   : > { %v1625_v62 = vpop.f32.mrf.mxu0 }
 0x126   : > { %v2153_v52 = vpop.f32.mrf.mxu3  ;;  %v1644_v20 = vadd.f32 %v1625_v62, %v4670_v28 }
 0x127   : > { %v2173_v53 = vadd.f32 %v2153_v52, %v1983_v38 }
 0x128   : > { %v1965_v2 = vpop.f32.mrf.mxu2  ;;  %v1846_v5 = vadd.f32 %v1827_v60, %v1644_v20  ;;  %v4767_v60 = vld [vmem:[%s4818_s2] ss:$0 sm:$0xff] }
 0x129   : > { %v1830_v54 = vpop.f32.mrf.mxu1 }
 0x12a   : > { %v1984_v33 = vadd.f32 %v1965_v2, %v1846_v5 }
 0x12d   : > { %v1628_v43 = vpop.f32.mrf.mxu0 }
 0x12e   : > { %v2155_v58 = vpop.f32.mrf.mxu3  ;;  %v1645_v3 = vadd.f32 %v1628_v43, %v4684_v27 }
 0x12f   : > { %v2174_v44 = vadd.f32 %v2155_v58, %v1984_v33 }
 0x130   : > { %v1968_v50 = vpop.f32.mrf.mxu2  ;;  %v1847_v8 = vadd.f32 %v1830_v54, %v1645_v3 }
 0x131   : > { %v1832_v6 = vpop.f32.mrf.mxu1 }
 0x132   : > { %v1985_v9 = vadd.f32 %v1968_v50, %v1847_v8 }
 0x135   : > { %v1630_v11 = vpop.f32.mrf.mxu0 }
 0x136   : > { %v2158_v49 = vpop.f32.mrf.mxu3  ;;  %v1646_v28 = vadd.f32 %v1630_v11, %v4699_v63 }
 0x137   : > { %v2175_v12 = vadd.f32 %v2158_v49, %v1985_v9  ;;  %v2878_v51 = vpop.permute.xlu0 %2877 }
 0x138   : > { %v1970_v14 = vpop.f32.mrf.mxu2  ;;  %v1848_v38 = vadd.f32 %v1832_v6, %v1646_v28 }
 0x139   : > { %v1835_v15 = vpop.f32.mrf.mxu1 }
 0x13a   : > { %v1986_v58 = vadd.f32 %v1970_v14, %v1848_v38 }
 0x13d   : > { %v1633_v13 = vpop.f32.mrf.mxu0 }
 0x13e   : > { %v2160_v16 = vpop.f32.mrf.mxu3  ;;  %v1647_v23 = vadd.f32 %v1633_v13, %v1533_v24 }
 0x140   : > { %v1973_v7 = vpop.f32.mrf.mxu2  ;;  %v1849_v0 = vadd.f32 %v1835_v15, %v1647_v23  ;;  %v2176_v15 = vadd.f32 %v2160_v16, %v1986_v58 }
 0x141   : > { %v4736_v56 = vpop.f32.mrf.mxu1 }
 0x142   : > { %v1987_v1 = vadd.f32 %v1973_v7, %v1849_v0 }
 0x143   : > { %v2883_v63 = vpop.permute.xlu0 %2882 }
 0x145   : > { %v4738_v55 = vpop.f32.mrf.mxu0 }
 0x146   : > { %v2163_v27 = vpop.f32.mrf.mxu3  ;;  %v1648_v5 = vadd.f32 %v4738_v55, %v4719_v19 }
 0x147   : > { %v4742_v26 = vadd.f32 %v2163_v27, %v1987_v1 }
 0x148   : > { %v4740_v25 = vpop.f32.mrf.mxu2  ;;  %v1850_v33 = vadd.f32 %v4736_v56, %v1648_v5 }
 0x149   : > { %v4744_v29 = vpop.f32.mrf.mxu1 }
 0x14a   : > { %v1988_v19 = vadd.f32 %v4740_v25, %v1850_v33  ;;  %v2898_v25 = vpop.permute.xlu2 %2897 }
 0x14d   : > { %v4746_v30 = vpop.f32.mrf.mxu0 }
 0x14e   : > { %v4750_v35 = vpop.f32.mrf.mxu3  ;;  %v1649_v55 = vadd.f32 %v4746_v30, %v4727_v45 }
 0x150   : > { %v4748_v34 = vpop.f32.mrf.mxu2  ;;  %v2888_v27 = vpop.permute.xlu1 %2887 }
 0x151   : > { %v4752_v24 = vpop.f32.mrf.mxu1 }
 0x155   : > { %v4754_v21 = vpop.f32.mrf.mxu0 }
 0x156   : > { %v4758_v18 = vpop.f32.mrf.mxu3 }
 0x158   : > { %v4756_v36 = vpop.f32.mrf.mxu2 }
 0x159   : > { %v2469_v37 = vpop.f32.mrf.mxu1 }
 0x15d   : > { %v2267_v4 = vpop.f32.mrf.mxu0 }
 0x15e   : > { %v4761_v10 = vpop.f32.mrf.mxu3  ;;  %v2287_v22 = vadd.f32 %v2267_v4, %v2173_v53 }
 0x160   : > { %v2607_v42 = vpop.f32.mrf.mxu2  ;;  %v2489_v17 = vadd.f32 %v2469_v37, %v2287_v22 }
 0x161   : > { %v2471_v39 = vpop.f32.mrf.mxu1 }
 0x162   : > { %v2627_v41 = vadd.f32 %v2607_v42, %v2489_v17 }
 0x165   : > { %v2269_v46 = vpop.f32.mrf.mxu0 }
 0x166   : > { %v2797_v32 = vpop.f32.mrf.mxu3  ;;  %v2288_v48 = vadd.f32 %v2269_v46, %v2174_v44 }
 0x167   : > { %v2817_v57 = vadd.f32 %v2797_v32, %v2627_v41 }
 0x168   : > { %v2609_v47 = vpop.f32.mrf.mxu2  ;;  %v2490_v59 = vadd.f32 %v2471_v39, %v2288_v48 }
 0x169   : > { %v2474_v40 = vpop.f32.mrf.mxu1  ;;  %v2829_v62 = vadd.f32 %v4767_v60, %v2817_v57 }
 0x16a   : > { %v2628_v31 = vadd.f32 %v2609_v47, %v2490_v59 }
 0x16b   : > { %v2915_v8 = vmul.f32 %v2878_v51, %v2829_v62 }
 0x16d   : > { %v2272_v2 = vpop.f32.mrf.mxu0 }
 0x16e   : > { %v2799_v53 = vpop.f32.mrf.mxu3  ;;  %v2289_v54 = vadd.f32 %v2272_v2, %v2175_v12  ;;  %v2936_v12 = vmul.f32 %v2915_v8, %v2915_v8 }
 0x16f   : > { %v2818_v43 = vadd.f32 %v2799_v53, %v2628_v31 }
 0x170   : > { %v2612_v52 = vpop.f32.mrf.mxu2  ;;  %v2491_v3 = vadd.f32 %v2474_v40, %v2289_v54  ;;  %v2893_v40 = vpop.permute.xlu1 %2892 }
 0x171   : > { %v2476_v50 = vpop.f32.mrf.mxu1  ;;  %v2830_v9 = vadd.f32 %v4767_v60, %v2818_v43 }
 0x172   : > { %v2629_v49 = vadd.f32 %v2612_v52, %v2491_v3 }
 0x173   : > { %v2916_v6 = vmul.f32 %v2883_v63, %v2830_v9  ;;  %v3811_v11 = vpack.c.bf16 %v2830_v9, %v2829_v62  ;;  %v2178_v62 = vadd.f32 %v4750_v35, %v1988_v19  ;;  %v1650_v63 = vadd.f32 %v4754_v21, %v4733_v61  ;;  %v2903_v21 = vpop.permute.xlu2 %2902 }
 0x175   : > { %v2923_v13 = vadd.f32 %v2916_v6, %v2915_v8  ;;  %v2937_v7 = vmul.f32 %v2916_v6, %v2916_v6  ;;  %3812 = vst [vmem:[%s4775_s8] sm:$0xff] %v3811_v11   ;;  %v2274_v14 = vpop.f32.mrf.mxu0  ;;  %v1852_v6 = vadd.f32 %v4752_v24, %v1650_v63 }
 0x176   : > { %v2802_v0 = vpop.f32.mrf.mxu3  ;;  %v2290_v1 = vadd.f32 %v2274_v14, %v2176_v15 }
 0x177   : > { %v2944_v37 = vadd.f32 %v2937_v7, %v2936_v12  ;;  %v2819_v20 = vadd.f32 %v2802_v0, %v2629_v49  ;;  %v1990_v61 = vadd.f32 %v4756_v36, %v1852_v6 }
 0x178   : > { %v2614_v23 = vpop.f32.mrf.mxu2  ;;  %v2492_v4 = vadd.f32 %v2476_v50, %v2290_v1 }
 0x179   : > { %v2831_v42 = vadd.f32 %v4767_v60, %v2819_v20  ;;  %v2479_v22 = vpop.f32.mrf.mxu1  ;;  %v2180_v24 = vadd.f32 %v4761_v10, %v1990_v61 }
 0x17a   : > { %v2630_v16 = vadd.f32 %v2614_v23, %v2492_v4 }
 0x17b   : > { %v2917_v39 = vmul.f32 %v2888_v27, %v2831_v42 }
 0x17d   : > { %v2924_v17 = vadd.f32 %v2923_v13, %v2917_v39  ;;  %v2938_v44 = vmul.f32 %v2917_v39, %v2917_v39  ;;  %v2277_v41 = vpop.f32.mrf.mxu0 }
 0x17e   : > { %v2804_v47 = vpop.f32.mrf.mxu3  ;;  %v2291_v32 = vadd.f32 %v2277_v41, %v4742_v26  ;;  %v1851_v26 = vadd.f32 %v4744_v29, %v1649_v55 }
 0x17f   : > { %v2945_v48 = vadd.f32 %v2944_v37, %v2938_v44  ;;  %v2820_v51 = vadd.f32 %v2804_v47, %v2630_v16  ;;  %v2908_v44 = vpop.permute.xlu0 %2907 }
 0x180   : > { %v2617_v46 = vpop.f32.mrf.mxu2  ;;  %v2493_v28 = vadd.f32 %v2479_v22, %v2291_v32  ;;  %v1989_v58 = vadd.f32 %v4748_v34, %v1851_v26 }
 0x181   : > { %v2832_v59 = vadd.f32 %v4767_v60, %v2820_v51  ;;  %v2481_v38 = vpop.f32.mrf.mxu1 }
 0x182   : > { %v2631_v31 = vadd.f32 %v2617_v46, %v2493_v28  ;;  %v2179_v9 = vadd.f32 %v4758_v18, %v1989_v58 }
 0x183   : > { %v2918_v56 = vmul.f32 %v2893_v40, %v2832_v59  ;;  %v3816_v57 = vpack.c.bf16 %v2832_v59, %v2831_v42  ;;  %v2913_v40 = vpop.permute.xlu1 %2912 }
 0x185   : > { %v2925_v2 = vadd.f32 %v2924_v17, %v2918_v56  ;;  %v2939_v52 = vmul.f32 %v2918_v56, %v2918_v56  ;;  %3828 = vst [vmem:[%s4775_s8 + $0x8] sm:$0xff] %v3816_v57   ;;  %v2279_v53 = vpop.f32.mrf.mxu0 }
 0x186   : > { %v2807_v54 = vpop.f32.mrf.mxu3  ;;  %v2292_v43 = vadd.f32 %v2279_v53, %v2178_v62 }
 0x187   : > { %v2946_v30 = vadd.f32 %v2945_v48, %v2939_v52  ;;  %v2821_v50 = vadd.f32 %v2807_v54, %v2631_v31 }
 0x188   : > { %v2619_v45 = vpop.f32.mrf.mxu2  ;;  %v2494_v3 = vadd.f32 %v2481_v38, %v2292_v43 }
 0x189   : > { %v2833_v35 = vadd.f32 %v4767_v60, %v2821_v50  ;;  %v2484_v15 = vpop.f32.mrf.mxu1 }
 0x18a   : > { %v2632_v29 = vadd.f32 %v2619_v45, %v2494_v3 }
 0x18b   : > { %v2919_v8 = vmul.f32 %v2898_v25, %v2833_v35 }
 0x18d   : > { %v2926_v11 = vadd.f32 %v2925_v2, %v2919_v8  ;;  %v2940_v49 = vmul.f32 %v2919_v8, %v2919_v8  ;;  %v2282_v12 = vpop.f32.mrf.mxu0 }
 0x18e   : > { %v2809_v13 = vpop.f32.mrf.mxu3  ;;  %v2293_v7 = vadd.f32 %v2282_v12, %v2179_v9 }
 0x18f   : > { %v2947_v34 = vadd.f32 %v2946_v30, %v2940_v49  ;;  %v2822_v14 = vadd.f32 %v2809_v13, %v2632_v29 }
 0x190   : > { %v2495_v23 = vadd.f32 %v2484_v15, %v2293_v7  ;;  %v2622_v0 = vpop.f32.mrf.mxu2 }
 0x191   : > { %v2834_v1 = vadd.f32 %v4767_v60, %v2822_v14  ;;  %v2486_v16 = vpop.f32.mrf.mxu1 }
 0x192   : > { %v2633_v37 = vadd.f32 %v2622_v0, %v2495_v23 }
 0x193   : > { %v2920_v27 = vmul.f32 %v2903_v21, %v2834_v1  ;;  %v3821_v18 = vpack.c.bf16 %v2834_v1, %v2833_v35 }
 0x195   : > { %v2927_v20 = vadd.f32 %v2926_v11, %v2920_v27  ;;  %v2941_v5 = vmul.f32 %v2920_v27, %v2920_v27  ;;  %3829 = vst [vmem:[%s4775_s8 + $0x10] sm:$0xff] %v3821_v18   ;;  %v2284_v4 = vpop.f32.mrf.mxu0 }
 0x196   : > { %v2812_v42 = vpop.f32.mrf.mxu3  ;;  %v2294_v22 = vadd.f32 %v2284_v4, %v2180_v24 }
 0x197   : > { %v2948_v39 = vadd.f32 %v2947_v34, %v2941_v5  ;;  %v2823_v33 = vadd.f32 %v2812_v42, %v2633_v37 }
 0x198   : > { %v2496_v36 = vadd.f32 %v2486_v16, %v2294_v22  ;;  %v2624_v41 = vpop.f32.mrf.mxu2 }
 0x199   : > { %v2835_v17 = vadd.f32 %v4767_v60, %v2823_v33 }
 0x19a   : > { %v2634_v47 = vadd.f32 %v2624_v41, %v2496_v36 }
 0x19b   : > { %v2921_v46 = vmul.f32 %v2908_v44, %v2835_v17 }
 0x19d   : > { %v2928_v32 = vadd.f32 %v2927_v20, %v2921_v46  ;;  %v2942_v48 = vmul.f32 %v2921_v46, %v2921_v46 }
 0x19e   : > { %v2814_v10 = vpop.f32.mrf.mxu3 }
 0x19f   : > { %v2949_v51 = vadd.f32 %v2948_v39, %v2942_v48  ;;  %v2824_v19 = vadd.f32 %v2814_v10, %v2634_v47 }
 0x1a1   : > { %v2836_v55 = vadd.f32 %v4767_v60, %v2824_v19 }
 0x1a3   : > { %v2922_v28 = vmul.f32 %v2913_v40, %v2836_v55  ;;  %v3826_v59 = vpack.c.bf16 %v2836_v55, %v2835_v17 }
 0x1a5   : > { %v2929_v56 = vadd.f32 %v2928_v32, %v2922_v28  ;;  %v2943_v57 = vmul.f32 %v2922_v28, %v2922_v28  ;;  %3830 = vst [vmem:[%s4775_s8 + $0x18] sm:$0xff] %v3826_v59  }
 0x1a7   : > { %v2930_v31 = vrot.slane %v2929_v56, 4  ;;  %v2950_v38 = vadd.f32 %v2949_v51, %v2943_v57 }
 0x1a9   : > { %v2931_v62 = vadd.f32 %v2930_v31, %v2929_v56  ;;  %v2951_v26 = vrot.slane %v2950_v38, 4 }
 0x1ab   : > { %v2932_v2 = vrot.slane %v2931_v62, 2  ;;  %v2952_v52 = vadd.f32 %v2951_v26, %v2950_v38 }
 0x1ad   : > { %v2933_v53 = vadd.f32 %v2932_v2, %v2931_v62  ;;  %v2953_v25 = vrot.slane %v2952_v52, 2 }
 0x1af   : > { %v2934_v54 = vrot.slane %v2933_v53, 1  ;;  %v2954_v43 = vadd.f32 %v2953_v25, %v2952_v52 }
 0x1b1   : > { %v2955_v45 = vrot.slane %v2954_v43, 1  ;;  %v2935_v60 = vadd.f32 %v2934_v54, %v2933_v53 }
 0x1b3   : > { %v2956_v30 = vadd.f32 %v2955_v45, %v2954_v43 }
 0x1b5   : > { %v2958_v50 = vsel %vm2957_vm10, %v2935_v60, %v2956_v30 }
 0x1b6   : > { %2959 = vst [vmem:[%s266_s12] sm:$0x3] %v2958_v50 }
 0x1b7 PF: > { %s16_s20 = sadd.s32 1, %s3883_s20   ;;  %s4828_s18 = smov %s3879_s19 }
 0x1b8   : > { %p13_p5 = scmp.ge.s32.totalorder %s16_s20, 4   ;;  %s4829_s19 = smov %s4831_s21 }
 0x1ba   :  { %15 = sbr.rel (!%p13_p5) target bundleno = 2 (0x2), region = 97 }

// kernel: nlayer_discriminator_forward.9
= control target key start
LH: loop header
LB: loop body
LE: loop exit
PB: predicated region body
PF: predicated region fallthrough
CT: control target
= control target key end

     0   :  { %s4904_s15 = smov 0   ;;  %s4906_s16 = smov 0   ;;  %s6180_s0 = inlined_call_operand.vmem [shape: bf16[2,8,19,128], index: 0, kind: input, shape index: {}]   ;;  %s6181_s1 = inlined_call_operand.vmem [shape: bf16[16,128,128], index: 1, kind: input, shape index: {}]   ;;  %s6182_s2 = inlined_call_operand.vmem [shape: f32[1,128], index: 2, kind: input, shape index: {}]   ;;  %s6183_s3 = inlined_call_operand.vmem [shape: f32[80,1], index: 3, kind: input, shape index: {}]   ;;  %s6184_s4 = inlined_call_operand.vmem [shape: f32[2,80,1], index: 4, kind: output, shape index: {}]  }
   0x1   :  { %s4908_s17 = smov 0  }
   0x2 LB: > { %s26_s3 = sadd.s32 1, %s4873_s16  ;;  %p3718_p0 = scmp.ge.s32.totalorder %s4877_s17, 1  ;;  %s4877_s17 = sphi %s4908_s17, %s14_s17   ;;  %s4873_s16 = sphi %s4906_s16, %s6192_s16   ;;  %s4869_s15 = sphi %s4904_s15, %s6191_s15  }
   0x3   : > { %p28_p1 = scmp.ge.s32.totalorder %s26_s3, 2  ;;  %p176_p2 = scmp.lt.s32.totalorder %s4877_s17, 3 }
   0x5   : > { %s6194_s3 = smov (%p28_p1, %s26_s3), 0  ;;  %p177_p3 = pnand %p3718_p0, %p176_p2 }
   0x6   : > { %p206_p4 = scmp.lt.s32.totalorder (!%p177_p3), %s4869_s15, 1 }
   0x7   : > { %180 = sbr.rel (%p177_p3) target bundleno = 497 (0x1f1), region = 36 }
   0xc   : > { %v4700_v0 = vld [vmem:[%s6181_s1 + $0x78] sm:$0xff]  ;;  %v4699_v4 = vld [vmem:[%s6181_s1 + $0x70] sm:$0xff]  ;;  %s6196_s15 = smov (!%p206_p4, %s4869_s15), 1  ;;  %v4698_v8 = vld [vmem:[%s6181_s1 + $0x68] sm:$0xff]  ;;  %vm256_vm0 = vsmask.f32 3328 }
   0xd   : > { %v4692_v1 = vld [vmem:[%s6181_s1 + $0x38] sm:$0xff]  ;;  %464 = vmatpush.bf16.msra.mxu0 %v4700_v0  ;;  %v4691_v5 = vld [vmem:[%s6181_s1 + $0x30] sm:$0xff]  ;;  %s4828_s8 = smul.u32 96, %s6196_s15  ;;  %v4690_v9 = vld [vmem:[%s6181_s1 + $0x28] sm:$0xff]  ;;  %vm257_vm1 = vsmask.f32 7440 }
   0xe   : > { %v4708_v2 = vld [vmem:[%s6181_s1 + $0xb8] sm:$0xff]  ;;  %576 = vmatpush.bf16.msra.mxu1 %v4692_v1  ;;  %v4707_v6 = vld [vmem:[%s6181_s1 + $0xb0] sm:$0xff]  ;;  %v4706_v10 = vld [vmem:[%s6181_s1 + $0xa8] sm:$0xff]  ;;  %vm625_vm2 = vcmask 1042432   ;;  %vm626_vm3 = vcmask 1046532   ;;  %vm3608_vm9 = vcmask 7168  }
   0xf   : > { %v4716_v3 = vld [vmem:[%s6181_s1 + $0xf8] sm:$0xff]  ;;  %748 = vmatpush.bf16.msra.mxu2 %v4708_v2  ;;  %v4715_v7 = vld [vmem:[%s6181_s1 + $0xf0] sm:$0xff]  ;;  %v4714_v11 = vld [vmem:[%s6181_s1 + $0xe8] sm:$0xff]  ;;  %s4964_s22 = scalar_lea.vmem %s6180_s0, %s4828_s8  ;;  %vm797_vm4 = vsmask.f32 2304 }
  0x10   : > { %1000 = vmatpush.bf16.msra.mxu3 %v4716_v3  ;;  %v4697_v12 = vld [vmem:[%s6181_s1 + $0x60] sm:$0xff]  ;;  %v4983_v18 = vld [vmem:[%s4964_s22 + $0x8] sm:$0x1]  ;;  %v4696_v27 = vld [vmem:[%s6181_s1 + $0x58] sm:$0xff]  ;;  %vm798_vm5 = vsmask.f32 6416 }
  0x11   : > { %465 = vmatpush.bf16.msra.mxu0 %v4699_v4  ;;  %v4689_v13 = vld [vmem:[%s6181_s1 + $0x20] sm:$0xff]  ;;  %v279_v26 = vshll.u32 %v4983_v18, 16  ;;  %v4688_v28 = vld [vmem:[%s6181_s1 + $0x18] sm:$0xff]  ;;  %v792_v35 = vld [vmem:[%s4964_s22 + $0x8] sm:$0x3]  ;;  %v633_v51 = vrot.slane %v4983_v18, 5 }
  0x12   : > { %577 = vmatpush.bf16.msra.mxu1 %v4691_v5  ;;  %v4705_v14 = vld [vmem:[%s6181_s1 + $0xa0] sm:$0xff]  ;;  %v4704_v31 = vld [vmem:[%s6181_s1 + $0x98] sm:$0xff]  ;;  %v4695_v37 = vld [vmem:[%s6181_s1 + $0x50] sm:$0xff]  ;;  %v815_v53 = vshrl.u32 %v792_v35, 16  ;;  %v818_v58 = vshll.u32 %v792_v35, 16 }
  0x13   : > { %749 = vmatpush.bf16.msra.mxu2 %v4707_v6  ;;  %v4713_v15 = vld [vmem:[%s6181_s1 + $0xe0] sm:$0xff]  ;;  %v4712_v32 = vld [vmem:[%s6181_s1 + $0xd8] sm:$0xff]  ;;  %vm5013_vm6 = vmor %vm256_vm0, %vm257_vm1  ;;  %v281_v44 = vrot.slane %v279_v26, 5 }
  0x14   : > { %1001 = vmatpush.bf16.msra.mxu3 %v4715_v7  ;;  %v225_v16 = vld [vmem:[%s4964_s22] sm:$0xf]  ;;  %v4980_v17 = vld [vmem:[%s4964_s22 + $0x4] sm:$0xf]  ;;  %v227_v47 = vld [vmem:[%s4964_s22 + $0xc] sm:$0xf] }
  0x15   : > { %466 = vmatpush.bf16.msra.mxu0 %v4698_v8  ;;  %v260_v19 = vshrl.u32 %v225_v16, 16  ;;  %v263_v20 = vshll.u32 %v225_v16, 16  ;;  %v269_v21 = vshll.u32 %v4980_v17, 16  ;;  %v273_v22 = vshrl.u32 %v4980_v17, 16  ;;  %v4988_v23 = vld [vmem:[%s4964_s22] sm:$0xe]  ;;  %vm5030_vm7 = vmor %vm625_vm2, %vm626_vm3 }
  0x16   : > { %578 = vmatpush.bf16.msra.mxu1 %v4690_v9  ;;  %v630_v34 = vrot.slane %v4980_v17, 5  ;;  %v801_v36 = vshrl.u32 %v4988_v23, 16  ;;  %v3821_v39 = vrot.slane %v4988_v23, 9  ;;  %v804_v40 = vshll.u32 %v4988_v23, 16  ;;  %v4687_v48 = vld [vmem:[%s6181_s1 + $0x10] sm:$0xff]  ;;  %vm5043_vm8 = vmor %vm797_vm4, %vm798_vm5  ;;  %v4694_v4 = vld [vmem:[%s6181_s1 + $0x48] sm:$0xff] }
  0x17   : > { %750 = vmatpush.bf16.msra.mxu2 %v4706_v10  ;;  %v262_v24 = vrot.slane %v260_v19, 4  ;;  %v265_v25 = vrot.slane %v263_v20, 5  ;;  %v271_v29 = vrot.slane %v269_v21, 5  ;;  %v275_v30 = vrot.slane %v273_v22, 4  ;;  %v4703_v49 = vld [vmem:[%s6181_s1 + $0x90] sm:$0xff]  ;;  %v4686_v5 = vld [vmem:[%s6181_s1 + $0x8] sm:$0xff] }
  0x18   : > { %1002 = vmatpush.bf16.msra.mxu3 %v4714_v11  ;;  %v809_v41 = vrot.slane %v273_v22, 5  ;;  %v803_v45 = vrot.slane %v801_v36, 5  ;;  %v810_v46 = vrot.slane %v269_v21, 6  ;;  %v806_v52 = vrot.slane %v804_v40, 6  ;;  %v4711_v54 = vld [vmem:[%s6181_s1 + $0xd0] sm:$0xff]  ;;  %v4702_v10 = vld [vmem:[%s6181_s1 + $0x88] sm:$0xff] }
  0x19   : > { %467 = vmatpush.bf16.msra.mxu0 %v4697_v12  ;;  %v266_v33 = vor.u32 %v265_v25, %v262_v24  ;;  %v276_v38 = vor.u32 %v275_v30, %v271_v29  ;;  %v632_v56 = vrot.slane %v630_v34, 4  ;;  %v5035_v59 = vld [vmem:[%s4964_s22 + $0x10] sm:$0xf]  ;;  %v284_v60 = vshrl.u32 %v227_v47, 16  ;;  %v4710_v11 = vld [vmem:[%s6181_s1 + $0xc8] sm:$0xff]  ;;  %v4693_v24 = vld [vmem:[%s6181_s1 + $0x40] sm:$0xff] }
  0x1a   : > { %579 = vmatpush.bf16.msra.mxu1 %v4689_v13  ;;  %v811_v57 = vor.u32 %v810_v46, %v809_v41  ;;  %v807_v62 = vor.u32 %v806_v52, %v803_v45  ;;  %v817_v2 = vrot.slane %v815_v53, 5  ;;  %v820_v3 = vrot.slane %v818_v58, 6  ;;  %v5068_v20 = vld [vmem:[%s4964_s22 + $0xc] sm:$0xe]  ;;  %v4685_v25 = vld [vmem:[%s6181_s1] sm:$0xff]  ;;  %v4753_v52 = vld [vmem:[%s6181_s1 + $0x1f8] sm:$0xff] }
  0x1b   : > { %751 = vmatpush.bf16.msra.mxu2 %v4705_v14  ;;  %v267_v43 = vrot.slane %v266_v33, 4  ;;  %v277_v50 = vrot.slane %v276_v38, 4  ;;  %v631_v6 = vsel %vm5030_vm7, %v3821_v39, %v630_v34  ;;  %v287_v8 = vshll.u32 %v227_v47, 16  ;;  %v5081_v30 = vld [vmem:[%s4964_s22 + $0x14] sm:$0x1]  ;;  %v4745_v38 = vld [vmem:[%s6181_s1 + $0x1b8] sm:$0xff] }
  0x1c   : > { %1003 = vmatpush.bf16.msra.mxu3 %v4713_v15  ;;  %v813_v1 = vrot.slane %v811_v57, 4  ;;  %v808_v7 = vrot.slane %v807_v62, 4  ;;  %v293_v9 = vshll.u32 %v5035_v59, 16  ;;  %v634_v12 = vsel %vm5030_vm7, %v632_v56, %v633_v51  ;;  %v793_v34 = vld [vmem:[%s4964_s22 + $0x14] sm:$0x3]  ;;  %v4729_v39 = vld [vmem:[%s6181_s1 + $0x138] sm:$0xff] }
  0x1d   : > { %468 = vmatpush.bf16.msra.mxu0 %v4696_v27  ;;  %v272_v61 = vsel %vm5013_vm6, %v267_v43, %v271_v29  ;;  %v282_v63 = vsel %vm5013_vm6, %v277_v50, %v281_v44  ;;  %v821_v13 = vor.u32 %v820_v3, %v817_v2  ;;  %v286_v14 = vrot.slane %v284_v60, 4  ;;  %v4680_v43 = vld [vmem:[%s4964_s22] sm:$0xff]  ;;  %v4737_v53 = vld [vmem:[%s6181_s1 + $0x178] sm:$0xff]  ;;  %v4728_v60 = vld [vmem:[%s6181_s1 + $0x130] sm:$0xff] }
  0x1e   : > { %580 = vmatpush.bf16.msra.mxu1 %v4688_v28  ;;  %v297_v15 = vshrl.u32 %v5035_v59, 16  ;;  %v396_v16 = vunpack.c.l.b16 %v272_v61  ;;  %v397_v17 = vunpack.c.l.b16 %v282_v63  ;;  %v812_v18 = vsel %vm5043_vm8, %v808_v7, %v811_v57 }
  0x1f   : > { %752 = vmatpush.bf16.msra.mxu2 %v4704_v31  ;;  %v289_v19 = vrot.slane %v287_v8, 5  ;;  %v822_v21 = vsel %vm5043_vm8, %v813_v1, %v821_v13  ;;  %v5072_v22 = vrot.slane %v293_v9, 5  ;;  %v680_v26 = vunpack.c.l.b16 %v631_v6  ;;  %v4701_v31 = vld [vmem:[%s6181_s1 + $0x80] sm:$0xff]  ;;  %v5118_v8 = vld [vmem:[%s4964_s22 + $0x1c] sm:$0xf] }
  0x20   : > { %1004 = vmatpush.bf16.msra.mxu3 %v4712_v32  ;;  %v299_v23 = vrot.slane %v297_v15, 4  ;;  %v681_v27 = vunpack.c.l.b16 %v634_v12  ;;  %v932_v28 = vunpack.c.l.b16 %v812_v18  ;;  %v933_v29 = vunpack.c.l.b16 %v822_v21  ;;  %v4709_v32 = vld [vmem:[%s6181_s1 + $0xc0] sm:$0xff]  ;;  %v5132_v13 = vld [vmem:[%s4964_s22 + $0x18] sm:$0xe] }
  0x21   : > { %469 = vmatpush.bf16.msra.mxu0 %v4695_v37  ;;  %v290_v33 = vor.u32 %v289_v19, %v286_v14  ;;  %v824_v35 = vshrl.u32 %v5068_v20, 16  ;;  %v827_v36 = vshll.u32 %v5068_v20, 16  ;;  %v406_v37 = vpack.c.b16 %v397_v17, %v396_v16  ;;  %v4743_v16 = vld [vmem:[%s6181_s1 + $0x1a8] sm:$0xff] }
  0x22   : > { %581 = vmatpush.bf16.msra.mxu1 %v4687_v48  ;;  %v637_v40 = vrot.slane %v5035_v59, 5  ;;  %v832_v41 = vrot.slane %v297_v15, 5  ;;  %v300_v44 = vor.u32 %v299_v23, %v5072_v22  ;;  %v303_v45 = vshll.u32 %v5081_v30, 16  ;;  %v4744_v59 = vld [vmem:[%s6181_s1 + $0x1b0] sm:$0xff]  ;;  %v4727_v17 = vld [vmem:[%s6181_s1 + $0x128] sm:$0xff] }
  0x23   : > { %753 = vmatpush.bf16.msra.mxu2 %v4703_v49  ;;  %v826_v46 = vrot.slane %v824_v35, 5  ;;  %v829_v47 = vrot.slane %v827_v36, 6  ;;  %v690_v48 = vpack.c.b16 %v681_v27, %v680_v26  ;;  %v942_v49 = vpack.c.b16 %v933_v29, %v932_v28  ;;  %v4751_v29 = vld [vmem:[%s6181_s1 + $0x1e8] sm:$0xff]  ;;  %v794_v35 = vld [vmem:[%s4964_s22 + $0x20] sm:$0x3] }
  0x24   : > { %1005 = vmatpush.bf16.msra.mxu3 %v4711_v54  ;;  %v833_v50 = vrot.slane %v293_v9, 6  ;;  %v838_v51 = vshrl.u32 %v793_v34, 16  ;;  %v291_v54 = vrot.slane %v290_v33, 4  ;;  %v3822_v56 = vrot.slane %v5068_v20, 9  ;;  %v4752_v9 = vld [vmem:[%s6181_s1 + $0x1f0] sm:$0xff] }
  0x25   : > { %470 = vmatpush.bf16.msra.mxu0 %v4694_v4  ;;  %v640_v57 = vrot.slane %v5081_v30, 5  ;;  %v830_v58 = vor.u32 %v829_v47, %v826_v46  ;;  %v639_v61 = vrot.slane %v637_v40, 4  ;;  %v841_v1 = vshll.u32 %v793_v34, 16  ;;  %v229_v4 = vld [vmem:[%s4964_s22 + $0x18] sm:$0xf]  ;;  %v4735_v30 = vld [vmem:[%s6181_s1 + $0x168] sm:$0xff] }
  0x26   : > { %582 = vmatpush.bf16.msra.mxu1 %v4686_v5  ;;  %v834_v62 = vor.u32 %v833_v50, %v832_v41  ;;  %v840_v63 = vrot.slane %v838_v51, 5  ;;  %v301_v2 = vrot.slane %v300_v44, 4  ;;  %v305_v3 = vrot.slane %v303_v45, 5  ;;  %v4750_v50 = vld [vmem:[%s6181_s1 + $0x1e0] sm:$0xff] }
  0x27   : > { %754 = vmatpush.bf16.msra.mxu2 %v4702_v10  ;;  %v831_v5 = vrot.slane %v830_v58, 4  ;;  %v843_v7 = vrot.slane %v841_v1, 6  ;;  %v4736_v10 = vld [vmem:[%s6181_s1 + $0x170] sm:$0xff]  ;;  %v638_v12 = vsel %vm5030_vm7, %v3822_v56, %v637_v40  ;;  %v641_v14 = vsel %vm5030_vm7, %v639_v61, %v640_v57  ;;  %v5166_v40 = vld [vmem:[%s4964_s22 + $0x20] sm:$0x1]  ;;  %v4741_v57 = vld [vmem:[%s6181_s1 + $0x198] sm:$0xff] }
  0x28   : > { %1006 = vmatpush.bf16.msra.mxu3 %v4710_v11  ;;  %v836_v6 = vrot.slane %v834_v62, 4  ;;  %v296_v11 = vsel %vm5013_vm6, %v291_v54, %v5072_v22  ;;  %v308_v18 = vshrl.u32 %v229_v4, 16  ;;  %v311_v19 = vshll.u32 %v229_v4, 16  ;;  %v4734_v51 = vld [vmem:[%s6181_s1 + $0x160] sm:$0xff]  ;;  %v4725_v58 = vld [vmem:[%s6181_s1 + $0x118] sm:$0xff] }
  0x29   : > { %471 = vmatpush.bf16.msra.mxu0 %v4693_v24  ;;  %v844_v15 = vor.u32 %v843_v7, %v840_v63  ;;  %v306_v20 = vsel %vm5013_vm6, %v301_v2, %v305_v3  ;;  %v317_v21 = vshll.u32 %v5118_v8, 16  ;;  %v321_v22 = vshrl.u32 %v5118_v8, 16 }
  0x2a   : > { %583 = vmatpush.bf16.msra.mxu1 %v4685_v25  ;;  %v835_v23 = vsel %vm5043_vm8, %v831_v5, %v834_v62  ;;  %v847_v25 = vshrl.u32 %v5132_v13, 16  ;;  %v398_v26 = vunpack.c.l.b16 %v296_v11  ;;  %v682_v27 = vunpack.c.l.b16 %v638_v12  ;;  %v4749_v5 = vld [vmem:[%s6181_s1 + $0x1d8] sm:$0xff] }
  0x2b   : > { %755 = vmatpush.bf16.msra.mxu2 %v4701_v31  ;;  %v845_v24 = vsel %vm5043_vm8, %v836_v6, %v844_v15  ;;  %v683_v28 = vunpack.c.l.b16 %v641_v14  ;;  %v4742_v31 = vld [vmem:[%s6181_s1 + $0x1a0] sm:$0xff]  ;;  %v310_v33 = vrot.slane %v308_v18, 4  ;;  %v313_v34 = vrot.slane %v311_v19, 5  ;;  %v4733_v6 = vld [vmem:[%s6181_s1 + $0x158] sm:$0xff]  ;;  %v4740_v19 = vld [vmem:[%s6181_s1 + $0x190] sm:$0xff] }
  0x2c   : > { %1007 = vmatpush.bf16.msra.mxu3 %v4709_v32  ;;  %472 = vmatmul.bf16.vlgmr.msra.gmra.mxu0 %v406_v37  ;;  %v399_v32 = vunpack.c.l.b16 %v306_v20  ;;  %v850_v36 = vshll.u32 %v5132_v13, 16  ;;  %v4726_v37 = vld [vmem:[%s6181_s1 + $0x120] sm:$0xff]  ;;  %v5168_v41 = vrot.slane %v317_v21, 5  ;;  %v849_v44 = vrot.slane %v847_v25, 5  ;;  %v4724_v20 = vld [vmem:[%s6181_s1 + $0x110] sm:$0xff] }
  0x2d   : > { %1153 = vmatpush.bf16.msrb.mxu0 %v4729_v39  ;;  %584 = vmatmul.bf16.vlgmr.msra.gmra.mxu1 %v4680_v43  ;;  %v935_v39 = vunpack.c.l.b16 %v845_v24  ;;  %v323_v43 = vrot.slane %v321_v22, 4  ;;  %v855_v46 = vrot.slane %v321_v22, 5  ;;  %v856_v47 = vrot.slane %v317_v21, 6  ;;  %v5201_v18 = vld [vmem:[%s4964_s22 + $0x24] sm:$0xe]  ;;  %v4748_v25 = vld [vmem:[%s6181_s1 + $0x1d0] sm:$0xff] }
  0x2e   : > { %756 = vmatmul.bf16.vlgmr.msra.gmra.mxu2 %v690_v48  ;;  %1417 = vmatpush.bf16.msrb.mxu1 %v4737_v53  ;;  %v852_v45 = vrot.slane %v850_v36, 6  ;;  %v861_v48 = vshrl.u32 %v794_v35, 16  ;;  %v691_v53 = vpack.c.b16 %v683_v28, %v682_v27  ;;  %v314_v54 = vor.u32 %v313_v34, %v310_v33  ;;  %v4739_v27 = vld [vmem:[%s6181_s1 + $0x188] sm:$0xff] }
  0x2f   : > { %1601 = vmatpush.bf16.msrb.mxu2 %v4745_v38  ;;  %1008 = vmatmul.bf16.vlgmr.msra.gmra.mxu3 %v942_v49  ;;  %v934_v38 = vunpack.c.l.b16 %v835_v23  ;;  %v864_v49 = vshll.u32 %v794_v35, 16  ;;  %v327_v56 = vshll.u32 %v5166_v40, 16  ;;  %v324_v61 = vor.u32 %v323_v43, %v5168_v41  ;;  %v4723_v28 = vld [vmem:[%s6181_s1 + $0x108] sm:$0xff] }
  0x30   : > { %1850 = vmatpush.bf16.msrb.mxu3 %v4753_v52  ;;  %v407_v52 = vpack.c.b16 %v399_v32, %v398_v26  ;;  %v3823_v62 = vrot.slane %v5132_v13, 9  ;;  %v644_v63 = vrot.slane %v5118_v8, 5  ;;  %v853_v1 = vor.u32 %v852_v45, %v849_v44  ;;  %v5195_v8 = vld [vmem:[%s4964_s22 + $0x28] sm:$0xf]  ;;  %v4732_v26 = vld [vmem:[%s6181_s1 + $0x150] sm:$0xff] }
  0x31   : > { %1154 = vmatpush.bf16.msrb.mxu0 %v4728_v60  ;;  %v943_v60 = vpack.c.b16 %v935_v39, %v934_v38  ;;  %v857_v2 = vor.u32 %v856_v47, %v855_v46  ;;  %v863_v3 = vrot.slane %v861_v48, 5  ;;  %v866_v4 = vrot.slane %v864_v49, 6  ;;  %v5231_v33 = vld [vmem:[%s4964_s22 + $0x2c] sm:$0x1] }
  0x32   : > { %1418 = vmatpush.bf16.msrb.mxu1 %v4736_v10  ;;  %v329_v7 = vrot.slane %v327_v56, 5  ;;  %v315_v10 = vrot.slane %v314_v54, 4  ;;  %v325_v11 = vrot.slane %v324_v61, 4  ;;  %v646_v12 = vrot.slane %v644_v63, 4  ;;  %v795_v36 = vld [vmem:[%s4964_s22 + $0x2c] sm:$0x3] }
  0x33   : > { %1602 = vmatpush.bf16.msrb.mxu2 %v4744_v59  ;;  %v4681_v59 = vld [vmem:[%s4964_s22 + $0xc] sm:$0xff]  ;;  %v647_v13 = vrot.slane %v5166_v40, 5  ;;  %v645_v14 = vsel %vm5030_vm7, %v3823_v62, %v644_v63  ;;  %v854_v15 = vrot.slane %v853_v1, 4  ;;  %v341_v23 = vshll.u32 %v5195_v8, 16  ;;  %v4682_v63 = vld [vmem:[%s4964_s22 + $0x18] sm:$0xff] }
  0x34   : > { %1851 = vmatpush.bf16.msrb.mxu3 %v4752_v9  ;;  %v231_v9 = vld [vmem:[%s4964_s22 + $0x24] sm:$0xf]  ;;  %v345_v24 = vshrl.u32 %v5195_v8, 16  ;;  %v684_v32 = vunpack.c.l.b16 %v645_v14  ;;  %v873_v38 = vshll.u32 %v5201_v18, 16  ;;  %v4747_v44 = vld [vmem:[%s6181_s1 + $0x1c8] sm:$0xff]  ;;  %v351_v48 = vshll.u32 %v5231_v33, 16 }
  0x35   : > { %1155 = vmatpush.bf16.msrb.mxu0 %v4727_v17  ;;  %v867_v17 = vor.u32 %v866_v4, %v863_v3  ;;  %v332_v21 = vshrl.u32 %v231_v9, 16  ;;  %v335_v22 = vshll.u32 %v231_v9, 16  ;;  %v858_v34 = vsel %vm5043_vm8, %v854_v15, %v857_v2  ;;  %v5256_v14 = vld [vmem:[%s4964_s22 + $0x30] sm:$0xe] }
  0x36   : > { %1419 = vmatpush.bf16.msrb.mxu1 %v4735_v30  ;;  %v330_v30 = vsel %vm5013_vm6, %v325_v11, %v329_v7  ;;  %v347_v43 = vrot.slane %v345_v24, 4  ;;  %v936_v49 = vunpack.c.l.b16 %v858_v34  ;;  %v875_v54 = vrot.slane %v873_v38, 6 }
  0x37   : > { %1603 = vmatpush.bf16.msrb.mxu2 %v4743_v16  ;;  %v859_v16 = vrot.slane %v857_v2, 4  ;;  %v334_v39 = vrot.slane %v332_v21, 4  ;;  %v337_v40 = vrot.slane %v335_v22, 5  ;;  %v401_v46 = vunpack.c.l.b16 %v330_v30  ;;  %v4730_v30 = vld [vmem:[%s6181_s1 + $0x140] sm:$0xff] }
  0x38   : > { %1852 = vmatpush.bf16.msrb.mxu3 %v4751_v29  ;;  %v320_v29 = vsel %vm5013_vm6, %v315_v10, %v5168_v41  ;;  %v5240_v41 = vrot.slane %v341_v23, 5  ;;  %v884_v56 = vshrl.u32 %v795_v36, 16  ;;  %v353_v2 = vrot.slane %v351_v48, 5 }
  0x39   : > { %1156 = vmatpush.bf16.msrb.mxu0 %v4726_v37  ;;  %v868_v35 = vsel %vm5043_vm8, %v859_v16, %v867_v17  ;;  %v870_v37 = vshrl.u32 %v5201_v18, 16  ;;  %v400_v45 = vunpack.c.l.b16 %v320_v29  ;;  %v3824_v3 = vrot.slane %v5201_v18, 9  ;;  %v4731_v18 = vld [vmem:[%s6181_s1 + $0x148] sm:$0xff] }
  0x3a   : > { %1420 = vmatpush.bf16.msrb.mxu1 %v4734_v51  ;;  %v878_v51 = vrot.slane %v345_v24, 5 }
  0x3b   : > { %1604 = vmatpush.bf16.msrb.mxu2 %v4742_v31  ;;  %v648_v31 = vsel %vm5030_vm7, %v646_v12, %v647_v13  ;;  %v408_v62 = vpack.c.b16 %v401_v46, %v400_v45  ;;  %v233_v12 = vld [vmem:[%s4964_s22 + $0x30] sm:$0xf]  ;;  %v5253_v13 = vld [vmem:[%s4964_s22 + $0x34] sm:$0xf] }
  0x3c   : > { %1853 = vmatpush.bf16.msrb.mxu3 %v4750_v50  ;;  %477 = vmatmul.bf16.gmra.mxu0 %v407_v52  ;;  %v685_v47 = vunpack.c.l.b16 %v648_v31  ;;  %v937_v50 = vunpack.c.l.b16 %v868_v35  ;;  %v879_v52 = vrot.slane %v341_v23, 6  ;;  %v369_v29 = vshrl.u32 %v5253_v13, 16 }
  0x3d   : > { %1157 = vmatpush.bf16.msrb.mxu0 %v4725_v58  ;;  %589 = vmatmul.bf16.gmra.mxu1 %v4681_v59  ;;  %v338_v58 = vor.u32 %v337_v40, %v334_v39  ;;  %v348_v59 = vor.u32 %v347_v43, %v5240_v41  ;;  %v893_v31 = vshrl.u32 %v5256_v14, 16  ;;  %v796_v39 = vld [vmem:[%s4964_s22 + $0x38] sm:$0x3] }
  0x3e   : > { %761 = vmatmul.bf16.gmra.mxu2 %v691_v53  ;;  %1421 = vmatpush.bf16.msrb.mxu1 %v4733_v6  ;;  %v872_v53 = vrot.slane %v870_v37, 5  ;;  %v692_v61 = vpack.c.b16 %v685_v47, %v684_v32  ;;  %v944_v1 = vpack.c.b16 %v937_v50, %v936_v49  ;;  %v886_v6 = vrot.slane %v884_v56, 5  ;;  %v255_v47 = vld [vmem:[%s4964_s22 + $0x38] sm:$0x1] }
  0x3f   : > { %1605 = vmatpush.bf16.msrb.mxu2 %v4741_v57  ;;  %1013 = vmatmul.bf16.gmra.mxu3 %v943_v60  ;;  %v887_v57 = vshll.u32 %v795_v36, 16  ;;  %v651_v60 = vrot.slane %v5195_v8, 5  ;;  %v339_v9 = vrot.slane %v338_v58, 4  ;;  %v349_v10 = vrot.slane %v348_v59, 4  ;;  %v4683_v59 = vld [vmem:[%s4964_s22 + $0x24] sm:$0xff] }
  0x40   : > { %1854 = vmatpush.bf16.msrb.mxu3 %v4749_v5  ;;  %v876_v4 = vor.u32 %v875_v54, %v872_v53  ;;  %v880_v5 = vor.u32 %v879_v52, %v878_v51  ;;  %v654_v8 = vrot.slane %v5231_v33, 5  ;;  %v896_v32 = vshll.u32 %v5256_v14, 16 }
  0x41   : > { %1158 = vmatpush.bf16.msrb.mxu0 %v4724_v20  ;;  %v889_v7 = vrot.slane %v887_v57, 6  ;;  %v653_v11 = vrot.slane %v651_v60, 4  ;;  %v4722_v20 = vld [vmem:[%s6181_s1 + $0x100] sm:$0xff]  ;;  %v344_v21 = vsel %vm5013_vm6, %v339_v9, %v5240_v41  ;;  %v354_v22 = vsel %vm5013_vm6, %v349_v10, %v353_v2 }
  0x42   : > { %1422 = vmatpush.bf16.msrb.mxu1 %v4732_v26  ;;  %v877_v15 = vrot.slane %v876_v4, 4  ;;  %v882_v16 = vrot.slane %v880_v5, 4  ;;  %v652_v23 = vsel %vm5030_vm7, %v3824_v3, %v651_v60  ;;  %v356_v26 = vshrl.u32 %v233_v12, 16  ;;  %v4000_v4 = vld [vmem:[%s4964_s22 + $0xc] sm:$0xf] }
  0x43   : > { %1606 = vmatpush.bf16.msrb.mxu2 %v4740_v19  ;;  %v890_v17 = vor.u32 %v889_v7, %v886_v6  ;;  %v4738_v19 = vld [vmem:[%s6181_s1 + $0x180] sm:$0xff]  ;;  %v655_v24 = vsel %vm5030_vm7, %v653_v11, %v654_v8  ;;  %v402_v35 = vunpack.c.l.b16 %v344_v21  ;;  %v403_v36 = vunpack.c.l.b16 %v354_v22  ;;  %v5300_v6 = vld [vmem:[%s4964_s22 + $0x10] sm:$0xf]  ;;  %v4790_v21 = vld [vmem:[%s6181_s1 + $0x2f8] sm:$0xff] }
  0x44   : > { %1855 = vmatpush.bf16.msrb.mxu3 %v4748_v25  ;;  %v4746_v25 = vld [vmem:[%s6181_s1 + $0x1c0] sm:$0xff]  ;;  %v881_v33 = vsel %vm5043_vm8, %v877_v15, %v880_v5  ;;  %v686_v37 = vunpack.c.l.b16 %v652_v23  ;;  %v687_v38 = vunpack.c.l.b16 %v655_v24  ;;  %v358_v40 = vrot.slane %v356_v26, 4  ;;  %v4774_v22 = vld [vmem:[%s6181_s1 + $0x278] sm:$0xff]  ;;  %v4781_v26 = vld [vmem:[%s6181_s1 + $0x2b0] sm:$0xff] }
  0x45   : > { %1159 = vmatpush.bf16.msrb.mxu0 %v4723_v28  ;;  %v365_v28 = vshll.u32 %v5253_v13, 16  ;;  %v891_v34 = vsel %vm5043_vm8, %v882_v16, %v890_v17  ;;  %v938_v45 = vunpack.c.l.b16 %v881_v33  ;;  %v895_v48 = vrot.slane %v893_v31, 5  ;;  %v4773_v33 = vld [vmem:[%s6181_s1 + $0x270] sm:$0xff] }
  0x46   : > { %1423 = vmatpush.bf16.msrb.mxu1 %v4731_v18  ;;  %v939_v46 = vunpack.c.l.b16 %v891_v34  ;;  %v898_v49 = vrot.slane %v896_v32, 6  ;;  %v901_v50 = vrot.slane %v369_v29, 5  ;;  %v907_v52 = vshrl.u32 %v796_v39, 16  ;;  %v4789_v32 = vld [vmem:[%s6181_s1 + $0x2f0] sm:$0xff] }
  0x47   : > { %1607 = vmatpush.bf16.msrb.mxu2 %v4739_v27  ;;  %v359_v27 = vshll.u32 %v233_v12, 16  ;;  %v5291_v43 = vrot.slane %v365_v28, 5  ;;  %v902_v51 = vrot.slane %v365_v28, 6  ;;  %v910_v53 = vshll.u32 %v796_v39, 16 }
  0x48   : > { %1856 = vmatpush.bf16.msrb.mxu3 %v4747_v44  ;;  %v371_v44 = vrot.slane %v369_v29, 4  ;;  %v375_v56 = vshll.u32 %v255_v47, 16  ;;  %v658_v57 = vrot.slane %v5253_v13, 5  ;;  %v409_v58 = vpack.c.b16 %v403_v36, %v402_v35  ;;  %v5345_v35 = vld [vmem:[%s4964_s22 + $0x14] sm:$0x1] }
  0x49   : > { %1160 = vmatpush.bf16.msrb.mxu0 %v4722_v20  ;;  %v361_v41 = vrot.slane %v359_v27, 5  ;;  %v693_v60 = vpack.c.b16 %v687_v38, %v686_v37  ;;  %v909_v2 = vrot.slane %v907_v52, 5  ;;  %v912_v3 = vrot.slane %v910_v53, 6  ;;  %v4766_v20 = vld [vmem:[%s6181_s1 + $0x238] sm:$0xff]  ;;  %v4765_v27 = vld [vmem:[%s6181_s1 + $0x230] sm:$0xff] }
  0x4a   : > { %1424 = vmatpush.bf16.msrb.mxu1 %v4730_v30  ;;  %v3825_v5 = vrot.slane %v5256_v14, 9  ;;  %v377_v9 = vrot.slane %v375_v56, 5  ;;  %v660_v10 = vrot.slane %v658_v57, 4  ;;  %v661_v11 = vrot.slane %v255_v47, 5 }
  0x4b   : > { %1608 = vmatpush.bf16.msrb.mxu2 %v4738_v19  ;;  %v362_v54 = vor.u32 %v361_v41, %v358_v40  ;;  %v1213_v13 = vshrl.u32 %v4000_v4, 16  ;;  %v1216_v15 = vshll.u32 %v4000_v4, 16  ;;  %v913_v17 = vor.u32 %v912_v3, %v909_v2  ;;  %v4782_v19 = vld [vmem:[%s6181_s1 + $0x2b8] sm:$0xff] }
  0x4c   : > { %482 = vmatmul.bf16.gmra.mxu0 %v408_v62  ;;  %1857 = vmatpush.bf16.msrb.mxu3 %v4746_v25  ;;  %v899_v62 = vor.u32 %v898_v49, %v895_v48  ;;  %v1222_v18 = vshll.u32 %v5300_v6, 16  ;;  %v1226_v14 = vshrl.u32 %v5300_v6, 16  ;;  %v659_v24 = vsel %vm5030_vm7, %v3825_v5, %v658_v57  ;;  %v5322_v25 = vld [vmem:[%s4964_s22 + $0xc] sm:$0xe] }
  0x4d   : > { %594 = vmatmul.bf16.gmra.mxu1 %v4682_v63  ;;  %v945_v63 = vpack.c.b16 %v939_v46, %v938_v45  ;;  %v363_v7 = vrot.slane %v362_v54, 4  ;;  %2003 = vmatpush.bf16.msra.mxu0 %v4766_v20  ;;  %v662_v29 = vsel %vm5030_vm7, %v660_v10, %v661_v11  ;;  %v1215_v31 = vrot.slane %v1213_v13, 4  ;;  %v4121_v45 = vld [vmem:[%s4964_s22 + $0x14] sm:$0x3]  ;;  %v4003_v10 = vld [vmem:[%s4964_s22 + $0x18] sm:$0xf] }
  0x4e   : > { %766 = vmatmul.bf16.gmra.mxu2 %v692_v61  ;;  %v372_v61 = vor.u32 %v371_v44, %v5291_v43  ;;  %v900_v12 = vrot.slane %v899_v62, 4  ;;  %2267 = vmatpush.bf16.msra.mxu1 %v4774_v22  ;;  %v1218_v36 = vrot.slane %v1216_v15, 5  ;;  %v5347_v37 = vrot.slane %v1222_v18, 5  ;;  %v5363_v13 = vld [vmem:[%s4964_s22 + $0x18] sm:$0xe] }
  0x4f   : > { %1018 = vmatmul.bf16.gmra.mxu3 %v944_v1  ;;  %v903_v1 = vor.u32 %v902_v51, %v901_v50  ;;  %v368_v23 = vsel %vm5013_vm6, %v363_v7, %v5291_v43  ;;  %2451 = vmatpush.bf16.msra.mxu2 %v4782_v19  ;;  %v1228_v38 = vrot.slane %v1226_v14, 4  ;;  %v1651_v39 = vshrl.u32 %v5322_v25, 16  ;;  %v4788_v19 = vld [vmem:[%s6181_s1 + $0x2e8] sm:$0xff] }
  0x50   : > { %v373_v8 = vrot.slane %v372_v61, 4  ;;  %2700 = vmatpush.bf16.msra.mxu3 %v4790_v21  ;;  %v1654_v40 = vshll.u32 %v5322_v25, 16  ;;  %v404_v41 = vunpack.c.l.b16 %v368_v23  ;;  %v688_v43 = vunpack.c.l.b16 %v659_v24  ;;  %v4772_v24 = vld [vmem:[%s6181_s1 + $0x268] sm:$0xff] }
  0x51   : > { %v905_v16 = vrot.slane %v903_v1, 4  ;;  %v904_v30 = vsel %vm5043_vm8, %v900_v12, %v903_v1  ;;  %v689_v44 = vunpack.c.l.b16 %v662_v29  ;;  %2004 = vmatpush.bf16.msra.mxu0 %v4765_v27  ;;  %v1232_v49 = vshll.u32 %v5345_v35, 16  ;;  %v5360_v12 = vld [vmem:[%s4964_s22 + $0x1c] sm:$0xf] }
  0x52   : > { %v378_v28 = vsel %vm5013_vm6, %v373_v8, %v377_v9  ;;  %v940_v47 = vunpack.c.l.b16 %v904_v30  ;;  %2268 = vmatpush.bf16.msra.mxu1 %v4773_v33  ;;  %v1219_v50 = vor.u32 %v1218_v36, %v1215_v31  ;;  %v1229_v51 = vor.u32 %v1228_v38, %v5347_v37 }
  0x53   : > { %v914_v34 = vsel %vm5043_vm8, %v905_v16, %v913_v17  ;;  %2452 = vmatpush.bf16.msra.mxu2 %v4781_v26  ;;  %v405_v46 = vunpack.c.l.b16 %v378_v28  ;;  %v1659_v52 = vrot.slane %v1226_v14, 5  ;;  %v1660_v53 = vrot.slane %v1222_v18, 6  ;;  %v4780_v18 = vld [vmem:[%s6181_s1 + $0x2a8] sm:$0xff]  ;;  %v4779_v28 = vld [vmem:[%s6181_s1 + $0x2a0] sm:$0xff] }
  0x54   : > { %v941_v48 = vunpack.c.l.b16 %v914_v34  ;;  %2701 = vmatpush.bf16.msra.mxu3 %v4789_v32  ;;  %v1653_v54 = vrot.slane %v1651_v39, 5  ;;  %v1656_v56 = vrot.slane %v1654_v40, 6  ;;  %v1665_v57 = vshrl.u32 %v4121_v45, 16  ;;  %v4764_v14 = vld [vmem:[%s6181_s1 + $0x228] sm:$0xff]  ;;  %v4122_v34 = vld [vmem:[%s4964_s22 + $0x20] sm:$0x3] }
  0x55   : > { %v694_v61 = vpack.c.b16 %v689_v44, %v688_v43  ;;  %v1234_v62 = vrot.slane %v1232_v49, 5  ;;  %v1220_v2 = vrot.slane %v1219_v50, 4  ;;  %v1230_v3 = vrot.slane %v1229_v51, 4  ;;  %2005 = vmatpush.bf16.msra.mxu0 %v4764_v14  ;;  %v4005_v39 = vld [vmem:[%s4964_s22 + $0x20] sm:$0x1] }
  0x56   : > { %v946_v1 = vpack.c.b16 %v941_v48, %v940_v47  ;;  %v1661_v4 = vor.u32 %v1660_v53, %v1659_v52  ;;  %v1657_v5 = vor.u32 %v1656_v56, %v1653_v54  ;;  %v1667_v7 = vrot.slane %v1665_v57, 5  ;;  %2269 = vmatpush.bf16.msra.mxu1 %v4772_v24  ;;  %v5421_v14 = vld [vmem:[%s4964_s22 + $0x24] sm:$0xe]  ;;  %v4786_v24 = vld [vmem:[%s6181_s1 + $0x2d8] sm:$0xff] }
  0x57   : > { %v4068_v11 = vrot.slane %v5322_v25, 9  ;;  %v1486_v8 = vrot.slane %v5345_v35, 5  ;;  %v1235_v15 = vsel %vm5013_vm6, %v1230_v3, %v1234_v62  ;;  %v1237_v22 = vshrl.u32 %v4003_v10, 16  ;;  %2453 = vmatpush.bf16.msra.mxu2 %v4780_v18  ;;  %v5418_v18 = vld [vmem:[%s4964_s22 + $0x28] sm:$0xf] }
  0x58   : > { %v1663_v17 = vrot.slane %v1661_v4, 4  ;;  %v1658_v20 = vrot.slane %v1657_v5, 4  ;;  %v1240_v23 = vshll.u32 %v4003_v10, 16  ;;  %v1246_v25 = vshll.u32 %v5360_v12, 16  ;;  %2702 = vmatpush.bf16.msra.mxu3 %v4788_v19  ;;  %v4778_v19 = vld [vmem:[%s6181_s1 + $0x298] sm:$0xff] }
  0x59   : > { %v1250_v26 = vshrl.u32 %v5360_v12, 16  ;;  %v1674_v27 = vshrl.u32 %v5363_v13, 16  ;;  %v1677_v29 = vshll.u32 %v5363_v13, 16  ;;  %v1350_v31 = vunpack.c.l.b16 %v1235_v15  ;;  %v4763_v15 = vld [vmem:[%s6181_s1 + $0x220] sm:$0xff] }
  0x5a   : > { %v1662_v35 = vsel %vm5043_vm8, %v1658_v20, %v1661_v4  ;;  %v1242_v38 = vrot.slane %v1240_v23, 5  ;;  %v5399_v40 = vrot.slane %v1246_v25, 5  ;;  %v1683_v44 = vrot.slane %v1246_v25, 6  ;;  %2006 = vmatpush.bf16.msra.mxu0 %v4763_v15  ;;  %v4762_v23 = vld [vmem:[%s6181_s1 + $0x218] sm:$0xff] }
  0x5b   : > { %v1676_v43 = vrot.slane %v1674_v27, 5  ;;  %2454 = vmatpush.bf16.msra.mxu2 %v4779_v28  ;;  %v1688_v47 = vshrl.u32 %v4122_v34, 16  ;;  %v1691_v48 = vshll.u32 %v4122_v34, 16  ;;  %v1782_v51 = vunpack.c.l.b16 %v1662_v35 }
  0x5c   : > { %487 = vmatmul.bf16.gmra.mxu0 %v409_v58  ;;  %v1668_v58 = vshll.u32 %v4121_v45, 16  ;;  %v1679_v45 = vrot.slane %v1677_v29, 6  ;;  %v1256_v53 = vshll.u32 %v4005_v39, 16  ;;  %v4069_v4 = vrot.slane %v5363_v13, 9  ;;  %v4787_v13 = vld [vmem:[%s6181_s1 + $0x2e0] sm:$0xff]  ;;  %v4770_v29 = vld [vmem:[%s6181_s1 + $0x258] sm:$0xff] }
  0x5d   : > { %599 = vmatmul.bf16.gmra.mxu1 %v4683_v59  ;;  %v410_v59 = vpack.c.b16 %v405_v46, %v404_v41  ;;  %v1252_v41 = vrot.slane %v1250_v26, 4  ;;  %v1682_v46 = vrot.slane %v1250_v26, 5  ;;  %v1690_v62 = vrot.slane %v1688_v47, 5  ;;  %2703 = vmatpush.bf16.msra.mxu3 %v4787_v13 }
  0x5e   : > { %771 = vmatmul.bf16.gmra.mxu2 %v693_v60  ;;  %v4684_v60 = vld [vmem:[%s4964_s22 + $0x30] sm:$0xff]  ;;  %v1670_v9 = vrot.slane %v1668_v58, 6  ;;  %v1490_v58 = vrot.slane %v5360_v12, 5  ;;  %v1258_v3 = vrot.slane %v1256_v53, 5  ;;  %v1493_v10 = vrot.slane %v4005_v39, 5  ;;  %2007 = vmatpush.bf16.msra.mxu0 %v4762_v23  ;;  %v4718_v53 = vld [vmem:[%s4964_s22 + $0x18] sm:$0xff] }
  0x5f   : > { %1023 = vmatmul.bf16.gmra.mxu3 %v945_v63  ;;  %v1483_v63 = vrot.slane %v5300_v6, 5  ;;  %v1225_v6 = vsel %vm5013_vm6, %v1220_v2, %v5347_v37  ;;  %v1239_v37 = vrot.slane %v1237_v22, 4  ;;  %v1253_v57 = vor.u32 %v1252_v41, %v5399_v40  ;;  %2455 = vmatpush.bf16.msra.mxu2 %v4778_v19 }
  0x60   : > { %v1671_v21 = vor.u32 %v1670_v9, %v1667_v7  ;;  %v1349_v30 = vunpack.c.l.b16 %v1225_v6  ;;  %v1492_v9 = vrot.slane %v1490_v58, 4  ;;  %v4006_v6 = vld [vmem:[%s4964_s22 + $0x24] sm:$0xf] }
  0x61   : > { %v1485_v16 = vrot.slane %v1483_v63, 4  ;;  %v1484_v32 = vsel %vm5030_vm7, %v4068_v11, %v1483_v63  ;;  %v1243_v56 = vor.u32 %v1242_v38, %v1239_v37  ;;  %v1693_v63 = vrot.slane %v1691_v48, 6  ;;  %v4123_v38 = vld [vmem:[%s4964_s22 + $0x2c] sm:$0x3]  ;;  %2704 = vmatpush.bf16.msra.mxu3 %v4786_v24 }
  0x62   : > { %v1672_v36 = vsel %vm5043_vm8, %v1663_v17, %v1671_v21  ;;  %v1533_v49 = vunpack.c.l.b16 %v1484_v32  ;;  %v1359_v54 = vpack.c.b16 %v1350_v31, %v1349_v30  ;;  %v1254_v7 = vrot.slane %v1253_v57, 4 }
  0x63   : > { %v1487_v33 = vsel %vm5030_vm7, %v1485_v16, %v1486_v8  ;;  %v1783_v52 = vunpack.c.l.b16 %v1672_v36  ;;  %v1244_v5 = vrot.slane %v1243_v56, 4  ;;  %v1694_v12 = vor.u32 %v1693_v63, %v1690_v62  ;;  %v4771_v16 = vld [vmem:[%s6181_s1 + $0x260] sm:$0xff] }
  0x64   : > { %v1534_v50 = vunpack.c.l.b16 %v1487_v33  ;;  %v1491_v17 = vsel %vm5030_vm7, %v4069_v4, %v1490_v58  ;;  %v1259_v21 = vsel %vm5013_vm6, %v1254_v7, %v1258_v3  ;;  %v1494_v22 = vsel %vm5030_vm7, %v1492_v9, %v1493_v10  ;;  %2270 = vmatpush.bf16.msra.mxu1 %v4771_v16  ;;  %v4009_v7 = vld [vmem:[%s4964_s22 + $0x30] sm:$0xf] }
  0x65   : > { %v1792_v2 = vpack.c.b16 %v1783_v52, %v1782_v51  ;;  %v1249_v20 = vsel %vm5013_vm6, %v1244_v5, %v5399_v40  ;;  %v1261_v27 = vshrl.u32 %v4006_v6, 16  ;;  %v1264_v28 = vshll.u32 %v4006_v6, 16  ;;  %v5463_v16 = vld [vmem:[%s4964_s22 + $0x30] sm:$0xe] }
  0x66   : > { %v1270_v30 = vshll.u32 %v5418_v18, 16  ;;  %v1274_v31 = vshrl.u32 %v5418_v18, 16  ;;  %v1697_v32 = vshrl.u32 %v5421_v14, 16  ;;  %v1700_v33 = vshll.u32 %v5421_v14, 16 }
  0x67   : > { %v1351_v34 = vunpack.c.l.b16 %v1249_v20  ;;  %v1352_v35 = vunpack.c.l.b16 %v1259_v21  ;;  %v1535_v36 = vunpack.c.l.b16 %v1491_v17  ;;  %v1536_v37 = vunpack.c.l.b16 %v1494_v22 }
  0x68   : > { %v1263_v41 = vrot.slane %v1261_v27, 4  ;;  %2271 = vmatpush.bf16.msra.mxu1 %v4770_v29  ;;  %v1699_v47 = vrot.slane %v1697_v32, 5  ;;  %v1702_v48 = vrot.slane %v1700_v33, 6  ;;  %v1711_v51 = vshrl.u32 %v4123_v38, 16  ;;  %v4761_v33 = vld [vmem:[%s6181_s1 + $0x210] sm:$0xff] }
  0x69   : > { %v1714_v52 = vshll.u32 %v4123_v38, 16  ;;  %v1544_v58 = vpack.c.b16 %v1536_v37, %v1535_v36  ;;  %v4070_v5 = vrot.slane %v5421_v14, 9  ;;  %v1285_v17 = vshrl.u32 %v4009_v7, 16  ;;  %v5492_v38 = vld [vmem:[%s4964_s22 + $0x38] sm:$0x1]  ;;  %2008 = vmatpush.bf16.msra.mxu0 %v4761_v33 }
  0x6a   : > { %v1703_v62 = vor.u32 %v1702_v48, %v1699_v47  ;;  %v1720_v24 = vshrl.u32 %v5463_v16, 16  ;;  %v5542_v33 = vld [vmem:[%s4964_s22 + $0x44] sm:$0x1] }
  0x6c   : > { %492 = vmatmul.bf16.gmra.mxu0 %v410_v59  ;;  %v4717_v59 = vld [vmem:[%s4964_s22 + $0xc] sm:$0xff]  ;;  %v1704_v6 = vrot.slane %v1703_v62, 4 }
  0x6d   : > { %604 = vmatmul.bf16.gmra.mxu1 %v4684_v60  ;;  %v1680_v60 = vor.u32 %v1679_v45, %v1676_v43  ;;  %v1266_v43 = vrot.slane %v1264_v28, 5  ;;  %v1272_v45 = vrot.slane %v1270_v30, 5  ;;  %v4124_v28 = vld [vmem:[%s4964_s22 + $0x38] sm:$0x3] }
  0x6e   : > { %776 = vmatmul.bf16.gmra.mxu2 %v694_v61  ;;  %v1684_v61 = vor.u32 %v1683_v44, %v1682_v46  ;;  %v4008_v44 = vld [vmem:[%s4964_s22 + $0x2c] sm:$0x1]  ;;  %v1276_v46 = vrot.slane %v1274_v31, 4  ;;  %v1734_v48 = vshrl.u32 %v4124_v28, 16 }
  0x6f   : > { %1028 = vmatmul.bf16.gmra.mxu3 %v946_v1  ;;  %v1543_v1 = vpack.c.b16 %v1534_v50, %v1533_v49  ;;  %v1681_v11 = vrot.slane %v1680_v60, 4  ;;  %v1705_v49 = vrot.slane %v1274_v31, 5  ;;  %v1706_v50 = vrot.slane %v1270_v30, 6 }
  0x70   : > { %v1686_v8 = vrot.slane %v1684_v61, 4  ;;  %v1267_v56 = vor.u32 %v1266_v43, %v1263_v41  ;;  %v1280_v57 = vshll.u32 %v4008_v44, 16  ;;  %v1277_v60 = vor.u32 %v1276_v46, %v1272_v45 }
  0x71   : > { %v1685_v25 = vsel %vm5043_vm8, %v1681_v11, %v1684_v61  ;;  %v1497_v61 = vrot.slane %v5418_v18, 5  ;;  %v1707_v63 = vor.u32 %v1706_v50, %v1705_v49  ;;  %v1500_v11 = vrot.slane %v4008_v44, 5 }
  0x72   : > { %v1695_v26 = vsel %vm5043_vm8, %v1686_v8, %v1694_v12  ;;  %v1784_v39 = vunpack.c.l.b16 %v1685_v25  ;;  %v1268_v3 = vrot.slane %v1267_v56, 4  ;;  %v1282_v4 = vrot.slane %v1280_v57, 5  ;;  %v5457_v8 = vld [vmem:[%s4964_s22 + $0x34] sm:$0xf] }
  0x73   : > { %v1785_v40 = vunpack.c.l.b16 %v1695_v26  ;;  %v1278_v9 = vrot.slane %v1277_v60, 4  ;;  %v1499_v10 = vrot.slane %v1497_v61, 4  ;;  %v4777_v12 = vld [vmem:[%s6181_s1 + $0x290] sm:$0xff]  ;;  %v1709_v15 = vrot.slane %v1707_v63, 4  ;;  %v4012_v60 = vld [vmem:[%s4964_s22 + $0x3c] sm:$0xf] }
  0x74   : > { %v1288_v18 = vshll.u32 %v4009_v7, 16  ;;  %2456 = vmatpush.bf16.msra.mxu2 %v4777_v12  ;;  %v1273_v14 = vsel %vm5013_vm6, %v1268_v3, %v1272_v45  ;;  %v1498_v19 = vsel %vm5030_vm7, %v4070_v5, %v1497_v61  ;;  %v1294_v20 = vshll.u32 %v5457_v8, 16  ;;  %v4776_v7 = vld [vmem:[%s6181_s1 + $0x288] sm:$0xff] }
  0x75   : > { %v1298_v21 = vshrl.u32 %v5457_v8, 16  ;;  %v1283_v22 = vsel %vm5013_vm6, %v1278_v9, %v1282_v4  ;;  %v1501_v23 = vsel %vm5030_vm7, %v1499_v10, %v1500_v11  ;;  %v1723_v25 = vshll.u32 %v5463_v16, 16  ;;  %v4760_v9 = vld [vmem:[%s6181_s1 + $0x208] sm:$0xff] }
  0x76   : > { %v1708_v26 = vsel %vm5043_vm8, %v1704_v6, %v1707_v63  ;;  %v1353_v29 = vunpack.c.l.b16 %v1273_v14  ;;  %v1537_v30 = vunpack.c.l.b16 %v1498_v19  ;;  %v1287_v31 = vrot.slane %v1285_v17, 4  ;;  %v4784_v10 = vld [vmem:[%s6181_s1 + $0x2c8] sm:$0xff]  ;;  %2009 = vmatpush.bf16.msra.mxu0 %v4760_v9 }
  0x77   : > { %v1290_v32 = vrot.slane %v1288_v18, 5  ;;  %v1354_v36 = vunpack.c.l.b16 %v1283_v22  ;;  %v1538_v37 = vunpack.c.l.b16 %v1501_v23  ;;  %v1786_v41 = vunpack.c.l.b16 %v1708_v26  ;;  %v4768_v18 = vld [vmem:[%s6181_s1 + $0x248] sm:$0xff] }
  0x78   : > { %v1722_v44 = vrot.slane %v1720_v24, 5  ;;  %v1725_v45 = vrot.slane %v1723_v25, 6  ;;  %v1728_v46 = vrot.slane %v1298_v21, 5  ;;  %v1729_v47 = vrot.slane %v1294_v20, 6  ;;  %2457 = vmatpush.bf16.msra.mxu2 %v4776_v7 }
  0x79   : > { %v1737_v49 = vshll.u32 %v4124_v28, 16  ;;  %v1291_v50 = vor.u32 %v1290_v32, %v1287_v31  ;;  %v1504_v56 = vrot.slane %v5457_v8, 5  ;;  %v1545_v57 = vpack.c.b16 %v1538_v37, %v1537_v30 }
  0x7a   : > { %v1730_v61 = vor.u32 %v1729_v47, %v1728_v46  ;;  %v1736_v62 = vrot.slane %v1734_v48, 5  ;;  %v4071_v5 = vrot.slane %v5463_v16, 9  ;;  %v1309_v12 = vshrl.u32 %v4012_v60, 16  ;;  %v4767_v48 = vld [vmem:[%s6181_s1 + $0x240] sm:$0xff] }
  0x7b   : > { %v1739_v63 = vrot.slane %v1737_v49, 6  ;;  %v1292_v3 = vrot.slane %v1291_v50, 4  ;;  %v1506_v8 = vrot.slane %v1504_v56, 4  ;;  %v1312_v6 = vshll.u32 %v4012_v60, 16  ;;  %v4720_v60 = vld [vmem:[%s4964_s22 + $0x30] sm:$0xff] }
  0x7c   : > { %1161 = vmatmul.bf16.vlgmr.msrb.gmra.mxu0 %v4717_v59  ;;  %v1793_v59 = vpack.c.b16 %v1785_v40, %v1784_v39  ;;  %v5494_v39 = vrot.slane %v1294_v20, 5  ;;  %v1300_v40 = vrot.slane %v1298_v21, 4  ;;  %v1732_v14 = vrot.slane %v1730_v61, 4 }
  0x7d   : > { %1425 = vmatmul.bf16.vlgmr.msrb.gmra.mxu1 %v1359_v54  ;;  %v1360_v54 = vpack.c.b16 %v1352_v35, %v1351_v34  ;;  %v4785_v34 = vld [vmem:[%s6181_s1 + $0x2d0] sm:$0xff]  ;;  %v1740_v19 = vor.u32 %v1739_v63, %v1736_v62  ;;  %v1505_v24 = vsel %vm5030_vm7, %v4071_v5, %v1504_v56  ;;  %v1311_v25 = vrot.slane %v1309_v12, 4 }
  0x7e   : > { %1609 = vmatmul.bf16.vlgmr.msrb.gmra.mxu2 %v1543_v1  ;;  %v1713_v1 = vrot.slane %v1711_v51, 5  ;;  %v4769_v35 = vld [vmem:[%s6181_s1 + $0x250] sm:$0xff]  ;;  %2705 = vmatpush.bf16.msra.mxu3 %v4785_v34  ;;  %v1304_v51 = vshll.u32 %v5492_v38, 16  ;;  %v1297_v22 = vsel %vm5013_vm6, %v1292_v3, %v5494_v39  ;;  %v1314_v26 = vrot.slane %v1312_v6, 5 }
  0x7f   : > { %1858 = vmatmul.bf16.vlgmr.msrb.gmra.mxu3 %v1792_v2  ;;  %v1716_v2 = vrot.slane %v1714_v52, 6  ;;  %2272 = vmatpush.bf16.msra.mxu1 %v4769_v35  ;;  %v4719_v52 = vld [vmem:[%s4964_s22 + $0x24] sm:$0xff]  ;;  %v1741_v32 = vsel %vm5043_vm8, %v1732_v14, %v1740_v19  ;;  %v1539_v46 = vunpack.c.l.b16 %v1505_v24  ;;  %v1514_v6 = vrot.slane %v5542_v33, 5  ;;  %v5569_v19 = vld [vmem:[%s4964_s22 + $0x18] sm:$0xe] }
  0x80   : > { %v1306_v4 = vrot.slane %v1304_v51, 5  ;;  %v1315_v47 = vor.u32 %v1314_v26, %v1311_v25  ;;  %v1789_v51 = vunpack.c.l.b16 %v1741_v32 }
  0x81   : > { %v1717_v13 = vor.u32 %v1716_v2, %v1713_v1  ;;  %v5502_v1 = vld [vmem:[%s4964_s22 + $0x40] sm:$0xf]  ;;  %v5505_v2 = vld [vmem:[%s4964_s22 + $0x3c] sm:$0xe] }
  0x82   : > { %v1318_v16 = vshll.u32 %v5502_v1, 16  ;;  %v1322_v17 = vshrl.u32 %v5502_v1, 16  ;;  %v1743_v20 = vshrl.u32 %v5505_v2, 16  ;;  %v1746_v21 = vshll.u32 %v5505_v2, 16  ;;  %2706 = vmatpush.bf16.msra.mxu3 %v4784_v10  ;;  %v5563_v10 = vld [vmem:[%s4964_s22 + $0x1c] sm:$0xf] }
  0x83   : > { %v1718_v27 = vsel %vm5043_vm8, %v1709_v15, %v1717_v13  ;;  %v1507_v15 = vrot.slane %v5492_v38, 5  ;;  %2273 = vmatpush.bf16.msra.mxu1 %v4768_v18  ;;  %v1316_v62 = vrot.slane %v1315_v47, 4  ;;  %v4072_v9 = vrot.slane %v5505_v2, 9 }
  0x84   : > { %v1787_v43 = vunpack.c.l.b16 %v1718_v27  ;;  %v4125_v27 = vld [vmem:[%s4964_s22 + $0x44] sm:$0x3]  ;;  %v5537_v30 = vrot.slane %v1318_v16, 5  ;;  %v1324_v31 = vrot.slane %v1322_v17, 4  ;;  %v1745_v34 = vrot.slane %v1743_v20, 5  ;;  %v4819_v20 = vld [vmem:[%s6181_s1 + $0x3b8] sm:$0xff] }
  0x85   : > { %v1508_v28 = vsel %vm5030_vm7, %v1506_v8, %v1507_v15  ;;  %v1748_v35 = vrot.slane %v1746_v21, 6  ;;  %v1752_v37 = vrot.slane %v1318_v16, 6  ;;  %v1757_v38 = vshrl.u32 %v4125_v27, 16  ;;  %v4803_v21 = vld [vmem:[%s6181_s1 + $0x338] sm:$0xff] }
  0x86   : > { %v1540_v49 = vunpack.c.l.b16 %v1508_v28  ;;  %v2072_v14 = vshll.u32 %v5563_v10, 16  ;;  %v2076_v2 = vshrl.u32 %v5563_v10, 16 }
  0x87   : > { %2274 = vmatpush.bf16.msra.mxu1 %v4767_v48  ;;  %v1749_v56 = vor.u32 %v1748_v35, %v1745_v34 }
  0x88   : > { %v5595_v35 = vrot.slane %v2072_v14, 5 }
  0x89   : > { %v1750_v15 = vrot.slane %v1749_v56, 4 }
  0x8c   : > { %1166 = vmatmul.bf16.gmra.mxu0 %v4718_v53  ;;  %v1361_v53 = vpack.c.b16 %v1354_v36, %v1353_v29  ;;  %v1751_v36 = vrot.slane %v1322_v17, 5 }
  0x8d   : > { %1430 = vmatmul.bf16.gmra.mxu1 %v1360_v54  ;;  %v1301_v54 = vor.u32 %v1300_v40, %v5494_v39  ;;  %v1760_v39 = vshll.u32 %v4125_v27, 16  ;;  %v4775_v40 = vld [vmem:[%s6181_s1 + $0x280] sm:$0xff] }
  0x8e   : > { %1614 = vmatmul.bf16.gmra.mxu2 %v1544_v58  ;;  %v1794_v58 = vpack.c.b16 %v1787_v43, %v1786_v41  ;;  %v4759_v41 = vld [vmem:[%s6181_s1 + $0x200] sm:$0xff] }
  0x8f   : > { %1863 = vmatmul.bf16.gmra.mxu3 %v1793_v59  ;;  %v1726_v59 = vor.u32 %v1725_v45, %v1722_v44  ;;  %v1302_v11 = vrot.slane %v1301_v54, 4  ;;  %v4783_v43 = vld [vmem:[%s6181_s1 + $0x2c0] sm:$0xff]  ;;  %v1355_v44 = vunpack.c.l.b16 %v1297_v22  ;;  %2458 = vmatpush.bf16.msra.mxu2 %v4775_v40  ;;  %v1511_v54 = vrot.slane %v5502_v1, 5  ;;  %v4252_v1 = vld [vmem:[%s4964_s22 + $0x18] sm:$0xf] }
  0x90   : > { %2010 = vmatpush.bf16.msra.mxu0 %v4759_v41  ;;  %2707 = vmatpush.bf16.msra.mxu3 %v4783_v43  ;;  %v2063_v17 = vshrl.u32 %v4252_v1, 16  ;;  %v2066_v18 = vshll.u32 %v4252_v1, 16  ;;  %v4827_v22 = vld [vmem:[%s6181_s1 + $0x3f8] sm:$0xff] }
  0x91   : > { %v1727_v13 = vrot.slane %v1726_v59, 4  ;;  %v1307_v23 = vsel %vm5013_vm6, %v1302_v11, %v1306_v4  ;;  %v1762_v59 = vrot.slane %v1760_v39, 6  ;;  %v1546_v4 = vpack.c.b16 %v1540_v49, %v1539_v46  ;;  %v4373_v46 = vld [vmem:[%s4964_s22 + $0x20] sm:$0x3] }
  0x92   : > { %v1356_v45 = vunpack.c.l.b16 %v1307_v23  ;;  %v1513_v12 = vrot.slane %v1511_v54, 4  ;;  %v1321_v23 = vsel %vm5013_vm6, %v1316_v62, %v5537_v30  ;;  %v1512_v25 = vsel %vm5030_vm7, %v4072_v9, %v1511_v54  ;;  %v4721_v1 = vld [vmem:[%s4964_s22 + $0x3c] sm:$0xff] }
  0x93   : > { %v1731_v29 = vsel %vm5043_vm8, %v1727_v13, %v1730_v61  ;;  %3301 = vmatpush.bf16.msrb.mxu2 %v4819_v20  ;;  %v2068_v34 = vrot.slane %v2066_v18, 5  ;;  %v1357_v41 = vunpack.c.l.b16 %v1321_v23  ;;  %v2518_v62 = vshll.u32 %v4373_v46, 16 }
  0x94   : > { %v1788_v50 = vunpack.c.l.b16 %v1731_v29  ;;  %v1362_v61 = vpack.c.b16 %v1356_v45, %v1355_v44  ;;  %v1515_v26 = vsel %vm5030_vm7, %v1513_v12, %v1514_v6  ;;  %v2501_v29 = vshrl.u32 %v5569_v19, 16  ;;  %2853 = vmatpush.bf16.msrb.mxu0 %v4803_v21  ;;  %3550 = vmatpush.bf16.msrb.mxu3 %v4827_v22  ;;  %v5598_v45 = vld [vmem:[%s4964_s22 + $0x20] sm:$0x1] }
  0x95   : > { %v1541_v44 = vunpack.c.l.b16 %v1512_v25  ;;  %v1542_v48 = vunpack.c.l.b16 %v1515_v26  ;;  %v2333_v12 = vrot.slane %v5563_v10, 5  ;;  %v2520_v21 = vrot.slane %v2518_v62, 6  ;;  %v4802_v10 = vld [vmem:[%s6181_s1 + $0x330] sm:$0xff] }
  0x96   : > { %v1795_v5 = vpack.c.b16 %v1789_v51, %v1788_v50  ;;  %v4811_v51 = vld [vmem:[%s6181_s1 + $0x378] sm:$0xff]  ;;  %v2503_v56 = vrot.slane %v2501_v29, 5  ;;  %v4826_v25 = vld [vmem:[%s6181_s1 + $0x3f0] sm:$0xff]  ;;  %v4320_v29 = vrot.slane %v5569_v19, 9 }
  0x97   : > { %3117 = vmatpush.bf16.msrb.mxu1 %v4811_v51  ;;  %v4810_v26 = vld [vmem:[%s6181_s1 + $0x370] sm:$0xff] }
  0x98   : > { %2854 = vmatpush.bf16.msrb.mxu0 %v4802_v10  ;;  %3551 = vmatpush.bf16.msrb.mxu3 %v4826_v25  ;;  %v4754_v25 = vld [vmem:[%s4964_s22 + $0x18] sm:$0xff] }
  0x9b   : > { %3118 = vmatpush.bf16.msrb.mxu1 %v4810_v26 }
  0x9c   : > { %1171 = vmatmul.bf16.gmra.mxu0 %v4719_v52  ;;  %v1325_v52 = vor.u32 %v1324_v31, %v5537_v30  ;;  %v2504_v31 = vshll.u32 %v5569_v19, 16 }
  0x9d   : > { %1435 = vmatmul.bf16.gmra.mxu1 %v1361_v53  ;;  %v1328_v53 = vshll.u32 %v5542_v33, 16  ;;  %v2065_v33 = vrot.slane %v2063_v17, 4 }
  0x9e   : > { %1619 = vmatmul.bf16.gmra.mxu2 %v1545_v57  ;;  %v1753_v57 = vor.u32 %v1752_v37, %v1751_v36  ;;  %v1326_v7 = vrot.slane %v1325_v52, 4  ;;  %v2078_v36 = vrot.slane %v2076_v2, 4  ;;  %v4818_v52 = vld [vmem:[%s6181_s1 + $0x3b0] sm:$0xff] }
  0x9f   : > { %1868 = vmatmul.bf16.gmra.mxu3 %v1794_v58  ;;  %v1759_v58 = vrot.slane %v1757_v38, 5  ;;  %v1330_v8 = vrot.slane %v1328_v53, 5  ;;  %v2069_v53 = vor.u32 %v2068_v34, %v2065_v33  ;;  %3302 = vmatpush.bf16.msrb.mxu2 %v4818_v52 }
  0xa0   : > { %v1755_v13 = vrot.slane %v1753_v57, 4  ;;  %v1754_v27 = vsel %vm5043_vm8, %v1750_v15, %v1753_v57  ;;  %v2079_v54 = vor.u32 %v2078_v36, %v5595_v35  ;;  %v2506_v57 = vrot.slane %v2504_v31, 6  ;;  %v5615_v15 = vld [vmem:[%s4964_s22 + $0x28] sm:$0xf] }
  0xa1   : > { %v1763_v16 = vor.u32 %v1762_v59, %v1759_v58  ;;  %v1331_v24 = vsel %vm5013_vm6, %v1326_v7, %v1330_v8  ;;  %v1790_v49 = vunpack.c.l.b16 %v1754_v27  ;;  %v2082_v58 = vshll.u32 %v5598_v45, 16 }
  0xa2   : > { %v1358_v43 = vunpack.c.l.b16 %v1331_v24  ;;  %v2509_v59 = vrot.slane %v2076_v2, 5  ;;  %v2080_v8 = vrot.slane %v2079_v54, 4  ;;  %v2507_v6 = vor.u32 %v2506_v57, %v2503_v56  ;;  %v4374_v57 = vld [vmem:[%s4964_s22 + $0x2c] sm:$0x3] }
  0xa3   : > { %v1764_v28 = vsel %vm5043_vm8, %v1755_v13, %v1763_v16  ;;  %v2084_v18 = vrot.slane %v2082_v58, 5  ;;  %v2096_v27 = vshll.u32 %v5615_v15, 16  ;;  %v2335_v31 = vrot.slane %v2333_v12, 4 }
  0xa4   : > { %v1791_v50 = vunpack.c.l.b16 %v1764_v28  ;;  %v2100_v28 = vshrl.u32 %v5615_v15, 16  ;;  %v2508_v36 = vrot.slane %v2507_v6, 4  ;;  %v4809_v6 = vld [vmem:[%s6181_s1 + $0x368] sm:$0xff] }
  0xa5   : > { %v2085_v34 = vsel %vm5013_vm6, %v2080_v8, %v2084_v18  ;;  %v2538_v8 = vshrl.u32 %v4374_v57, 16  ;;  %3119 = vmatpush.bf16.msrb.mxu1 %v4809_v6 }
  0xa6   : > { %v2200_v54 = vunpack.c.l.b16 %v2085_v34 }
  0xa9   : > { %v473_v63 = vpop.f32.mrf.mxu0 }
  0xaa   : > { %v585_v3 = vpop.f32.mrf.mxu1 }
  0xab   : > { %v586_v11 = vadd.f32 %v585_v3, %v473_v63  ;;  %v1363_v63 = vpack.c.b16 %v1358_v43, %v1357_v41  ;;  %v1547_v3 = vpack.c.b16 %v1542_v48, %v1541_v44  ;;  %v5646_v41 = vrot.slane %v2096_v27, 5 }
  0xac   : > { %1176 = vmatmul.bf16.gmra.mxu0 %v4720_v60  ;;  %v2510_v60 = vrot.slane %v2072_v14, 6  ;;  %v2102_v43 = vrot.slane %v2100_v28, 4  ;;  %v2334_v48 = vsel %vm5030_vm7, %v4320_v29, %v2333_v12  ;;  %v2541_v12 = vshll.u32 %v4374_v57, 16  ;;  %v4808_v57 = vld [vmem:[%s6181_s1 + $0x360] sm:$0xff] }
  0xad   : > { %1440 = vmatmul.bf16.gmra.mxu1 %v1362_v61  ;;  %v2515_v61 = vshrl.u32 %v4373_v46, 16 }
  0xae   : > { %1624 = vmatmul.bf16.gmra.mxu2 %v1546_v4  ;;  %v1796_v4 = vpack.c.b16 %v1791_v50, %v1790_v49  ;;  %v5617_v14 = vor.u32 %v2510_v60, %v2509_v59  ;;  %v2543_v29 = vrot.slane %v2541_v12, 6  ;;  %3120 = vmatpush.bf16.msrb.mxu1 %v4808_v57 }
  0xaf   : > { %1873 = vmatmul.bf16.gmra.mxu3 %v1795_v5  ;;  %v4255_v5 = vld [vmem:[%s4964_s22 + $0x24] sm:$0xf]  ;;  %v2517_v2 = vrot.slane %v2515_v61, 5 }
  0xb0   : > { %v2087_v22 = vshrl.u32 %v4255_v5, 16  ;;  %v2090_v23 = vshll.u32 %v4255_v5, 16  ;;  %v2512_v56 = vsel %vm5043_vm8, %v2508_v36, %v5617_v14  ;;  %v4817_v5 = vld [vmem:[%s6181_s1 + $0x3a8] sm:$0xff] }
  0xb1   : > { %v757_v30 = vpop.f32.mrf.mxu2  ;;  %v475_v38 = vpop.f32.mrf.mxu0  ;;  %3303 = vmatpush.bf16.msrb.mxu2 %v4817_v5 }
  0xb2   : > { %v1009_v32 = vpop.f32.mrf.mxu3  ;;  %v782_v37 = vadd.f32 %v757_v30, %v586_v11  ;;  %v587_v39 = vpop.f32.mrf.mxu1  ;;  %v2070_v11 = vrot.slane %v2069_v53, 4  ;;  %v2336_v30 = vrot.slane %v5598_v45, 5  ;;  %v2089_v19 = vrot.slane %v2087_v22, 4 }
  0xb3   : > { %v588_v40 = vadd.f32 %v587_v39, %v475_v38  ;;  %v2521_v38 = vor.u32 %v2520_v21, %v2517_v2  ;;  %v2092_v39 = vrot.slane %v2090_v23, 5 }
  0xb4   : > { %v5601_v47 = vadd.f32 %v1009_v32, %v782_v37  ;;  %v5635_v32 = vld [vmem:[%s4964_s22 + $0x24] sm:$0xe]  ;;  %v2075_v33 = vsel %vm5013_vm6, %v2070_v11, %v5595_v35  ;;  %v2513_v37 = vrot.slane %v5617_v14, 4  ;;  %v2337_v49 = vsel %vm5030_vm7, %v2335_v31, %v2336_v30 }
  0xb5   : > { %v2524_v35 = vshrl.u32 %v5635_v32, 16  ;;  %v2527_v44 = vshll.u32 %v5635_v32, 16  ;;  %v2199_v53 = vunpack.c.l.b16 %v2075_v33  ;;  %v2093_v60 = vor.u32 %v2092_v39, %v2089_v19 }
  0xb6   : > { %v2522_v59 = vsel %vm5043_vm8, %v2513_v37, %v2521_v38  ;;  %v2533_v11 = vrot.slane %v2096_v27, 6  ;;  %v2340_v14 = vrot.slane %v5615_v15, 5  ;;  %v4321_v36 = vrot.slane %v5635_v32, 9  ;;  %v4258_v37 = vld [vmem:[%s4964_s22 + $0x30] sm:$0xf]  ;;  %v4816_v32 = vld [vmem:[%s6181_s1 + $0x3a0] sm:$0xff] }
  0xb7   : > { %v2633_v18 = vunpack.c.l.b16 %v2522_v59  ;;  %v2094_v2 = vrot.slane %v2093_v60, 4  ;;  %v2209_v26 = vpack.c.b16 %v2200_v54, %v2199_v53  ;;  %v4800_v54 = vld [vmem:[%s6181_s1 + $0x320] sm:$0xff]  ;;  %3304 = vmatpush.bf16.msrb.mxu2 %v4816_v32 }
  0xb8   : > { %v2342_v19 = vrot.slane %v2340_v14, 4  ;;  %v4755_v32 = vld [vmem:[%s4964_s22 + $0x24] sm:$0xff] }
  0xb9   : > { %v759_v7 = vpop.f32.mrf.mxu2  ;;  %v478_v16 = vpop.f32.mrf.mxu0 }
  0xba   : > { %v1011_v9 = vpop.f32.mrf.mxu3  ;;  %v783_v13 = vadd.f32 %v759_v7, %v588_v40  ;;  %v590_v17 = vpop.f32.mrf.mxu1  ;;  %v5644_v40 = vld [vmem:[%s4964_s22 + $0x2c] sm:$0x1] }
  0xbb   : > { %v591_v20 = vadd.f32 %v590_v17, %v478_v16  ;;  %v2106_v61 = vshll.u32 %v5644_v40, 16  ;;  %v4801_v7 = vld [vmem:[%s6181_s1 + $0x328] sm:$0xff]  ;;  %v2384_v16 = vunpack.c.l.b16 %v2337_v49  ;;  %v2632_v17 = vunpack.c.l.b16 %v2512_v56  ;;  %v4824_v56 = vld [vmem:[%s6181_s1 + $0x3e0] sm:$0xff] }
  0xbc   : > { %v5619_v24 = vadd.f32 %v1011_v9, %v783_v13  ;;  %1181 = vmatmul.bf16.gmra.mxu0 %v4721_v1  ;;  %v4825_v9 = vld [vmem:[%s6181_s1 + $0x3e8] sm:$0xff]  ;;  %v2532_v1 = vrot.slane %v2100_v28, 5  ;;  %v2383_v13 = vunpack.c.l.b16 %v2334_v48  ;;  %v2540_v28 = vrot.slane %v2538_v8, 5 }
  0xbd   : > { %1445 = vmatmul.bf16.gmra.mxu1 %v1363_v63  ;;  %v2103_v63 = vor.u32 %v2102_v43, %v5646_v41  ;;  %2855 = vmatpush.bf16.msrb.mxu0 %v4801_v7  ;;  %v2108_v21 = vrot.slane %v2106_v61, 5  ;;  %v2642_v34 = vpack.c.b16 %v2633_v18, %v2632_v17  ;;  %v2343_v39 = vrot.slane %v5644_v40, 5  ;;  %v5684_v43 = vld [vmem:[%s4964_s22 + $0x34] sm:$0xf] }
  0xbe   : > { %1629 = vmatmul.bf16.gmra.mxu2 %v1547_v3  ;;  %v2526_v3 = vrot.slane %v2524_v35, 5  ;;  %3552 = vmatpush.bf16.msrb.mxu3 %v4825_v9  ;;  %v5678_v27 = vor.u32 %v2533_v11, %v2532_v1  ;;  %v2393_v33 = vpack.c.b16 %v2384_v16, %v2383_v13  ;;  %v5687_v35 = vld [vmem:[%s4964_s22 + $0x30] sm:$0xe]  ;;  %v2544_v49 = vor.u32 %v2543_v29, %v2540_v28  ;;  %v4375_v11 = vld [vmem:[%s4964_s22 + $0x38] sm:$0x3] }
  0xbf   : > { %1878 = vmatmul.bf16.gmra.mxu3 %v1796_v4  ;;  %v2529_v4 = vrot.slane %v2527_v44, 6  ;;  %v2547_v53 = vshrl.u32 %v5687_v35, 16  ;;  %v2341_v61 = vsel %vm5030_vm7, %v4321_v36, %v2340_v14  ;;  %v5730_v14 = vld [vmem:[%s4964_s22 + $0x38] sm:$0x1] }
  0xc0   : > { %v2536_v40 = vrot.slane %v5678_v27, 4  ;;  %v4823_v28 = vld [vmem:[%s6181_s1 + $0x3d8] sm:$0xff]  ;;  %v2130_v36 = vshll.u32 %v5730_v14, 16  ;;  %v2350_v57 = vrot.slane %v5730_v14, 5 }
  0xc1   : > { %v762_v45 = vpop.f32.mrf.mxu2  ;;  %v480_v51 = vpop.f32.mrf.mxu0  ;;  %v2530_v22 = vor.u32 %v2529_v4, %v2526_v3  ;;  %2856 = vmatpush.bf16.msrb.mxu0 %v4800_v54  ;;  %v2549_v17 = vrot.slane %v2547_v53, 5 }
  0xc2   : > { %v1014_v46 = vpop.f32.mrf.mxu3  ;;  %v784_v50 = vadd.f32 %v762_v45, %v591_v20  ;;  %v592_v52 = vpop.f32.mrf.mxu1  ;;  %v2104_v20 = vrot.slane %v2103_v63, 4  ;;  %v2099_v45 = vsel %vm5013_vm6, %v2094_v2, %v5646_v41  ;;  %v2124_v41 = vshrl.u32 %v5684_v43, 16  ;;  %3553 = vmatpush.bf16.msrb.mxu3 %v4824_v56 }
  0xc3   : > { %v593_v58 = vadd.f32 %v592_v52, %v480_v51  ;;  %v2531_v48 = vrot.slane %v2530_v22, 4  ;;  %v2114_v51 = vshll.u32 %v4258_v37, 16  ;;  %v2120_v52 = vshll.u32 %v5684_v43, 16 }
  0xc4   : > { %v5661_v62 = vadd.f32 %v1014_v46, %v784_v50  ;;  %v2109_v46 = vsel %vm5013_vm6, %v2104_v20, %v2108_v21  ;;  %v2111_v50 = vshrl.u32 %v4258_v37, 16  ;;  %v5713_v59 = vunpack.c.l.b16 %v2099_v45 }
  0xc5   : > { %v5715_v60 = vunpack.c.l.b16 %v2109_v46  ;;  %v2344_v63 = vsel %vm5030_vm7, %v2342_v19, %v2343_v39  ;;  %v2535_v5 = vsel %vm5043_vm8, %v2531_v48, %v5678_v27  ;;  %v2545_v7 = vsel %vm5043_vm8, %v2536_v40, %v2544_v49  ;;  %v4799_v27 = vld [vmem:[%s6181_s1 + $0x318] sm:$0xff] }
  0xc6   : > { %v2113_v9 = vrot.slane %v2111_v50, 4  ;;  %v2116_v1 = vrot.slane %v2114_v51, 5  ;;  %v5727_v13 = vrot.slane %v2120_v52, 5  ;;  %v2126_v16 = vrot.slane %v2124_v41, 4  ;;  %2857 = vmatpush.bf16.msrb.mxu0 %v4799_v27  ;;  %3554 = vmatpush.bf16.msrb.mxu3 %v4823_v28  ;;  %v4261_v51 = vld [vmem:[%s4964_s22 + $0x3c] sm:$0xf] }
  0xc7   : > { %v2555_v20 = vrot.slane %v2124_v41, 5  ;;  %v2556_v21 = vrot.slane %v2120_v52, 6  ;;  %v2386_v29 = vunpack.c.l.b16 %v2344_v63  ;;  %v2210_v19 = vpack.c.b16 %v5715_v60, %v5713_v59 }
  0xc8   : > { %v4322_v50 = vrot.slane %v5687_v35, 9  ;;  %v2132_v60 = vrot.slane %v2130_v36, 5 }
  0xc9   : > { %v764_v23 = vpop.f32.mrf.mxu2  ;;  %v483_v30 = vpop.f32.mrf.mxu0 }
  0xca   : > { %v1016_v10 = vpop.f32.mrf.mxu3  ;;  %v785_v31 = vadd.f32 %v764_v23, %v593_v58  ;;  %v595_v15 = vpop.f32.mrf.mxu1  ;;  %v2550_v58 = vshll.u32 %v5687_v35, 16  ;;  %v2385_v23 = vunpack.c.l.b16 %v2341_v61  ;;  %v4807_v35 = vld [vmem:[%s6181_s1 + $0x358] sm:$0xff] }
  0xcb   : > { %v596_v38 = vadd.f32 %v595_v15, %v483_v30  ;;  %v2635_v30 = vunpack.c.l.b16 %v2545_v7  ;;  %v2117_v15 = vor.u32 %v2116_v1, %v2113_v9  ;;  %v2138_v7 = vshll.u32 %v4261_v51, 16  ;;  %3121 = vmatpush.bf16.msrb.mxu1 %v4807_v35 }
  0xcc   : > { %v5689_v44 = vadd.f32 %v1016_v10, %v785_v31  ;;  %2011 = vmatmul.bf16.vlgmr.msra.gmra.mxu0 %v4754_v25  ;;  %v2552_v2 = vrot.slane %v2550_v58, 6  ;;  %v2561_v10 = vshrl.u32 %v4375_v11, 16  ;;  %v2564_v25 = vshll.u32 %v4375_v11, 16  ;;  %v5755_v58 = vld [vmem:[%s4964_s22 + $0x40] sm:$0xf] }
  0xcd   : > { %2275 = vmatmul.bf16.vlgmr.msra.gmra.mxu1 %v2209_v26  ;;  %v4815_v26 = vld [vmem:[%s6181_s1 + $0x398] sm:$0xff]  ;;  %v2634_v31 = vunpack.c.l.b16 %v2535_v5  ;;  %v2394_v40 = vpack.c.b16 %v2386_v29, %v2385_v23  ;;  %v2118_v49 = vrot.slane %v2117_v15, 4  ;;  %v2135_v5 = vshrl.u32 %v4261_v51, 16 }
  0xce   : > { %2459 = vmatmul.bf16.vlgmr.msra.gmra.mxu2 %v2393_v33  ;;  %v2127_v33 = vor.u32 %v2126_v16, %v5727_v13  ;;  %v2553_v37 = vor.u32 %v2552_v2, %v2549_v17  ;;  %v2563_v39 = vrot.slane %v2561_v10, 5  ;;  %v2566_v45 = vrot.slane %v2564_v25, 6  ;;  %v5766_v11 = vld [vmem:[%s4964_s22 + $0x3c] sm:$0xe] }
  0xcf   : > { %2708 = vmatmul.bf16.vlgmr.msra.gmra.mxu3 %v2642_v34  ;;  %v2347_v34 = vrot.slane %v5684_v43, 5  ;;  %3305 = vmatpush.bf16.msrb.mxu2 %v4815_v26  ;;  %v2643_v43 = vpack.c.b16 %v2635_v30, %v2634_v31  ;;  %v2144_v9 = vshll.u32 %v5755_v58, 16  ;;  %v2148_v1 = vshrl.u32 %v5755_v58, 16  ;;  %v5790_v30 = vld [vmem:[%s4964_s22 + $0x44] sm:$0x1] }
  0xd0   : > { %v2128_v54 = vrot.slane %v2127_v33, 4  ;;  %v2554_v61 = vrot.slane %v2553_v37, 4  ;;  %v2137_v2 = vrot.slane %v2135_v5, 4  ;;  %v2570_v25 = vshrl.u32 %v5766_v11, 16  ;;  %v4376_v37 = vld [vmem:[%s4964_s22 + $0x44] sm:$0x3] }
  0xd1   : > { %v767_v3 = vpop.f32.mrf.mxu2  ;;  %v485_v12 = vpop.f32.mrf.mxu0  ;;  %v2349_v56 = vrot.slane %v2347_v34, 4  ;;  %v2348_v16 = vsel %vm5030_vm7, %v4322_v50, %v2347_v34  ;;  %v5785_v23 = vrot.slane %v2144_v9, 5  ;;  %v2150_v10 = vrot.slane %v2148_v1, 4  ;;  %v4806_v50 = vld [vmem:[%s6181_s1 + $0x350] sm:$0xff] }
  0xd2   : > { %v1019_v4 = vpop.f32.mrf.mxu3  ;;  %v786_v8 = vadd.f32 %v767_v3, %v596_v38  ;;  %v597_v6 = vpop.f32.mrf.mxu1  ;;  %v5746_v38 = vor.u32 %v2556_v21, %v2555_v20  ;;  %v2573_v26 = vshll.u32 %v5766_v11, 16  ;;  %v2387_v34 = vunpack.c.l.b16 %v2348_v16  ;;  %3122 = vmatpush.bf16.msrb.mxu1 %v4806_v50 }
  0xd3   : > { %v598_v18 = vadd.f32 %v597_v6, %v485_v12  ;;  %v2123_v12 = vsel %vm5013_vm6, %v2118_v49, %v5727_v13  ;;  %v2133_v6 = vsel %vm5013_vm6, %v2128_v54, %v2132_v60  ;;  %v2351_v17 = vsel %vm5030_vm7, %v2349_v56, %v2350_v57 }
  0xd4   : > { %v5732_v22 = vadd.f32 %v1019_v4, %v786_v8  ;;  %v2559_v63 = vrot.slane %v5746_v38, 4  ;;  %v2567_v4 = vor.u32 %v2566_v45, %v2563_v39  ;;  %v4814_v8 = vld [vmem:[%s6181_s1 + $0x390] sm:$0xff]  ;;  %v2140_v13 = vrot.slane %v2138_v7, 5 }
  0xd5   : > { %3306 = vmatpush.bf16.msrb.mxu2 %v4814_v8  ;;  %v2203_v31 = vunpack.c.l.b16 %v2123_v12  ;;  %v2204_v33 = vunpack.c.l.b16 %v2133_v6  ;;  %v2388_v36 = vunpack.c.l.b16 %v2351_v17  ;;  %v2575_v49 = vrot.slane %v2573_v26, 6  ;;  %v4264_v17 = vld [vmem:[%s4964_s22 + $0x48] sm:$0xf] }
  0xd6   : > { %v2568_v14 = vsel %vm5043_vm8, %v2559_v63, %v2567_v4  ;;  %v2141_v45 = vor.u32 %v2140_v13, %v2137_v2  ;;  %v2578_v51 = vrot.slane %v2148_v1, 5  ;;  %v2354_v54 = vrot.slane %v5755_v58, 5  ;;  %v4756_v4 = vld [vmem:[%s4964_s22 + $0x30] sm:$0xff]  ;;  %v5812_v13 = vld [vmem:[%s4964_s22 + $0x4c] sm:$0xf] }
  0xd7   : > { %v2637_v39 = vunpack.c.l.b16 %v2568_v14  ;;  %v2211_v56 = vpack.c.b16 %v2204_v33, %v2203_v31  ;;  %v2395_v57 = vpack.c.b16 %v2388_v36, %v2387_v34  ;;  %v4323_v7 = vrot.slane %v5766_v11, 9  ;;  %v4805_v34 = vld [vmem:[%s6181_s1 + $0x348] sm:$0xff] }
  0xd8   : > { %v2142_v60 = vrot.slane %v2141_v45, 4  ;;  %v2356_v14 = vrot.slane %v2354_v54, 4  ;;  %v2357_v2 = vrot.slane %v5790_v30, 5  ;;  %v2168_v33 = vshll.u32 %v5812_v13, 16  ;;  %3123 = vmatpush.bf16.msrb.mxu1 %v4805_v34 }
  0xd9   : > { %v769_v46 = vpop.f32.mrf.mxu2  ;;  %v488_v41 = vpop.f32.mrf.mxu0 }
  0xda   : > { %v1021_v48 = vpop.f32.mrf.mxu3  ;;  %v787_v52 = vadd.f32 %v769_v46, %v598_v18  ;;  %v600_v53 = vpop.f32.mrf.mxu1  ;;  %v2558_v18 = vsel %vm5043_vm8, %v2554_v61, %v5746_v38  ;;  %v4798_v46 = vld [vmem:[%s6181_s1 + $0x310] sm:$0xff]  ;;  %v2147_v11 = vsel %vm5013_vm6, %v2142_v60, %v5785_v23  ;;  %v2358_v36 = vsel %vm5030_vm7, %v2356_v14, %v2357_v2  ;;  %v4804_v2 = vld [vmem:[%s6181_s1 + $0x340] sm:$0xff] }
  0xdb   : > { %v601_v59 = vadd.f32 %v600_v53, %v488_v41  ;;  %v2584_v41 = vshrl.u32 %v4376_v37, 16  ;;  %v2587_v53 = vshll.u32 %v4376_v37, 16  ;;  %2858 = vmatpush.bf16.msrb.mxu0 %v4798_v46  ;;  %v2172_v37 = vshrl.u32 %v5812_v13, 16  ;;  %v5856_v60 = vld [vmem:[%s4964_s22 + $0x50] sm:$0x1] }
  0xdc   : > { %v5758_v3 = vadd.f32 %v1021_v48, %v787_v52  ;;  %2016 = vmatmul.bf16.gmra.mxu0 %v4755_v32  ;;  %v4822_v48 = vld [vmem:[%s6181_s1 + $0x3d0] sm:$0xff]  ;;  %v2151_v32 = vor.u32 %v2150_v10, %v5785_v23  ;;  %v2579_v52 = vrot.slane %v2144_v9, 6  ;;  %v5823_v10 = vld [vmem:[%s4964_s22 + $0x48] sm:$0xe]  ;;  %v5844_v45 = vunpack.c.l.b16 %v2147_v11  ;;  %3124 = vmatpush.bf16.msrb.mxu1 %v4804_v2  ;;  %v5910_v2 = vld [vmem:[%s4964_s22 + $0x2c] sm:$0x1] }
  0xdd   : > { %2280 = vmatmul.bf16.gmra.mxu1 %v2210_v19  ;;  %v2636_v19 = vunpack.c.l.b16 %v2558_v18  ;;  %3555 = vmatpush.bf16.msrb.mxu3 %v4822_v48  ;;  %v2586_v6 = vrot.slane %v2584_v41, 5  ;;  %v2589_v16 = vrot.slane %v2587_v53, 6  ;;  %v4821_v23 = vld [vmem:[%s6181_s1 + $0x3c8] sm:$0xff]  ;;  %v2390_v53 = vunpack.c.l.b16 %v2358_v36 }
  0xde   : > { %2464 = vmatmul.bf16.gmra.mxu2 %v2394_v40  ;;  %v2154_v40 = vshll.u32 %v5790_v30, 16  ;;  %v2152_v35 = vrot.slane %v2151_v32, 4  ;;  %v2580_v58 = vor.u32 %v2579_v52, %v2578_v51  ;;  %v2361_v14 = vrot.slane %v5812_v13, 5 }
  0xdf   : > { %2713 = vmatmul.bf16.gmra.mxu3 %v2643_v43  ;;  %v2572_v43 = vrot.slane %v2570_v25, 5  ;;  %v2355_v25 = vsel %vm5030_vm7, %v4323_v7, %v2354_v54  ;;  %v2601_v7 = vrot.slane %v2172_v37, 5 }
  0xe0   : > { %v2156_v5 = vrot.slane %v2154_v40, 5  ;;  %v2582_v30 = vrot.slane %v2580_v58, 4  ;;  %v2389_v46 = vunpack.c.l.b16 %v2355_v25 }
  0xe1   : > { %v772_v20 = vpop.f32.mrf.mxu2  ;;  %v490_v28 = vpop.f32.mrf.mxu0  ;;  %v2576_v9 = vor.u32 %v2575_v49, %v2572_v43  ;;  %3556 = vmatpush.bf16.msrb.mxu3 %v4821_v23 }
  0xe2   : > { %v1024_v21 = vpop.f32.mrf.mxu3  ;;  %v788_v27 = vadd.f32 %v772_v20, %v601_v59  ;;  %v602_v29 = vpop.f32.mrf.mxu1  ;;  %v2644_v59 = vpack.c.b16 %v2637_v39, %v2636_v19  ;;  %v2157_v31 = vsel %vm5013_vm6, %v2152_v35, %v2156_v5  ;;  %v2593_v19 = vshrl.u32 %v5823_v10, 16 }
  0xe3   : > { %v603_v15 = vadd.f32 %v602_v29, %v490_v28  ;;  %v2577_v26 = vrot.slane %v2576_v9, 4  ;;  %v2159_v28 = vshrl.u32 %v4264_v17, 16  ;;  %v2162_v29 = vshll.u32 %v4264_v17, 16  ;;  %v4820_v17 = vld [vmem:[%s6181_s1 + $0x3c0] sm:$0xff] }
  0xe4   : > { %v5793_v38 = vadd.f32 %v1024_v21, %v788_v27  ;;  %v4813_v21 = vld [vmem:[%s6181_s1 + $0x388] sm:$0xff]  ;;  %v2596_v39 = vshll.u32 %v5823_v10, 16  ;;  %v5846_v40 = vunpack.c.l.b16 %v2157_v31  ;;  %v2602_v9 = vrot.slane %v2168_v33, 6 }
  0xe5   : > { %v4797_v27 = vld [vmem:[%s6181_s1 + $0x308] sm:$0xff]  ;;  %3307 = vmatpush.bf16.msrb.mxu2 %v4813_v21  ;;  %v2581_v43 = vsel %vm5043_vm8, %v2577_v26, %v2580_v58  ;;  %v2161_v49 = vrot.slane %v2159_v28, 4  ;;  %v2164_v50 = vrot.slane %v2162_v29, 5  ;;  %v2396_v26 = vpack.c.b16 %v2390_v53, %v2389_v46  ;;  %3557 = vmatpush.bf16.msrb.mxu3 %v4820_v17  ;;  %v4757_v28 = vld [vmem:[%s4964_s22 + $0x3c] sm:$0xff] }
  0xe6   : > { %2859 = vmatpush.bf16.msrb.mxu0 %v4797_v27  ;;  %v2638_v5 = vunpack.c.l.b16 %v2581_v43  ;;  %v2212_v25 = vpack.c.b16 %v5846_v40, %v5844_v45  ;;  %v2603_v27 = vor.u32 %v2602_v9, %v2601_v7  ;;  %v2363_v45 = vrot.slane %v2361_v14, 4  ;;  %v5881_v46 = vld [vmem:[%s4964_s22 + $0x28] sm:$0xf] }
  0xe7   : > { %v2364_v40 = vrot.slane %v5856_v60, 5 }
  0xe9   : > { %v774_v61 = vpop.f32.mrf.mxu2  ;;  %v493_v8 = vpop.f32.mrf.mxu0 }
  0xea   : > { %v1026_v63 = vpop.f32.mrf.mxu3  ;;  %v789_v1 = vadd.f32 %v774_v61, %v603_v15  ;;  %v605_v12 = vpop.f32.mrf.mxu1  ;;  %v2590_v15 = vor.u32 %v2589_v16, %v2586_v6  ;;  %v2174_v61 = vrot.slane %v2172_v37, 4  ;;  %v4812_v6 = vld [vmem:[%s6181_s1 + $0x380] sm:$0xff] }
  0xeb   : > { %v606_v18 = vadd.f32 %v605_v12, %v493_v8  ;;  %v2165_v8 = vor.u32 %v2164_v50, %v2161_v49  ;;  %v4796_v16 = vld [vmem:[%s6181_s1 + $0x300] sm:$0xff]  ;;  %3308 = vmatpush.bf16.msrb.mxu2 %v4812_v6  ;;  %v2605_v50 = vrot.slane %v2603_v27, 4 }
  0xec   : > { %v5814_v20 = vadd.f32 %v1026_v63, %v789_v1  ;;  %2021 = vmatmul.bf16.gmra.mxu0 %v4756_v4  ;;  %v2591_v54 = vsel %vm5043_vm8, %v2582_v30, %v2590_v15  ;;  %v2595_v63 = vrot.slane %v2593_v19, 5  ;;  %v2598_v4 = vrot.slane %v2596_v39, 6 }
  0xed   : > { %2285 = vmatmul.bf16.gmra.mxu1 %v2211_v56  ;;  %v5852_v56 = vrot.slane %v2168_v33, 5  ;;  %v2639_v1 = vunpack.c.l.b16 %v2591_v54  ;;  %2860 = vmatpush.bf16.msrb.mxu0 %v4796_v16  ;;  %v2166_v31 = vrot.slane %v2165_v8, 4  ;;  %v4504_v33 = vld [vmem:[%s4964_s22 + $0x24] sm:$0xf]  ;;  %v4324_v39 = vrot.slane %v5823_v10, 9 }
  0xee   : > { %2469 = vmatmul.bf16.gmra.mxu2 %v2395_v57  ;;  %v4377_v57 = vld [vmem:[%s4964_s22 + $0x50] sm:$0x3]  ;;  %v2599_v21 = vor.u32 %v2598_v4, %v2595_v63  ;;  %v2922_v10 = vshll.u32 %v5881_v46, 16  ;;  %v2926_v54 = vshrl.u32 %v5881_v46, 16 }
  0xef   : > { %2718 = vmatmul.bf16.gmra.mxu3 %v2644_v59  ;;  %v2607_v12 = vshrl.u32 %v4377_v57, 16  ;;  %v2610_v58 = vshll.u32 %v4377_v57, 16  ;;  %v2175_v11 = vor.u32 %v2174_v61, %v5852_v56  ;;  %v2645_v29 = vpack.c.b16 %v2639_v1, %v2638_v5  ;;  %v5890_v57 = vld [vmem:[%s4964_s22 + $0x24] sm:$0xe] }
  0xf0   : > { %v2600_v43 = vrot.slane %v2599_v21, 4  ;;  %v2365_v61 = vsel %vm5030_vm7, %v2363_v45, %v2364_v40  ;;  %v3351_v7 = vshrl.u32 %v5890_v57, 16  ;;  %v5906_v8 = vrot.slane %v2922_v10, 5 }
  0xf1   : > { %v777_v48 = vpop.f32.mrf.mxu2  ;;  %v495_v52 = vpop.f32.mrf.mxu0  ;;  %v2609_v30 = vrot.slane %v2607_v12, 5  ;;  %v2612_v15 = vrot.slane %v2610_v58, 6  ;;  %v2928_v12 = vrot.slane %v2926_v54, 4  ;;  %v3354_v58 = vshll.u32 %v5890_v57, 16 }
  0xf2   : > { %v1029_v32 = vpop.f32.mrf.mxu3  ;;  %v790_v51 = vadd.f32 %v777_v48, %v606_v18  ;;  %v607_v41 = vpop.f32.mrf.mxu1  ;;  %v2178_v18 = vshll.u32 %v5856_v60, 16  ;;  %v2362_v60 = vsel %vm5030_vm7, %v4324_v39, %v2361_v14  ;;  %v2604_v63 = vsel %vm5043_vm8, %v2600_v43, %v2603_v27  ;;  %v4625_v27 = vld [vmem:[%s4964_s22 + $0x2c] sm:$0x3] }
  0xf3   : > { %v608_v59 = vadd.f32 %v607_v41, %v495_v52  ;;  %v2916_v52 = vshll.u32 %v4504_v33, 16  ;;  %v2613_v53 = vor.u32 %v2612_v15, %v2609_v30  ;;  %v2391_v21 = vunpack.c.l.b16 %v2362_v60 }
  0xf4   : > { %v5858_v35 = vadd.f32 %v1029_v32, %v790_v51  ;;  %v2180_v19 = vrot.slane %v2178_v18, 5  ;;  %v2176_v32 = vrot.slane %v2175_v11, 4  ;;  %v2913_v51 = vshrl.u32 %v4504_v33, 16 }
  0xf5   : > { %v2918_v5 = vrot.slane %v2916_v52, 5  ;;  %v2614_v1 = vsel %vm5043_vm8, %v2605_v50, %v2613_v53  ;;  %v2929_v30 = vor.u32 %v2928_v12, %v5906_v8  ;;  %v2932_v15 = vshll.u32 %v5910_v2, 16  ;;  %v4758_v50 = vld [vmem:[%s4964_s22 + $0x48] sm:$0xff] }
  0xf6   : > { %v2915_v4 = vrot.slane %v2913_v51, 4  ;;  %v3356_v33 = vrot.slane %v3354_v58, 6 }
  0xf7   : > { %v2930_v51 = vrot.slane %v2929_v30, 4  ;;  %v2934_v52 = vrot.slane %v2932_v15, 5 }
  0xf9   : > { %v779_v23 = vpop.f32.mrf.mxu2  ;;  %v1162_v36 = vpop.f32.mrf.mxu0 }
  0xfa   : > { %v1031_v13 = vpop.f32.mrf.mxu3  ;;  %v791_v34 = vadd.f32 %v779_v23, %v608_v59  ;;  %v1426_v37 = vpop.f32.mrf.mxu1  ;;  %v1187_v48 = vadd.f32 %v1162_v36, %v5601_v47  ;;  %v2171_v47 = vsel %vm5013_vm6, %v2166_v31, %v5852_v56  ;;  %v2181_v59 = vsel %vm5013_vm6, %v2176_v32, %v2180_v19 }
  0xfb   : > { %v2207_v18 = vunpack.c.l.b16 %v2171_v47  ;;  %v2208_v14 = vunpack.c.l.b16 %v2181_v59  ;;  %v3360_v36 = vrot.slane %v2922_v10, 6  ;;  %v3183_v32 = vrot.slane %v5881_v46, 5 }
  0xfc   : > { %v5885_v49 = vadd.f32 %v1031_v13, %v791_v34  ;;  %v1451_v41 = vadd.f32 %v1426_v37, %v1187_v48  ;;  %2026 = vmatmul.bf16.gmra.mxu0 %v4757_v28  ;;  %v2641_v13 = vunpack.c.l.b16 %v2614_v1  ;;  %v2919_v28 = vor.u32 %v2918_v5, %v2915_v4  ;;  %v4507_v4 = vld [vmem:[%s4964_s22 + $0x30] sm:$0xf] }
  0xfd   : > { %2290 = vmatmul.bf16.gmra.mxu1 %v2212_v25  ;;  %v2392_v25 = vunpack.c.l.b16 %v2365_v61  ;;  %v3359_v34 = vrot.slane %v2926_v54, 5  ;;  %v3365_v37 = vshrl.u32 %v4625_v27, 16  ;;  %v2213_v19 = vpack.c.b16 %v2208_v14, %v2207_v18 }
  0xfe   : > { %2474 = vmatmul.bf16.gmra.mxu2 %v2396_v26  ;;  %v2640_v26 = vunpack.c.l.b16 %v2604_v63  ;;  %v2920_v48 = vrot.slane %v2919_v28, 4 }
  0xff   : > { %2723 = vmatmul.bf16.gmra.mxu3 %v2645_v29  ;;  %v3353_v29 = vrot.slane %v3351_v7, 5  ;;  %v2397_v39 = vpack.c.b16 %v2392_v25, %v2391_v21  ;;  %v3361_v59 = vor.u32 %v3360_v36, %v3359_v34  ;;  %v3367_v60 = vrot.slane %v3365_v37, 5  ;;  %v4626_v37 = vld [vmem:[%s4964_s22 + $0x38] sm:$0x3] }
 0x100   : > { %v2646_v45 = vpack.c.b16 %v2641_v13, %v2640_v26  ;;  %v2925_v5 = vsel %vm5013_vm6, %v2920_v48, %v5906_v8  ;;  %v3185_v7 = vrot.slane %v3183_v32, 4 }
 0x101   : > { %v1610_v9 = vpop.f32.mrf.mxu2  ;;  %v1164_v16 = vpop.f32.mrf.mxu0  ;;  %v3357_v53 = vor.u32 %v3356_v33, %v3353_v29  ;;  %v3363_v8 = vrot.slane %v3361_v59, 4 }
 0x102   : > { %v1859_v56 = vpop.f32.mrf.mxu3  ;;  %v1635_v6 = vadd.f32 %v1610_v9, %v1451_v41  ;;  %v1428_v17 = vpop.f32.mrf.mxu1  ;;  %v1188_v11 = vadd.f32 %v1164_v16, %v5619_v24  ;;  %v3368_v24 = vshll.u32 %v4625_v27, 16  ;;  %v4572_v41 = vrot.slane %v5890_v57, 9  ;;  %v5930_v57 = vld [vmem:[%s4964_s22 + $0x34] sm:$0xf] }
 0x103   : > { %v3186_v9 = vrot.slane %v5910_v2, 5  ;;  %v3358_v58 = vrot.slane %v3357_v53, 4  ;;  %v2937_v16 = vshrl.u32 %v4507_v4, 16  ;;  %v2946_v18 = vshll.u32 %v5930_v57, 16 }
 0x104   : > { %v5914_v23 = vadd.f32 %v1859_v56, %v1635_v6  ;;  %v1452_v31 = vadd.f32 %v1428_v17, %v1188_v11  ;;  %v3370_v61 = vrot.slane %v3368_v24, 6  ;;  %v5933_v56 = vld [vmem:[%s4964_s22 + $0x30] sm:$0xe]  ;;  %v3184_v12 = vsel %vm5030_vm7, %v4572_v41, %v3183_v32 }
 0x105   : > { %v2940_v17 = vshll.u32 %v4507_v4, 16  ;;  %v2950_v14 = vshrl.u32 %v5930_v57, 16  ;;  %v3374_v2 = vshrl.u32 %v5933_v56, 16  ;;  %v3049_v11 = vunpack.c.l.b16 %v2925_v5 }
 0x106   : > { %v3371_v6 = vor.u32 %v3370_v61, %v3367_v60  ;;  %v3377_v21 = vshll.u32 %v5933_v56, 16  ;;  %v3187_v13 = vsel %vm5030_vm7, %v3185_v7, %v3186_v9  ;;  %v3233_v28 = vunpack.c.l.b16 %v3184_v12  ;;  %v4791_v7 = vld [vmem:[%s4964_s22 + $0x24] sm:$0xff] }
 0x107   : > { %v3362_v29 = vsel %vm5043_vm8, %v3358_v58, %v3361_v59  ;;  %v2939_v34 = vrot.slane %v2937_v16, 4  ;;  %v2942_v36 = vrot.slane %v2940_v17, 5  ;;  %v3376_v48 = vrot.slane %v3374_v2, 5 }
 0x108   : > { %v3372_v33 = vsel %vm5043_vm8, %v3363_v8, %v3371_v6  ;;  %v3388_v41 = vshrl.u32 %v4626_v37, 16  ;;  %v3391_v53 = vshll.u32 %v4626_v37, 16  ;;  %v3190_v60 = vrot.slane %v5930_v57, 5 }
 0x109   : > { %v1612_v40 = vpop.f32.mrf.mxu2  ;;  %v1167_v54 = vpop.f32.mrf.mxu0 }
 0x10a   : > { %v1861_v43 = vpop.f32.mrf.mxu3  ;;  %v1636_v10 = vadd.f32 %v1612_v40, %v1452_v31  ;;  %v1431_v47 = vpop.f32.mrf.mxu1  ;;  %v1189_v63 = vadd.f32 %v1167_v54, %v5661_v62  ;;  %v2935_v62 = vsel %vm5013_vm6, %v2930_v51, %v2934_v52  ;;  %v3379_v40 = vrot.slane %v3377_v21, 6 }
 0x10b   : > { %v3050_v27 = vunpack.c.l.b16 %v2935_v62  ;;  %v3234_v52 = vunpack.c.l.b16 %v3187_v13  ;;  %v3483_v54 = vunpack.c.l.b16 %v3372_v33  ;;  %v3390_v62 = vrot.slane %v3388_v41, 5  ;;  %v5970_v33 = vld [vmem:[%s4964_s22 + $0x3c] sm:$0xe] }
 0x10c   : > { %v5923_v46 = vadd.f32 %v1861_v43, %v1636_v10  ;;  %v1453_v1 = vadd.f32 %v1431_v47, %v1189_v63  ;;  %2031 = vmatmul.bf16.gmra.mxu0 %v4758_v50  ;;  %v3382_v43 = vrot.slane %v2950_v14, 5  ;;  %v3383_v50 = vrot.slane %v2946_v18, 6 }
 0x10d   : > { %2295 = vmatmul.bf16.gmra.mxu1 %v2213_v19  ;;  %v4509_v19 = vld [vmem:[%s4964_s22 + $0x38] sm:$0x1]  ;;  %v3482_v10 = vunpack.c.l.b16 %v3362_v29  ;;  %v2943_v47 = vor.u32 %v2942_v36, %v2939_v34  ;;  %v3380_v61 = vor.u32 %v3379_v40, %v3376_v48  ;;  %v3059_v9 = vpack.c.b16 %v3050_v27, %v3049_v11 }
 0x10e   : > { %2479 = vmatmul.bf16.gmra.mxu2 %v2397_v39  ;;  %v5952_v39 = vrot.slane %v2946_v18, 5  ;;  %v2956_v59 = vshll.u32 %v4509_v19, 16  ;;  %v3384_v63 = vor.u32 %v3383_v50, %v3382_v43  ;;  %v3393_v12 = vrot.slane %v3391_v53, 6 }
 0x10f   : > { %2728 = vmatmul.bf16.gmra.mxu3 %v2646_v45  ;;  %v2952_v45 = vrot.slane %v2950_v14, 4  ;;  %v3492_v16 = vpack.c.b16 %v3483_v54, %v3482_v10  ;;  %v2944_v17 = vrot.slane %v2943_v47, 4  ;;  %v4510_v14 = vld [vmem:[%s4964_s22 + $0x3c] sm:$0xf]  ;;  %v4573_v21 = vrot.slane %v5933_v56, 9 }
 0x110   : > { %v2958_v18 = vrot.slane %v2956_v59, 5  ;;  %v3193_v27 = vrot.slane %v4509_v19, 5  ;;  %v3381_v13 = vrot.slane %v3380_v61, 4  ;;  %v3397_v50 = vshrl.u32 %v5970_v33, 16 }
 0x111   : > { %v1615_v25 = vpop.f32.mrf.mxu2  ;;  %v1169_v30 = vpop.f32.mrf.mxu0  ;;  %v2949_v34 = vsel %vm5013_vm6, %v2944_v17, %v5952_v39  ;;  %v3191_v37 = vsel %vm5030_vm7, %v4573_v21, %v3190_v60  ;;  %v3400_v54 = vshll.u32 %v5970_v33, 16 }
 0x112   : > { %v1864_v26 = vpop.f32.mrf.mxu3  ;;  %v1637_v31 = vadd.f32 %v1615_v25, %v1453_v1  ;;  %v1433_v15 = vpop.f32.mrf.mxu1  ;;  %v1190_v24 = vadd.f32 %v1169_v30, %v5689_v44  ;;  %v2953_v44 = vor.u32 %v2952_v45, %v5952_v39  ;;  %v3243_v1 = vpack.c.b16 %v3234_v52, %v3233_v28 }
 0x113   : > { %v3192_v25 = vrot.slane %v3190_v60, 4  ;;  %v3386_v28 = vrot.slane %v3384_v63, 4  ;;  %v2961_v30 = vshrl.u32 %v4510_v14, 16  ;;  %v3385_v19 = vsel %vm5043_vm8, %v3381_v13, %v3384_v63 }
 0x114   : > { %v5954_v32 = vadd.f32 %v1864_v26, %v1637_v31  ;;  %v1454_v51 = vadd.f32 %v1433_v15, %v1190_v24  ;;  %v2954_v2 = vrot.slane %v2953_v44, 4  ;;  %v5963_v26 = vld [vmem:[%s4964_s22 + $0x40] sm:$0xf]  ;;  %v3394_v31 = vor.u32 %v3393_v12, %v3390_v62  ;;  %v5991_v44 = vld [vmem:[%s4964_s22 + $0x44] sm:$0x1] }
 0x115   : > { %v2964_v15 = vshll.u32 %v4510_v14, 16  ;;  %v2974_v56 = vshrl.u32 %v5963_v26, 16  ;;  %v3194_v24 = vsel %vm5030_vm7, %v3192_v25, %v3193_v27  ;;  %v2963_v43 = vrot.slane %v2961_v30, 4  ;;  %v4792_v25 = vld [vmem:[%s4964_s22 + $0x30] sm:$0xff] }
 0x116   : > { %v2959_v36 = vsel %vm5013_vm6, %v2954_v2, %v2958_v18  ;;  %v3395_v40 = vsel %vm5043_vm8, %v3386_v28, %v3394_v31  ;;  %v3051_v59 = vunpack.c.l.b16 %v2949_v34  ;;  %v3235_v63 = vunpack.c.l.b16 %v3191_v37 }
 0x117   : > { %v2966_v39 = vrot.slane %v2964_v15, 5  ;;  %v2976_v10 = vrot.slane %v2974_v56, 4  ;;  %v3052_v61 = vunpack.c.l.b16 %v2959_v36 }
 0x119   : > { %v1617_v4 = vpop.f32.mrf.mxu2  ;;  %v1172_v8 = vpop.f32.mrf.mxu0  ;;  %v2967_v62 = vor.u32 %v2966_v39, %v2963_v43  ;;  %v3060_v14 = vpack.c.b16 %v3052_v61, %v3051_v59 }
 0x11a   : > { %v1866_v5 = vpop.f32.mrf.mxu3  ;;  %v1638_v58 = vadd.f32 %v1617_v4, %v1454_v51  ;;  %v1436_v6 = vpop.f32.mrf.mxu1  ;;  %v1191_v57 = vadd.f32 %v1172_v8, %v5732_v22  ;;  %v2970_v22 = vshll.u32 %v5963_v26, 16  ;;  %v3236_v4 = vunpack.c.l.b16 %v3194_v24 }
 0x11b   : > { %v3399_v8 = vrot.slane %v3397_v50, 5  ;;  %v2968_v28 = vrot.slane %v2967_v62, 4  ;;  %v6015_v50 = vld [vmem:[%s4964_s22 + $0x48] sm:$0xe] }
 0x11c   : > { %v5965_v11 = vadd.f32 %v1866_v5, %v1638_v58  ;;  %v1455_v29 = vadd.f32 %v1436_v6, %v1191_v57  ;;  %2861 = vmatmul.bf16.vlgmr.msrb.gmra.mxu0 %v4791_v7  ;;  %v5986_v53 = vrot.slane %v2970_v22, 5  ;;  %v4627_v5 = vld [vmem:[%s4964_s22 + $0x44] sm:$0x3]  ;;  %v2980_v58 = vshll.u32 %v5991_v44, 16 }
 0x11d   : > { %3125 = vmatmul.bf16.vlgmr.msrb.gmra.mxu1 %v3059_v9  ;;  %v3484_v9 = vunpack.c.l.b16 %v3385_v19  ;;  %v3405_v6 = vrot.slane %v2974_v56, 5  ;;  %v3411_v17 = vshrl.u32 %v4627_v5, 16  ;;  %v3414_v18 = vshll.u32 %v4627_v5, 16  ;;  %v4513_v19 = vld [vmem:[%s4964_s22 + $0x48] sm:$0xf] }
 0x11e   : > { %3309 = vmatmul.bf16.vlgmr.msrb.gmra.mxu2 %v3243_v1  ;;  %v3485_v1 = vunpack.c.l.b16 %v3395_v40  ;;  %v2977_v12 = vor.u32 %v2976_v10, %v5986_v53  ;;  %v3197_v57 = vrot.slane %v5963_v26, 5  ;;  %v3244_v27 = vpack.c.b16 %v3236_v4, %v3235_v63  ;;  %v6006_v40 = vld [vmem:[%s4964_s22 + $0x4c] sm:$0xf] }
 0x11f   : > { %3558 = vmatmul.bf16.vlgmr.msrb.gmra.mxu3 %v3492_v16  ;;  %v3406_v16 = vrot.slane %v2970_v22, 6  ;;  %v2982_v22 = vrot.slane %v2980_v58, 5  ;;  %v3413_v37 = vrot.slane %v3411_v17, 5  ;;  %v3416_v24 = vrot.slane %v3414_v18, 6 }
 0x120   : > { %v3493_v13 = vpack.c.b16 %v3485_v1, %v3484_v9  ;;  %v2978_v56 = vrot.slane %v2977_v12, 4  ;;  %v2988_v10 = vshll.u32 %v4513_v19, 16  ;;  %v2994_v59 = vshll.u32 %v6006_v40, 16 }
 0x121   : > { %v1620_v45 = vpop.f32.mrf.mxu2  ;;  %v1174_v52 = vpop.f32.mrf.mxu0  ;;  %v3407_v26 = vor.u32 %v3406_v16, %v3405_v6  ;;  %v3420_v61 = vshrl.u32 %v6015_v50, 16  ;;  %v4628_v16 = vld [vmem:[%s4964_s22 + $0x50] sm:$0x3] }
 0x122   : > { %v1869_v48 = vpop.f32.mrf.mxu3  ;;  %v1639_v51 = vadd.f32 %v1620_v45, %v1455_v29  ;;  %v1438_v41 = vpop.f32.mrf.mxu1  ;;  %v1192_v47 = vadd.f32 %v1174_v52, %v5758_v3  ;;  %v3402_v3 = vrot.slane %v3400_v54, 6  ;;  %v4574_v29 = vrot.slane %v5970_v33, 9 }
 0x123   : > { %v2973_v33 = vsel %vm5013_vm6, %v2968_v28, %v5986_v53  ;;  %v3409_v54 = vrot.slane %v3407_v26, 4  ;;  %v2998_v53 = vshrl.u32 %v6006_v40, 16  ;;  %v2990_v6 = vrot.slane %v2988_v10, 5 }
 0x124   : > { %v5993_v60 = vadd.f32 %v1869_v48, %v1639_v51  ;;  %v1456_v7 = vadd.f32 %v1438_v41, %v1192_v47  ;;  %v3403_v34 = vor.u32 %v3402_v3, %v3399_v8  ;;  %v3199_v48 = vrot.slane %v3197_v57, 4 }
 0x125   : > { %v3198_v39 = vsel %vm5030_vm7, %v4574_v29, %v3197_v57  ;;  %v2983_v51 = vsel %vm5013_vm6, %v2978_v56, %v2982_v22  ;;  %v2985_v41 = vshrl.u32 %v4513_v19, 16  ;;  %v3417_v47 = vor.u32 %v3416_v24, %v3413_v37 }
 0x126   : > { %v3404_v52 = vrot.slane %v3403_v34, 4  ;;  %v3053_v5 = vunpack.c.l.b16 %v2973_v33  ;;  %v3237_v1 = vunpack.c.l.b16 %v3198_v39  ;;  %v3000_v57 = vrot.slane %v2998_v53, 4 }
 0x127   : > { %v2987_v3 = vrot.slane %v2985_v41, 4  ;;  %v3418_v18 = vsel %vm5043_vm8, %v3409_v54, %v3417_v47  ;;  %v3429_v29 = vrot.slane %v2994_v59, 6 }
 0x128   : > { %v3408_v8 = vsel %vm5043_vm8, %v3404_v52, %v3407_v26 }
 0x129   : > { %v1622_v2 = vpop.f32.mrf.mxu2  ;;  %v1177_v30 = vpop.f32.mrf.mxu0  ;;  %v3486_v56 = vunpack.c.l.b16 %v3408_v8  ;;  %v2991_v22 = vor.u32 %v2990_v6, %v2987_v3 }
 0x12a   : > { %v1871_v21 = vpop.f32.mrf.mxu3  ;;  %v1640_v31 = vadd.f32 %v1622_v2, %v1456_v7  ;;  %v1441_v15 = vpop.f32.mrf.mxu1  ;;  %v1193_v36 = vadd.f32 %v1177_v30, %v5793_v38  ;;  %v3200_v38 = vrot.slane %v5991_v44, 5  ;;  %v3423_v44 = vshll.u32 %v6015_v50, 16 }
 0x12b   : > { %v3054_v7 = vunpack.c.l.b16 %v2983_v51  ;;  %v3437_v30 = vshll.u32 %v4628_v16, 16  ;;  %v2992_v47 = vrot.slane %v2991_v22, 4 }
 0x12c   : > { %v6003_v45 = vadd.f32 %v1871_v21, %v1640_v31  ;;  %v1457_v43 = vadd.f32 %v1441_v15, %v1193_v36  ;;  %2866 = vmatmul.bf16.gmra.mxu0 %v4792_v25  ;;  %v3201_v9 = vsel %vm5030_vm7, %v3199_v48, %v3200_v38  ;;  %v4515_v21 = vld [vmem:[%s4964_s22 + $0x50] sm:$0x1]  ;;  %v3422_v25 = vrot.slane %v3420_v61, 5  ;;  %v4793_v48 = vld [vmem:[%s4964_s22 + $0x3c] sm:$0xff] }
 0x12d   : > { %3130 = vmatmul.bf16.gmra.mxu1 %v3060_v14  ;;  %v6031_v14 = vrot.slane %v2994_v59, 5  ;;  %v3434_v31 = vshrl.u32 %v4628_v16, 16  ;;  %v3238_v15 = vunpack.c.l.b16 %v3201_v9  ;;  %v3004_v34 = vshll.u32 %v4515_v21, 16 }
 0x12e   : > { %3314 = vmatmul.bf16.gmra.mxu2 %v3244_v27  ;;  %v3425_v27 = vrot.slane %v3423_v44, 6  ;;  %v3204_v36 = vrot.slane %v6006_v40, 5  ;;  %v3439_v38 = vrot.slane %v3437_v30, 6 }
 0x12f   : > { %3563 = vmatmul.bf16.gmra.mxu3 %v3493_v13  ;;  %v3428_v13 = vrot.slane %v2998_v53, 5  ;;  %v3001_v26 = vor.u32 %v3000_v57, %v6031_v14  ;;  %v3436_v39 = vrot.slane %v3434_v31, 5  ;;  %v3245_v10 = vpack.c.b16 %v3238_v15, %v3237_v1 }
 0x130   : > { %v3426_v37 = vor.u32 %v3425_v27, %v3422_v25  ;;  %v3006_v40 = vrot.slane %v3004_v34, 5  ;;  %v4575_v53 = vrot.slane %v6015_v50, 9  ;;  %v3206_v61 = vrot.slane %v3204_v36, 4 }
 0x131   : > { %v1625_v63 = vpop.f32.mrf.mxu2  ;;  %v1179_v12 = vpop.f32.mrf.mxu0  ;;  %v3430_v33 = vor.u32 %v3429_v29, %v3428_v13  ;;  %v3440_v1 = vor.u32 %v3439_v38, %v3436_v39  ;;  %v2997_v50 = vsel %vm5013_vm6, %v2992_v47, %v6031_v14 }
 0x132   : > { %v1874_v4 = vpop.f32.mrf.mxu3  ;;  %v1641_v62 = vadd.f32 %v1625_v63, %v1457_v43  ;;  %v1443_v58 = vpop.f32.mrf.mxu1  ;;  %v1194_v17 = vadd.f32 %v1179_v12, %v5814_v20  ;;  %v3487_v20 = vunpack.c.l.b16 %v3418_v18  ;;  %v3061_v43 = vpack.c.b16 %v3054_v7, %v3053_v5  ;;  %v6051_v12 = vld [vmem:[%s4964_s22 + $0x54] sm:$0xe] }
 0x133   : > { %v3002_v63 = vrot.slane %v3001_v26, 4  ;;  %v3427_v5 = vrot.slane %v3426_v37, 4  ;;  %v3432_v9 = vrot.slane %v3430_v33, 4  ;;  %v3205_v8 = vsel %vm5030_vm7, %v4575_v53, %v3204_v36  ;;  %v4629_v26 = vld [vmem:[%s4964_s22 + $0x5c] sm:$0x3] }
 0x134   : > { %v6033_v2 = vadd.f32 %v1874_v4, %v1641_v62  ;;  %v1458_v28 = vadd.f32 %v1443_v58, %v1194_v17  ;;  %v3494_v54 = vpack.c.b16 %v3487_v20, %v3486_v56  ;;  %v3207_v4 = vrot.slane %v4515_v21, 5  ;;  %v4516_v62 = vld [vmem:[%s4964_s22 + $0x54] sm:$0xf] }
 0x135   : > { %v3007_v58 = vsel %vm5013_vm6, %v3002_v63, %v3006_v40  ;;  %v3431_v6 = vsel %vm5043_vm8, %v3427_v5, %v3430_v33  ;;  %v3441_v18 = vsel %vm5043_vm8, %v3432_v9, %v3440_v1  ;;  %v3009_v14 = vshrl.u32 %v4516_v62, 16  ;;  %v4794_v40 = vld [vmem:[%s4964_s22 + $0x48] sm:$0xff] }
 0x136   : > { %v3208_v3 = vsel %vm5030_vm7, %v3206_v61, %v3207_v4  ;;  %v3012_v57 = vshll.u32 %v4516_v62, 16  ;;  %v3443_v29 = vshrl.u32 %v6051_v12, 16  ;;  %v3446_v31 = vshll.u32 %v6051_v12, 16 }
 0x137   : > { %v3055_v15 = vunpack.c.l.b16 %v2997_v50  ;;  %v3056_v56 = vunpack.c.l.b16 %v3007_v58  ;;  %v3239_v22 = vunpack.c.l.b16 %v3205_v8  ;;  %v3240_v34 = vunpack.c.l.b16 %v3208_v3 }
 0x138   : > { %v3488_v36 = vunpack.c.l.b16 %v3431_v6  ;;  %v3445_v38 = vrot.slane %v3443_v29, 5 }
 0x139   : > { %v1627_v24 = vpop.f32.mrf.mxu2  ;;  %v1182_v52 = vpop.f32.mrf.mxu0  ;;  %v3246_v53 = vpack.c.b16 %v3240_v34, %v3239_v22 }
 0x13a   : > { %v1876_v19 = vpop.f32.mrf.mxu3  ;;  %v1642_v51 = vadd.f32 %v1627_v24, %v1458_v28  ;;  %v1446_v41 = vpop.f32.mrf.mxu1  ;;  %v1195_v59 = vadd.f32 %v1182_v52, %v5858_v35  ;;  %v6045_v35 = vld [vmem:[%s4964_s22 + $0x58] sm:$0xf]  ;;  %v3489_v24 = vunpack.c.l.b16 %v3441_v18 }
 0x13b   : > { %v3018_v21 = vshll.u32 %v6045_v35, 16  ;;  %v3022_v28 = vshrl.u32 %v6045_v35, 16  ;;  %v3211_v62 = vrot.slane %v6045_v35, 5 }
 0x13c   : > { %v6041_v44 = vadd.f32 %v1876_v19, %v1642_v51  ;;  %v1459_v7 = vadd.f32 %v1446_v41, %v1195_v59  ;;  %2871 = vmatmul.bf16.gmra.mxu0 %v4793_v48  ;;  %v3011_v19 = vrot.slane %v3009_v14, 4  ;;  %v3014_v48 = vrot.slane %v3012_v57, 5 }
 0x13d   : > { %3135 = vmatmul.bf16.gmra.mxu1 %v3061_v43  ;;  %v4518_v43 = vld [vmem:[%s4964_s22 + $0x5c] sm:$0x1]  ;;  %v3020_v33 = vrot.slane %v3018_v21, 5  ;;  %v3024_v39 = vrot.slane %v3022_v28, 4  ;;  %v3448_v51 = vrot.slane %v3446_v31, 6  ;;  %v3451_v52 = vrot.slane %v3022_v28, 5 }
 0x13e   : > { %3319 = vmatmul.bf16.gmra.mxu2 %v3245_v10  ;;  %v3457_v41 = vshrl.u32 %v4629_v26, 16  ;;  %v3460_v10 = vshll.u32 %v4629_v26, 16  ;;  %v3495_v61 = vpack.c.b16 %v3489_v24, %v3488_v36  ;;  %v3015_v63 = vor.u32 %v3014_v48, %v3011_v19 }
 0x13f   : > { %3568 = vmatmul.bf16.gmra.mxu3 %v3494_v54  ;;  %v3062_v54 = vpack.c.b16 %v3056_v56, %v3055_v15  ;;  %v3028_v4 = vshll.u32 %v4518_v43, 16  ;;  %v3025_v1 = vor.u32 %v3024_v39, %v3020_v33  ;;  %v3449_v50 = vor.u32 %v3448_v51, %v3445_v38 }
 0x140   : > { %v3459_v3 = vrot.slane %v3457_v41, 5  ;;  %v3462_v6 = vrot.slane %v3460_v10, 6  ;;  %v3016_v18 = vrot.slane %v3015_v63, 4  ;;  %v3214_v35 = vrot.slane %v4518_v43, 5 }
 0x141   : > { %v1630_v16 = vpop.f32.mrf.mxu2  ;;  %v1184_v27 = vpop.f32.mrf.mxu0  ;;  %v3026_v14 = vrot.slane %v3025_v1, 4  ;;  %v3030_v57 = vrot.slane %v3028_v4, 5 }
 0x142   : > { %v1879_v17 = vpop.f32.mrf.mxu3  ;;  %v1643_v25 = vadd.f32 %v1630_v16, %v1459_v7  ;;  %v1448_v13 = vpop.f32.mrf.mxu1  ;;  %v1196_v30 = vadd.f32 %v1184_v27, %v5885_v49  ;;  %v3452_v49 = vrot.slane %v3018_v21, 6  ;;  %v4576_v21 = vrot.slane %v6051_v12, 9 }
 0x143   : > { %v3450_v27 = vrot.slane %v3449_v50, 4  ;;  %v3021_v56 = vsel %vm5013_vm6, %v3016_v18, %v3020_v33  ;;  %v3031_v22 = vsel %vm5013_vm6, %v3026_v14, %v3030_v57 }
 0x144   : > { %v6068_v20 = vadd.f32 %v1879_v17, %v1643_v25  ;;  %v1460_v37 = vadd.f32 %v1448_v13, %v1196_v30  ;;  %v3453_v8 = vor.u32 %v3452_v49, %v3451_v52  ;;  %v3213_v25 = vrot.slane %v3211_v62, 4  ;;  %v4795_v52 = vld [vmem:[%s4964_s22 + $0x54] sm:$0xff]  ;;  %s4829_s22 = smul.u32 80, %s6196_s15 }
 0x145   : > { %v3212_v12 = vsel %vm5030_vm7, %v4576_v21, %v3211_v62  ;;  %v3057_v42 = vunpack.c.l.b16 %v3021_v56  ;;  %v3058_v48 = vunpack.c.l.b16 %v3031_v22 }
 0x146   : > { %v3455_v13 = vrot.slane %v3453_v8, 4  ;;  %v3215_v36 = vsel %vm5030_vm7, %v3213_v25, %v3214_v35  ;;  %v3454_v26 = vsel %vm5043_vm8, %v3450_v27, %v3453_v8  ;;  %v3241_v43 = vunpack.c.l.b16 %v3212_v12  ;;  %s6131_s13 = scalar_lea.vmem %s6184_s4, %s4829_s22 }
 0x147   : > { %v3242_v33 = vunpack.c.l.b16 %v3215_v36  ;;  %v3490_v39 = vunpack.c.l.b16 %v3454_v26  ;;  %v3063_v55 = vpack.c.b16 %v3058_v48, %v3057_v42 }
 0x149   : > { %v1632_v47 = vpop.f32.mrf.mxu2  ;;  %v2012_v7 = vpop.f32.mrf.mxu0 }
 0x14a   : > { %v1881_v59 = vpop.f32.mrf.mxu3  ;;  %v1644_v5 = vadd.f32 %v1632_v47, %v1460_v37  ;;  %v2276_v9 = vpop.f32.mrf.mxu1  ;;  %v2037_v58 = vadd.f32 %v2012_v7, %v5914_v23  ;;  %v3463_v23 = vor.u32 %v3462_v6, %v3459_v3 }
 0x14c   : > { %v6075_v16 = vadd.f32 %v1881_v59, %v1644_v5  ;;  %v2301_v17 = vadd.f32 %v2276_v9, %v2037_v58  ;;  %2876 = vmatmul.bf16.gmra.mxu0 %v4794_v40  ;;  %v3464_v37 = vsel %vm5043_vm8, %v3455_v13, %v3463_v23 }
 0x14d   : > { %3140 = vmatmul.bf16.gmra.mxu1 %v3062_v54  ;;  %v3491_v38 = vunpack.c.l.b16 %v3464_v37  ;;  %v3247_v54 = vpack.c.b16 %v3242_v33, %v3241_v43 }
 0x14e   : > { %3324 = vmatmul.bf16.gmra.mxu2 %v3246_v53 }
 0x14f   : > { %3573 = vmatmul.bf16.gmra.mxu3 %v3495_v61  ;;  %v3496_v47 = vpack.c.b16 %v3491_v38, %v3490_v39 }
 0x151   : > { %v2460_v28 = vpop.f32.mrf.mxu2  ;;  %v2014_v30 = vpop.f32.mrf.mxu0 }
 0x152   : > { %v2709_v29 = vpop.f32.mrf.mxu3  ;;  %v2485_v31 = vadd.f32 %v2460_v28, %v2301_v17  ;;  %v2278_v15 = vpop.f32.mrf.mxu1  ;;  %v2038_v34 = vadd.f32 %v2014_v30, %v5923_v46 }
 0x154   : > { %v6091_v24 = vadd.f32 %v2709_v29, %v2485_v31  ;;  %v2302_v19 = vadd.f32 %v2278_v15, %v2038_v34 }
 0x159   : > { %v2462_v51 = vpop.f32.mrf.mxu2  ;;  %v2017_v41 = vpop.f32.mrf.mxu0 }
 0x15a   : > { %v2711_v46 = vpop.f32.mrf.mxu3  ;;  %v2486_v49 = vadd.f32 %v2462_v51, %v2302_v19  ;;  %v2281_v10 = vpop.f32.mrf.mxu1  ;;  %v2039_v0 = vadd.f32 %v2017_v41, %v5954_v32 }
 0x15c   : > { %v6095_v59 = vadd.f32 %v2711_v46, %v2486_v49  ;;  %v2303_v40 = vadd.f32 %v2281_v10, %v2039_v0  ;;  %2881 = vmatmul.bf16.gmra.mxu0 %v4795_v52 }
 0x15d   : > { %3145 = vmatmul.bf16.gmra.mxu1 %v3063_v55 }
 0x15e   : > { %3329 = vmatmul.bf16.gmra.mxu2 %v3247_v54 }
 0x15f   : > { %3578 = vmatmul.bf16.gmra.mxu3 %v3496_v47 }
 0x161   : > { %v2465_v53 = vpop.f32.mrf.mxu2  ;;  %v2019_v4 = vpop.f32.mrf.mxu0 }
 0x162   : > { %v2714_v61 = vpop.f32.mrf.mxu3  ;;  %v2487_v63 = vadd.f32 %v2465_v53, %v2303_v40  ;;  %v2283_v5 = vpop.f32.mrf.mxu1  ;;  %v2040_v7 = vadd.f32 %v2019_v4, %v5965_v11 }
 0x164   : > { %v6098_v9 = vadd.f32 %v2714_v61, %v2487_v63  ;;  %v2304_v1 = vadd.f32 %v2283_v5, %v2040_v7 }
 0x169   : > { %v2467_v62 = vpop.f32.mrf.mxu2  ;;  %v2022_v58 = vpop.f32.mrf.mxu0 }
 0x16a   : > { %v2716_v50 = vpop.f32.mrf.mxu3  ;;  %v2488_v32 = vadd.f32 %v2467_v62, %v2304_v1  ;;  %v2286_v8 = vpop.f32.mrf.mxu1  ;;  %v2041_v3 = vadd.f32 %v2022_v58, %v5993_v60 }
 0x16c   : > { %v6101_v6 = vadd.f32 %v2716_v50, %v2488_v32  ;;  %v2305_v17 = vadd.f32 %v2286_v8, %v2041_v3 }
 0x171   : > { %v2470_v18 = vpop.f32.mrf.mxu2  ;;  %v2024_v21 = vpop.f32.mrf.mxu0 }
 0x172   : > { %v2719_v14 = vpop.f32.mrf.mxu3  ;;  %v2489_v57 = vadd.f32 %v2470_v18, %v2305_v17  ;;  %v2288_v25 = vpop.f32.mrf.mxu1  ;;  %v2042_v11 = vadd.f32 %v2024_v21, %v6003_v45 }
 0x174   : > { %v6104_v35 = vadd.f32 %v2719_v14, %v2489_v57  ;;  %v2306_v27 = vadd.f32 %v2288_v25, %v2042_v11 }
 0x179   : > { %v2472_v13 = vpop.f32.mrf.mxu2  ;;  %v2027_v29 = vpop.f32.mrf.mxu0 }
 0x17a   : > { %v2721_v23 = vpop.f32.mrf.mxu3  ;;  %v2490_v28 = vadd.f32 %v2472_v13, %v2306_v27  ;;  %v2291_v31 = vpop.f32.mrf.mxu1  ;;  %v2043_v60 = vadd.f32 %v2027_v29, %v6033_v2 }
 0x17c   : > { %v6107_v30 = vadd.f32 %v2721_v23, %v2490_v28  ;;  %v2307_v15 = vadd.f32 %v2291_v31, %v2043_v60 }
 0x181   : > { %v2475_v56 = vpop.f32.mrf.mxu2  ;;  %v2029_v34 = vpop.f32.mrf.mxu0 }
 0x182   : > { %v2724_v22 = vpop.f32.mrf.mxu3  ;;  %v2491_v12 = vadd.f32 %v2475_v56, %v2307_v15  ;;  %v2293_v36 = vpop.f32.mrf.mxu1  ;;  %v2044_v45 = vadd.f32 %v2029_v34, %v6041_v44 }
 0x184   : > { %v6110_v26 = vadd.f32 %v2724_v22, %v2491_v12  ;;  %v2308_v37 = vadd.f32 %v2293_v36, %v2044_v45 }
 0x189   : > { %v2477_v19 = vpop.f32.mrf.mxu2  ;;  %v2032_v43 = vpop.f32.mrf.mxu0 }
 0x18a   : > { %v2726_v42 = vpop.f32.mrf.mxu3  ;;  %v2492_v48 = vadd.f32 %v2477_v19, %v2308_v37  ;;  %v2296_v33 = vpop.f32.mrf.mxu1  ;;  %v2045_v2 = vadd.f32 %v2032_v43, %v6068_v20 }
 0x18c   : > { %v6113_v39 = vadd.f32 %v2726_v42, %v2492_v48  ;;  %v2309_v38 = vadd.f32 %v2296_v33, %v2045_v2 }
 0x191   : > { %v2480_v51 = vpop.f32.mrf.mxu2  ;;  %v2034_v55 = vpop.f32.mrf.mxu0 }
 0x192   : > { %v2729_v46 = vpop.f32.mrf.mxu3  ;;  %v2493_v52 = vadd.f32 %v2480_v51, %v2309_v38  ;;  %v2298_v49 = vpop.f32.mrf.mxu1  ;;  %v2046_v44 = vadd.f32 %v2034_v55, %v6075_v16  ;;  %v6125_v16 = vld [vmem:[%s6182_s2] ss:$0 sm:$0xff] }
 0x194   : > { %v6116_v41 = vadd.f32 %v2729_v46, %v2493_v52  ;;  %v2310_v10 = vadd.f32 %v2298_v49, %v2046_v44 }
 0x199   : > { %v2482_v54 = vpop.f32.mrf.mxu2  ;;  %v2862_v40 = vpop.f32.mrf.mxu0 }
 0x19a   : > { %v2731_v47 = vpop.f32.mrf.mxu3  ;;  %v2494_v0 = vadd.f32 %v2482_v54, %v2310_v10  ;;  %v3126_v53 = vpop.f32.mrf.mxu1  ;;  %v2887_v61 = vadd.f32 %v2862_v40, %v6091_v24 }
 0x19c   : > { %v6118_v20 = vadd.f32 %v2731_v47, %v2494_v0  ;;  %v3151_v63 = vadd.f32 %v3126_v53, %v2887_v61 }
 0x1a1   : > { %v3310_v4 = vpop.f32.mrf.mxu2  ;;  %v2864_v1 = vpop.f32.mrf.mxu0 }
 0x1a2   : > { %v3559_v5 = vpop.f32.mrf.mxu3  ;;  %v3335_v7 = vadd.f32 %v3310_v4, %v3151_v63  ;;  %v3128_v62 = vpop.f32.mrf.mxu1  ;;  %v2888_v32 = vadd.f32 %v2864_v1, %v6095_v59 }
 0x1a4   : > { %v3584_v50 = vadd.f32 %v3559_v5, %v3335_v7  ;;  %v3152_v58 = vadd.f32 %v3128_v62, %v2888_v32 }
 0x1a6   : > { %v3598_v24 = vadd.f32 %v6125_v16, %v3584_v50 }
 0x1a8   : > { %3609 = vst.msk [vmem:[%s6131_s13] sm:$0xff] %vm3608_vm9, %v3598_v24 }
 0x1a9   : > { %v3312_v8 = vpop.f32.mrf.mxu2  ;;  %v2867_v18 = vpop.f32.mrf.mxu0 }
 0x1aa   : > { %v3561_v3 = vpop.f32.mrf.mxu3  ;;  %v3336_v17 = vadd.f32 %v3312_v8, %v3152_v58  ;;  %v3131_v14 = vpop.f32.mrf.mxu1  ;;  %v2889_v57 = vadd.f32 %v2867_v18, %v6098_v9 }
 0x1ac   : > { %v3585_v59 = vadd.f32 %v3561_v3, %v3336_v17  ;;  %v3153_v25 = vadd.f32 %v3131_v14, %v2889_v57 }
 0x1ae   : > { %v3599_v21 = vadd.f32 %v6125_v16, %v3585_v59 }
 0x1b0   : > { %3610 = vst.msk [vmem:[%s6131_s13 + $0x8] sm:$0xff] %vm3608_vm9, %v3599_v21 }
 0x1b1   : > { %v3315_v11 = vpop.f32.mrf.mxu2  ;;  %v2869_v23 = vpop.f32.mrf.mxu0 }
 0x1b2   : > { %v3564_v27 = vpop.f32.mrf.mxu3  ;;  %v3337_v13 = vadd.f32 %v3315_v11, %v3153_v25  ;;  %v3133_v28 = vpop.f32.mrf.mxu1  ;;  %v2890_v31 = vadd.f32 %v2869_v23, %v6101_v6 }
 0x1b4   : > { %v3586_v29 = vadd.f32 %v3564_v27, %v3337_v13  ;;  %v3154_v15 = vadd.f32 %v3133_v28, %v2890_v31 }
 0x1b6   : > { %v3600_v60 = vadd.f32 %v6125_v16, %v3586_v29 }
 0x1b8   : > { %3611 = vst.msk [vmem:[%s6131_s13 + $0x10] sm:$0xff] %vm3608_vm9, %v3600_v60 }
 0x1b9   : > { %v3317_v9 = vpop.f32.mrf.mxu2  ;;  %v2872_v12 = vpop.f32.mrf.mxu0 }
 0x1ba   : > { %v3566_v56 = vpop.f32.mrf.mxu3  ;;  %v3338_v22 = vadd.f32 %v3317_v9, %v3154_v15  ;;  %v3136_v34 = vpop.f32.mrf.mxu1  ;;  %v2891_v45 = vadd.f32 %v2872_v12, %v6104_v35 }
 0x1bc   : > { %v3587_v36 = vadd.f32 %v3566_v56, %v3338_v22  ;;  %v3155_v19 = vadd.f32 %v3136_v34, %v2891_v45 }
 0x1be   : > { %v3601_v37 = vadd.f32 %v6125_v16, %v3587_v36 }
 0x1c0   : > { %3612 = vst.msk [vmem:[%s6131_s13 + $0x18] sm:$0xff] %vm3608_vm9, %v3601_v37 }
 0x1c1   : > { %v3320_v6 = vpop.f32.mrf.mxu2  ;;  %v2874_v43 = vpop.f32.mrf.mxu0 }
 0x1c2   : > { %v3569_v42 = vpop.f32.mrf.mxu3  ;;  %v3339_v48 = vadd.f32 %v3320_v6, %v3155_v19  ;;  %v3138_v33 = vpop.f32.mrf.mxu1  ;;  %v2892_v38 = vadd.f32 %v2874_v43, %v6107_v30 }
 0x1c4   : > { %v3588_v2 = vadd.f32 %v3569_v42, %v3339_v48  ;;  %v3156_v46 = vadd.f32 %v3138_v33, %v2892_v38 }
 0x1c6   : > { %v3602_v51 = vadd.f32 %v6125_v16, %v3588_v2 }
 0x1c8   : > { %3613 = vst.msk [vmem:[%s6131_s13 + $0x20] sm:$0xff] %vm3608_vm9, %v3602_v51 }
 0x1c9   : > { %v3322_v35 = vpop.f32.mrf.mxu2  ;;  %v2877_v49 = vpop.f32.mrf.mxu0 }
 0x1ca   : > { %v3571_v52 = vpop.f32.mrf.mxu3  ;;  %v3340_v55 = vadd.f32 %v3322_v35, %v3156_v46  ;;  %v3141_v44 = vpop.f32.mrf.mxu1  ;;  %v2893_v54 = vadd.f32 %v2877_v49, %v6110_v26 }
 0x1cc   : > { %v3589_v10 = vadd.f32 %v3571_v52, %v3340_v55  ;;  %v3157_v0 = vadd.f32 %v3141_v44, %v2893_v54 }
 0x1ce   : > { %v3603_v47 = vadd.f32 %v6125_v16, %v3589_v10 }
 0x1d0   : > { %3614 = vst.msk [vmem:[%s6131_s13 + $0x28] sm:$0xff] %vm3608_vm9, %v3603_v47 }
 0x1d1   : > { %v3325_v30 = vpop.f32.mrf.mxu2  ;;  %v2879_v61 = vpop.f32.mrf.mxu0 }
 0x1d2   : > { %v3574_v40 = vpop.f32.mrf.mxu3  ;;  %v3341_v53 = vadd.f32 %v3325_v30, %v3157_v0  ;;  %v3143_v63 = vpop.f32.mrf.mxu1  ;;  %v2894_v5 = vadd.f32 %v2879_v61, %v6113_v39 }
 0x1d4   : > { %v3590_v4 = vadd.f32 %v3574_v40, %v3341_v53  ;;  %v3158_v1 = vadd.f32 %v3143_v63, %v2894_v5 }
 0x1d6   : > { %v3604_v7 = vadd.f32 %v6125_v16, %v3590_v4 }
 0x1d8   : > { %3615 = vst.msk [vmem:[%s6131_s13 + $0x30] sm:$0xff] %vm3608_vm9, %v3604_v7 }
 0x1d9   : > { %v3327_v26 = vpop.f32.mrf.mxu2  ;;  %v2882_v32 = vpop.f32.mrf.mxu0 }
 0x1da   : > { %v3576_v62 = vpop.f32.mrf.mxu3  ;;  %v3342_v50 = vadd.f32 %v3327_v26, %v3158_v1  ;;  %v2895_v58 = vadd.f32 %v2882_v32, %v6116_v41  ;;  %v3146_v8 = vpop.f32.mrf.mxu1 }
 0x1dc   : > { %v3591_v24 = vadd.f32 %v3576_v62, %v3342_v50  ;;  %v3159_v17 = vadd.f32 %v3146_v8, %v2895_v58 }
 0x1de   : > { %v3605_v3 = vadd.f32 %v6125_v16, %v3591_v24 }
 0x1e0   : > { %3616 = vst.msk [vmem:[%s6131_s13 + $0x38] sm:$0xff] %vm3608_vm9, %v3605_v3 }
 0x1e1   : > { %v3330_v39 = vpop.f32.mrf.mxu2  ;;  %v2884_v59 = vpop.f32.mrf.mxu0 }
 0x1e2   : > { %v3579_v18 = vpop.f32.mrf.mxu3  ;;  %v3343_v14 = vadd.f32 %v3330_v39, %v3159_v17  ;;  %v2896_v21 = vadd.f32 %v2884_v59, %v6118_v20  ;;  %v3148_v11 = vpop.f32.mrf.mxu1 }
 0x1e4   : > { %v3592_v57 = vadd.f32 %v3579_v18, %v3343_v14  ;;  %v3160_v41 = vadd.f32 %v3148_v11, %v2896_v21 }
 0x1e6   : > { %v3606_v25 = vadd.f32 %v6125_v16, %v3592_v57 }
 0x1e8   : > { %3617 = vst.msk [vmem:[%s6131_s13 + $0x40] sm:$0xff] %vm3608_vm9, %v3606_v25 }
 0x1e9   : > { %v3332_v27 = vpop.f32.mrf.mxu2 }
 0x1ea   : > { %v3344_v13 = vadd.f32 %v3332_v27, %v3160_v41  ;;  %v3581_v23 = vpop.f32.mrf.mxu3 }
 0x1ec   : > { %v3593_v28 = vadd.f32 %v3581_v23, %v3344_v13 }
 0x1ee   : > { %v3607_v29 = vadd.f32 %v6125_v16, %v3593_v28 }
 0x1f0   : > { %3618 = vst.msk [vmem:[%s6131_s13 + $0x48] sm:$0xff] %vm3608_vm9, %v3607_v29 }
 0x1f1 PF: > { %s14_s17 = sadd.s32 1, %s4877_s17   ;;  %s6191_s15 = smov %s4873_s16 }
 0x1f2   : > { %p11_p5 = scmp.ge.s32.totalorder %s14_s17, 4   ;;  %s6192_s16 = smov %s6194_s3 }
 0x1f4   :  { %13 = sbr.rel (!%p11_p5) target bundleno = 2 (0x2), region = 85 }

</bundles_post_ra>
